<compile_context>
chip_gen: v7x
topology: tpu7x:2x2x1
jax: 0.10.0
libtpu: 0.0.40
codegen_flags: <defaults>
</compile_context>

<pallas_src>
import math

import jax
import jax.numpy as jnp
from jax.experimental import pallas as pl
from jax.experimental.pallas import tpu as pltpu

NEG_SLOPE = 0.2                 # LeakyReLU(0.2)
BN_EPS = 1e-5                   # PyTorch BatchNorm1d default eps
TM = 1024                       # packed-row tile for the conv kernels
VMEM_LIMIT = 32 * 1024 * 1024   # <= physical VMEM on v5e/v6e/v7x


def _cparams():
    return pltpu.CompilerParams(
        dimension_semantics=("parallel",),
        vmem_limit_bytes=VMEM_LIMIT,
    )


def _pack_factor(k_in, c_out):
    """How many consecutive output positions share one MXU contraction."""
    p = max(1, 128 // max(k_in, 1))
    p = min(p, max(1, 256 // max(c_out, 1)))
    return p


def _block_diag_weight(w2d, pack):
    """(K, C) conv weight -> block-diagonal (pack*K, pack*C)."""
    if pack == 1:
        return w2d
    k, c = w2d.shape
    eye = jnp.eye(pack, dtype=w2d.dtype)
    return jnp.einsum("pq,kc->pkqc", eye, w2d).reshape(pack * k, pack * c)


# ---------------------------------------------------------------------------
# Pallas kernels
# ---------------------------------------------------------------------------
def _conv1_kernel(cols_ref, w_ref, b_ref, y_ref):
    # Conv1 = packed matmul + bias.  LeakyReLU is deferred to the next kernel.
    y_ref[...] = (
        jnp.dot(cols_ref[...], w_ref[...], preferred_element_type=jnp.float32)
        + b_ref[...]
    )


def conv1_pallas(cols, w2d, b_row, *, tm):
    m, k = cols.shape
    c_out = w2d.shape[1]
    assert m % tm == 0
    return pl.pallas_call(
        _conv1_kernel,
        out_shape=jax.ShapeDtypeStruct((m, c_out), jnp.float32),
        grid=(m // tm,),
        in_specs=[
            pl.BlockSpec((tm, k), lambda i: (i, 0)),
            pl.BlockSpec((k, c_out), lambda i: (0, 0)),
            pl.BlockSpec((1, c_out), lambda i: (0, 0)),
        ],
        out_specs=pl.BlockSpec((tm, c_out), lambda i: (i, 0)),
        compiler_params=_cparams(),
    )(cols, w2d, b_row)


def _block_conv_kernel(cols_ref, scale_ref, shift_ref, w_ref,
                       y_ref, sum_ref, ssq_ref):
    # Deferred BN-affine + LeakyReLU of the previous layer, applied on load.
    h = cols_ref[...] * scale_ref[...] + shift_ref[...]
    h = jnp.where(h >= 0, h, NEG_SLOPE * h)
    # Conv as a packed matmul against the block-diagonal weight (MXU).
    y = jnp.dot(h, w_ref[...], preferred_element_type=jnp.float32)
    y_ref[...] = y
    # Partial BatchNorm statistics for THIS layer (padded rows are exactly 0).
    sum_ref[...] = jnp.sum(y, axis=0, keepdims=True)[None]
    ssq_ref[...] = jnp.sum(y * y, axis=0, keepdims=True)[None]


def block_conv_pallas(cols, scale_row, shift_row, w2d, *, tm):
    m, k = cols.shape
    c_out = w2d.shape[1]
    assert m % tm == 0
    g = m // tm
    return pl.pallas_call(
        _block_conv_kernel,
        out_shape=(
            jax.ShapeDtypeStruct((m, c_out), jnp.float32),
            jax.ShapeDtypeStruct((g, 1, c_out), jnp.float32),
            jax.ShapeDtypeStruct((g, 1, c_out), jnp.float32),
        ),
        grid=(g,),
        in_specs=[
            pl.BlockSpec((tm, k), lambda i: (i, 0)),
            pl.BlockSpec((1, k), lambda i: (0, 0)),
            pl.BlockSpec((1, k), lambda i: (0, 0)),
            pl.BlockSpec((k, c_out), lambda i: (0, 0)),
        ],
        out_specs=(
            pl.BlockSpec((tm, c_out), lambda i: (i, 0)),
            pl.BlockSpec((1, 1, c_out), lambda i: (i, 0, 0)),
            pl.BlockSpec((1, 1, c_out), lambda i: (i, 0, 0)),
        ),
        compiler_params=_cparams(),
    )(cols, scale_row, shift_row, w2d)


def _head_kernel(cols_ref, scale_ref, shift_ref, u_ref, c0_ref, o_ref):
    # Deferred BN-affine + LeakyReLU of block 4.
    h = cols_ref[0] * scale_ref[...] + shift_ref[...]
    h = jnp.where(h >= 0, h, NEG_SLOPE * h)
    # conv5 + Flatten + Linear folded into one (1563, 128) contraction.
    prod = h * u_ref[...]
    v = jnp.sum(prod, axis=0, keepdims=True)        # (1, 128)
    v = jnp.sum(v, axis=1, keepdims=True)           # (1, 1)
    v = v + c0_ref[...]
    sig = 0.5 * (jnp.tanh(0.5 * v) + 1.0)           # numerically stable sigmoid
    o_ref[...] = sig * jnp.ones((1, 1, 128), jnp.float32)


def head_pallas(cols5, scale_row, shift_row, u, c0):
    n, l5, kk = cols5.shape
    out = pl.pallas_call(
        _head_kernel,
        out_shape=jax.ShapeDtypeStruct((n, 1, 128), jnp.float32),
        grid=(n,),
        in_specs=[
            pl.BlockSpec((1, l5, kk), lambda i: (i, 0, 0)),
            pl.BlockSpec((1, kk), lambda i: (0, 0)),
            pl.BlockSpec((1, kk), lambda i: (0, 0)),
            pl.BlockSpec((l5, kk), lambda i: (0, 0)),
            pl.BlockSpec((1, 1), lambda i: (0, 0)),
        ],
        out_specs=pl.BlockSpec((1, 1, 128), lambda i: (i, 0, 0)),
        compiler_params=_cparams(),
    )(cols5, scale_row, shift_row, u, c0)
    return out[:, 0, :1]                             # (N, 1)


# ---------------------------------------------------------------------------
# XLA glue (layer-1 im2col, per-block pad+reshape, per-channel BN math)
# ---------------------------------------------------------------------------
def im2col_conv1(x, k, s, p):
    """(N, C, L) NCL input -> rows (n, l_out), columns (tap, channel)."""
    n, c, l = x.shape
    xp = jnp.pad(x, ((0, 0), (0, 0), (p, p)))
    l_out = (l + 2 * p - k) // s + 1
    taps = [xp[:, :, t:t + s * l_out:s] for t in range(k)]    # K x (N, C, L_out)
    cols = jnp.stack(taps, axis=1)                            # (N, K, C, L_out)
    cols = cols.transpose(0, 3, 1, 2).reshape(n * l_out, k * c)
    return cols, l_out


def build_pair_cols(y_flat, n, l_in, c, pad_vec):
    """Logical-row im2col for a k=2, s=2, p=1 conv on a channels-last slab.

    pad_vec (c,) is placed in the conv-padding slots: 0 for already-activated
    data, the BN 'neutral' value for a not-yet-normalized slab."""
    a = y_flat[: n * l_in].reshape(n, l_in, c)
    l_out = l_in // 2 + 1
    pad_r = 2 * l_out - l_in - 1                 # 1 if l_in even, else 0
    edge = jnp.broadcast_to(pad_vec.reshape(1, 1, c), (n, 1, c))
    pieces = [edge, a]
    if pad_r:
        pieces.append(jnp.broadcast_to(pad_vec.reshape(1, 1, c), (n, pad_r, c)))
    ap = jnp.concatenate(pieces, axis=1)         # (n, 2*l_out, c)
    cols = ap.reshape(n * l_out, 2 * c)          # pairs consecutive positions
    return cols, l_out


def pack_rows(cols, fill_row, pack, tm):
    """Pad logical rows to a multiple of tm*pack (fill = fill_row) and fold
    `pack` consecutive rows into one packed, lane-dense row."""
    m, k = cols.shape
    m_pad = pl.cdiv(m, tm * pack) * (tm * pack)
    if m_pad != m:
        fill = jnp.broadcast_to(fill_row.reshape(1, k), (m_pad - m, k))
        cols = jnp.concatenate([cols, fill], axis=0)
    return cols.reshape(m_pad // pack, pack * k)


def bn_affine(psum, pssq, count, gamma, beta, pack, c_out):
    """Training-mode BatchNorm1d (biased batch variance over (N, L))."""
    s = jnp.sum(psum, axis=(0, 1)).reshape(pack, c_out).sum(axis=0)
    sq = jnp.sum(pssq, axis=(0, 1)).reshape(pack, c_out).sum(axis=0)
    mean = s / count
    var = jnp.maximum(sq / count - mean * mean, 0.0)   # biased variance: intentional
    scale = gamma / jnp.sqrt(var + BN_EPS)
    shift = beta - mean * scale
    neutral = -shift / scale    # BN+LeakyReLU(neutral) == 0  (assumes gamma != 0)
    return scale, shift, neutral


def run_block(y_prev_flat, n, l_in, c_in, scale_prev, shift_prev, neutral_prev,
              w, gamma, beta):
    """One _block(): [deferred prev BN+LReLU] -> Conv(k=2,s=2,p=1) -> BN stats."""
    c_out = w.shape[0]
    k = 2 * c_in
    pack = _pack_factor(k, c_out)
    cols, l_out = build_pair_cols(y_prev_flat, n, l_in, c_in, neutral_prev)
    fill_row = jnp.tile(neutral_prev, 2)                       # length k
    cols_p = pack_rows(cols, fill_row, pack, TM)
    w_p = _block_diag_weight(w.transpose(2, 1, 0).reshape(k, c_out), pack)
    scale_row = jnp.tile(scale_prev, 2 * pack).reshape(1, pack * k)
    shift_row = jnp.tile(shift_prev, 2 * pack).reshape(1, pack * k)
    y_p, psum, pssq = block_conv_pallas(cols_p, scale_row, shift_row, w_p, tm=TM)
    m = n * l_out
    sc, sh, nt = bn_affine(psum, pssq, m, gamma, beta, pack, c_out)
    y_flat = y_p.reshape(-1, c_out)       # channels-last logical rows (padded tail)
    return y_flat, l_out, sc, sh, nt


# ---------------------------------------------------------------------------
# Forward pass
# ---------------------------------------------------------------------------
def discriminator_forward(x, p):
    n, c_img, _ = x.shape
    f = p["w1"].shape[0]

    # ---- layer 1: Conv1d(c_img, f, 4, 2, 1) + bias (LeakyReLU deferred)
    cols1, l1 = im2col_conv1(x, 4, 2, 1)
    k1 = 4 * c_img
    pack1 = _pack_factor(k1, f)
    cols1_p = pack_rows(cols1, jnp.zeros((k1,), jnp.float32), pack1, TM)
    w1_p = _block_diag_weight(p["w1"].transpose(2, 1, 0).reshape(k1, f), pack1)
    b1_row = jnp.tile(p["b1"], pack1).reshape(1, pack1 * f)
    y1 = conv1_pallas(cols1_p, w1_p, b1_row, tm=TM).reshape(-1, f)

    # ---- block 2: Conv(f -> 2f) + BN stats; input act = plain LeakyReLU
    y2, l2, sc2, sh2, nt2 = run_block(
        y1, n, l1, f,
        jnp.ones((f,), jnp.float32), jnp.zeros((f,), jnp.float32),
        jnp.zeros((f,), jnp.float32), p["w2"], p["g2"], p["be2"])

    # ---- block 3: Conv(2f -> 4f); input act = block-2 BN + LeakyReLU (deferred)
    y3, l3, sc3, sh3, nt3 = run_block(
        y2, n, l2, 2 * f, sc2, sh2, nt2, p["w3"], p["g3"], p["be3"])

    # ---- block 4: Conv(4f -> 8f); input act = block-3 BN + LeakyReLU (deferred)
    y4, l4, sc4, sh4, _ = run_block(
        y3, n, l3, 4 * f, sc3, sh3, nt3, p["w4"], p["g4"], p["be4"])

    # ---- fused head: [block-4 BN+LReLU] -> conv5 -> Flatten -> Linear -> Sigmoid
    c4 = 8 * f
    a4 = y4[: n * l4].reshape(n, l4, c4)
    l5 = l4 // 2                                    # conv5: k=2, s=2, p=0
    cols5 = a4[:, : 2 * l5, :].reshape(n, l5, 2 * c4)   # pure reshape, lane-dense
    assert l5 == p["w6"].shape[1], (l5, p["w6"].shape)   # matches Linear(1563, 1)
    w5col = p["w5"].transpose(2, 1, 0).reshape(2 * c4, 1)       # (128, 1)
    u = p["w6"].reshape(l5, 1) * w5col.reshape(1, 2 * c4)       # (1563, 128)
    c0 = (p["b5"].reshape(()) * jnp.sum(p["w6"]) + p["b6"].reshape(())).reshape(1, 1)
    return head_pallas(cols5,
                       jnp.tile(sc4, 2).reshape(1, 2 * c4),
                       jnp.tile(sh4, 2).reshape(1, 2 * c4),
                       u, c0)


# ---------------------------------------------------------------------------
# Deterministic parameter init (same shapes as the PyTorch module)
# ---------------------------------------------------------------------------
def init_params(key, channels_img, features_d):
    ks = jax.random.split(key, 12)
    f = features_d

    def conv_init(kw, kb, c_out, c_in, k, bias):
        bound = 1.0 / math.sqrt(c_in * k)
        w = jax.random.uniform(kw, (c_out, c_in, k), jnp.float32, -bound, bound)
        b = jax.random.uniform(kb, (c_out,), jnp.float32, -bound, bound) if bias else None
        return w, b

    p = {}
    p["w1"], p["b1"] = conv_init(ks[0], ks[1], f, channels_img, 4, True)
    p["w2"], _ = conv_init(ks[2], ks[3], 2 * f, f, 2, False)
    p["g2"], p["be2"] = jnp.ones((2 * f,), jnp.float32), jnp.zeros((2 * f,), jnp.float32)
    p["w3"], _ = conv_init(ks[4], ks[5], 4 * f, 2 * f, 2, False)
    p["g3"], p["be3"] = jnp.ones((4 * f,), jnp.float32), jnp.zeros((4 * f,), jnp.float32)
    p["w4"], _ = conv_init(ks[6], ks[7], 8 * f, 4 * f, 2, False)
    p["g4"], p["be4"] = jnp.ones((8 * f,), jnp.float32), jnp.zeros((8 * f,), jnp.float32)
    p["w5"], p["b5"] = conv_init(ks[8], ks[9], 1, 8 * f, 2, True)
    lb = 1.0 / math.sqrt(1563)
    p["w6"] = jax.random.uniform(ks[10], (1, 1563), jnp.float32, -lb, lb)
    p["b6"] = jax.random.uniform(ks[11], (1, 1), jnp.float32, -lb, lb)
    return p


if __name__ == "__main__":
    channels_img, features_d = 3, 8
    N, L = 2, 50000   # nn.Linear(1563, 1) in the module forces this input length

    key = jax.random.PRNGKey(0)
    kx, kp = jax.random.split(key)
    x = jax.random.normal(kx, (N, channels_img, L), jnp.float32)
    params = init_params(kp, channels_img, features_d)

    fwd = jax.jit(discriminator_forward)
    out = jax.block_until_ready(fwd(x, params))
    assert out.shape == (N, 1)
    assert bool(jnp.all(jnp.isfinite(out)))
    assert bool(jnp.all((out >= 0.0) & (out <= 1.0)))
    print("KERNEL_OK")
</pallas_src>

<mosaic_0001>
module attributes {stable_mosaic.version = 11 : i64} {
  func.func @_conv1_kernel(%arg0: i32, %arg1: memref<1024x120xf32, #tpu.memory_space<vmem>>, %arg2: memref<120x80xf32, #tpu.memory_space<vmem>>, %arg3: memref<1x80xf32, #tpu.memory_space<vmem>>, %arg4: memref<1024x80xf32, #tpu.memory_space<vmem>>) attributes {dimension_semantics = [#tpu.dimension_semantics<parallel>], iteration_bounds = array<i64: 5>, scalar_prefetch = 0 : i64, scratch_operands = 0 : i64, tpu.core_type = #tpu.core_type<tc>, window_params = [{transform_indices = @transform_0, window_bounds = array<i64: 1024, 120>}, {pipeline_mode = #tpu.pipeline_mode<synchronous>, transform_indices = @transform_1, window_bounds = array<i64: 120, 80>}, {pipeline_mode = #tpu.pipeline_mode<synchronous>, transform_indices = @transform_2, window_bounds = array<i64: 1, 80>}, {transform_indices = @transform_3, window_bounds = array<i64: 1024, 80>}]} {
    %c0 = arith.constant 0 : index
    %c0_0 = arith.constant 0 : index
    %0 = vector.load %arg1[%c0, %c0_0] : memref<1024x120xf32, #tpu.memory_space<vmem>>, vector<1024x120xf32>
    %c0_1 = arith.constant 0 : index
    %c0_2 = arith.constant 0 : index
    %1 = vector.load %arg2[%c0_1, %c0_2] : memref<120x80xf32, #tpu.memory_space<vmem>>, vector<120x80xf32>
    %cst = arith.constant dense<0.000000e+00> : vector<1024x80xf32>
    %2 = tpu.matmul %0, %1, %cst {dimension_numbers = #tpu.dot_dimension_numbers<[1], [0], [0], [1], [0, 0, 1, 1], [], []>} : vector<1024x120xf32>, vector<120x80xf32>, vector<1024x80xf32> -> vector<1024x80xf32>
    %c0_3 = arith.constant 0 : index
    %c0_4 = arith.constant 0 : index
    %3 = vector.load %arg3[%c0_3, %c0_4] : memref<1x80xf32, #tpu.memory_space<vmem>>, vector<1x80xf32>
    %4 = vector.broadcast %3 : vector<1x80xf32> to vector<1024x80xf32>
    %5 = arith.addf %2, %4 : vector<1024x80xf32>
    %c0_5 = arith.constant 0 : index
    %c0_6 = arith.constant 0 : index
    %6 = vector.load %arg4[%c0_5, %c0_6] : memref<1024x80xf32, #tpu.memory_space<vmem>>, vector<1024x80xf32>
    tpu.vector_store %arg4[%c0_5, %c0_6], %5 {strides = array<i32>} : memref<1024x80xf32, #tpu.memory_space<vmem>>, vector<1024x80xf32>,
    return
  }
  func.func @transform_0(%arg0: i32) -> (i32, i32) {
    %c0_i32 = arith.constant 0 : i32
    %c0_i32_0 = arith.constant 0 : i32
    return %arg0, %c0_i32 : i32, i32
  }
  func.func @transform_1(%arg0: i32) -> (i32, i32) {
    %c0_i32 = arith.constant 0 : i32
    %c0_i32_0 = arith.constant 0 : i32
    %c0_i32_1 = arith.constant 0 : i32
    return %c0_i32, %c0_i32_0 : i32, i32
  }
  func.func @transform_2(%arg0: i32) -> (i32, i32) {
    %c0_i32 = arith.constant 0 : i32
    %c0_i32_0 = arith.constant 0 : i32
    %c0_i32_1 = arith.constant 0 : i32
    return %c0_i32, %c0_i32_0 : i32, i32
  }
  func.func @transform_3(%arg0: i32) -> (i32, i32) {
    %c0_i32 = arith.constant 0 : i32
    %c0_i32_0 = arith.constant 0 : i32
    return %arg0, %c0_i32 : i32, i32
  }
}

module attributes {stable_mosaic.version = 11 : i64} {
  func.func @_block_conv_kernel(%arg0: i32, %arg1: memref<1024x128xf32, #tpu.memory_space<vmem>>, %arg2: memref<1x128xf32, #tpu.memory_space<vmem>>, %arg3: memref<1x128xf32, #tpu.memory_space<vmem>>, %arg4: memref<128x128xf32, #tpu.memory_space<vmem>>, %arg5: memref<1024x128xf32, #tpu.memory_space<vmem>>, %arg6: memref<1x1x128xf32, #tpu.memory_space<vmem>>, %arg7: memref<1x1x128xf32, #tpu.memory_space<vmem>>) attributes {dimension_semantics = [#tpu.dimension_semantics<parallel>], iteration_bounds = array<i64: 4>, scalar_prefetch = 0 : i64, scratch_operands = 0 : i64, tpu.core_type = #tpu.core_type<tc>, window_params = [{transform_indices = @transform_0, window_bounds = array<i64: 1024, 128>}, {pipeline_mode = #tpu.pipeline_mode<synchronous>, transform_indices = @transform_1, window_bounds = array<i64: 1, 128>}, {pipeline_mode = #tpu.pipeline_mode<synchronous>, transform_indices = @transform_2, window_bounds = array<i64: 1, 128>}, {pipeline_mode = #tpu.pipeline_mode<synchronous>, transform_indices = @transform_3, window_bounds = array<i64: 128, 128>}, {transform_indices = @transform_4, window_bounds = array<i64: 1024, 128>}, {transform_indices = @transform_5, window_bounds = array<i64: 1, 1, 128>}, {transform_indices = @transform_6, window_bounds = array<i64: 1, 1, 128>}]} {
    %c0 = arith.constant 0 : index
    %c0_0 = arith.constant 0 : index
    %0 = vector.load %arg1[%c0, %c0_0] : memref<1024x128xf32, #tpu.memory_space<vmem>>, vector<1024x128xf32>
    %c0_1 = arith.constant 0 : index
    %c0_2 = arith.constant 0 : index
    %1 = vector.load %arg2[%c0_1, %c0_2] : memref<1x128xf32, #tpu.memory_space<vmem>>, vector<1x128xf32>
    %2 = vector.broadcast %1 : vector<1x128xf32> to vector<1024x128xf32>
    %3 = arith.mulf %0, %2 : vector<1024x128xf32>
    %c0_3 = arith.constant 0 : index
    %c0_4 = arith.constant 0 : index
    %4 = vector.load %arg3[%c0_3, %c0_4] : memref<1x128xf32, #tpu.memory_space<vmem>>, vector<1x128xf32>
    %5 = vector.broadcast %4 : vector<1x128xf32> to vector<1024x128xf32>
    %6 = arith.addf %3, %5 : vector<1024x128xf32>
    %cst = arith.constant 0.000000e+00 : f32
    %7 = vector.broadcast %cst : f32 to vector<1024x128xf32>
    %8 = arith.cmpf oge, %6, %7 : vector<1024x128xf32>
    %cst_5 = arith.constant 2.000000e-01 : f32
    %9 = vector.broadcast %cst_5 : f32 to vector<1024x128xf32>
    %10 = arith.mulf %9, %6 : vector<1024x128xf32>
    %11 = arith.select %8, %6, %10 : vector<1024x128xi1>, vector<1024x128xf32>
    %c0_6 = arith.constant 0 : index
    %c0_7 = arith.constant 0 : index
    %12 = vector.load %arg4[%c0_6, %c0_7] : memref<128x128xf32, #tpu.memory_space<vmem>>, vector<128x128xf32>
    %cst_8 = arith.constant dense<0.000000e+00> : vector<1024x128xf32>
    %13 = tpu.matmul %11, %12, %cst_8 {dimension_numbers = #tpu.dot_dimension_numbers<[1], [0], [0], [1], [0, 0, 1, 1], [], []>} : vector<1024x128xf32>, vector<128x128xf32>, vector<1024x128xf32> -> vector<1024x128xf32>
    %c0_9 = arith.constant 0 : index
    %c0_10 = arith.constant 0 : index
    %14 = vector.load %arg5[%c0_9, %c0_10] : memref<1024x128xf32, #tpu.memory_space<vmem>>, vector<1024x128xf32>
    tpu.vector_store %arg5[%c0_9, %c0_10], %13 {strides = array<i32>} : memref<1024x128xf32, #tpu.memory_space<vmem>>, vector<1024x128xf32>,
    %cst_11 = arith.constant dense<0.000000e+00> : vector<128xf32>
    %15 = vector.multi_reduction <add>, %13, %cst_11 [0] : vector<1024x128xf32> to vector<128xf32>
    %16 = vector.shape_cast %15 : vector<128xf32> to vector<1x128xf32>
    %17 = vector.shape_cast %16 : vector<1x128xf32> to vector<1x1x128xf32>
    %c0_12 = arith.constant 0 : index
    %c0_13 = arith.constant 0 : index
    %c0_14 = arith.constant 0 : index
    %18 = vector.load %arg6[%c0_12, %c0_13, %c0_14] : memref<1x1x128xf32, #tpu.memory_space<vmem>>, vector<1x1x128xf32>
    tpu.vector_store %arg6[%c0_12, %c0_13, %c0_14], %17 {strides = array<i32>} : memref<1x1x128xf32, #tpu.memory_space<vmem>>, vector<1x1x128xf32>,
    %19 = arith.mulf %13, %13 : vector<1024x128xf32>
    %cst_15 = arith.constant dense<0.000000e+00> : vector<128xf32>
    %20 = vector.multi_reduction <add>, %19, %cst_15 [0] : vector<1024x128xf32> to vector<128xf32>
    %21 = vector.shape_cast %20 : vector<128xf32> to vector<1x128xf32>
    %22 = vector.shape_cast %21 : vector<1x128xf32> to vector<1x1x128xf32>
    %c0_16 = arith.constant 0 : index
    %c0_17 = arith.constant 0 : index
    %c0_18 = arith.constant 0 : index
    %23 = vector.load %arg7[%c0_16, %c0_17, %c0_18] : memref<1x1x128xf32, #tpu.memory_space<vmem>>, vector<1x1x128xf32>
    tpu.vector_store %arg7[%c0_16, %c0_17, %c0_18], %22 {strides = array<i32>} : memref<1x1x128xf32, #tpu.memory_space<vmem>>, vector<1x1x128xf32>,
    return
  }
  func.func @transform_0(%arg0: i32) -> (i32, i32) {
    %c0_i32 = arith.constant 0 : i32
    %c0_i32_0 = arith.constant 0 : i32
    return %arg0, %c0_i32 : i32, i32
  }
  func.func @transform_1(%arg0: i32) -> (i32, i32) {
    %c0_i32 = arith.constant 0 : i32
    %c0_i32_0 = arith.constant 0 : i32
    %c0_i32_1 = arith.constant 0 : i32
    return %c0_i32, %c0_i32_0 : i32, i32
  }
  func.func @transform_2(%arg0: i32) -> (i32, i32) {
    %c0_i32 = arith.constant 0 : i32
    %c0_i32_0 = arith.constant 0 : i32
    %c0_i32_1 = arith.constant 0 : i32
    return %c0_i32, %c0_i32_0 : i32, i32
  }
  func.func @transform_3(%arg0: i32) -> (i32, i32) {
    %c0_i32 = arith.constant 0 : i32
    %c0_i32_0 = arith.constant 0 : i32
    %c0_i32_1 = arith.constant 0 : i32
    return %c0_i32, %c0_i32_0 : i32, i32
  }
  func.func @transform_4(%arg0: i32) -> (i32, i32) {
    %c0_i32 = arith.constant 0 : i32
    %c0_i32_0 = arith.constant 0 : i32
    return %arg0, %c0_i32 : i32, i32
  }
  func.func @transform_5(%arg0: i32) -> (i32, i32, i32) {
    %c0_i32 = arith.constant 0 : i32
    %c0_i32_0 = arith.constant 0 : i32
    %c0_i32_1 = arith.constant 0 : i32
    return %arg0, %c0_i32, %c0_i32_0 : i32, i32, i32
  }
  func.func @transform_6(%arg0: i32) -> (i32, i32, i32) {
    %c0_i32 = arith.constant 0 : i32
    %c0_i32_0 = arith.constant 0 : i32
    %c0_i32_1 = arith.constant 0 : i32
    return %arg0, %c0_i32, %c0_i32_0 : i32, i32, i32
  }
}

module attributes {stable_mosaic.version = 11 : i64} {
  func.func @_head_kernel(%arg0: i32, %arg1: memref<1x1563x128xf32, #tpu.memory_space<vmem>>, %arg2: memref<1x128xf32, #tpu.memory_space<vmem>>, %arg3: memref<1x128xf32, #tpu.memory_space<vmem>>, %arg4: memref<1563x128xf32, #tpu.memory_space<vmem>>, %arg5: memref<1x1xf32, #tpu.memory_space<vmem>>, %arg6: memref<1x1x128xf32, #tpu.memory_space<vmem>>) attributes {dimension_semantics = [#tpu.dimension_semantics<parallel>], iteration_bounds = array<i64: 2>, scalar_prefetch = 0 : i64, scratch_operands = 0 : i64, tpu.core_type = #tpu.core_type<tc>, window_params = [{transform_indices = @transform_0, window_bounds = array<i64: 1, 1563, 128>}, {pipeline_mode = #tpu.pipeline_mode<synchronous>, transform_indices = @transform_1, window_bounds = array<i64: 1, 128>}, {pipeline_mode = #tpu.pipeline_mode<synchronous>, transform_indices = @transform_2, window_bounds = array<i64: 1, 128>}, {pipeline_mode = #tpu.pipeline_mode<synchronous>, transform_indices = @transform_3, window_bounds = array<i64: 1563, 128>}, {pipeline_mode = #tpu.pipeline_mode<synchronous>, transform_indices = @transform_4, window_bounds = array<i64: 1, 1>}, {transform_indices = @transform_5, window_bounds = array<i64: 1, 1, 128>}]} {
    %c0 = arith.constant 0 : index
    %c0_0 = arith.constant 0 : index
    %c0_1 = arith.constant 0 : index
    %0 = vector.load %arg1[%c0, %c0_0, %c0_1] : memref<1x1563x128xf32, #tpu.memory_space<vmem>>, vector<1x1563x128xf32>
    %1 = vector.shape_cast %0 : vector<1x1563x128xf32> to vector<1563x128xf32>
    %c0_2 = arith.constant 0 : index
    %c0_3 = arith.constant 0 : index
    %2 = vector.load %arg2[%c0_2, %c0_3] : memref<1x128xf32, #tpu.memory_space<vmem>>, vector<1x128xf32>
    %3 = vector.broadcast %2 : vector<1x128xf32> to vector<1563x128xf32>
    %4 = arith.mulf %1, %3 : vector<1563x128xf32>
    %c0_4 = arith.constant 0 : index
    %c0_5 = arith.constant 0 : index
    %5 = vector.load %arg3[%c0_4, %c0_5] : memref<1x128xf32, #tpu.memory_space<vmem>>, vector<1x128xf32>
    %6 = vector.broadcast %5 : vector<1x128xf32> to vector<1563x128xf32>
    %7 = arith.addf %4, %6 : vector<1563x128xf32>
    %cst = arith.constant 0.000000e+00 : f32
    %8 = vector.broadcast %cst : f32 to vector<1563x128xf32>
    %9 = arith.cmpf oge, %7, %8 : vector<1563x128xf32>
    %cst_6 = arith.constant 2.000000e-01 : f32
    %10 = vector.broadcast %cst_6 : f32 to vector<1563x128xf32>
    %11 = arith.mulf %10, %7 : vector<1563x128xf32>
    %12 = arith.select %9, %7, %11 : vector<1563x128xi1>, vector<1563x128xf32>
    %c0_7 = arith.constant 0 : index
    %c0_8 = arith.constant 0 : index
    %13 = vector.load %arg4[%c0_7, %c0_8] : memref<1563x128xf32, #tpu.memory_space<vmem>>, vector<1563x128xf32>
    %14 = arith.mulf %12, %13 : vector<1563x128xf32>
    %cst_9 = arith.constant dense<0.000000e+00> : vector<128xf32>
    %15 = vector.multi_reduction <add>, %14, %cst_9 [0] : vector<1563x128xf32> to vector<128xf32>
    %16 = vector.shape_cast %15 : vector<128xf32> to vector<1x128xf32>
    %cst_10 = arith.constant dense<0.000000e+00> : vector<1xf32>
    %17 = vector.multi_reduction <add>, %16, %cst_10 [1] : vector<1x128xf32> to vector<1xf32>
    %18 = vector.shape_cast %17 : vector<1xf32> to vector<1x1xf32>
    %c0_11 = arith.constant 0 : index
    %c0_12 = arith.constant 0 : index
    %19 = vector.load %arg5[%c0_11, %c0_12] : memref<1x1xf32, #tpu.memory_space<vmem>>, vector<1x1xf32>
    %20 = arith.addf %18, %19 : vector<1x1xf32>
    %cst_13 = arith.constant 5.000000e-01 : f32
    %21 = vector.broadcast %cst_13 : f32 to vector<1x1xf32>
    %22 = arith.mulf %21, %20 : vector<1x1xf32>
    %23 = math.tanh %22 : vector<1x1xf32>
    %cst_14 = arith.constant 1.000000e+00 : f32
    %24 = vector.broadcast %cst_14 : f32 to vector<1x1xf32>
    %25 = arith.addf %23, %24 : vector<1x1xf32>
    %cst_15 = arith.constant 5.000000e-01 : f32
    %26 = vector.broadcast %cst_15 : f32 to vector<1x1xf32>
    %27 = arith.mulf %26, %25 : vector<1x1xf32>
    %cst_16 = arith.constant 1.000000e+00 : f32
    %28 = vector.broadcast %cst_16 : f32 to vector<1x1x128xf32>
    %29 = vector.shape_cast %27 : vector<1x1xf32> to vector<1x1x1xf32>
    %30 = vector.broadcast %29 : vector<1x1x1xf32> to vector<1x1x128xf32>
    %31 = arith.mulf %30, %28 : vector<1x1x128xf32>
    %c0_17 = arith.constant 0 : index
    %c0_18 = arith.constant 0 : index
    %c0_19 = arith.constant 0 : index
    %32 = vector.load %arg6[%c0_17, %c0_18, %c0_19] : memref<1x1x128xf32, #tpu.memory_space<vmem>>, vector<1x1x128xf32>
    tpu.vector_store %arg6[%c0_17, %c0_18, %c0_19], %31 {strides = array<i32>} : memref<1x1x128xf32, #tpu.memory_space<vmem>>, vector<1x1x128xf32>,
    return
  }
  func.func @transform_0(%arg0: i32) -> (i32, i32, i32) {
    %c0_i32 = arith.constant 0 : i32
    %c0_i32_0 = arith.constant 0 : i32
    %c0_i32_1 = arith.constant 0 : i32
    return %arg0, %c0_i32, %c0_i32_0 : i32, i32, i32
  }
  func.func @transform_1(%arg0: i32) -> (i32, i32) {
    %c0_i32 = arith.constant 0 : i32
    %c0_i32_0 = arith.constant 0 : i32
    %c0_i32_1 = arith.constant 0 : i32
    return %c0_i32, %c0_i32_0 : i32, i32
  }
  func.func @transform_2(%arg0: i32) -> (i32, i32) {
    %c0_i32 = arith.constant 0 : i32
    %c0_i32_0 = arith.constant 0 : i32
    %c0_i32_1 = arith.constant 0 : i32
    return %c0_i32, %c0_i32_0 : i32, i32
  }
  func.func @transform_3(%arg0: i32) -> (i32, i32) {
    %c0_i32 = arith.constant 0 : i32
    %c0_i32_0 = arith.constant 0 : i32
    %c0_i32_1 = arith.constant 0 : i32
    return %c0_i32, %c0_i32_0 : i32, i32
  }
  func.func @transform_4(%arg0: i32) -> (i32, i32) {
    %c0_i32 = arith.constant 0 : i32
    %c0_i32_0 = arith.constant 0 : i32
    %c0_i32_1 = arith.constant 0 : i32
    return %c0_i32, %c0_i32_0 : i32, i32
  }
  func.func @transform_5(%arg0: i32) -> (i32, i32, i32) {
    %c0_i32 = arith.constant 0 : i32
    %c0_i32_0 = arith.constant 0 : i32
    %c0_i32_1 = arith.constant 0 : i32
    return %arg0, %c0_i32, %c0_i32_0 : i32, i32, i32
  }
}

</mosaic_0001>

<bundles_post_ra>
// kernel: tile.52
= control target key start
LH: loop header
LB: loop body
LE: loop exit
PB: predicated region body
PF: predicated region fallthrough
CT: control target
= control target key end

     0   :  { %s28_s0 = inlined_call_operand.vmem [shape: f32[8], index: 0, kind: input, shape index: {}]   ;;  %s29_s1 = inlined_call_operand.vmem [shape: f32[10,8], index: 1, kind: output, shape index: {}]  }
   0x1   :  { %v4_v0 = vld [vmem:[%s28_s0] ss:$0 sm:$0xff] }
   0x2   :  { %5 = vst [vmem:[%s29_s1] sm:$0xff] %v4_v0  ;;  %8 = vst [vmem:[%s29_s1 + $0x8] sm:$0xff] %v4_v0 }

// kernel: tile.53
= control target key start
LH: loop header
LB: loop body
LE: loop exit
PB: predicated region body
PF: predicated region fallthrough
CT: control target
= control target key end

     0   :  { %s83_s10 = smov 72   ;;  %s84_s11 = smov 56   ;;  %vm3_vm0 = vcmask 64512   ;;  %vm9_vm1 = vcmask 654912   ;;  %vm15_vm2 = vcmask 589312   ;;  %vm21_vm3 = vcmask 523712   ;;  %s135_s0 = inlined_call_operand.vmem [shape: f32[10,8], index: 0, kind: input, shape index: {}]   ;;  %s136_s1 = inlined_call_operand.vmem [shape: f32[1,80], index: 1, kind: output, shape index: {}]  }
   0x1   :  { %v65_v0 = vld [vmem:[%s135_s0 + $0x9] sm:$0x1]   ;;  %v67_v1 = vld [vmem:[%s135_s0 + $0x7] sm:$0x1]   ;;  %v66_v2 = vld [vmem:[%s135_s0 + $0x8] sm:$0x1]  }
   0x2   :  { %7 = vrot.lane.b32.xlu0 %v65_v0, %s83_s10  ;;  %19 = vrot.lane.b32.xlu1 %v67_v1, %s84_s11  ;;  %v68_v3 = vld [vmem:[%s135_s0 + $0x6] sm:$0x1]   ;;  %v2_v4 = vld [vmem:[%s135_s0] sm:$0x1]   ;;  %s85_s18 = smov 64   ;;  %s86_s19 = smov 48  }
   0x3   :  { %v69_v5 = vld [vmem:[%s135_s0 + $0x5] sm:$0x1]   ;;  %v70_v6 = vld [vmem:[%s135_s0 + $0x4] sm:$0x1]   ;;  %4 = vst.msk [vmem:[#allocation0] sm:$0x1] %vm3_vm0, %v2_v4  }
   0x4   :  { %s87_s24 = smov 40   ;;  %s88_s25 = smov 32   ;;  %v71_v7 = vld [vmem:[%s135_s0 + $0x3] sm:$0x1]   ;;  %v72_v8 = vld [vmem:[%s135_s0 + $0x2] sm:$0x1]  }
   0x5   :  { %s89_s30 = smov 24   ;;  %s90_s2 = smov 16   ;;  %v73_v9 = vld [vmem:[%s135_s0 + $0x1] sm:$0x1]   ;;  %vm27_vm4 = vcmask 458112   ;;  %vm33_vm5 = vcmask 392512  }
   0x6   :  { %13 = vrot.lane.b32.xlu0 %v66_v2, %s85_s18  ;;  %25 = vrot.lane.b32.xlu1 %v68_v3, %s86_s19  ;;  %s91_s0 = smov 8   ;;  %vm39_vm6 = vcmask 326912   ;;  %vm45_vm7 = vcmask 261312   ;;  %vm51_vm8 = vcmask 195712   ;;  %vm57_vm9 = vcmask 130112  }
   0xa   :  { %31 = vrot.lane.b32.xlu0 %v69_v5, %s87_s24  ;;  %37 = vrot.lane.b32.xlu1 %v70_v6, %s88_s25 }
   0xe   :  { %43 = vrot.lane.b32.xlu0 %v71_v7, %s89_s30  ;;  %49 = vrot.lane.b32.xlu1 %v72_v8, %s90_s2 }
  0x12   :  { %55 = vrot.lane.b32.xlu0 %v73_v9, %s91_s0 }
  0x74   :  { %v8_v10 = vpop.permute.xlu0 %7   ;;  %v20_v11 = vpop.permute.xlu1 %19  }
  0x75   :  { %10 = vst.msk [vmem:[#allocation0] sm:$0x1] %vm9_vm1, %v8_v10  }
  0x78   :  { %v14_v12 = vpop.permute.xlu0 %13   ;;  %v26_v13 = vpop.permute.xlu1 %25  }
  0x79   :  { %16 = vst.msk [vmem:[#allocation0] sm:$0x1] %vm15_vm2, %v14_v12  }
  0x7a   :  { %22 = vst.msk [vmem:[#allocation0] sm:$0x1] %vm21_vm3, %v20_v11  }
  0x7b   :  { %28 = vst.msk [vmem:[#allocation0] sm:$0x1] %vm27_vm4, %v26_v13  }
  0x7c   :  { %v32_v14 = vpop.permute.xlu0 %31   ;;  %v38_v15 = vpop.permute.xlu1 %37  }
  0x7d   :  { %34 = vst.msk [vmem:[#allocation0] sm:$0x1] %vm33_vm5, %v32_v14  }
  0x7e   :  { %40 = vst.msk [vmem:[#allocation0] sm:$0x1] %vm39_vm6, %v38_v15  }
  0x80   :  { %v44_v16 = vpop.permute.xlu0 %43   ;;  %v50_v17 = vpop.permute.xlu1 %49  }
  0x81   :  { %46 = vst.msk [vmem:[#allocation0] sm:$0x1] %vm45_vm7, %v44_v16  }
  0x82   :  { %52 = vst.msk [vmem:[#allocation0] sm:$0x1] %vm51_vm8, %v50_v17  }
  0x84   :  { %v56_v18 = vpop.permute.xlu0 %55  }
  0x85   :  { %58 = vst.msk [vmem:[#allocation0] sm:$0x1] %vm57_vm9, %v56_v18  }
  0x8c   :  { %v62_v19 = vld [vmem:[#allocation0] sm:$0x1] }
  0x8d   :  { %64 = vst [vmem:[%s136_s1] sm:$0x1] %v62_v19 }

// kernel: discriminator_forward.5
= control target key start
LH: loop header
LB: loop body
LE: loop exit
PB: predicated region body
PF: predicated region fallthrough
CT: control target
= control target key end

     0   :  { %s2184_s12 = smov 0   ;;  %s2902_s0 = inlined_call_operand.vmem [shape: f32[5120,120], index: 0, kind: input, shape index: {}]   ;;  %s2903_s1 = inlined_call_operand.vmem [shape: f32[120,80], index: 1, kind: input, shape index: {}]   ;;  %s2904_s2 = inlined_call_operand.vmem [shape: f32[1,80], index: 2, kind: input, shape index: {}]   ;;  %s2905_s3 = inlined_call_operand.vmem [shape: f32[5120,80], index: 3, kind: output, shape index: {}]  }
   0x1 LB: > { %s1599_s13 = sadd.s32 4294967295, %s2162_s12   ;;  %p1603_p0 = scmp.ge.s32.totalorder %s2162_s12, 1  ;;  %s2162_s12 = sphi %s2184_s12, %s13_s12  }
   0x2   : > { %p138_p1 = scmp.lt.s32.totalorder %s2162_s12, 6 }
   0x4   : > { %p139_p2 = pnand %p1603_p0, %p138_p1 }
   0x5   : > { %v302_v0 = vld [vmem:[%s2903_s1] sm:$0xff] (!%p139_p2)  ;;  %v303_v1 = vld [vmem:[%s2903_s1 + $0x8] sm:$0xff] (!%p139_p2)  ;;  %v304_v2 = vld [vmem:[%s2903_s1 + $0x10] sm:$0xff] (!%p139_p2)  ;;  %s1604_s20 = sshll.u32 (!%p139_p2), %s1599_s13, 7  ;;  %vm324_vm0 = vcmask (!%p139_p2), 982016   ;;  %vm1414_vm1 = vcmask (!%p139_p2), 654336  }
   0x6   : > { %142 = sbr.rel (%p139_p2) target bundleno = 379 (0x17b), region = 32  ;;  %v2104_v3 = vpack.c.bf16 (!%p139_p2), %v303_v1, %v302_v0  ;;  %v305_v4 = vld [vmem:[%s2903_s1 + $0x18] sm:$0xff] (!%p139_p2)  ;;  %p163_p3 = scmp.lt.s32.totalorder (!%p139_p2), %s1604_s20, 639  ;;  %v306_v6 = vld [vmem:[%s2903_s1 + $0x20] sm:$0xff] (!%p139_p2)  ;;  %v307_v7 = vld [vmem:[%s2903_s1 + $0x28] sm:$0xff] (!%p139_p2) }
   0x7   : > { %v2108_v5 = vpack.c.bf16 (!%p139_p2), %v305_v4, %v304_v2  ;;  %v2112_v8 = vpack.c.bf16 (!%p139_p2), %v307_v7, %v306_v6  ;;  %v308_v9 = vld [vmem:[%s2903_s1 + $0x30] sm:$0xff] (!%p139_p2)  ;;  %v309_v10 = vld [vmem:[%s2903_s1 + $0x38] sm:$0xff] (!%p139_p2)  ;;  %v310_v14 = vld [vmem:[%s2903_s1 + $0x40] sm:$0xff] (!%p139_p2) }
   0x8   : > { %2105 = vmatprep.subr.bf16.mxu0 (!%p139_p2), %v2104_v3  ;;  %2132 = vmatprep.subr.bf16.mxu1 (!%p139_p2), %v2104_v3  ;;  %v2116_v13 = vpack.c.bf16 (!%p139_p2), %v309_v10, %v308_v9  ;;  %v311_v15 = vld [vmem:[%s2903_s1 + $0x48] sm:$0xff] (!%p139_p2)  ;;  %v312_v17 = vld [vmem:[%s2903_s1 + $0x50] sm:$0xff] (!%p139_p2)  ;;  %v313_v18 = vld [vmem:[%s2903_s1 + $0x58] sm:$0xff] (!%p139_p2) }
   0x9   : > { %2107 = vmatpush3.bf16.msra.mxu0 (!%p139_p2), %v2104_v3  ;;  %2140 = vmatpush3.bf16.msra.mxu1 (!%p139_p2), %v2104_v3  ;;  %v2120_v16 = vpack.c.bf16 (!%p139_p2), %v311_v15, %v310_v14  ;;  %v2124_v19 = vpack.c.bf16 (!%p139_p2), %v313_v18, %v312_v17  ;;  %v314_v20 = vld [vmem:[%s2903_s1 + $0x60] sm:$0xff] (!%p139_p2)  ;;  %v315_v21 = vld [vmem:[%s2903_s1 + $0x68] sm:$0xff] (!%p139_p2)  ;;  %v316_v23 = vld [vmem:[%s2903_s1 + $0x70] sm:$0xff] (!%p139_p2) }
   0xa   : > { %2109 = vmatprep.subr.bf16.mxu0 (!%p139_p2), %v2108_v5  ;;  %2133 = vmatprep.subr.bf16.mxu1 (!%p139_p2), %v2108_v5  ;;  %v2128_v22 = vpack.c.bf16 (!%p139_p2), %v315_v21, %v314_v20 }
   0xd   : > { %s2907_s20 = smov (!%p163_p3, %s1604_s20), 639  ;;  %2111 = vmatpush3.bf16.msra.mxu0 %v2108_v5  ;;  %2141 = vmatpush3.bf16.msra.mxu1 %v2108_v5 }
   0xe   : > { %s1605_s27 = sshll.u32 %s2907_s20, 3  ;;  %2113 = vmatprep.subr.bf16.mxu0 %v2112_v8  ;;  %2134 = vmatprep.subr.bf16.mxu1 %v2112_v8 }
   0xf   : > { %s2224_s7 = scalar_lea.vmem %s2902_s0, %s1605_s27  ;;  %s2513_s29 = scalar_lea.vmem %s2905_s3, %s1605_s27 }
  0x10   : > { %v174_v11 = vld [vmem:[%s2224_s7] sm:$0xff]  ;;  %v175_v24 = vld [vmem:[%s2224_s7 + $0x8] sm:$0xff]  ;;  %v176_v26 = vld [vmem:[%s2224_s7 + $0x10] sm:$0xff] }
  0x11   : > { %v238_v12 = vld [vmem:[%s2224_s7 + $0x200] sm:$0xff]  ;;  %1912 = vmatprep.mubr.msk.f32.mxu0 %vm324_vm0, %v174_v11  ;;  %2115 = vmatpush3.bf16.msra.mxu0 %v2112_v8  ;;  %v239_v25 = vld [vmem:[%s2224_s7 + $0x208] sm:$0xff]  ;;  %v240_v27 = vld [vmem:[%s2224_s7 + $0x210] sm:$0xff] }
  0x12   : > { %2008 = vmatprep.mubr.msk.f32.mxu1 %vm324_vm0, %v238_v12  ;;  %2142 = vmatpush3.bf16.msra.mxu1 %v2112_v8  ;;  %v177_v28 = vld [vmem:[%s2224_s7 + $0x18] sm:$0xff]  ;;  %v178_v30 = vld [vmem:[%s2224_s7 + $0x20] sm:$0xff]  ;;  %v179_v32 = vld [vmem:[%s2224_s7 + $0x28] sm:$0xff] }
  0x13   : > { %2117 = vmatprep.subr.bf16.mxu0 %v2116_v13  ;;  %2135 = vmatprep.subr.bf16.mxu1 %v2116_v13  ;;  %v241_v29 = vld [vmem:[%s2224_s7 + $0x218] sm:$0xff]  ;;  %v242_v31 = vld [vmem:[%s2224_s7 + $0x220] sm:$0xff]  ;;  %v243_v33 = vld [vmem:[%s2224_s7 + $0x228] sm:$0xff] }
  0x14   : > { %v180_v34 = vld [vmem:[%s2224_s7 + $0x30] sm:$0xff]  ;;  %v181_v36 = vld [vmem:[%s2224_s7 + $0x38] sm:$0xff]  ;;  %v182_v38 = vld [vmem:[%s2224_s7 + $0x40] sm:$0xff] }
  0x15   : > { %2119 = vmatpush3.bf16.msra.mxu0 %v2116_v13  ;;  %v244_v35 = vld [vmem:[%s2224_s7 + $0x230] sm:$0xff]  ;;  %v245_v37 = vld [vmem:[%s2224_s7 + $0x238] sm:$0xff]  ;;  %v246_v39 = vld [vmem:[%s2224_s7 + $0x240] sm:$0xff] }
  0x16   : > { %2143 = vmatpush3.bf16.msra.mxu1 %v2116_v13  ;;  %2121 = vmatprep.subr.bf16.mxu0 %v2120_v16  ;;  %v183_v40 = vld [vmem:[%s2224_s7 + $0x48] sm:$0xff]  ;;  %v184_v42 = vld [vmem:[%s2224_s7 + $0x50] sm:$0xff]  ;;  %v185_v44 = vld [vmem:[%s2224_s7 + $0x58] sm:$0xff] }
  0x17   : > { %2136 = vmatprep.subr.bf16.mxu1 %v2120_v16  ;;  %v247_v41 = vld [vmem:[%s2224_s7 + $0x248] sm:$0xff]  ;;  %v248_v43 = vld [vmem:[%s2224_s7 + $0x250] sm:$0xff]  ;;  %v249_v45 = vld [vmem:[%s2224_s7 + $0x258] sm:$0xff] }
  0x18   : > { %v186_v46 = vld [vmem:[%s2224_s7 + $0x60] sm:$0xff]  ;;  %v187_v48 = vld [vmem:[%s2224_s7 + $0x68] sm:$0xff]  ;;  %v188_v50 = vld [vmem:[%s2224_s7 + $0x70] sm:$0xff] }
  0x19   : > { %2123 = vmatpush3.bf16.msra.mxu0 %v2120_v16  ;;  %v250_v47 = vld [vmem:[%s2224_s7 + $0x260] sm:$0xff]  ;;  %v251_v49 = vld [vmem:[%s2224_s7 + $0x268] sm:$0xff]  ;;  %v252_v51 = vld [vmem:[%s2224_s7 + $0x270] sm:$0xff] }
  0x1a   : > { %2144 = vmatpush3.bf16.msra.mxu1 %v2120_v16  ;;  %2125 = vmatprep.subr.bf16.mxu0 %v2124_v19  ;;  %v189_v52 = vld [vmem:[%s2224_s7 + $0x78] sm:$0xff]  ;;  %v190_v54 = vld [vmem:[%s2224_s7 + $0x80] sm:$0xff]  ;;  %v191_v56 = vld [vmem:[%s2224_s7 + $0x88] sm:$0xff] }
  0x1b   : > { %2137 = vmatprep.subr.bf16.mxu1 %v2124_v19  ;;  %v253_v53 = vld [vmem:[%s2224_s7 + $0x278] sm:$0xff]  ;;  %v254_v55 = vld [vmem:[%s2224_s7 + $0x280] sm:$0xff]  ;;  %v255_v57 = vld [vmem:[%s2224_s7 + $0x288] sm:$0xff] }
  0x1c   : > { %v192_v58 = vld [vmem:[%s2224_s7 + $0x90] sm:$0xff]  ;;  %v193_v60 = vld [vmem:[%s2224_s7 + $0x98] sm:$0xff]  ;;  %v194_v62 = vld [vmem:[%s2224_s7 + $0xa0] sm:$0xff] }
  0x1d   : > { %2127 = vmatpush3.bf16.msra.mxu0 %v2124_v19  ;;  %v256_v59 = vld [vmem:[%s2224_s7 + $0x290] sm:$0xff]  ;;  %v257_v61 = vld [vmem:[%s2224_s7 + $0x298] sm:$0xff]  ;;  %v258_v63 = vld [vmem:[%s2224_s7 + $0x2a0] sm:$0xff] }
  0x1e   : > { %2145 = vmatpush3.bf16.msra.mxu1 %v2124_v19  ;;  %2129 = vmatprep.subr.bf16.mxu0 %v2128_v22  ;;  %v195_v0 = vld [vmem:[%s2224_s7 + $0xa8] sm:$0xff]  ;;  %v196_v2 = vld [vmem:[%s2224_s7 + $0xb0] sm:$0xff]  ;;  %v197_v4 = vld [vmem:[%s2224_s7 + $0xb8] sm:$0xff] }
  0x1f   : > { %2138 = vmatprep.subr.bf16.mxu1 %v2128_v22  ;;  %v259_v1 = vld [vmem:[%s2224_s7 + $0x2a8] sm:$0xff]  ;;  %v260_v3 = vld [vmem:[%s2224_s7 + $0x2b0] sm:$0xff]  ;;  %v261_v5 = vld [vmem:[%s2224_s7 + $0x2b8] sm:$0xff] }
  0x20   : > { %v198_v6 = vld [vmem:[%s2224_s7 + $0xc0] sm:$0xff]  ;;  %v199_v8 = vld [vmem:[%s2224_s7 + $0xc8] sm:$0xff]  ;;  %v200_v10 = vld [vmem:[%s2224_s7 + $0xd0] sm:$0xff] }
  0x21   : > { %2131 = vmatpush3.bf16.msra.mxu0 %v2128_v22  ;;  %v262_v7 = vld [vmem:[%s2224_s7 + $0x2c0] sm:$0xff]  ;;  %v263_v9 = vld [vmem:[%s2224_s7 + $0x2c8] sm:$0xff]  ;;  %v264_v11 = vld [vmem:[%s2224_s7 + $0x2d0] sm:$0xff] }
  0x22   : > { %2146 = vmatpush3.bf16.msra.mxu1 %v2128_v22  ;;  %1910 = vmatprep.subr.mxu0 %v316_v23  ;;  %v201_v12 = vld [vmem:[%s2224_s7 + $0xd8] sm:$0xff]  ;;  %v202_v14 = vld [vmem:[%s2224_s7 + $0xe0] sm:$0xff]  ;;  %v203_v16 = vld [vmem:[%s2224_s7 + $0xe8] sm:$0xff] }
  0x23   : > { %2139 = vmatprep.subr.mxu1 %v316_v23  ;;  %v265_v13 = vld [vmem:[%s2224_s7 + $0x2d8] sm:$0xff]  ;;  %v266_v15 = vld [vmem:[%s2224_s7 + $0x2e0] sm:$0xff]  ;;  %v267_v17 = vld [vmem:[%s2224_s7 + $0x2e8] sm:$0xff] }
  0x24   : > { %v204_v18 = vld [vmem:[%s2224_s7 + $0xf0] sm:$0xff]  ;;  %v205_v20 = vld [vmem:[%s2224_s7 + $0xf8] sm:$0xff]  ;;  %v206_v22 = vld [vmem:[%s2224_s7 + $0x100] sm:$0xff] }
  0x25   : > { %1911 = vmatpush3.msra.mxu0 %v316_v23  ;;  %v268_v19 = vld [vmem:[%s2224_s7 + $0x2f0] sm:$0xff]  ;;  %v269_v21 = vld [vmem:[%s2224_s7 + $0x2f8] sm:$0xff] }
  0x26   : > { %2147 = vmatpush3.msra.mxu1 %v316_v23  ;;  %1913 = vmatmul.mubr.msk.f32.vlgmr.msra.gmra.mrb[0].mxu0 %vm324_vm0, %v175_v24  ;;  %v270_v23 = vld [vmem:[%s2224_s7 + $0x300] sm:$0xff]  ;;  %v207_v24 = vld [vmem:[%s2224_s7 + $0x108] sm:$0xff] }
  0x27   : > { %2009 = vmatmul.mubr.msk.f32.vlgmr.msra.gmra.mrb[0].mxu1 %vm324_vm0, %v239_v25  ;;  %1915 = vmatprep.mubr.msk.f32.mxu0 %vm324_vm0, %v176_v26  ;;  %v271_v25 = vld [vmem:[%s2224_s7 + $0x308] sm:$0xff]  ;;  %v208_v26 = vld [vmem:[%s2224_s7 + $0x110] sm:$0xff] }
  0x28   : > { %2011 = vmatprep.mubr.msk.f32.mxu1 %vm324_vm0, %v240_v27  ;;  %v272_v27 = vld [vmem:[%s2224_s7 + $0x310] sm:$0xff] }
  0x2a   : > { %1916 = vmatmul.mubr.msk.f32.gmra.mrb[2].mxu0 %vm324_vm0, %v177_v28  ;;  %v209_v28 = vld [vmem:[%s2224_s7 + $0x118] sm:$0xff] }
  0x2b   : > { %2012 = vmatmul.mubr.msk.f32.gmra.mrb[2].mxu1 %vm324_vm0, %v241_v29  ;;  %1918 = vmatprep.mubr.msk.f32.mxu0 %vm324_vm0, %v178_v30  ;;  %v273_v29 = vld [vmem:[%s2224_s7 + $0x318] sm:$0xff]  ;;  %v210_v30 = vld [vmem:[%s2224_s7 + $0x120] sm:$0xff] }
  0x2c   : > { %2014 = vmatprep.mubr.msk.f32.mxu1 %vm324_vm0, %v242_v31  ;;  %v274_v31 = vld [vmem:[%s2224_s7 + $0x320] sm:$0xff] }
  0x2e   : > { %1919 = vmatmul.mubr.msk.f32.gmra.mrb[4].mxu0 %vm324_vm0, %v179_v32  ;;  %v211_v32 = vld [vmem:[%s2224_s7 + $0x128] sm:$0xff] }
  0x2f   : > { %2015 = vmatmul.mubr.msk.f32.gmra.mrb[4].mxu1 %vm324_vm0, %v243_v33  ;;  %1921 = vmatprep.mubr.msk.f32.mxu0 %vm324_vm0, %v180_v34  ;;  %v275_v33 = vld [vmem:[%s2224_s7 + $0x328] sm:$0xff]  ;;  %v212_v34 = vld [vmem:[%s2224_s7 + $0x130] sm:$0xff] }
  0x30   : > { %2017 = vmatprep.mubr.msk.f32.mxu1 %vm324_vm0, %v244_v35  ;;  %v276_v35 = vld [vmem:[%s2224_s7 + $0x330] sm:$0xff] }
  0x32   : > { %1922 = vmatmul.mubr.msk.f32.gmra.mrb[6].mxu0 %vm324_vm0, %v181_v36  ;;  %v213_v36 = vld [vmem:[%s2224_s7 + $0x138] sm:$0xff] }
  0x33   : > { %2018 = vmatmul.mubr.msk.f32.gmra.mrb[6].mxu1 %vm324_vm0, %v245_v37  ;;  %1924 = vmatprep.mubr.msk.f32.mxu0 %vm324_vm0, %v182_v38  ;;  %v277_v37 = vld [vmem:[%s2224_s7 + $0x338] sm:$0xff]  ;;  %v214_v38 = vld [vmem:[%s2224_s7 + $0x140] sm:$0xff] }
  0x34   : > { %2020 = vmatprep.mubr.msk.f32.mxu1 %vm324_vm0, %v246_v39  ;;  %v278_v39 = vld [vmem:[%s2224_s7 + $0x340] sm:$0xff] }
  0x36   : > { %1925 = vmatmul.mubr.msk.f32.gmra.mrb[8].mxu0 %vm324_vm0, %v183_v40  ;;  %v215_v40 = vld [vmem:[%s2224_s7 + $0x148] sm:$0xff] }
  0x37   : > { %2021 = vmatmul.mubr.msk.f32.gmra.mrb[8].mxu1 %vm324_vm0, %v247_v41  ;;  %1927 = vmatprep.mubr.msk.f32.mxu0 %vm324_vm0, %v184_v42  ;;  %v279_v41 = vld [vmem:[%s2224_s7 + $0x348] sm:$0xff]  ;;  %v216_v42 = vld [vmem:[%s2224_s7 + $0x150] sm:$0xff] }
  0x38   : > { %2023 = vmatprep.mubr.msk.f32.mxu1 %vm324_vm0, %v248_v43  ;;  %v280_v43 = vld [vmem:[%s2224_s7 + $0x350] sm:$0xff] }
  0x3a   : > { %1928 = vmatmul.mubr.msk.f32.gmra.mrb[10].mxu0 %vm324_vm0, %v185_v44  ;;  %v217_v44 = vld [vmem:[%s2224_s7 + $0x158] sm:$0xff] }
  0x3b   : > { %2024 = vmatmul.mubr.msk.f32.gmra.mrb[10].mxu1 %vm324_vm0, %v249_v45  ;;  %1930 = vmatprep.mubr.msk.f32.mxu0 %vm324_vm0, %v186_v46  ;;  %v281_v45 = vld [vmem:[%s2224_s7 + $0x358] sm:$0xff]  ;;  %v218_v46 = vld [vmem:[%s2224_s7 + $0x160] sm:$0xff] }
  0x3c   : > { %2026 = vmatprep.mubr.msk.f32.mxu1 %vm324_vm0, %v250_v47  ;;  %v282_v47 = vld [vmem:[%s2224_s7 + $0x360] sm:$0xff] }
  0x3e   : > { %1931 = vmatmul.mubr.msk.f32.gmra.mrb[12].mxu0 %vm324_vm0, %v187_v48  ;;  %v219_v48 = vld [vmem:[%s2224_s7 + $0x168] sm:$0xff] }
  0x3f   : > { %2027 = vmatmul.mubr.msk.f32.gmra.mrb[12].mxu1 %vm324_vm0, %v251_v49  ;;  %1933 = vmatprep.mubr.msk.f32.mxu0 %vm324_vm0, %v188_v50  ;;  %v283_v49 = vld [vmem:[%s2224_s7 + $0x368] sm:$0xff]  ;;  %v220_v50 = vld [vmem:[%s2224_s7 + $0x170] sm:$0xff] }
  0x40   : > { %2029 = vmatprep.mubr.msk.f32.mxu1 %vm324_vm0, %v252_v51  ;;  %v284_v51 = vld [vmem:[%s2224_s7 + $0x370] sm:$0xff] }
  0x42   : > { %1934 = vmatmul.mubr.msk.f32.gmra.mrb[14].mxu0 %vm324_vm0, %v189_v52  ;;  %v221_v52 = vld [vmem:[%s2224_s7 + $0x178] sm:$0xff] }
  0x43   : > { %2030 = vmatmul.mubr.msk.f32.gmra.mrb[14].mxu1 %vm324_vm0, %v253_v53  ;;  %1936 = vmatprep.mubr.msk.f32.mxu0 %vm324_vm0, %v190_v54  ;;  %v285_v53 = vld [vmem:[%s2224_s7 + $0x378] sm:$0xff]  ;;  %v222_v54 = vld [vmem:[%s2224_s7 + $0x180] sm:$0xff] }
  0x44   : > { %2032 = vmatprep.mubr.msk.f32.mxu1 %vm324_vm0, %v254_v55  ;;  %v286_v55 = vld [vmem:[%s2224_s7 + $0x380] sm:$0xff] }
  0x46   : > { %1937 = vmatmul.mubr.msk.f32.gmra.mrb[16].mxu0 %vm324_vm0, %v191_v56  ;;  %v223_v56 = vld [vmem:[%s2224_s7 + $0x188] sm:$0xff] }
  0x47   : > { %2033 = vmatmul.mubr.msk.f32.gmra.mrb[16].mxu1 %vm324_vm0, %v255_v57  ;;  %1939 = vmatprep.mubr.msk.f32.mxu0 %vm324_vm0, %v192_v58  ;;  %v287_v57 = vld [vmem:[%s2224_s7 + $0x388] sm:$0xff]  ;;  %v224_v58 = vld [vmem:[%s2224_s7 + $0x190] sm:$0xff] }
  0x48   : > { %2035 = vmatprep.mubr.msk.f32.mxu1 %vm324_vm0, %v256_v59  ;;  %v288_v59 = vld [vmem:[%s2224_s7 + $0x390] sm:$0xff] }
  0x4a   : > { %1940 = vmatmul.mubr.msk.f32.gmra.mrb[18].mxu0 %vm324_vm0, %v193_v60  ;;  %v225_v60 = vld [vmem:[%s2224_s7 + $0x198] sm:$0xff] }
  0x4b   : > { %2036 = vmatmul.mubr.msk.f32.gmra.mrb[18].mxu1 %vm324_vm0, %v257_v61  ;;  %1942 = vmatprep.mubr.msk.f32.mxu0 %vm324_vm0, %v194_v62  ;;  %v289_v61 = vld [vmem:[%s2224_s7 + $0x398] sm:$0xff]  ;;  %v226_v62 = vld [vmem:[%s2224_s7 + $0x1a0] sm:$0xff] }
  0x4c   : > { %2038 = vmatprep.mubr.msk.f32.mxu1 %vm324_vm0, %v258_v63  ;;  %v290_v63 = vld [vmem:[%s2224_s7 + $0x3a0] sm:$0xff] }
  0x4e   : > { %1943 = vmatmul.mubr.msk.f32.gmra.mrb[20].mxu0 %vm324_vm0, %v195_v0  ;;  %v227_v0 = vld [vmem:[%s2224_s7 + $0x1a8] sm:$0xff] }
  0x4f   : > { %2039 = vmatmul.mubr.msk.f32.gmra.mrb[20].mxu1 %vm324_vm0, %v259_v1  ;;  %1945 = vmatprep.mubr.msk.f32.mxu0 %vm324_vm0, %v196_v2  ;;  %v291_v1 = vld [vmem:[%s2224_s7 + $0x3a8] sm:$0xff]  ;;  %v228_v2 = vld [vmem:[%s2224_s7 + $0x1b0] sm:$0xff] }
  0x50   : > { %2041 = vmatprep.mubr.msk.f32.mxu1 %vm324_vm0, %v260_v3  ;;  %v292_v3 = vld [vmem:[%s2224_s7 + $0x3b0] sm:$0xff] }
  0x52   : > { %1946 = vmatmul.mubr.msk.f32.gmra.mrb[22].mxu0 %vm324_vm0, %v197_v4  ;;  %v229_v4 = vld [vmem:[%s2224_s7 + $0x1b8] sm:$0xff] }
  0x53   : > { %2042 = vmatmul.mubr.msk.f32.gmra.mrb[22].mxu1 %vm324_vm0, %v261_v5  ;;  %1948 = vmatprep.mubr.msk.f32.mxu0 %vm324_vm0, %v198_v6  ;;  %v293_v5 = vld [vmem:[%s2224_s7 + $0x3b8] sm:$0xff]  ;;  %v230_v6 = vld [vmem:[%s2224_s7 + $0x1c0] sm:$0xff] }
  0x54   : > { %2044 = vmatprep.mubr.msk.f32.mxu1 %vm324_vm0, %v262_v7  ;;  %v294_v7 = vld [vmem:[%s2224_s7 + $0x3c0] sm:$0xff] }
  0x56   : > { %1949 = vmatmul.mubr.msk.f32.gmra.mrb[24].mxu0 %vm324_vm0, %v199_v8  ;;  %v231_v8 = vld [vmem:[%s2224_s7 + $0x1c8] sm:$0xff] }
  0x57   : > { %2045 = vmatmul.mubr.msk.f32.gmra.mrb[24].mxu1 %vm324_vm0, %v263_v9  ;;  %1951 = vmatprep.mubr.msk.f32.mxu0 %vm324_vm0, %v200_v10  ;;  %v295_v9 = vld [vmem:[%s2224_s7 + $0x3c8] sm:$0xff]  ;;  %v232_v10 = vld [vmem:[%s2224_s7 + $0x1d0] sm:$0xff] }
  0x58   : > { %2047 = vmatprep.mubr.msk.f32.mxu1 %vm324_vm0, %v264_v11  ;;  %v296_v11 = vld [vmem:[%s2224_s7 + $0x3d0] sm:$0xff] }
  0x5a   : > { %1952 = vmatmul.mubr.msk.f32.gmra.mrb[26].mxu0 %vm324_vm0, %v201_v12  ;;  %v233_v12 = vld [vmem:[%s2224_s7 + $0x1d8] sm:$0xff] }
  0x5b   : > { %2048 = vmatmul.mubr.msk.f32.gmra.mrb[26].mxu1 %vm324_vm0, %v265_v13  ;;  %1954 = vmatprep.mubr.msk.f32.mxu0 %vm324_vm0, %v202_v14  ;;  %v297_v13 = vld [vmem:[%s2224_s7 + $0x3d8] sm:$0xff]  ;;  %v234_v14 = vld [vmem:[%s2224_s7 + $0x1e0] sm:$0xff] }
  0x5c   : > { %2050 = vmatprep.mubr.msk.f32.mxu1 %vm324_vm0, %v266_v15  ;;  %v298_v15 = vld [vmem:[%s2224_s7 + $0x3e0] sm:$0xff] }
  0x5e   : > { %1955 = vmatmul.mubr.msk.f32.gmra.mrb[28].mxu0 %vm324_vm0, %v203_v16  ;;  %v235_v16 = vld [vmem:[%s2224_s7 + $0x1e8] sm:$0xff] }
  0x5f   : > { %2051 = vmatmul.mubr.msk.f32.gmra.mrb[28].mxu1 %vm324_vm0, %v267_v17  ;;  %1957 = vmatprep.mubr.msk.f32.mxu0 %vm324_vm0, %v204_v18  ;;  %v299_v17 = vld [vmem:[%s2224_s7 + $0x3e8] sm:$0xff]  ;;  %v236_v18 = vld [vmem:[%s2224_s7 + $0x1f0] sm:$0xff] }
  0x60   : > { %2053 = vmatprep.mubr.msk.f32.mxu1 %vm324_vm0, %v268_v19  ;;  %v300_v19 = vld [vmem:[%s2224_s7 + $0x3f0] sm:$0xff] }
  0x62   : > { %1958 = vmatmul.mubr.msk.f32.gmra.mrb[30].mxu0 %vm324_vm0, %v205_v20  ;;  %v237_v20 = vld [vmem:[%s2224_s7 + $0x1f8] sm:$0xff] }
  0x63   : > { %2054 = vmatmul.mubr.msk.f32.gmra.mrb[30].mxu1 %vm324_vm0, %v269_v21  ;;  %1960 = vmatprep.mubr.msk.f32.mxu0 %vm324_vm0, %v206_v22  ;;  %v301_v21 = vld [vmem:[%s2224_s7 + $0x3f8] sm:$0xff]  ;;  %v2506_v22 = vld [vmem:[%s2904_s2] ss:$0 sm:$0xff] }
  0x64   : > { %2056 = vmatprep.mubr.msk.f32.mxu1 %vm324_vm0, %v270_v23 }
  0x66   : > { %1961 = vmatmul.mubr.msk.f32.gmra.mrb[32].mxu0 %vm324_vm0, %v207_v24 }
  0x67   : > { %2057 = vmatmul.mubr.msk.f32.gmra.mrb[32].mxu1 %vm324_vm0, %v271_v25  ;;  %1963 = vmatprep.mubr.msk.f32.mxu0 %vm324_vm0, %v208_v26 }
  0x68   : > { %2059 = vmatprep.mubr.msk.f32.mxu1 %vm324_vm0, %v272_v27 }
  0x6a   : > { %1964 = vmatmul.mubr.msk.f32.gmra.mrb[34].mxu0 %vm324_vm0, %v209_v28 }
  0x6b   : > { %2060 = vmatmul.mubr.msk.f32.gmra.mrb[34].mxu1 %vm324_vm0, %v273_v29  ;;  %1966 = vmatprep.mubr.msk.f32.mxu0 %vm324_vm0, %v210_v30 }
  0x6c   : > { %2062 = vmatprep.mubr.msk.f32.mxu1 %vm324_vm0, %v274_v31 }
  0x6e   : > { %1967 = vmatmul.mubr.msk.f32.gmra.mrb[36].mxu0 %vm324_vm0, %v211_v32 }
  0x6f   : > { %2063 = vmatmul.mubr.msk.f32.gmra.mrb[36].mxu1 %vm324_vm0, %v275_v33  ;;  %1969 = vmatprep.mubr.msk.f32.mxu0 %vm324_vm0, %v212_v34 }
  0x70   : > { %2065 = vmatprep.mubr.msk.f32.mxu1 %vm324_vm0, %v276_v35 }
  0x72   : > { %1970 = vmatmul.mubr.msk.f32.gmra.mrb[38].mxu0 %vm324_vm0, %v213_v36 }
  0x73   : > { %2066 = vmatmul.mubr.msk.f32.gmra.mrb[38].mxu1 %vm324_vm0, %v277_v37  ;;  %1972 = vmatprep.mubr.msk.f32.mxu0 %vm324_vm0, %v214_v38 }
  0x74   : > { %2068 = vmatprep.mubr.msk.f32.mxu1 %vm324_vm0, %v278_v39 }
  0x76   : > { %1973 = vmatmul.mubr.msk.f32.gmra.mrb[40].mxu0 %vm324_vm0, %v215_v40 }
  0x77   : > { %2069 = vmatmul.mubr.msk.f32.gmra.mrb[40].mxu1 %vm324_vm0, %v279_v41  ;;  %1975 = vmatprep.mubr.msk.f32.mxu0 %vm324_vm0, %v216_v42 }
  0x78   : > { %2071 = vmatprep.mubr.msk.f32.mxu1 %vm324_vm0, %v280_v43 }
  0x7a   : > { %1976 = vmatmul.mubr.msk.f32.gmra.mrb[42].mxu0 %vm324_vm0, %v217_v44 }
  0x7b   : > { %2072 = vmatmul.mubr.msk.f32.gmra.mrb[42].mxu1 %vm324_vm0, %v281_v45  ;;  %1978 = vmatprep.mubr.msk.f32.mxu0 %vm324_vm0, %v218_v46 }
  0x7c   : > { %2074 = vmatprep.mubr.msk.f32.mxu1 %vm324_vm0, %v282_v47 }
  0x7e   : > { %1979 = vmatmul.mubr.msk.f32.gmra.mrb[44].mxu0 %vm324_vm0, %v219_v48 }
  0x7f   : > { %2075 = vmatmul.mubr.msk.f32.gmra.mrb[44].mxu1 %vm324_vm0, %v283_v49  ;;  %1981 = vmatprep.mubr.msk.f32.mxu0 %vm324_vm0, %v220_v50 }
  0x80   : > { %2077 = vmatprep.mubr.msk.f32.mxu1 %vm324_vm0, %v284_v51 }
  0x82   : > { %1982 = vmatmul.mubr.msk.f32.gmra.mrb[46].mxu0 %vm324_vm0, %v221_v52 }
  0x83   : > { %2078 = vmatmul.mubr.msk.f32.gmra.mrb[46].mxu1 %vm324_vm0, %v285_v53  ;;  %1984 = vmatprep.mubr.msk.f32.mxu0 %vm324_vm0, %v222_v54 }
  0x84   : > { %2080 = vmatprep.mubr.msk.f32.mxu1 %vm324_vm0, %v286_v55 }
  0x86   : > { %1985 = vmatmul.mubr.msk.f32.gmra.mrb[48].mxu0 %vm324_vm0, %v223_v56 }
  0x87   : > { %2081 = vmatmul.mubr.msk.f32.gmra.mrb[48].mxu1 %vm324_vm0, %v287_v57  ;;  %1987 = vmatprep.mubr.msk.f32.mxu0 %vm324_vm0, %v224_v58 }
  0x88   : > { %2083 = vmatprep.mubr.msk.f32.mxu1 %vm324_vm0, %v288_v59 }
  0x8a   : > { %1988 = vmatmul.mubr.msk.f32.gmra.mrb[50].mxu0 %vm324_vm0, %v225_v60 }
  0x8b   : > { %2084 = vmatmul.mubr.msk.f32.gmra.mrb[50].mxu1 %vm324_vm0, %v289_v61  ;;  %1990 = vmatprep.mubr.msk.f32.mxu0 %vm324_vm0, %v226_v62 }
  0x8c   : > { %2086 = vmatprep.mubr.msk.f32.mxu1 %vm324_vm0, %v290_v63 }
  0x8e   : > { %1991 = vmatmul.mubr.msk.f32.gmra.mrb[52].mxu0 %vm324_vm0, %v227_v0 }
  0x8f   : > { %2087 = vmatmul.mubr.msk.f32.gmra.mrb[52].mxu1 %vm324_vm0, %v291_v1  ;;  %1993 = vmatprep.mubr.msk.f32.mxu0 %vm324_vm0, %v228_v2 }
  0x90   : > { %2089 = vmatprep.mubr.msk.f32.mxu1 %vm324_vm0, %v292_v3 }
  0x92   : > { %1994 = vmatmul.mubr.msk.f32.gmra.mrb[54].mxu0 %vm324_vm0, %v229_v4 }
  0x93   : > { %2090 = vmatmul.mubr.msk.f32.gmra.mrb[54].mxu1 %vm324_vm0, %v293_v5  ;;  %1996 = vmatprep.mubr.msk.f32.mxu0 %vm324_vm0, %v230_v6 }
  0x94   : > { %2092 = vmatprep.mubr.msk.f32.mxu1 %vm324_vm0, %v294_v7 }
  0x96   : > { %1997 = vmatmul.mubr.msk.f32.gmra.mrb[56].mxu0 %vm324_vm0, %v231_v8 }
  0x97   : > { %2093 = vmatmul.mubr.msk.f32.gmra.mrb[56].mxu1 %vm324_vm0, %v295_v9  ;;  %1999 = vmatprep.mubr.msk.f32.mxu0 %vm324_vm0, %v232_v10 }
  0x98   : > { %2095 = vmatprep.mubr.msk.f32.mxu1 %vm324_vm0, %v296_v11 }
  0x9a   : > { %2000 = vmatmul.mubr.msk.f32.gmra.mrb[58].mxu0 %vm324_vm0, %v233_v12 }
  0x9b   : > { %2096 = vmatmul.mubr.msk.f32.gmra.mrb[58].mxu1 %vm324_vm0, %v297_v13  ;;  %2002 = vmatprep.mubr.msk.f32.mxu0 %vm324_vm0, %v234_v14 }
  0x9c   : > { %2098 = vmatprep.mubr.msk.f32.mxu1 %vm324_vm0, %v298_v15 }
  0x9e   : > { %2003 = vmatmul.mubr.msk.f32.gmra.mrb[60].mxu0 %vm324_vm0, %v235_v16 }
  0x9f   : > { %2099 = vmatmul.mubr.msk.f32.gmra.mrb[60].mxu1 %vm324_vm0, %v299_v17  ;;  %2005 = vmatprep.mubr.msk.f32.mxu0 %vm324_vm0, %v236_v18 }
  0xa0   : > { %2101 = vmatprep.mubr.msk.f32.mxu1 %vm324_vm0, %v300_v19 }
  0xa2   : > { %2006 = vmatmul.mubr.msk.f32.gmra.mrb[62].mxu0 %vm324_vm0, %v237_v20 }
  0xa3   : > { %2102 = vmatmul.mubr.msk.f32.gmra.mrb[62].mxu1 %vm324_vm0, %v301_v21 }
  0xf9   : > { %v1914_v23 = vpop.f32.mrb[0].mxu0 }
  0xfa   : > { %v2010_v24 = vpop.f32.mrb[0].mxu1  ;;  %v781_v25 = vadd.f32 %v1914_v23, %v2506_v22  ;;  %v775_v27 = vpop.f32.mrb[1].mxu0 }
  0xfb   : > { %v1101_v26 = vadd.f32 %v2010_v24, %v2506_v22  ;;  %v1095_v28 = vpop.f32.mrb[1].mxu1  ;;  %v776_v29 = vadd.f32 %v2506_v22, %v775_v27 }
  0xfc   : > { %v1096_v30 = vadd.f32 %v2506_v22, %v1095_v28  ;;  %1416 = vst.msk [vmem:[%s2513_s29 + $0x8] sm:$0xff] %vm1414_vm1, %v781_v25 }
  0xfd   : > { %1480 = vst.msk [vmem:[%s2513_s29 + $0x208] sm:$0xff] %vm1414_vm1, %v1101_v26  ;;  %1415 = vst.msk [vmem:[%s2513_s29] sm:$0xff] %vm1414_vm1, %v776_v29  ;;  %v1917_v31 = vpop.f32.mrb[2].mxu0 }
  0xfe   : > { %1479 = vst.msk [vmem:[%s2513_s29 + $0x200] sm:$0xff] %vm1414_vm1, %v1096_v30  ;;  %v2013_v32 = vpop.f32.mrb[2].mxu1  ;;  %v791_v33 = vadd.f32 %v1917_v31, %v2506_v22  ;;  %v785_v35 = vpop.f32.mrb[3].mxu0 }
  0xff   : > { %v1111_v34 = vadd.f32 %v2013_v32, %v2506_v22  ;;  %v1105_v36 = vpop.f32.mrb[3].mxu1  ;;  %v786_v37 = vadd.f32 %v2506_v22, %v785_v35 }
 0x100   : > { %v1106_v38 = vadd.f32 %v2506_v22, %v1105_v36  ;;  %1418 = vst.msk [vmem:[%s2513_s29 + $0x18] sm:$0xff] %vm1414_vm1, %v791_v33 }
 0x101   : > { %1482 = vst.msk [vmem:[%s2513_s29 + $0x218] sm:$0xff] %vm1414_vm1, %v1111_v34  ;;  %1417 = vst.msk [vmem:[%s2513_s29 + $0x10] sm:$0xff] %vm1414_vm1, %v786_v37  ;;  %v1920_v39 = vpop.f32.mrb[4].mxu0 }
 0x102   : > { %1481 = vst.msk [vmem:[%s2513_s29 + $0x210] sm:$0xff] %vm1414_vm1, %v1106_v38  ;;  %v2016_v40 = vpop.f32.mrb[4].mxu1  ;;  %v801_v41 = vadd.f32 %v1920_v39, %v2506_v22  ;;  %v795_v43 = vpop.f32.mrb[5].mxu0 }
 0x103   : > { %v1121_v42 = vadd.f32 %v2016_v40, %v2506_v22  ;;  %v1115_v44 = vpop.f32.mrb[5].mxu1  ;;  %v796_v45 = vadd.f32 %v2506_v22, %v795_v43 }
 0x104   : > { %v1116_v46 = vadd.f32 %v2506_v22, %v1115_v44  ;;  %1420 = vst.msk [vmem:[%s2513_s29 + $0x28] sm:$0xff] %vm1414_vm1, %v801_v41 }
 0x105   : > { %1484 = vst.msk [vmem:[%s2513_s29 + $0x228] sm:$0xff] %vm1414_vm1, %v1121_v42  ;;  %1419 = vst.msk [vmem:[%s2513_s29 + $0x20] sm:$0xff] %vm1414_vm1, %v796_v45  ;;  %v1923_v47 = vpop.f32.mrb[6].mxu0 }
 0x106   : > { %1483 = vst.msk [vmem:[%s2513_s29 + $0x220] sm:$0xff] %vm1414_vm1, %v1116_v46  ;;  %v2019_v48 = vpop.f32.mrb[6].mxu1  ;;  %v811_v49 = vadd.f32 %v1923_v47, %v2506_v22  ;;  %v805_v51 = vpop.f32.mrb[7].mxu0 }
 0x107   : > { %v1131_v50 = vadd.f32 %v2019_v48, %v2506_v22  ;;  %v1125_v52 = vpop.f32.mrb[7].mxu1  ;;  %v806_v53 = vadd.f32 %v2506_v22, %v805_v51 }
 0x108   : > { %v1126_v54 = vadd.f32 %v2506_v22, %v1125_v52  ;;  %1422 = vst.msk [vmem:[%s2513_s29 + $0x38] sm:$0xff] %vm1414_vm1, %v811_v49 }
 0x109   : > { %1486 = vst.msk [vmem:[%s2513_s29 + $0x238] sm:$0xff] %vm1414_vm1, %v1131_v50  ;;  %1421 = vst.msk [vmem:[%s2513_s29 + $0x30] sm:$0xff] %vm1414_vm1, %v806_v53  ;;  %v1926_v55 = vpop.f32.mrb[8].mxu0 }
 0x10a   : > { %1485 = vst.msk [vmem:[%s2513_s29 + $0x230] sm:$0xff] %vm1414_vm1, %v1126_v54  ;;  %v2022_v56 = vpop.f32.mrb[8].mxu1  ;;  %v821_v57 = vadd.f32 %v1926_v55, %v2506_v22  ;;  %v815_v59 = vpop.f32.mrb[9].mxu0 }
 0x10b   : > { %v1141_v58 = vadd.f32 %v2022_v56, %v2506_v22  ;;  %v1135_v60 = vpop.f32.mrb[9].mxu1  ;;  %v816_v61 = vadd.f32 %v2506_v22, %v815_v59 }
 0x10c   : > { %v1136_v62 = vadd.f32 %v2506_v22, %v1135_v60  ;;  %1424 = vst.msk [vmem:[%s2513_s29 + $0x48] sm:$0xff] %vm1414_vm1, %v821_v57 }
 0x10d   : > { %1488 = vst.msk [vmem:[%s2513_s29 + $0x248] sm:$0xff] %vm1414_vm1, %v1141_v58  ;;  %1423 = vst.msk [vmem:[%s2513_s29 + $0x40] sm:$0xff] %vm1414_vm1, %v816_v61  ;;  %v1929_v63 = vpop.f32.mrb[10].mxu0 }
 0x10e   : > { %1487 = vst.msk [vmem:[%s2513_s29 + $0x240] sm:$0xff] %vm1414_vm1, %v1136_v62  ;;  %v2025_v0 = vpop.f32.mrb[10].mxu1  ;;  %v831_v1 = vadd.f32 %v1929_v63, %v2506_v22  ;;  %v825_v3 = vpop.f32.mrb[11].mxu0 }
 0x10f   : > { %v1151_v2 = vadd.f32 %v2025_v0, %v2506_v22  ;;  %v1145_v4 = vpop.f32.mrb[11].mxu1  ;;  %v826_v5 = vadd.f32 %v2506_v22, %v825_v3 }
 0x110   : > { %v1146_v6 = vadd.f32 %v2506_v22, %v1145_v4  ;;  %1426 = vst.msk [vmem:[%s2513_s29 + $0x58] sm:$0xff] %vm1414_vm1, %v831_v1 }
 0x111   : > { %1490 = vst.msk [vmem:[%s2513_s29 + $0x258] sm:$0xff] %vm1414_vm1, %v1151_v2  ;;  %1425 = vst.msk [vmem:[%s2513_s29 + $0x50] sm:$0xff] %vm1414_vm1, %v826_v5  ;;  %v1932_v7 = vpop.f32.mrb[12].mxu0 }
 0x112   : > { %1489 = vst.msk [vmem:[%s2513_s29 + $0x250] sm:$0xff] %vm1414_vm1, %v1146_v6  ;;  %v2028_v8 = vpop.f32.mrb[12].mxu1  ;;  %v841_v9 = vadd.f32 %v1932_v7, %v2506_v22  ;;  %v835_v11 = vpop.f32.mrb[13].mxu0 }
 0x113   : > { %v1161_v10 = vadd.f32 %v2028_v8, %v2506_v22  ;;  %v1155_v12 = vpop.f32.mrb[13].mxu1  ;;  %v836_v13 = vadd.f32 %v2506_v22, %v835_v11 }
 0x114   : > { %v1156_v14 = vadd.f32 %v2506_v22, %v1155_v12  ;;  %1428 = vst.msk [vmem:[%s2513_s29 + $0x68] sm:$0xff] %vm1414_vm1, %v841_v9 }
 0x115   : > { %1492 = vst.msk [vmem:[%s2513_s29 + $0x268] sm:$0xff] %vm1414_vm1, %v1161_v10  ;;  %1427 = vst.msk [vmem:[%s2513_s29 + $0x60] sm:$0xff] %vm1414_vm1, %v836_v13  ;;  %v1935_v15 = vpop.f32.mrb[14].mxu0 }
 0x116   : > { %1491 = vst.msk [vmem:[%s2513_s29 + $0x260] sm:$0xff] %vm1414_vm1, %v1156_v14  ;;  %v2031_v16 = vpop.f32.mrb[14].mxu1  ;;  %v851_v17 = vadd.f32 %v1935_v15, %v2506_v22  ;;  %v845_v19 = vpop.f32.mrb[15].mxu0 }
 0x117   : > { %v1171_v18 = vadd.f32 %v2031_v16, %v2506_v22  ;;  %v1165_v20 = vpop.f32.mrb[15].mxu1  ;;  %v846_v21 = vadd.f32 %v2506_v22, %v845_v19 }
 0x118   : > { %v1166_v23 = vadd.f32 %v2506_v22, %v1165_v20  ;;  %1430 = vst.msk [vmem:[%s2513_s29 + $0x78] sm:$0xff] %vm1414_vm1, %v851_v17 }
 0x119   : > { %1494 = vst.msk [vmem:[%s2513_s29 + $0x278] sm:$0xff] %vm1414_vm1, %v1171_v18  ;;  %1429 = vst.msk [vmem:[%s2513_s29 + $0x70] sm:$0xff] %vm1414_vm1, %v846_v21  ;;  %v1938_v24 = vpop.f32.mrb[16].mxu0 }
 0x11a   : > { %1493 = vst.msk [vmem:[%s2513_s29 + $0x270] sm:$0xff] %vm1414_vm1, %v1166_v23  ;;  %v2034_v25 = vpop.f32.mrb[16].mxu1  ;;  %v861_v26 = vadd.f32 %v1938_v24, %v2506_v22  ;;  %v855_v28 = vpop.f32.mrb[17].mxu0 }
 0x11b   : > { %v1181_v27 = vadd.f32 %v2034_v25, %v2506_v22  ;;  %v1175_v29 = vpop.f32.mrb[17].mxu1  ;;  %v856_v30 = vadd.f32 %v2506_v22, %v855_v28 }
 0x11c   : > { %v1176_v31 = vadd.f32 %v2506_v22, %v1175_v29  ;;  %1432 = vst.msk [vmem:[%s2513_s29 + $0x88] sm:$0xff] %vm1414_vm1, %v861_v26 }
 0x11d   : > { %1496 = vst.msk [vmem:[%s2513_s29 + $0x288] sm:$0xff] %vm1414_vm1, %v1181_v27  ;;  %1431 = vst.msk [vmem:[%s2513_s29 + $0x80] sm:$0xff] %vm1414_vm1, %v856_v30  ;;  %v1941_v32 = vpop.f32.mrb[18].mxu0 }
 0x11e   : > { %1495 = vst.msk [vmem:[%s2513_s29 + $0x280] sm:$0xff] %vm1414_vm1, %v1176_v31  ;;  %v2037_v33 = vpop.f32.mrb[18].mxu1  ;;  %v871_v34 = vadd.f32 %v1941_v32, %v2506_v22  ;;  %v865_v36 = vpop.f32.mrb[19].mxu0 }
 0x11f   : > { %v1191_v35 = vadd.f32 %v2037_v33, %v2506_v22  ;;  %v1185_v37 = vpop.f32.mrb[19].mxu1  ;;  %v866_v38 = vadd.f32 %v2506_v22, %v865_v36 }
 0x120   : > { %v1186_v39 = vadd.f32 %v2506_v22, %v1185_v37  ;;  %1434 = vst.msk [vmem:[%s2513_s29 + $0x98] sm:$0xff] %vm1414_vm1, %v871_v34 }
 0x121   : > { %1498 = vst.msk [vmem:[%s2513_s29 + $0x298] sm:$0xff] %vm1414_vm1, %v1191_v35  ;;  %1433 = vst.msk [vmem:[%s2513_s29 + $0x90] sm:$0xff] %vm1414_vm1, %v866_v38  ;;  %v1944_v40 = vpop.f32.mrb[20].mxu0 }
 0x122   : > { %1497 = vst.msk [vmem:[%s2513_s29 + $0x290] sm:$0xff] %vm1414_vm1, %v1186_v39  ;;  %v2040_v41 = vpop.f32.mrb[20].mxu1  ;;  %v881_v42 = vadd.f32 %v1944_v40, %v2506_v22  ;;  %v875_v44 = vpop.f32.mrb[21].mxu0 }
 0x123   : > { %v1201_v43 = vadd.f32 %v2040_v41, %v2506_v22  ;;  %v1195_v45 = vpop.f32.mrb[21].mxu1  ;;  %v876_v46 = vadd.f32 %v2506_v22, %v875_v44 }
 0x124   : > { %v1196_v47 = vadd.f32 %v2506_v22, %v1195_v45  ;;  %1436 = vst.msk [vmem:[%s2513_s29 + $0xa8] sm:$0xff] %vm1414_vm1, %v881_v42 }
 0x125   : > { %1500 = vst.msk [vmem:[%s2513_s29 + $0x2a8] sm:$0xff] %vm1414_vm1, %v1201_v43  ;;  %1435 = vst.msk [vmem:[%s2513_s29 + $0xa0] sm:$0xff] %vm1414_vm1, %v876_v46  ;;  %v1947_v48 = vpop.f32.mrb[22].mxu0 }
 0x126   : > { %1499 = vst.msk [vmem:[%s2513_s29 + $0x2a0] sm:$0xff] %vm1414_vm1, %v1196_v47  ;;  %v2043_v49 = vpop.f32.mrb[22].mxu1  ;;  %v891_v50 = vadd.f32 %v1947_v48, %v2506_v22  ;;  %v885_v52 = vpop.f32.mrb[23].mxu0 }
 0x127   : > { %v1211_v51 = vadd.f32 %v2043_v49, %v2506_v22  ;;  %v1205_v53 = vpop.f32.mrb[23].mxu1  ;;  %v886_v54 = vadd.f32 %v2506_v22, %v885_v52 }
 0x128   : > { %v1206_v55 = vadd.f32 %v2506_v22, %v1205_v53  ;;  %1438 = vst.msk [vmem:[%s2513_s29 + $0xb8] sm:$0xff] %vm1414_vm1, %v891_v50 }
 0x129   : > { %1502 = vst.msk [vmem:[%s2513_s29 + $0x2b8] sm:$0xff] %vm1414_vm1, %v1211_v51  ;;  %1437 = vst.msk [vmem:[%s2513_s29 + $0xb0] sm:$0xff] %vm1414_vm1, %v886_v54  ;;  %v1950_v56 = vpop.f32.mrb[24].mxu0 }
 0x12a   : > { %1501 = vst.msk [vmem:[%s2513_s29 + $0x2b0] sm:$0xff] %vm1414_vm1, %v1206_v55  ;;  %v2046_v57 = vpop.f32.mrb[24].mxu1  ;;  %v901_v58 = vadd.f32 %v1950_v56, %v2506_v22  ;;  %v895_v60 = vpop.f32.mrb[25].mxu0 }
 0x12b   : > { %v1221_v59 = vadd.f32 %v2046_v57, %v2506_v22  ;;  %v1215_v61 = vpop.f32.mrb[25].mxu1  ;;  %v896_v62 = vadd.f32 %v2506_v22, %v895_v60 }
 0x12c   : > { %v1216_v63 = vadd.f32 %v2506_v22, %v1215_v61  ;;  %1440 = vst.msk [vmem:[%s2513_s29 + $0xc8] sm:$0xff] %vm1414_vm1, %v901_v58 }
 0x12d   : > { %1504 = vst.msk [vmem:[%s2513_s29 + $0x2c8] sm:$0xff] %vm1414_vm1, %v1221_v59  ;;  %1439 = vst.msk [vmem:[%s2513_s29 + $0xc0] sm:$0xff] %vm1414_vm1, %v896_v62  ;;  %v1953_v0 = vpop.f32.mrb[26].mxu0 }
 0x12e   : > { %1503 = vst.msk [vmem:[%s2513_s29 + $0x2c0] sm:$0xff] %vm1414_vm1, %v1216_v63  ;;  %v2049_v1 = vpop.f32.mrb[26].mxu1  ;;  %v911_v2 = vadd.f32 %v1953_v0, %v2506_v22  ;;  %v905_v4 = vpop.f32.mrb[27].mxu0 }
 0x12f   : > { %v1231_v3 = vadd.f32 %v2049_v1, %v2506_v22  ;;  %v1225_v5 = vpop.f32.mrb[27].mxu1  ;;  %v906_v6 = vadd.f32 %v2506_v22, %v905_v4 }
 0x130   : > { %v1226_v7 = vadd.f32 %v2506_v22, %v1225_v5  ;;  %1442 = vst.msk [vmem:[%s2513_s29 + $0xd8] sm:$0xff] %vm1414_vm1, %v911_v2 }
 0x131   : > { %1506 = vst.msk [vmem:[%s2513_s29 + $0x2d8] sm:$0xff] %vm1414_vm1, %v1231_v3  ;;  %1441 = vst.msk [vmem:[%s2513_s29 + $0xd0] sm:$0xff] %vm1414_vm1, %v906_v6  ;;  %v1956_v8 = vpop.f32.mrb[28].mxu0 }
 0x132   : > { %1505 = vst.msk [vmem:[%s2513_s29 + $0x2d0] sm:$0xff] %vm1414_vm1, %v1226_v7  ;;  %v2052_v9 = vpop.f32.mrb[28].mxu1  ;;  %v921_v10 = vadd.f32 %v1956_v8, %v2506_v22  ;;  %v915_v12 = vpop.f32.mrb[29].mxu0 }
 0x133   : > { %v1241_v11 = vadd.f32 %v2052_v9, %v2506_v22  ;;  %v1235_v13 = vpop.f32.mrb[29].mxu1  ;;  %v916_v14 = vadd.f32 %v2506_v22, %v915_v12 }
 0x134   : > { %v1236_v15 = vadd.f32 %v2506_v22, %v1235_v13  ;;  %1444 = vst.msk [vmem:[%s2513_s29 + $0xe8] sm:$0xff] %vm1414_vm1, %v921_v10 }
 0x135   : > { %1508 = vst.msk [vmem:[%s2513_s29 + $0x2e8] sm:$0xff] %vm1414_vm1, %v1241_v11  ;;  %1443 = vst.msk [vmem:[%s2513_s29 + $0xe0] sm:$0xff] %vm1414_vm1, %v916_v14  ;;  %v1959_v16 = vpop.f32.mrb[30].mxu0 }
 0x136   : > { %1507 = vst.msk [vmem:[%s2513_s29 + $0x2e0] sm:$0xff] %vm1414_vm1, %v1236_v15  ;;  %v2055_v17 = vpop.f32.mrb[30].mxu1  ;;  %v931_v18 = vadd.f32 %v1959_v16, %v2506_v22  ;;  %v925_v20 = vpop.f32.mrb[31].mxu0 }
 0x137   : > { %v1251_v19 = vadd.f32 %v2055_v17, %v2506_v22  ;;  %v1245_v21 = vpop.f32.mrb[31].mxu1  ;;  %v926_v23 = vadd.f32 %v2506_v22, %v925_v20 }
 0x138   : > { %v1246_v24 = vadd.f32 %v2506_v22, %v1245_v21  ;;  %1446 = vst.msk [vmem:[%s2513_s29 + $0xf8] sm:$0xff] %vm1414_vm1, %v931_v18 }
 0x139   : > { %1510 = vst.msk [vmem:[%s2513_s29 + $0x2f8] sm:$0xff] %vm1414_vm1, %v1251_v19  ;;  %1445 = vst.msk [vmem:[%s2513_s29 + $0xf0] sm:$0xff] %vm1414_vm1, %v926_v23  ;;  %v1962_v25 = vpop.f32.mrb[32].mxu0 }
 0x13a   : > { %1509 = vst.msk [vmem:[%s2513_s29 + $0x2f0] sm:$0xff] %vm1414_vm1, %v1246_v24  ;;  %v2058_v26 = vpop.f32.mrb[32].mxu1  ;;  %v941_v27 = vadd.f32 %v1962_v25, %v2506_v22  ;;  %v935_v29 = vpop.f32.mrb[33].mxu0 }
 0x13b   : > { %v1261_v28 = vadd.f32 %v2058_v26, %v2506_v22  ;;  %v1255_v30 = vpop.f32.mrb[33].mxu1  ;;  %v936_v31 = vadd.f32 %v2506_v22, %v935_v29 }
 0x13c   : > { %v1256_v32 = vadd.f32 %v2506_v22, %v1255_v30  ;;  %1448 = vst.msk [vmem:[%s2513_s29 + $0x108] sm:$0xff] %vm1414_vm1, %v941_v27 }
 0x13d   : > { %1512 = vst.msk [vmem:[%s2513_s29 + $0x308] sm:$0xff] %vm1414_vm1, %v1261_v28  ;;  %1447 = vst.msk [vmem:[%s2513_s29 + $0x100] sm:$0xff] %vm1414_vm1, %v936_v31  ;;  %v1965_v33 = vpop.f32.mrb[34].mxu0 }
 0x13e   : > { %1511 = vst.msk [vmem:[%s2513_s29 + $0x300] sm:$0xff] %vm1414_vm1, %v1256_v32  ;;  %v2061_v34 = vpop.f32.mrb[34].mxu1  ;;  %v951_v35 = vadd.f32 %v1965_v33, %v2506_v22  ;;  %v945_v37 = vpop.f32.mrb[35].mxu0 }
 0x13f   : > { %v1271_v36 = vadd.f32 %v2061_v34, %v2506_v22  ;;  %v1265_v38 = vpop.f32.mrb[35].mxu1  ;;  %v946_v39 = vadd.f32 %v2506_v22, %v945_v37 }
 0x140   : > { %v1266_v40 = vadd.f32 %v2506_v22, %v1265_v38  ;;  %1450 = vst.msk [vmem:[%s2513_s29 + $0x118] sm:$0xff] %vm1414_vm1, %v951_v35 }
 0x141   : > { %1514 = vst.msk [vmem:[%s2513_s29 + $0x318] sm:$0xff] %vm1414_vm1, %v1271_v36  ;;  %1449 = vst.msk [vmem:[%s2513_s29 + $0x110] sm:$0xff] %vm1414_vm1, %v946_v39  ;;  %v1968_v41 = vpop.f32.mrb[36].mxu0 }
 0x142   : > { %1513 = vst.msk [vmem:[%s2513_s29 + $0x310] sm:$0xff] %vm1414_vm1, %v1266_v40  ;;  %v2064_v42 = vpop.f32.mrb[36].mxu1  ;;  %v961_v43 = vadd.f32 %v1968_v41, %v2506_v22  ;;  %v955_v45 = vpop.f32.mrb[37].mxu0 }
 0x143   : > { %v1281_v44 = vadd.f32 %v2064_v42, %v2506_v22  ;;  %v1275_v46 = vpop.f32.mrb[37].mxu1  ;;  %v956_v47 = vadd.f32 %v2506_v22, %v955_v45 }
 0x144   : > { %v1276_v48 = vadd.f32 %v2506_v22, %v1275_v46  ;;  %1452 = vst.msk [vmem:[%s2513_s29 + $0x128] sm:$0xff] %vm1414_vm1, %v961_v43 }
 0x145   : > { %1516 = vst.msk [vmem:[%s2513_s29 + $0x328] sm:$0xff] %vm1414_vm1, %v1281_v44  ;;  %1451 = vst.msk [vmem:[%s2513_s29 + $0x120] sm:$0xff] %vm1414_vm1, %v956_v47  ;;  %v1971_v49 = vpop.f32.mrb[38].mxu0 }
 0x146   : > { %1515 = vst.msk [vmem:[%s2513_s29 + $0x320] sm:$0xff] %vm1414_vm1, %v1276_v48  ;;  %v2067_v50 = vpop.f32.mrb[38].mxu1  ;;  %v971_v51 = vadd.f32 %v1971_v49, %v2506_v22  ;;  %v965_v53 = vpop.f32.mrb[39].mxu0 }
 0x147   : > { %v1291_v52 = vadd.f32 %v2067_v50, %v2506_v22  ;;  %v1285_v54 = vpop.f32.mrb[39].mxu1  ;;  %v966_v55 = vadd.f32 %v2506_v22, %v965_v53 }
 0x148   : > { %v1286_v56 = vadd.f32 %v2506_v22, %v1285_v54  ;;  %1454 = vst.msk [vmem:[%s2513_s29 + $0x138] sm:$0xff] %vm1414_vm1, %v971_v51 }
 0x149   : > { %1518 = vst.msk [vmem:[%s2513_s29 + $0x338] sm:$0xff] %vm1414_vm1, %v1291_v52  ;;  %1453 = vst.msk [vmem:[%s2513_s29 + $0x130] sm:$0xff] %vm1414_vm1, %v966_v55  ;;  %v1974_v57 = vpop.f32.mrb[40].mxu0 }
 0x14a   : > { %1517 = vst.msk [vmem:[%s2513_s29 + $0x330] sm:$0xff] %vm1414_vm1, %v1286_v56  ;;  %v2070_v58 = vpop.f32.mrb[40].mxu1  ;;  %v981_v59 = vadd.f32 %v1974_v57, %v2506_v22  ;;  %v975_v61 = vpop.f32.mrb[41].mxu0 }
 0x14b   : > { %v1301_v60 = vadd.f32 %v2070_v58, %v2506_v22  ;;  %v1295_v62 = vpop.f32.mrb[41].mxu1  ;;  %v976_v63 = vadd.f32 %v2506_v22, %v975_v61 }
 0x14c   : > { %v1296_v0 = vadd.f32 %v2506_v22, %v1295_v62  ;;  %1456 = vst.msk [vmem:[%s2513_s29 + $0x148] sm:$0xff] %vm1414_vm1, %v981_v59 }
 0x14d   : > { %1520 = vst.msk [vmem:[%s2513_s29 + $0x348] sm:$0xff] %vm1414_vm1, %v1301_v60  ;;  %1455 = vst.msk [vmem:[%s2513_s29 + $0x140] sm:$0xff] %vm1414_vm1, %v976_v63  ;;  %v1977_v1 = vpop.f32.mrb[42].mxu0 }
 0x14e   : > { %1519 = vst.msk [vmem:[%s2513_s29 + $0x340] sm:$0xff] %vm1414_vm1, %v1296_v0  ;;  %v2073_v2 = vpop.f32.mrb[42].mxu1  ;;  %v991_v3 = vadd.f32 %v1977_v1, %v2506_v22  ;;  %v985_v5 = vpop.f32.mrb[43].mxu0 }
 0x14f   : > { %v1311_v4 = vadd.f32 %v2073_v2, %v2506_v22  ;;  %v1305_v6 = vpop.f32.mrb[43].mxu1  ;;  %v986_v7 = vadd.f32 %v2506_v22, %v985_v5 }
 0x150   : > { %v1306_v8 = vadd.f32 %v2506_v22, %v1305_v6  ;;  %1458 = vst.msk [vmem:[%s2513_s29 + $0x158] sm:$0xff] %vm1414_vm1, %v991_v3 }
 0x151   : > { %1522 = vst.msk [vmem:[%s2513_s29 + $0x358] sm:$0xff] %vm1414_vm1, %v1311_v4  ;;  %1457 = vst.msk [vmem:[%s2513_s29 + $0x150] sm:$0xff] %vm1414_vm1, %v986_v7  ;;  %v1980_v9 = vpop.f32.mrb[44].mxu0 }
 0x152   : > { %1521 = vst.msk [vmem:[%s2513_s29 + $0x350] sm:$0xff] %vm1414_vm1, %v1306_v8  ;;  %v2076_v10 = vpop.f32.mrb[44].mxu1  ;;  %v1001_v11 = vadd.f32 %v1980_v9, %v2506_v22  ;;  %v995_v13 = vpop.f32.mrb[45].mxu0 }
 0x153   : > { %v1321_v12 = vadd.f32 %v2076_v10, %v2506_v22  ;;  %v1315_v14 = vpop.f32.mrb[45].mxu1  ;;  %v996_v15 = vadd.f32 %v2506_v22, %v995_v13 }
 0x154   : > { %v1316_v16 = vadd.f32 %v2506_v22, %v1315_v14  ;;  %1460 = vst.msk [vmem:[%s2513_s29 + $0x168] sm:$0xff] %vm1414_vm1, %v1001_v11 }
 0x155   : > { %1524 = vst.msk [vmem:[%s2513_s29 + $0x368] sm:$0xff] %vm1414_vm1, %v1321_v12  ;;  %1459 = vst.msk [vmem:[%s2513_s29 + $0x160] sm:$0xff] %vm1414_vm1, %v996_v15  ;;  %v1983_v17 = vpop.f32.mrb[46].mxu0 }
 0x156   : > { %1523 = vst.msk [vmem:[%s2513_s29 + $0x360] sm:$0xff] %vm1414_vm1, %v1316_v16  ;;  %v2079_v18 = vpop.f32.mrb[46].mxu1  ;;  %v1011_v19 = vadd.f32 %v1983_v17, %v2506_v22  ;;  %v1005_v21 = vpop.f32.mrb[47].mxu0 }
 0x157   : > { %v1331_v20 = vadd.f32 %v2079_v18, %v2506_v22  ;;  %v1325_v23 = vpop.f32.mrb[47].mxu1  ;;  %v1006_v24 = vadd.f32 %v2506_v22, %v1005_v21 }
 0x158   : > { %v1326_v25 = vadd.f32 %v2506_v22, %v1325_v23  ;;  %1462 = vst.msk [vmem:[%s2513_s29 + $0x178] sm:$0xff] %vm1414_vm1, %v1011_v19 }
 0x159   : > { %1526 = vst.msk [vmem:[%s2513_s29 + $0x378] sm:$0xff] %vm1414_vm1, %v1331_v20  ;;  %1461 = vst.msk [vmem:[%s2513_s29 + $0x170] sm:$0xff] %vm1414_vm1, %v1006_v24  ;;  %v1986_v26 = vpop.f32.mrb[48].mxu0 }
 0x15a   : > { %1525 = vst.msk [vmem:[%s2513_s29 + $0x370] sm:$0xff] %vm1414_vm1, %v1326_v25  ;;  %v2082_v27 = vpop.f32.mrb[48].mxu1  ;;  %v1021_v28 = vadd.f32 %v1986_v26, %v2506_v22  ;;  %v1015_v30 = vpop.f32.mrb[49].mxu0 }
 0x15b   : > { %v1341_v29 = vadd.f32 %v2082_v27, %v2506_v22  ;;  %v1335_v31 = vpop.f32.mrb[49].mxu1  ;;  %v1016_v32 = vadd.f32 %v2506_v22, %v1015_v30 }
 0x15c   : > { %v1336_v33 = vadd.f32 %v2506_v22, %v1335_v31  ;;  %1464 = vst.msk [vmem:[%s2513_s29 + $0x188] sm:$0xff] %vm1414_vm1, %v1021_v28 }
 0x15d   : > { %1528 = vst.msk [vmem:[%s2513_s29 + $0x388] sm:$0xff] %vm1414_vm1, %v1341_v29  ;;  %1463 = vst.msk [vmem:[%s2513_s29 + $0x180] sm:$0xff] %vm1414_vm1, %v1016_v32  ;;  %v1989_v34 = vpop.f32.mrb[50].mxu0 }
 0x15e   : > { %1527 = vst.msk [vmem:[%s2513_s29 + $0x380] sm:$0xff] %vm1414_vm1, %v1336_v33  ;;  %v2085_v35 = vpop.f32.mrb[50].mxu1  ;;  %v1031_v36 = vadd.f32 %v1989_v34, %v2506_v22  ;;  %v1025_v38 = vpop.f32.mrb[51].mxu0 }
 0x15f   : > { %v1351_v37 = vadd.f32 %v2085_v35, %v2506_v22  ;;  %v1345_v39 = vpop.f32.mrb[51].mxu1  ;;  %v1026_v40 = vadd.f32 %v2506_v22, %v1025_v38 }
 0x160   : > { %v1346_v41 = vadd.f32 %v2506_v22, %v1345_v39  ;;  %1466 = vst.msk [vmem:[%s2513_s29 + $0x198] sm:$0xff] %vm1414_vm1, %v1031_v36 }
 0x161   : > { %1530 = vst.msk [vmem:[%s2513_s29 + $0x398] sm:$0xff] %vm1414_vm1, %v1351_v37  ;;  %1465 = vst.msk [vmem:[%s2513_s29 + $0x190] sm:$0xff] %vm1414_vm1, %v1026_v40  ;;  %v1992_v42 = vpop.f32.mrb[52].mxu0 }
 0x162   : > { %1529 = vst.msk [vmem:[%s2513_s29 + $0x390] sm:$0xff] %vm1414_vm1, %v1346_v41  ;;  %v2088_v43 = vpop.f32.mrb[52].mxu1  ;;  %v1041_v44 = vadd.f32 %v1992_v42, %v2506_v22  ;;  %v1035_v46 = vpop.f32.mrb[53].mxu0 }
 0x163   : > { %v1361_v45 = vadd.f32 %v2088_v43, %v2506_v22  ;;  %v1355_v47 = vpop.f32.mrb[53].mxu1  ;;  %v1036_v48 = vadd.f32 %v2506_v22, %v1035_v46 }
 0x164   : > { %v1356_v49 = vadd.f32 %v2506_v22, %v1355_v47  ;;  %1468 = vst.msk [vmem:[%s2513_s29 + $0x1a8] sm:$0xff] %vm1414_vm1, %v1041_v44 }
 0x165   : > { %1532 = vst.msk [vmem:[%s2513_s29 + $0x3a8] sm:$0xff] %vm1414_vm1, %v1361_v45  ;;  %1467 = vst.msk [vmem:[%s2513_s29 + $0x1a0] sm:$0xff] %vm1414_vm1, %v1036_v48  ;;  %v1995_v50 = vpop.f32.mrb[54].mxu0 }
 0x166   : > { %1531 = vst.msk [vmem:[%s2513_s29 + $0x3a0] sm:$0xff] %vm1414_vm1, %v1356_v49  ;;  %v2091_v51 = vpop.f32.mrb[54].mxu1  ;;  %v1051_v52 = vadd.f32 %v1995_v50, %v2506_v22  ;;  %v1045_v54 = vpop.f32.mrb[55].mxu0 }
 0x167   : > { %v1371_v53 = vadd.f32 %v2091_v51, %v2506_v22  ;;  %v1365_v55 = vpop.f32.mrb[55].mxu1  ;;  %v1046_v56 = vadd.f32 %v2506_v22, %v1045_v54 }
 0x168   : > { %v1366_v57 = vadd.f32 %v2506_v22, %v1365_v55  ;;  %1470 = vst.msk [vmem:[%s2513_s29 + $0x1b8] sm:$0xff] %vm1414_vm1, %v1051_v52 }
 0x169   : > { %1534 = vst.msk [vmem:[%s2513_s29 + $0x3b8] sm:$0xff] %vm1414_vm1, %v1371_v53  ;;  %1469 = vst.msk [vmem:[%s2513_s29 + $0x1b0] sm:$0xff] %vm1414_vm1, %v1046_v56  ;;  %v1998_v58 = vpop.f32.mrb[56].mxu0 }
 0x16a   : > { %1533 = vst.msk [vmem:[%s2513_s29 + $0x3b0] sm:$0xff] %vm1414_vm1, %v1366_v57  ;;  %v2094_v59 = vpop.f32.mrb[56].mxu1  ;;  %v1061_v60 = vadd.f32 %v1998_v58, %v2506_v22  ;;  %v1055_v62 = vpop.f32.mrb[57].mxu0 }
 0x16b   : > { %v1381_v61 = vadd.f32 %v2094_v59, %v2506_v22  ;;  %v1375_v63 = vpop.f32.mrb[57].mxu1  ;;  %v1056_v0 = vadd.f32 %v2506_v22, %v1055_v62 }
 0x16c   : > { %v1376_v1 = vadd.f32 %v2506_v22, %v1375_v63  ;;  %1472 = vst.msk [vmem:[%s2513_s29 + $0x1c8] sm:$0xff] %vm1414_vm1, %v1061_v60 }
 0x16d   : > { %1536 = vst.msk [vmem:[%s2513_s29 + $0x3c8] sm:$0xff] %vm1414_vm1, %v1381_v61  ;;  %1471 = vst.msk [vmem:[%s2513_s29 + $0x1c0] sm:$0xff] %vm1414_vm1, %v1056_v0  ;;  %v2001_v2 = vpop.f32.mrb[58].mxu0 }
 0x16e   : > { %1535 = vst.msk [vmem:[%s2513_s29 + $0x3c0] sm:$0xff] %vm1414_vm1, %v1376_v1  ;;  %v2097_v3 = vpop.f32.mrb[58].mxu1  ;;  %v1071_v4 = vadd.f32 %v2001_v2, %v2506_v22  ;;  %v1065_v6 = vpop.f32.mrb[59].mxu0 }
 0x16f   : > { %v1391_v5 = vadd.f32 %v2097_v3, %v2506_v22  ;;  %v1385_v7 = vpop.f32.mrb[59].mxu1  ;;  %v1066_v8 = vadd.f32 %v2506_v22, %v1065_v6 }
 0x170   : > { %v1386_v9 = vadd.f32 %v2506_v22, %v1385_v7  ;;  %1474 = vst.msk [vmem:[%s2513_s29 + $0x1d8] sm:$0xff] %vm1414_vm1, %v1071_v4 }
 0x171   : > { %1538 = vst.msk [vmem:[%s2513_s29 + $0x3d8] sm:$0xff] %vm1414_vm1, %v1391_v5  ;;  %1473 = vst.msk [vmem:[%s2513_s29 + $0x1d0] sm:$0xff] %vm1414_vm1, %v1066_v8  ;;  %v2004_v10 = vpop.f32.mrb[60].mxu0 }
 0x172   : > { %1537 = vst.msk [vmem:[%s2513_s29 + $0x3d0] sm:$0xff] %vm1414_vm1, %v1386_v9  ;;  %v2100_v11 = vpop.f32.mrb[60].mxu1  ;;  %v1081_v12 = vadd.f32 %v2004_v10, %v2506_v22  ;;  %v1075_v14 = vpop.f32.mrb[61].mxu0 }
 0x173   : > { %v1401_v13 = vadd.f32 %v2100_v11, %v2506_v22  ;;  %v1395_v15 = vpop.f32.mrb[61].mxu1  ;;  %v1076_v16 = vadd.f32 %v2506_v22, %v1075_v14 }
 0x174   : > { %v1396_v17 = vadd.f32 %v2506_v22, %v1395_v15  ;;  %1476 = vst.msk [vmem:[%s2513_s29 + $0x1e8] sm:$0xff] %vm1414_vm1, %v1081_v12 }
 0x175   : > { %1540 = vst.msk [vmem:[%s2513_s29 + $0x3e8] sm:$0xff] %vm1414_vm1, %v1401_v13  ;;  %1475 = vst.msk [vmem:[%s2513_s29 + $0x1e0] sm:$0xff] %vm1414_vm1, %v1076_v16  ;;  %v2007_v18 = vpop.f32.mrb[62].mxu0 }
 0x176   : > { %1539 = vst.msk [vmem:[%s2513_s29 + $0x3e0] sm:$0xff] %vm1414_vm1, %v1396_v17  ;;  %v2103_v19 = vpop.f32.mrb[62].mxu1  ;;  %v1091_v20 = vadd.f32 %v2007_v18, %v2506_v22  ;;  %v1085_v23 = vpop.f32.mrb[63].mxu0 }
 0x177   : > { %v1411_v21 = vadd.f32 %v2103_v19, %v2506_v22  ;;  %v1405_v24 = vpop.f32.mrb[63].mxu1  ;;  %v1086_v25 = vadd.f32 %v2506_v22, %v1085_v23 }
 0x178   : > { %v1406_v26 = vadd.f32 %v2506_v22, %v1405_v24  ;;  %1478 = vst.msk [vmem:[%s2513_s29 + $0x1f8] sm:$0xff] %vm1414_vm1, %v1091_v20 }
 0x179   : > { %1542 = vst.msk [vmem:[%s2513_s29 + $0x3f8] sm:$0xff] %vm1414_vm1, %v1411_v21  ;;  %1477 = vst.msk [vmem:[%s2513_s29 + $0x1f0] sm:$0xff] %vm1414_vm1, %v1086_v25 }
 0x17a   : > { %1541 = vst.msk [vmem:[%s2513_s29 + $0x3f0] sm:$0xff] %vm1414_vm1, %v1406_v26 }
 0x17b PF: > { %s13_s12 = sadd.s32 1, %s2162_s12  }
 0x17c   : > { %p10_p4 = scmp.ge.s32.totalorder %s13_s12, 7  }
 0x17e   :  { %12 = sbr.rel (!%p10_p4) target bundleno = 1 (0x1), region = 62 }

// kernel: tile.47
= control target key start
LH: loop header
LB: loop body
LE: loop exit
PB: predicated region body
PF: predicated region fallthrough
CT: control target
= control target key end

     0   :  { %s20_s0 = inlined_call_operand.<no memory space> [shape: f32[], index: 0, kind: input, shape index: {}]   ;;  %s21_s1 = inlined_call_operand.vmem [shape: f32[1,128], index: 1, kind: output, shape index: {}]  }
   0x1   :  { %v2_v0 = vstv %s20_s0 }
   0x2   :  { %3 = vst [vmem:[%s21_s1] sm:$0x1] %v2_v0 }

// kernel: discriminator_forward.6
= control target key start
LH: loop header
LB: loop body
LE: loop exit
PB: predicated region body
PF: predicated region fallthrough
CT: control target
= control target key end

     0   :  { %s2887_s21 = smov 0   ;;  %s4161_s0 = inlined_call_operand.vmem [shape: f32[4096,128], index: 0, kind: input, shape index: {}]   ;;  %s4162_s1 = inlined_call_operand.vmem [shape: f32[1,128], index: 1, kind: input, shape index: {}]   ;;  %s4163_s2 = inlined_call_operand.vmem [shape: f32[1,128], index: 2, kind: input, shape index: {}]   ;;  %s4164_s3 = inlined_call_operand.vmem [shape: f32[128,128], index: 3, kind: input, shape index: {}]   ;;  %s4165_s4 = inlined_call_operand.vmem [shape: f32[4096,128], index: 4, kind: output, shape index: {0}]   ;;  %s4166_s5 = inlined_call_operand.vmem [shape: f32[4,1,128], index: 5, kind: output, shape index: {1}]   ;;  %s4167_s6 = inlined_call_operand.vmem [shape: f32[4,1,128], index: 6, kind: output, shape index: {2}]  }
   0x1 LB: > { %s2893_s22 = sadd.s32 4294967295, %s2850_s21   ;;  %p2409_p0 = scmp.ge.s32.totalorder %s2850_s21, 1  ;;  %s2850_s21 = sphi %s2887_s21, %s17_s21  }
   0x2   : > { %p218_p1 = scmp.lt.s32.totalorder %s2850_s21, 5 }
   0x4   : > { %p219_p2 = pnand %p2409_p0, %p218_p1 }
   0x5   : > { %v1054_v0 = vld [vmem:[%s4164_s3] sm:$0xff] (!%p219_p2)  ;;  %v1055_v1 = vld [vmem:[%s4164_s3 + $0x8] sm:$0xff] (!%p219_p2)  ;;  %v1056_v2 = vld [vmem:[%s4164_s3 + $0x10] sm:$0xff] (!%p219_p2)  ;;  %s2410_s29 = sshll.u32 (!%p219_p2), %s2893_s22, 7  ;;  %p266_p4 = scmp.lt.s32.totalorder (!%p219_p2), %s2893_s22, 3 }
   0x6   : > { %222 = sbr.rel (%p219_p2) target bundleno = 524 (0x20c), region = 36  ;;  %v2786_v3 = vpack.c.bf16 (!%p219_p2), %v1055_v1, %v1054_v0  ;;  %v1057_v4 = vld [vmem:[%s4164_s3 + $0x18] sm:$0xff] (!%p219_p2)  ;;  %p255_p3 = scmp.lt.s32.totalorder (!%p219_p2), %s2410_s29, 511  ;;  %v1058_v6 = vld [vmem:[%s4164_s3 + $0x20] sm:$0xff] (!%p219_p2)  ;;  %v1059_v7 = vld [vmem:[%s4164_s3 + $0x28] sm:$0xff] (!%p219_p2) }
   0x7   : > { %v2790_v5 = vpack.c.bf16 (!%p219_p2), %v1057_v4, %v1056_v2  ;;  %v2794_v8 = vpack.c.bf16 (!%p219_p2), %v1059_v7, %v1058_v6  ;;  %v2922_v9 = vld [vmem:[%s4162_s1] ss:$0 sm:$0xff] (!%p219_p2)  ;;  %v1060_v10 = vld [vmem:[%s4164_s3 + $0x30] sm:$0xff] (!%p219_p2)  ;;  %v1061_v11 = vld [vmem:[%s4164_s3 + $0x38] sm:$0xff] (!%p219_p2) }
   0x8   : > { %2787 = vmatprep.subr.bf16.mxu0 (!%p219_p2), %v2786_v3  ;;  %2818 = vmatprep.subr.bf16.mxu1 (!%p219_p2), %v2786_v3  ;;  %v2941_v13 = vld [vmem:[%s4163_s2] ss:$0 sm:$0xff] (!%p219_p2)  ;;  %v2798_v15 = vpack.c.bf16 (!%p219_p2), %v1061_v11, %v1060_v10  ;;  %v1063_v17 = vld [vmem:[%s4164_s3 + $0x48] sm:$0xff] (!%p219_p2)  ;;  %v1064_v21 = vld [vmem:[%s4164_s3 + $0x50] sm:$0xff] (!%p219_p2) }
   0x9   : > { %2789 = vmatpush3.bf16.msra.mxu0 (!%p219_p2), %v2786_v3  ;;  %2826 = vmatpush3.bf16.msra.mxu1 (!%p219_p2), %v2786_v3  ;;  %v1062_v16 = vld [vmem:[%s4164_s3 + $0x40] sm:$0xff] (!%p219_p2)  ;;  %v1065_v22 = vld [vmem:[%s4164_s3 + $0x58] sm:$0xff] (!%p219_p2)  ;;  %v1067_v27 = vld [vmem:[%s4164_s3 + $0x68] sm:$0xff] (!%p219_p2) }
   0xa   : > { %2791 = vmatprep.subr.bf16.mxu0 (!%p219_p2), %v2790_v5  ;;  %2819 = vmatprep.subr.bf16.mxu1 (!%p219_p2), %v2790_v5  ;;  %v2802_v20 = vpack.c.bf16 (!%p219_p2), %v1063_v17, %v1062_v16  ;;  %v2806_v24 = vpack.c.bf16 (!%p219_p2), %v1065_v22, %v1064_v21  ;;  %v1066_v26 = vld [vmem:[%s4164_s3 + $0x60] sm:$0xff] (!%p219_p2)  ;;  %v1068_v34 = vld [vmem:[%s4164_s3 + $0x70] sm:$0xff] (!%p219_p2)  ;;  %v1069_v35 = vld [vmem:[%s4164_s3 + $0x78] sm:$0xff] (!%p219_p2) }
   0xb   : > { %v2810_v31 = vpack.c.bf16 (!%p219_p2), %v1067_v27, %v1066_v26  ;;  %v2814_v40 = vpack.c.bf16 (!%p219_p2), %v1069_v35, %v1068_v34 }
   0xd   : > { %s4169_s29 = smov (!%p255_p3, %s2410_s29), 511  ;;  %2793 = vmatpush3.bf16.msra.mxu0 %v2790_v5  ;;  %2827 = vmatpush3.bf16.msra.mxu1 %v2790_v5  ;;  %s4171_s22 = smov (!%p266_p4, %s2893_s22), 3 }
   0xe   : > { %s2411_s12 = sshll.u32 %s4169_s29, 3  ;;  %2795 = vmatprep.subr.bf16.mxu0 %v2794_v8  ;;  %2820 = vmatprep.subr.bf16.mxu1 %v2794_v8  ;;  %s268_s30 = scalar_lea.vmem %s4166_s5, %s4171_s22 }
   0xf   : > { %s2935_s23 = scalar_lea.vmem %s4161_s0, %s2411_s12  ;;  %s3636_s28 = scalar_lea.vmem %s4165_s4, %s2411_s12 }
  0x10   : > { %v272_v12 = vld [vmem:[%s2935_s23] sm:$0xff]  ;;  %v273_v25 = vld [vmem:[%s2935_s23 + $0x8] sm:$0xff]  ;;  %v274_v28 = vld [vmem:[%s2935_s23 + $0x10] sm:$0xff]  ;;  %s271_s9 = scalar_lea.vmem %s4167_s6, %s4171_s22 }
  0x11   : > { %v407_v14 = vmul.f32 %v2922_v9, %v272_v12  ;;  %2797 = vmatpush3.bf16.msra.mxu0 %v2794_v8  ;;  %2828 = vmatpush3.bf16.msra.mxu1 %v2794_v8  ;;  %v408_v29 = vmul.f32 %v2922_v9, %v273_v25  ;;  %v275_v30 = vld [vmem:[%s2935_s23 + $0x18] sm:$0xff]  ;;  %v409_v32 = vmul.f32 %v2922_v9, %v274_v28  ;;  %v276_v33 = vld [vmem:[%s2935_s23 + $0x20] sm:$0xff]  ;;  %v277_v39 = vld [vmem:[%s2935_s23 + $0x28] sm:$0xff] }
  0x12   : > { %2799 = vmatprep.subr.bf16.mxu0 %v2798_v15  ;;  %2821 = vmatprep.subr.bf16.mxu1 %v2798_v15  ;;  %v410_v36 = vmul.f32 %v2922_v9, %v275_v30  ;;  %v411_v38 = vmul.f32 %v2922_v9, %v276_v33  ;;  %v278_v42 = vld [vmem:[%s2935_s23 + $0x30] sm:$0xff]  ;;  %v412_v44 = vmul.f32 %v2922_v9, %v277_v39  ;;  %v279_v49 = vld [vmem:[%s2935_s23 + $0x38] sm:$0xff]  ;;  %v280_v50 = vld [vmem:[%s2935_s23 + $0x40] sm:$0xff] }
  0x13   : > { %v542_v18 = vadd.f32 %v2941_v13, %v407_v14  ;;  %v543_v37 = vadd.f32 %v2941_v13, %v408_v29  ;;  %v544_v41 = vadd.f32 %v2941_v13, %v409_v32  ;;  %v413_v48 = vmul.f32 %v2922_v9, %v278_v42  ;;  %v281_v51 = vld [vmem:[%s2935_s23 + $0x48] sm:$0xff]  ;;  %v282_v54 = vld [vmem:[%s2935_s23 + $0x50] sm:$0xff]  ;;  %v283_v62 = vld [vmem:[%s2935_s23 + $0x58] sm:$0xff] }
  0x14   : > { %v545_v43 = vadd.f32 %v2941_v13, %v410_v36  ;;  %v546_v46 = vadd.f32 %v2941_v13, %v411_v38  ;;  %v547_v53 = vadd.f32 %v2941_v13, %v412_v44  ;;  %v414_v57 = vmul.f32 %v2922_v9, %v279_v49  ;;  %v284_v1 = vld [vmem:[%s2935_s23 + $0x60] sm:$0xff]  ;;  %v285_v5 = vld [vmem:[%s2935_s23 + $0x68] sm:$0xff]  ;;  %v286_v6 = vld [vmem:[%s2935_s23 + $0x70] sm:$0xff] }
  0x15   : > { %vm670_vm0 = vcmp.ge.f32.partialorder %v542_v18, 0.0  ;;  %v798_v19 = vmul.f32 0.2, %v542_v18  ;;  %2801 = vmatpush3.bf16.msra.mxu0 %v2798_v15  ;;  %2829 = vmatpush3.bf16.msra.mxu1 %v2798_v15  ;;  %v799_v45 = vmul.f32 0.2, %v543_v37  ;;  %vm671_vm1 = vcmp.ge.f32.partialorder %v543_v37, 0.0 }
  0x16   : > { %2803 = vmatprep.subr.bf16.mxu0 %v2802_v20  ;;  %2822 = vmatprep.subr.bf16.mxu1 %v2802_v20  ;;  %v800_v47 = vmul.f32 0.2, %v544_v41  ;;  %vm672_vm2 = vcmp.ge.f32.partialorder %v544_v41, 0.0  ;;  %v801_v52 = vmul.f32 0.2, %v545_v43  ;;  %vm673_vm3 = vcmp.ge.f32.partialorder %v545_v43, 0.0 }
  0x17   : > { %v926_v23 = vsel %vm670_vm0, %v542_v18, %v798_v19  ;;  %v927_v55 = vsel %vm671_vm1, %v543_v37, %v799_v45  ;;  %v802_v56 = vmul.f32 0.2, %v546_v46  ;;  %v548_v59 = vadd.f32 %v2941_v13, %v413_v48  ;;  %v287_v12 = vld [vmem:[%s2935_s23 + $0x78] sm:$0xff]  ;;  %v288_v22 = vld [vmem:[%s2935_s23 + $0x80] sm:$0xff]  ;;  %v289_v28 = vld [vmem:[%s2935_s23 + $0x88] sm:$0xff] }
  0x18   : > { %2594 = vmatprep.mubr.f32.mxu0 %v926_v23  ;;  %v928_v58 = vsel %vm672_vm2, %v544_v41, %v800_v47  ;;  %v415_v60 = vmul.f32 %v2922_v9, %v280_v50  ;;  %v416_v61 = vmul.f32 %v2922_v9, %v281_v51  ;;  %vm674_vm4 = vcmp.ge.f32.partialorder %v546_v46, 0.0  ;;  %v290_v29 = vld [vmem:[%s2935_s23 + $0x90] sm:$0xff]  ;;  %v291_v33 = vld [vmem:[%s2935_s23 + $0x98] sm:$0xff]  ;;  %v292_v41 = vld [vmem:[%s2935_s23 + $0xa0] sm:$0xff] }
  0x19   : > { %2805 = vmatpush3.bf16.msra.mxu0 %v2802_v20  ;;  %2830 = vmatpush3.bf16.msra.mxu1 %v2802_v20  ;;  %v417_v63 = vmul.f32 %v2922_v9, %v282_v54  ;;  %v929_v0 = vsel %vm673_vm3, %v545_v43, %v801_v52  ;;  %vm675_vm5 = vcmp.ge.f32.partialorder %v547_v53, 0.0  ;;  %v803_v2 = vmul.f32 0.2, %v547_v53  ;;  %v293_v42 = vld [vmem:[%s2935_s23 + $0xa8] sm:$0xff]  ;;  %v295_v50 = vld [vmem:[%s2935_s23 + $0xb8] sm:$0xff] }
  0x1a   : > { %2807 = vmatprep.subr.bf16.mxu0 %v2806_v24  ;;  %2823 = vmatprep.subr.bf16.mxu1 %v2806_v24  ;;  %v549_v3 = vadd.f32 %v2941_v13, %v414_v57  ;;  %v418_v4 = vmul.f32 %v2922_v9, %v283_v62  ;;  %v930_v7 = vsel %vm674_vm4, %v546_v46, %v802_v56  ;;  %v804_v8 = vmul.f32 0.2, %v548_v59  ;;  %v294_v46 = vld [vmem:[%s2935_s23 + $0xb0] sm:$0xff] }
  0x1b   : > { %v550_v10 = vadd.f32 %v2941_v13, %v415_v60  ;;  %v551_v11 = vadd.f32 %v2941_v13, %v416_v61  ;;  %vm676_vm6 = vcmp.ge.f32.partialorder %v548_v59, 0.0  ;;  %v552_v14 = vadd.f32 %v2941_v13, %v417_v63 }
  0x1c   : > { %v419_v15 = vmul.f32 %v2922_v9, %v284_v1  ;;  %v420_v16 = vmul.f32 %v2922_v9, %v285_v5  ;;  %v421_v17 = vmul.f32 %v2922_v9, %v286_v6  ;;  %v931_v18 = vsel %vm675_vm5, %v547_v53, %v803_v2  ;;  %v298_v5 = vld [vmem:[%s2935_s23 + $0xd0] sm:$0xff] }
  0x1d   : > { %2809 = vmatpush3.bf16.msra.mxu0 %v2806_v24  ;;  %2831 = vmatpush3.bf16.msra.mxu1 %v2806_v24  ;;  %v805_v19 = vmul.f32 0.2, %v549_v3  ;;  %v553_v20 = vadd.f32 %v2941_v13, %v418_v4  ;;  %v422_v21 = vmul.f32 %v2922_v9, %v287_v12  ;;  %v932_v23 = vsel %vm676_vm6, %v548_v59, %v804_v8  ;;  %v297_v4 = vld [vmem:[%s2935_s23 + $0xc8] sm:$0xff]  ;;  %v299_v8 = vld [vmem:[%s2935_s23 + $0xd8] sm:$0xff] }
  0x1e   : > { %2811 = vmatprep.subr.bf16.mxu0 %v2810_v31  ;;  %2824 = vmatprep.subr.bf16.mxu1 %v2810_v31  ;;  %vm677_vm7 = vcmp.ge.f32.partialorder %v549_v3, 0.0  ;;  %v806_v24 = vmul.f32 0.2, %v550_v10  ;;  %v807_v25 = vmul.f32 0.2, %v551_v11  ;;  %vm678_vm8 = vcmp.ge.f32.partialorder %v550_v10, 0.0 }
  0x1f   : > { %vm679_vm9 = vcmp.ge.f32.partialorder %v551_v11, 0.0  ;;  %v808_v26 = vmul.f32 0.2, %v552_v14  ;;  %v554_v27 = vadd.f32 %v2941_v13, %v419_v15  ;;  %vm680_vm10 = vcmp.ge.f32.partialorder %v552_v14, 0.0  ;;  %v301_v15 = vld [vmem:[%s2935_s23 + $0xe8] sm:$0xff] }
  0x20   : > { %v555_v30 = vadd.f32 %v2941_v13, %v420_v16  ;;  %v423_v32 = vmul.f32 %v2922_v9, %v288_v22  ;;  %v933_v34 = vsel %vm677_vm7, %v549_v3, %v805_v19  ;;  %vm681_vm11 = vcmp.ge.f32.partialorder %v553_v20, 0.0 }
  0x21   : > { %2813 = vmatpush3.bf16.msra.mxu0 %v2810_v31  ;;  %2832 = vmatpush3.bf16.msra.mxu1 %v2810_v31  ;;  %v556_v31 = vadd.f32 %v2941_v13, %v421_v17  ;;  %v809_v35 = vmul.f32 0.2, %v553_v20  ;;  %v557_v36 = vadd.f32 %v2941_v13, %v422_v21  ;;  %v934_v37 = vsel %vm678_vm8, %v550_v10, %v806_v24 }
  0x22   : > { %2815 = vmatprep.subr.bf16.mxu0 %v2814_v40  ;;  %2825 = vmatprep.subr.bf16.mxu1 %v2814_v40  ;;  %v935_v38 = vsel %vm679_vm9, %v551_v11, %v807_v25  ;;  %v424_v39 = vmul.f32 %v2922_v9, %v289_v28  ;;  %v936_v43 = vsel %vm680_vm10, %v552_v14, %v808_v26  ;;  %vm682_vm12 = vcmp.ge.f32.partialorder %v554_v27, 0.0  ;;  %v300_v14 = vld [vmem:[%s2935_s23 + $0xe0] sm:$0xff] }
  0x23   : > { %v810_v44 = vmul.f32 0.2, %v554_v27  ;;  %v426_v45 = vmul.f32 %v2922_v9, %v291_v33  ;;  %vm683_vm13 = vcmp.ge.f32.partialorder %v555_v30, 0.0  ;;  %v811_v47 = vmul.f32 0.2, %v555_v30  ;;  %v303_v33 = vld [vmem:[%s2935_s23 + $0xf8] sm:$0xff] }
  0x24   : > { %v812_v48 = vmul.f32 0.2, %v556_v31  ;;  %v558_v49 = vadd.f32 %v2941_v13, %v423_v32  ;;  %vm684_vm14 = vcmp.ge.f32.partialorder %v556_v31, 0.0  ;;  %v813_v51 = vmul.f32 0.2, %v557_v36 }
  0x25   : > { %2817 = vmatpush3.bf16.msra.mxu0 %v2814_v40  ;;  %2833 = vmatpush3.bf16.msra.mxu1 %v2814_v40  ;;  %v425_v40 = vmul.f32 %v2922_v9, %v290_v29  ;;  %v427_v52 = vmul.f32 %v2922_v9, %v292_v41  ;;  %v428_v53 = vmul.f32 %v2922_v9, %v293_v42  ;;  %vm685_vm15 = vcmp.ge.f32.partialorder %v557_v36, 0.0  ;;  %v302_v29 = vld [vmem:[%s2935_s23 + $0xf0] sm:$0xff] }
  0x26   : > { %v559_v54 = vadd.f32 %v2941_v13, %v424_v39  ;;  %v429_v56 = vmul.f32 %v2922_v9, %v294_v46  ;;  %v937_v57 = vsel %vm681_vm11, %v553_v20, %v809_v35  ;;  %v430_v59 = vmul.f32 %v2922_v9, %v295_v50  ;;  %v307_v50 = vld [vmem:[%s2935_s23 + $0x118] sm:$0xff] }
  0x27   : > { %v938_v60 = vsel %vm682_vm12, %v554_v27, %v810_v44  ;;  %v939_v61 = vsel %vm683_vm13, %v555_v30, %v811_v47  ;;  %v940_v62 = vsel %vm684_vm14, %v556_v31, %v812_v48  ;;  %v814_v63 = vmul.f32 0.2, %v558_v49  ;;  %v306_v47 = vld [vmem:[%s2935_s23 + $0x110] sm:$0xff] }
  0x28   : > { %2595 = vmatmul.mubr.f32.vlgmr.msra.gmra.mrb[0].mxu0 %v927_v55  ;;  %v560_v55 = vadd.f32 %v2941_v13, %v425_v40  ;;  %v941_v1 = vsel %vm685_vm15, %v557_v36, %v813_v51  ;;  %vm686_vm0 = vcmp.ge.f32.partialorder %v558_v49, 0.0  ;;  %v562_v2 = vadd.f32 %v2941_v13, %v427_v52  ;;  %v308_v51 = vld [vmem:[%s2935_s23 + $0x120] sm:$0xff] }
  0x29   : > { %2597 = vmatprep.mubr.f32.mxu0 %v928_v58  ;;  %v561_v58 = vadd.f32 %v2941_v13, %v426_v45  ;;  %v563_v3 = vadd.f32 %v2941_v13, %v428_v53  ;;  %vm687_vm1 = vcmp.ge.f32.partialorder %v559_v54, 0.0  ;;  %v815_v6 = vmul.f32 0.2, %v559_v54 }
  0x2a   : > { %vm688_vm2 = vcmp.ge.f32.partialorder %v560_v55, 0.0  ;;  %v816_v10 = vmul.f32 0.2, %v560_v55  ;;  %v565_v11 = vadd.f32 %v2941_v13, %v430_v59  ;;  %v942_v16 = vsel %vm686_vm0, %v558_v49, %v814_v63 }
  0x2b   : > { %vm689_vm3 = vcmp.ge.f32.partialorder %v561_v58, 0.0  ;;  %v817_v17 = vmul.f32 0.2, %v561_v58  ;;  %v433_v19 = vmul.f32 %v2922_v9, %v298_v5  ;;  %vm690_vm4 = vcmp.ge.f32.partialorder %v562_v2, 0.0 }
  0x2c   : > { %2598 = vmatmul.mubr.f32.gmra.mrb[2].mxu0 %v929_v0  ;;  %v296_v0 = vld [vmem:[%s2935_s23 + $0xc0] sm:$0xff]  ;;  %v818_v20 = vmul.f32 0.2, %v562_v2  ;;  %v819_v21 = vmul.f32 0.2, %v563_v3  ;;  %v434_v22 = vmul.f32 %v2922_v9, %v299_v8  ;;  %vm691_vm5 = vcmp.ge.f32.partialorder %v563_v3, 0.0 }
  0x2d   : > { %2600 = vmatprep.mubr.f32.mxu0 %v930_v7  ;;  %v564_v7 = vadd.f32 %v2941_v13, %v429_v56  ;;  %v431_v12 = vmul.f32 %v2922_v9, %v296_v0  ;;  %v435_v24 = vmul.f32 %v2922_v9, %v300_v14  ;;  %v436_v25 = vmul.f32 %v2922_v9, %v301_v15 }
  0x2e   : > { %v943_v26 = vsel %vm687_vm1, %v559_v54, %v815_v6  ;;  %v821_v27 = vmul.f32 0.2, %v565_v11  ;;  %v944_v30 = vsel %vm688_vm2, %v560_v55, %v816_v10  ;;  %vm693_vm7 = vcmp.ge.f32.partialorder %v565_v11, 0.0  ;;  %v309_v55 = vld [vmem:[%s2935_s23 + $0x128] sm:$0xff]  ;;  %v310_v10 = vld [vmem:[%s2935_s23 + $0x130] sm:$0xff] }
  0x2f   : > { %vm692_vm6 = vcmp.ge.f32.partialorder %v564_v7, 0.0  ;;  %v566_v28 = vadd.f32 %v2941_v13, %v431_v12  ;;  %v568_v32 = vadd.f32 %v2941_v13, %v433_v19  ;;  %v3068_v35 = vsel %vm690_vm4, %v562_v2, %v818_v20  ;;  %v312_v12 = vld [vmem:[%s2935_s23 + $0x140] sm:$0xff] }
  0x30   : > { %2601 = vmatmul.mubr.f32.gmra.mrb[4].mxu0 %v931_v18  ;;  %v432_v18 = vmul.f32 %v2922_v9, %v297_v4  ;;  %v3071_v36 = vsel %vm691_vm5, %v563_v3, %v819_v21  ;;  %v570_v40 = vadd.f32 %v2941_v13, %v435_v24  ;;  %v571_v41 = vadd.f32 %v2941_v13, %v436_v25  ;;  %v314_v21 = vld [vmem:[%s2935_s23 + $0x150] sm:$0xff] }
  0x31   : > { %2603 = vmatprep.mubr.f32.mxu0 %v932_v23  ;;  %v820_v23 = vmul.f32 0.2, %v564_v7  ;;  %v437_v42 = vmul.f32 %v2922_v9, %v302_v29  ;;  %v3082_v44 = vsel %vm693_vm7, %v565_v11, %v821_v27  ;;  %vm694_vm8 = vcmp.ge.f32.partialorder %v566_v28, 0.0  ;;  %v311_v11 = vld [vmem:[%s2935_s23 + $0x138] sm:$0xff]  ;;  %v316_v29 = vld [vmem:[%s2935_s23 + $0x160] sm:$0xff] }
  0x32   : > { %v567_v31 = vadd.f32 %v2941_v13, %v432_v18  ;;  %v822_v45 = vmul.f32 0.2, %v566_v28  ;;  %v438_v46 = vmul.f32 %v2922_v9, %v303_v33  ;;  %vm696_vm10 = vcmp.ge.f32.partialorder %v568_v32, 0.0 }
  0x33   : > { %v3076_v39 = vsel %vm692_vm6, %v564_v7, %v820_v23  ;;  %v824_v52 = vmul.f32 0.2, %v568_v32  ;;  %v826_v56 = vmul.f32 0.2, %v570_v40  ;;  %v441_v59 = vmul.f32 %v2922_v9, %v306_v47 }
  0x34   : > { %2604 = vmatmul.mubr.f32.gmra.mrb[6].mxu0 %v933_v34  ;;  %v945_v34 = vsel %vm689_vm3, %v561_v58, %v817_v17  ;;  %vm695_vm9 = vcmp.ge.f32.partialorder %v567_v31, 0.0  ;;  %v823_v48 = vmul.f32 0.2, %v567_v31  ;;  %v572_v58 = vadd.f32 %v2941_v13, %v437_v42  ;;  %v313_v17 = vld [vmem:[%s2935_s23 + $0x148] sm:$0xff] }
  0x35   : > { %2606 = vmatprep.mubr.f32.mxu0 %v934_v37  ;;  %v569_v37 = vadd.f32 %v2941_v13, %v434_v22  ;;  %vm698_vm12 = vcmp.ge.f32.partialorder %v570_v40, 0.0  ;;  %vm699_vm13 = vcmp.ge.f32.partialorder %v571_v41, 0.0  ;;  %v443_v0 = vmul.f32 %v2922_v9, %v308_v51  ;;  %v315_v22 = vld [vmem:[%s2935_s23 + $0x158] sm:$0xff] }
  0x36   : > { %v3102_v2 = vsel %vm695_vm9, %v567_v31, %v823_v48  ;;  %v3105_v3 = vsel %vm696_vm10, %v568_v32, %v824_v52  ;;  %v3111_v6 = vsel %vm698_vm12, %v570_v40, %v826_v56  ;;  %vm700_vm14 = vcmp.ge.f32.partialorder %v572_v58, 0.0  ;;  %v318_v56 = vld [vmem:[%s2935_s23 + $0x170] sm:$0xff] }
  0x37   : > { %vm697_vm11 = vcmp.ge.f32.partialorder %v569_v37, 0.0  ;;  %v825_v53 = vmul.f32 0.2, %v569_v37  ;;  %v576_v8 = vadd.f32 %v2941_v13, %v441_v59  ;;  %v828_v14 = vmul.f32 0.2, %v572_v58 }
  0x38   : > { %2607 = vmatmul.mubr.f32.gmra.mrb[8].mxu0 %v935_v38  ;;  %v304_v38 = vld [vmem:[%s2935_s23 + $0x100] sm:$0xff]  ;;  %v578_v19 = vadd.f32 %v2941_v13, %v443_v0  ;;  %v445_v24 = vmul.f32 %v2922_v9, %v310_v10  ;;  %v446_v25 = vmul.f32 %v2922_v9, %v311_v11  ;;  %v447_v27 = vmul.f32 %v2922_v9, %v312_v12  ;;  %v338_v11 = vld [vmem:[%s2935_s23 + $0x210] sm:$0xff]  ;;  %v339_v12 = vld [vmem:[%s2935_s23 + $0x218] sm:$0xff] }
  0x39   : > { %2609 = vmatprep.mubr.f32.mxu0 %v936_v43  ;;  %v305_v43 = vld [vmem:[%s2935_s23 + $0x108] sm:$0xff]  ;;  %v439_v49 = vmul.f32 %v2922_v9, %v304_v38  ;;  %v3108_v4 = vsel %vm697_vm11, %v569_v37, %v825_v53  ;;  %vm704_vm2 = vcmp.ge.f32.partialorder %v576_v8, 0.0  ;;  %v449_v32 = vmul.f32 %v2922_v9, %v314_v21  ;;  %v336_v0 = vld [vmem:[%s2935_s23 + $0x200] sm:$0xff] }
  0x3a   : > { %v440_v54 = vmul.f32 %v2922_v9, %v305_v43  ;;  %v450_v33 = vmul.f32 %v2922_v9, %v315_v22  ;;  %vm706_vm4 = vcmp.ge.f32.partialorder %v578_v19, 0.0  ;;  %v580_v37 = vadd.f32 %v2941_v13, %v445_v24  ;;  %v323_v24 = vld [vmem:[%s2935_s23 + $0x198] sm:$0xff] }
  0x3b   : > { %v574_v63 = vadd.f32 %v2941_v13, %v439_v49  ;;  %v581_v38 = vadd.f32 %v2941_v13, %v446_v25  ;;  %v451_v40 = vmul.f32 %v2922_v9, %v316_v29  ;;  %v3141_v42 = vsel %vm700_vm14, %v572_v58, %v828_v14 }
  0x3c   : > { %2610 = vmatmul.mubr.f32.gmra.mrb[10].mxu0 %v937_v57  ;;  %v827_v57 = vmul.f32 0.2, %v571_v41  ;;  %v575_v5 = vadd.f32 %v2941_v13, %v440_v54  ;;  %v584_v47 = vadd.f32 %v2941_v13, %v449_v32  ;;  %v585_v48 = vadd.f32 %v2941_v13, %v450_v33 }
  0x3d   : > { %2612 = vmatprep.mubr.f32.mxu0 %v938_v60  ;;  %v573_v60 = vadd.f32 %v2941_v13, %v438_v46  ;;  %vm702_vm0 = vcmp.ge.f32.partialorder %v574_v63, 0.0  ;;  %v830_v18 = vmul.f32 0.2, %v574_v63  ;;  %v836_v53 = vmul.f32 0.2, %v580_v37 }
  0x3e   : > { %v3113_v7 = vsel %vm699_vm13, %v571_v41, %v827_v57  ;;  %vm703_vm1 = vcmp.ge.f32.partialorder %v575_v5, 0.0  ;;  %v831_v23 = vmul.f32 0.2, %v575_v5  ;;  %v837_v54 = vmul.f32 0.2, %v581_v38  ;;  %v319_v57 = vld [vmem:[%s2935_s23 + $0x178] sm:$0xff] }
  0x3f   : > { %vm701_vm15 = vcmp.ge.f32.partialorder %v573_v60, 0.0  ;;  %v829_v15 = vmul.f32 0.2, %v573_v60  ;;  %vm708_vm6 = vcmp.ge.f32.partialorder %v580_v37, 0.0  ;;  %vm709_vm7 = vcmp.ge.f32.partialorder %v581_v38, 0.0 }
  0x40   : > { %2613 = vmatmul.mubr.f32.gmra.mrb[12].mxu0 %v939_v61  ;;  %v442_v61 = vmul.f32 %v2922_v9, %v307_v50  ;;  %v3152_v46 = vsel %vm703_vm1, %v575_v5, %v831_v23  ;;  %vm712_vm10 = vcmp.ge.f32.partialorder %v584_v47, 0.0  ;;  %vm713_vm11 = vcmp.ge.f32.partialorder %v585_v48, 0.0 }
  0x41   : > { %2615 = vmatprep.mubr.f32.mxu0 %v940_v62  ;;  %v3096_v62 = vsel %vm694_vm8, %v566_v28, %v822_v45  ;;  %v448_v28 = vmul.f32 %v2922_v9, %v313_v17  ;;  %v3144_v43 = vsel %vm701_vm15, %v573_v60, %v829_v15  ;;  %v840_v60 = vmul.f32 0.2, %v584_v47 }
  0x42   : > { %v3181_v5 = vsel %vm708_vm6, %v580_v37, %v836_v53  ;;  %v473_v25 = vmul.f32 %v2922_v9, %v338_v11  ;;  %v3236_v37 = vmul.f32 %v2922_v9, %v323_v24 }
  0x43   : > { %v583_v45 = vadd.f32 %v2941_v13, %v448_v28  ;;  %v3197_v17 = vsel %vm712_vm10, %v584_v47, %v840_v60  ;;  %v341_v28 = vld [vmem:[%s2935_s23 + $0x228] sm:$0xff]  ;;  %v346_v60 = vld [vmem:[%s2935_s23 + $0x250] sm:$0xff] }
  0x44   : > { %2616 = vmatmul.mubr.f32.gmra.mrb[14].mxu0 %v941_v1  ;;  %v444_v1 = vmul.f32 %v2922_v9, %v309_v55  ;;  %v586_v55 = vadd.f32 %v2941_v13, %v451_v40  ;;  %v476_v40 = vmul.f32 %v2922_v9, %v341_v28 }
  0x45   : > { %2618 = vmatprep.mubr.f32.mxu0 %v942_v16  ;;  %v577_v16 = vadd.f32 %v2941_v13, %v442_v61  ;;  %v839_v59 = vmul.f32 0.2, %v583_v45  ;;  %vm711_vm9 = vcmp.ge.f32.partialorder %v583_v45, 0.0  ;;  %v841_v61 = vmul.f32 0.2, %v585_v48 }
  0x46   : > { %v579_v20 = vadd.f32 %v2941_v13, %v444_v1  ;;  %v337_v1 = vld [vmem:[%s2935_s23 + $0x208] sm:$0xff]  ;;  %vm714_vm12 = vcmp.ge.f32.partialorder %v586_v55, 0.0 }
  0x47   : > { %vm705_vm3 = vcmp.ge.f32.partialorder %v577_v16, 0.0  ;;  %v833_v31 = vmul.f32 0.2, %v577_v16  ;;  %v3192_v15 = vsel %vm711_vm9, %v583_v45, %v839_v59  ;;  %v472_v21 = vmul.f32 %v2922_v9, %v337_v1  ;;  %v345_v59 = vld [vmem:[%s2935_s23 + $0x248] sm:$0xff] }
  0x48   : > { %2619 = vmatmul.mubr.f32.gmra.mrb[16].mxu0 %v943_v26  ;;  %v832_v26 = vmul.f32 0.2, %v576_v8  ;;  %vm707_vm5 = vcmp.ge.f32.partialorder %v579_v20, 0.0  ;;  %v480_v11 = vmul.f32 %v2922_v9, %v345_v59 }
  0x49   : > { %2621 = vmatprep.mubr.f32.mxu0 %v944_v30  ;;  %v317_v30 = vld [vmem:[%s2935_s23 + $0x168] sm:$0xff]  ;;  %v3161_v50 = vsel %vm705_vm3, %v577_v16, %v833_v31  ;;  %v607_v33 = vadd.f32 %v2941_v13, %v472_v21 }
  0x4a   : > { %v452_v41 = vmul.f32 %v2922_v9, %v317_v30  ;;  %v3158_v49 = vsel %vm704_vm2, %v576_v8, %v832_v26  ;;  %v3184_v8 = vsel %vm709_vm7, %v581_v38, %v837_v54  ;;  %v321_v16 = vld [vmem:[%s2935_s23 + $0x188] sm:$0xff]  ;;  %v474_v26 = vmul.f32 %v2922_v9, %v339_v12 }
  0x4b   : > { %v3226_v31 = vmul.f32 %v2922_v9, %v321_v16  ;;  %vm735_vm15 = vcmp.ge.f32.partialorder %v607_v33, 0.0  ;;  %v863_v47 = vmul.f32 0.2, %v607_v33  ;;  %v481_v12 = vmul.f32 %v2922_v9, %v346_v60  ;;  %v353_v60 = vld [vmem:[%s2935_s23 + $0x288] sm:$0xff] }
  0x4c   : > { %2622 = vmatmul.mubr.f32.gmra.mrb[18].mxu0 %v945_v34  ;;  %v834_v34 = vmul.f32 0.2, %v578_v19  ;;  %v615_v24 = vadd.f32 %v2941_v13, %v480_v11  ;;  %v326_v11 = vld [vmem:[%s2935_s23 + $0x1b0] sm:$0xff] }
  0x4d   : > { %2624 = vmatprep.mubr.f32.mxu0 %v3068_v35  ;;  %v835_v35 = vmul.f32 0.2, %v579_v20 }
  0x4e   : > { %v3164_v51 = vsel %vm706_vm4, %v578_v19, %v834_v34  ;;  %v322_v19 = vld [vmem:[%s2935_s23 + $0x190] sm:$0xff]  ;;  %v608_v34 = vadd.f32 %v2941_v13, %v473_v25  ;;  %v348_v25 = vld [vmem:[%s2935_s23 + $0x260] sm:$0xff]  ;;  %vm743_vm9 = vcmp.ge.f32.partialorder %v615_v24, 0.0 }
  0x4f   : > { %v3167_v52 = vsel %vm707_vm5, %v579_v20, %v835_v35  ;;  %v471_v20 = vmul.f32 %v2922_v9, %v336_v0  ;;  %v609_v35 = vadd.f32 %v2941_v13, %v474_v26  ;;  %v324_v26 = vld [vmem:[%s2935_s23 + $0x1a0] sm:$0xff] }
  0x50   : > { %2625 = vmatmul.mubr.f32.gmra.mrb[20].mxu0 %v3071_v36  ;;  %v582_v36 = vadd.f32 %v2941_v13, %v447_v27  ;;  %v340_v27 = vld [vmem:[%s2935_s23 + $0x220] sm:$0xff] }
  0x51   : > { %2627 = vmatprep.mubr.f32.mxu0 %v3076_v39  ;;  %v3149_v39 = vsel %vm702_vm0, %v574_v63, %v830_v18  ;;  %v454_v63 = vmul.f32 %v2922_v9, %v319_v57  ;;  %v3200_v18 = vsel %vm713_vm11, %v585_v48, %v841_v61  ;;  %v606_v32 = vadd.f32 %v2941_v13, %v471_v20  ;;  %v344_v57 = vld [vmem:[%s2935_s23 + $0x240] sm:$0xff] }
  0x52   : > { %v838_v58 = vmul.f32 0.2, %v582_v36  ;;  %vm710_vm8 = vcmp.ge.f32.partialorder %v582_v36, 0.0  ;;  %v475_v38 = vmul.f32 %v2922_v9, %v340_v27  ;;  %vm736_vm0 = vcmp.ge.f32.partialorder %v608_v34, 0.0 }
  0x53   : > { %v3210_v23 = vadd.f32 %v2941_v13, %v454_v63  ;;  %vm734_vm14 = vcmp.ge.f32.partialorder %v606_v32, 0.0  ;;  %v862_v45 = vmul.f32 0.2, %v606_v32  ;;  %v864_v48 = vmul.f32 0.2, %v608_v34 }
  0x54   : > { %2628 = vmatmul.mubr.f32.gmra.mrb[22].mxu0 %v3082_v44  ;;  %v587_v44 = vadd.f32 %v2941_v13, %v452_v41  ;;  %v3189_v14 = vsel %vm710_vm8, %v582_v36, %v838_v58  ;;  %v342_v41 = vld [vmem:[%s2935_s23 + $0x230] sm:$0xff]  ;;  %v343_v36 = vld [vmem:[%s2935_s23 + $0x238] sm:$0xff]  ;;  %vm737_vm1 = vcmp.ge.f32.partialorder %v609_v35, 0.0  ;;  %v865_v53 = vmul.f32 0.2, %v609_v35 }
  0x55   : > { %2630 = vmatprep.mubr.f32.mxu0 %v3096_v62  ;;  %v453_v62 = vmul.f32 %v2922_v9, %v318_v56  ;;  %v990_v54 = vsel %vm734_vm14, %v606_v32, %v862_v45  ;;  %v611_v56 = vadd.f32 %v2941_v13, %v476_v40  ;;  %v477_v58 = vmul.f32 %v2922_v9, %v342_v41  ;;  %v350_v40 = vld [vmem:[%s2935_s23 + $0x270] sm:$0xff] }
  0x56   : > { %v843_v10 = vmul.f32 0.2, %v587_v44  ;;  %vm715_vm13 = vcmp.ge.f32.partialorder %v587_v44, 0.0  ;;  %2690 = vmatprep.mubr.f32.mxu1 %v990_v54  ;;  %vm717_vm5 = vcmp.ge.f32.partialorder %v3210_v23, 0.0  ;;  %v459_v41 = vmul.f32 %v2922_v9, %v324_v26  ;;  %v351_v54 = vld [vmem:[%s2935_s23 + $0x278] sm:$0xff] }
  0x57   : > { %v3207_v22 = vadd.f32 %v2941_v13, %v453_v62  ;;  %v993_v62 = vsel %vm737_vm1, %v609_v35, %v865_v53  ;;  %v867_v0 = vmul.f32 0.2, %v611_v56  ;;  %v612_v1 = vadd.f32 %v2941_v13, %v477_v58 }
  0x58   : > { %2631 = vmatmul.mubr.f32.gmra.mrb[24].mxu0 %v3102_v2  ;;  %v842_v2 = vmul.f32 0.2, %v586_v55  ;;  %vm739_vm4 = vcmp.ge.f32.partialorder %v611_v56, 0.0  ;;  %v485_v53 = vmul.f32 %v2922_v9, %v350_v40 }
  0x59   : > { %2633 = vmatprep.mubr.f32.mxu0 %v3105_v3  ;;  %v320_v3 = vld [vmem:[%s2935_s23 + $0x180] sm:$0xff]  ;;  %vm716_vm2 = vcmp.ge.f32.partialorder %v3207_v22, 0.0  ;;  %v844_v61 = vmul.f32 0.2, %v3207_v22  ;;  %vm740_vm6 = vcmp.ge.f32.partialorder %v612_v1, 0.0  ;;  %v995_v27 = vsel %vm739_vm4, %v611_v56, %v867_v0 }
  0x5a   : > { %v3219_v29 = vsel %vm714_vm12, %v586_v55, %v842_v2  ;;  %v455_v30 = vmul.f32 %v2922_v9, %v320_v3  ;;  %v991_v55 = vsel %vm735_vm15, %v607_v33, %v863_v47  ;;  %v347_v3 = vld [vmem:[%s2935_s23 + $0x258] sm:$0xff]  ;;  %v868_v16 = vmul.f32 0.2, %v612_v1  ;;  %v352_v56 = vld [vmem:[%s2935_s23 + $0x280] sm:$0xff] }
  0x5b   : > { %2691 = vmatmul.mubr.f32.vlgmr.msra.gmra.mrb[0].mxu1 %v991_v55  ;;  %v482_v28 = vmul.f32 %v2922_v9, %v347_v3  ;;  %v3287_v35 = vsel %vm716_vm2, %v3207_v22, %v844_v61  ;;  %v325_v22 = vld [vmem:[%s2935_s23 + $0x1a8] sm:$0xff]  ;;  %v327_v3 = vld [vmem:[%s2935_s23 + $0x1b8] sm:$0xff] }
  0x5c   : > { %2634 = vmatmul.mubr.f32.gmra.mrb[26].mxu0 %v3108_v4  ;;  %v3222_v4 = vsel %vm715_vm13, %v587_v44, %v843_v10  ;;  %v610_v44 = vadd.f32 %v2941_v13, %v475_v38  ;;  %v479_v10 = vmul.f32 %v2922_v9, %v344_v57  ;;  %v3291_v38 = vadd.f32 %v2941_v13, %v3236_v37 }
  0x5d   : > { %2636 = vmatprep.mubr.f32.mxu0 %v3111_v6  ;;  %v3233_v6 = vmul.f32 %v2922_v9, %v322_v19  ;;  %v3266_v19 = vadd.f32 %v2941_v13, %v455_v30  ;;  %v591_v30 = vadd.f32 %v2941_v13, %v3226_v31  ;;  %v483_v31 = vmul.f32 %v2922_v9, %v348_v25 }
  0x5e   : > { %vm738_vm3 = vcmp.ge.f32.partialorder %v610_v44, 0.0  ;;  %v866_v63 = vmul.f32 0.2, %v610_v44  ;;  %v614_v21 = vadd.f32 %v2941_v13, %v479_v10  ;;  %v871_v37 = vmul.f32 0.2, %v615_v24 }
  0x5f   : > { %v3280_v32 = vadd.f32 %v2941_v13, %v3233_v6  ;;  %vm718_vm11 = vcmp.ge.f32.partialorder %v3266_v19, 0.0  ;;  %v846_v55 = vmul.f32 0.2, %v3266_v19  ;;  %vm719_vm12 = vcmp.ge.f32.partialorder %v591_v30, 0.0 }
  0x60   : > { %2637 = vmatmul.mubr.f32.gmra.mrb[28].mxu0 %v3113_v7  ;;  %v992_v7 = vsel %vm736_vm0, %v608_v34, %v864_v48  ;;  %v870_v33 = vmul.f32 0.2, %v614_v21  ;;  %v349_v34 = vld [vmem:[%s2935_s23 + $0x268] sm:$0xff]  ;;  %vm742_vm8 = vcmp.ge.f32.partialorder %v614_v21, 0.0  ;;  %v618_v48 = vadd.f32 %v2941_v13, %v483_v31 }
  0x61   : > { %2639 = vmatprep.mubr.f32.mxu0 %v3141_v42  ;;  %v478_v42 = vmul.f32 %v2922_v9, %v343_v36  ;;  %2693 = vmatprep.mubr.f32.mxu1 %v992_v7  ;;  %v484_v47 = vmul.f32 %v2922_v9, %v349_v34  ;;  %vm720_vm13 = vcmp.ge.f32.partialorder %v3280_v32, 0.0  ;;  %v848_v57 = vmul.f32 0.2, %v3280_v32 }
  0x62   : > { %2694 = vmatmul.mubr.f32.gmra.mrb[2].mxu1 %v993_v62  ;;  %v999_v7 = vsel %vm743_vm9, %v615_v24, %v871_v37  ;;  %v874_v61 = vmul.f32 0.2, %v618_v48  ;;  %v620_v62 = vadd.f32 %v2941_v13, %v485_v53  ;;  %vm746_vm15 = vcmp.ge.f32.partialorder %v618_v48, 0.0  ;;  %v330_v53 = vld [vmem:[%s2935_s23 + $0x1d0] sm:$0xff] }
  0x63   : > { %v613_v2 = vadd.f32 %v2941_v13, %v478_v42  ;;  %v619_v59 = vadd.f32 %v2941_v13, %v484_v47  ;;  %vm721_vm0 = vcmp.ge.f32.partialorder %v3291_v38, 0.0  ;;  %v3339_v10 = vadd.f32 %v2941_v13, %v459_v41  ;;  %v357_v41 = vld [vmem:[%s2935_s23 + $0x2a8] sm:$0xff] }
  0x64   : > { %2640 = vmatmul.mubr.f32.gmra.mrb[30].mxu0 %v3144_v43  ;;  %v994_v43 = vsel %vm738_vm3, %v610_v44, %v866_v63  ;;  %v460_v44 = vmul.f32 %v2922_v9, %v325_v22  ;;  %v487_v63 = vmul.f32 %v2922_v9, %v352_v56  ;;  %v3362_v25 = vsel %vm720_vm13, %v3280_v32, %v848_v57  ;;  %v358_v22 = vld [vmem:[%s2935_s23 + $0x2b0] sm:$0xff] }
  0x65   : > { %2642 = vmatprep.mubr.f32.mxu0 %v3149_v39  ;;  %v845_v39 = vmul.f32 0.2, %v3210_v23  ;;  %v869_v20 = vmul.f32 0.2, %v613_v2  ;;  %2696 = vmatprep.mubr.f32.mxu1 %v994_v43  ;;  %vm741_vm7 = vcmp.ge.f32.partialorder %v613_v2, 0.0  ;;  %vm747_vm1 = vcmp.ge.f32.partialorder %v619_v59, 0.0 }
  0x66   : > { %2697 = vmatmul.mubr.f32.gmra.mrb[4].mxu1 %v995_v27  ;;  %v3342_v43 = vadd.f32 %v2941_v13, %v460_v44  ;;  %v622_v24 = vadd.f32 %v2941_v13, %v487_v63  ;;  %vm748_vm2 = vcmp.ge.f32.partialorder %v620_v62, 0.0  ;;  %v356_v27 = vld [vmem:[%s2935_s23 + $0x2a0] sm:$0xff]  ;;  %vm722_vm3 = vcmp.ge.f32.partialorder %v3339_v10, 0.0 }
  0x67   : > { %v3299_v6 = vsel %vm717_vm5, %v3210_v23, %v845_v39  ;;  %v997_v36 = vsel %vm741_vm7, %v613_v2, %v869_v20  ;;  %v998_v23 = vsel %vm742_vm8, %v614_v21, %v870_v33  ;;  %v354_v2 = vld [vmem:[%s2935_s23 + $0x290] sm:$0xff]  ;;  %v1002_v20 = vsel %vm746_vm15, %v618_v48, %v874_v61  ;;  %v328_v33 = vld [vmem:[%s2935_s23 + $0x1c0] sm:$0xff] }
  0x68   : > { %2643 = vmatmul.mubr.f32.gmra.mrb[32].mxu0 %v3152_v46  ;;  %v616_v46 = vadd.f32 %v2941_v13, %v481_v12  ;;  %v488_v12 = vmul.f32 %v2922_v9, %v353_v60  ;;  %v876_v21 = vmul.f32 0.2, %v620_v62  ;;  %vm723_vm5 = vcmp.ge.f32.partialorder %v3342_v43, 0.0 }
  0x69   : > { %2645 = vmatprep.mubr.f32.mxu0 %v3158_v49  ;;  %v996_v49 = vsel %vm740_vm6, %v612_v1, %v868_v16  ;;  %v849_v1 = vmul.f32 0.2, %v3291_v38  ;;  %vm750_vm6 = vcmp.ge.f32.partialorder %v622_v24, 0.0 }
  0x6a   : > { %2699 = vmatprep.mubr.f32.mxu1 %v996_v49  ;;  %v872_v45 = vmul.f32 0.2, %v616_v46  ;;  %vm744_vm10 = vcmp.ge.f32.partialorder %v616_v46, 0.0  ;;  %v1004_v34 = vsel %vm748_vm2, %v620_v62, %v876_v21  ;;  %v333_v21 = vld [vmem:[%s2935_s23 + $0x1e8] sm:$0xff] }
  0x6b   : > { %2700 = vmatmul.mubr.f32.gmra.mrb[6].mxu1 %v997_v36  ;;  %v3367_v26 = vsel %vm721_vm0, %v3291_v38, %v849_v1  ;;  %v878_v38 = vmul.f32 0.2, %v622_v24  ;;  %v851_v36 = vmul.f32 0.2, %v3342_v43 }
  0x6c   : > { %2646 = vmatmul.mubr.f32.gmra.mrb[34].mxu0 %v3161_v50  ;;  %v617_v50 = vadd.f32 %v2941_v13, %v482_v28  ;;  %2702 = vmatprep.mubr.f32.mxu1 %v998_v23  ;;  %v1000_v58 = vsel %vm744_vm10, %v616_v46, %v872_v45  ;;  %v3376_v28 = vld [vmem:[%s4163_s2] ss:$0 sm:$0xff] }
  0x6d   : > { %2648 = vmatprep.mubr.f32.mxu0 %v3164_v51  ;;  %v847_v51 = vmul.f32 0.2, %v591_v30 }
  0x6e   : > { %v873_v42 = vmul.f32 0.2, %v617_v50  ;;  %vm745_vm14 = vcmp.ge.f32.partialorder %v617_v50, 0.0 }
  0x6f   : > { %v3332_v0 = vsel %vm719_vm12, %v591_v30, %v847_v51  ;;  %2703 = vmatmul.mubr.f32.gmra.mrb[8].mxu1 %v999_v7  ;;  %v623_v30 = vadd.f32 %v3376_v28, %v488_v12  ;;  %v1006_v51 = vsel %vm750_vm6, %v622_v24, %v878_v38  ;;  %v359_v7 = vld [vmem:[%s2935_s23 + $0x2b8] sm:$0xff] }
  0x70   : > { %2649 = vmatmul.mubr.f32.gmra.mrb[36].mxu0 %v3167_v52  ;;  %v486_v52 = vmul.f32 %v2922_v9, %v351_v54  ;;  %2705 = vmatprep.mubr.f32.mxu1 %v1000_v58  ;;  %v1001_v39 = vsel %vm745_vm14, %v617_v50, %v873_v42  ;;  %v3356_v9 = vld [vmem:[%s4162_s1] ss:$0 sm:$0xff]  ;;  %v329_v50 = vld [vmem:[%s2935_s23 + $0x1c8] sm:$0xff]  ;;  %v331_v54 = vld [vmem:[%s2935_s23 + $0x1d8] sm:$0xff]  ;;  %v3419_v42 = vsel %vm723_vm5, %v3342_v43, %v851_v36 }
  0x71   : > { %2651 = vmatprep.mubr.f32.mxu0 %v3181_v5  ;;  %v3329_v5 = vsel %vm718_vm11, %v3266_v19, %v846_v55  ;;  %v355_v19 = vld [vmem:[%s2935_s23 + $0x298] sm:$0xff]  ;;  %v462_v46 = vmul.f32 %v3356_v9, %v327_v3  ;;  %v491_v40 = vmul.f32 %v3356_v9, %v356_v27  ;;  %v879_v47 = vmul.f32 0.2, %v623_v30  ;;  %v360_v58 = vld [vmem:[%s2935_s23 + $0x2c0] sm:$0xff] }
  0x72   : > { %v621_v16 = vadd.f32 %v2941_v13, %v486_v52  ;;  %v461_v13 = vmul.f32 %v3356_v9, %v326_v11  ;;  %v490_v32 = vmul.f32 %v3356_v9, %v355_v19  ;;  %v463_v48 = vmul.f32 %v3356_v9, %v328_v33  ;;  %v361_v11 = vld [vmem:[%s2935_s23 + $0x2c8] sm:$0xff]  ;;  %v363_v27 = vld [vmem:[%s2935_s23 + $0x2d8] sm:$0xff] }
  0x73   : > { %2706 = vmatmul.mubr.f32.gmra.mrb[10].mxu1 %v1001_v39  ;;  %v3396_v45 = vadd.f32 %v3376_v28, %v462_v46  ;;  %vm751_vm7 = vcmp.ge.f32.partialorder %v623_v30, 0.0  ;;  %v492_v55 = vmul.f32 %v3356_v9, %v357_v41  ;;  %v626_v56 = vadd.f32 %v3376_v28, %v491_v40  ;;  %v362_v39 = vld [vmem:[%s2935_s23 + $0x2d0] sm:$0xff] }
  0x74   : > { %2652 = vmatmul.mubr.f32.gmra.mrb[38].mxu0 %v3184_v8  ;;  %v875_v8 = vmul.f32 0.2, %v619_v59  ;;  %2708 = vmatprep.mubr.f32.mxu1 %v1002_v20  ;;  %vm749_vm4 = vcmp.ge.f32.partialorder %v621_v16, 0.0  ;;  %v877_v49 = vmul.f32 0.2, %v621_v16  ;;  %v3393_v37 = vadd.f32 %v3376_v28, %v461_v13  ;;  %v332_v20 = vld [vmem:[%s2935_s23 + $0x1e0] sm:$0xff] }
  0x75   : > { %2654 = vmatprep.mubr.f32.mxu0 %v3189_v14  ;;  %v489_v14 = vmul.f32 %v3356_v9, %v354_v2  ;;  %v625_v23 = vadd.f32 %v3376_v28, %v490_v32  ;;  %v493_v57 = vmul.f32 %v3356_v9, %v358_v22  ;;  %v465_v52 = vmul.f32 %v3356_v9, %v330_v53  ;;  %v334_v53 = vld [vmem:[%s2935_s23 + $0x1f0] sm:$0xff] }
  0x76   : > { %v466_v60 = vmul.f32 %v3356_v9, %v331_v54  ;;  %v1007_v61 = vsel %vm751_vm7, %v623_v30, %v879_v47  ;;  %v627_v63 = vadd.f32 %v3376_v28, %v492_v55  ;;  %v494_v1 = vmul.f32 %v3356_v9, %v359_v7 }
  0x77   : > { %v624_v31 = vadd.f32 %v3376_v28, %v489_v14  ;;  %v881_v62 = vmul.f32 0.2, %v625_v23  ;;  %vm753_vm9 = vcmp.ge.f32.partialorder %v625_v23, 0.0  ;;  %vm724_vm10 = vcmp.ge.f32.partialorder %v3393_v37, 0.0 }
  0x78   : > { %2655 = vmatmul.mubr.f32.gmra.mrb[40].mxu0 %v3192_v15  ;;  %v1003_v15 = vsel %vm747_vm1, %v619_v59, %v875_v8  ;;  %v464_v59 = vmul.f32 %v3356_v9, %v329_v50  ;;  %v628_v43 = vadd.f32 %v3376_v28, %v493_v57  ;;  %v852_v12 = vmul.f32 0.2, %v3393_v37  ;;  %v366_v50 = vld [vmem:[%s2935_s23 + $0x2f0] sm:$0xff]  ;;  %v367_v57 = vld [vmem:[%s2935_s23 + $0x2f8] sm:$0xff] }
  0x79   : > { %2657 = vmatprep.mubr.f32.mxu0 %v3197_v17  ;;  %v850_v17 = vmul.f32 0.2, %v3339_v10  ;;  %2709 = vmatmul.mubr.f32.gmra.mrb[12].mxu1 %v1003_v15  ;;  %v880_v44 = vmul.f32 0.2, %v624_v31  ;;  %vm752_vm8 = vcmp.ge.f32.partialorder %v624_v31, 0.0  ;;  %v3436_v3 = vadd.f32 %v3376_v28, %v463_v48  ;;  %v364_v15 = vld [vmem:[%s2935_s23 + $0x2e0] sm:$0xff] }
  0x7a   : > { %2711 = vmatprep.mubr.f32.mxu1 %v1004_v34  ;;  %vm754_vm11 = vcmp.ge.f32.partialorder %v626_v56, 0.0  ;;  %vm725_vm12 = vcmp.ge.f32.partialorder %v3396_v45, 0.0  ;;  %v3442_v8 = vadd.f32 %v3376_v28, %v464_v59  ;;  %v1009_v19 = vsel %vm753_vm9, %v625_v23, %v881_v62  ;;  %v368_v59 = vld [vmem:[%s2935_s23 + $0x300] sm:$0xff] }
  0x7b   : > { %v1008_v2 = vsel %vm752_vm8, %v624_v31, %v880_v44  ;;  %v883_v24 = vmul.f32 0.2, %v627_v63  ;;  %v496_v13 = vmul.f32 %v3356_v9, %v361_v11  ;;  %vm755_vm13 = vcmp.ge.f32.partialorder %v627_v63, 0.0  ;;  %v369_v11 = vld [vmem:[%s2935_s23 + $0x308] sm:$0xff] }
  0x7c   : > { %2658 = vmatmul.mubr.f32.gmra.mrb[42].mxu0 %v3200_v18  ;;  %v1005_v18 = vsel %vm749_vm4, %v621_v16, %v877_v49  ;;  %v3445_v16 = vadd.f32 %v3376_v28, %v465_v52  ;;  %v884_v30 = vmul.f32 0.2, %v628_v43  ;;  %v497_v32 = vmul.f32 %v3356_v9, %v362_v39 }
  0x7d   : > { %2660 = vmatprep.mubr.f32.mxu0 %v3219_v29  ;;  %v3414_v29 = vsel %vm722_vm3, %v3339_v10, %v850_v17  ;;  %2712 = vmatmul.mubr.f32.gmra.mrb[14].mxu1 %v1005_v18  ;;  %v882_v10 = vmul.f32 0.2, %v626_v56  ;;  %v3467_v33 = vadd.f32 %v3376_v28, %v466_v60  ;;  %vm756_vm14 = vcmp.ge.f32.partialorder %v628_v43, 0.0 }
  0x7e   : > { %2714 = vmatprep.mubr.f32.mxu1 %v1006_v51  ;;  %vm726_vm15 = vcmp.ge.f32.partialorder %v3436_v3, 0.0  ;;  %v467_v34 = vmul.f32 %v3356_v9, %v332_v20  ;;  %v3473_v38 = vmul.f32 %v3356_v9, %v333_v21  ;;  %v498_v31 = vmul.f32 %v3356_v9, %v363_v27 }
  0x7f   : > { %v1010_v46 = vsel %vm754_vm11, %v626_v56, %v882_v10  ;;  %v1011_v40 = vsel %vm755_vm13, %v627_v63, %v883_v24  ;;  %v499_v22 = vmul.f32 %v3356_v9, %v364_v15  ;;  %v1012_v17 = vsel %vm756_vm14, %v628_v43, %v884_v30 }
  0x80   : > { %2661 = vmatmul.mubr.f32.gmra.mrb[44].mxu0 %v3222_v4  ;;  %v495_v4 = vmul.f32 %v3356_v9, %v360_v58  ;;  %v854_v47 = vmul.f32 0.2, %v3436_v3  ;;  %vm727_vm1 = vcmp.ge.f32.partialorder %v3442_v8, 0.0  ;;  %vm728_vm3 = vcmp.ge.f32.partialorder %v3445_v16, 0.0 }
  0x81   : > { %2663 = vmatprep.mubr.f32.mxu0 %v3287_v35  ;;  %v853_v35 = vmul.f32 0.2, %v3396_v45  ;;  %2715 = vmatmul.mubr.f32.gmra.mrb[16].mxu1 %v1007_v61  ;;  %v856_v23 = vmul.f32 0.2, %v3445_v16  ;;  %vm729_vm4 = vcmp.ge.f32.partialorder %v3467_v33, 0.0  ;;  %v633_v48 = vadd.f32 %v3376_v28, %v498_v31  ;;  %v335_v61 = vld [vmem:[%s2935_s23 + $0x1f8] sm:$0xff] }
  0x82   : > { %2717 = vmatprep.mubr.f32.mxu1 %v1008_v2  ;;  %v630_v14 = vadd.f32 %v3376_v28, %v495_v4  ;;  %v501_v56 = vmul.f32 %v3356_v9, %v366_v50  ;;  %v982_v7 = vsel %vm726_vm15, %v3436_v3, %v854_v47  ;;  %v602_v52 = vadd.f32 %v3376_v28, %v467_v34 }
  0x83   : > { %v3464_v49 = vsel %vm725_vm12, %v3396_v45, %v853_v35  ;;  %v365_v45 = vld [vmem:[%s2935_s23 + $0x2e8] sm:$0xff]  ;;  %v469_v60 = vmul.f32 %v3356_v9, %v334_v53  ;;  %vm761_vm7 = vcmp.ge.f32.partialorder %v633_v48, 0.0  ;;  %v889_v62 = vmul.f32 0.2, %v633_v48 }
  0x84   : > { %2664 = vmatmul.mubr.f32.gmra.mrb[46].mxu0 %v3299_v6  ;;  %v629_v6 = vadd.f32 %v3376_v28, %v494_v1  ;;  %v886_v36 = vmul.f32 0.2, %v630_v14  ;;  %vm758_vm2 = vcmp.ge.f32.partialorder %v630_v14, 0.0  ;;  %v500_v55 = vmul.f32 %v3356_v9, %v365_v45  ;;  %v374_v45 = vld [vmem:[%s2935_s23 + $0x330] sm:$0xff] }
  0x85   : > { %2666 = vmatprep.mubr.f32.mxu0 %v3329_v5  ;;  %v980_v5 = vsel %vm724_vm10, %v3393_v37, %v852_v12  ;;  %2718 = vmatmul.mubr.f32.gmra.mrb[18].mxu1 %v1009_v19  ;;  %v632_v37 = vadd.f32 %v3376_v28, %v497_v32  ;;  %v502_v2 = vmul.f32 %v3356_v9, %v367_v57  ;;  %vm730_vm9 = vcmp.ge.f32.partialorder %v602_v52, 0.0  ;;  %v372_v32 = vld [vmem:[%s2935_s23 + $0x320] sm:$0xff] }
  0x86   : > { %2720 = vmatprep.mubr.f32.mxu1 %v1010_v46  ;;  %v885_v41 = vmul.f32 0.2, %v629_v6  ;;  %vm757_vm0 = vcmp.ge.f32.partialorder %v629_v6, 0.0  ;;  %v1014_v51 = vsel %vm758_vm2, %v630_v14, %v886_v36  ;;  %v635_v4 = vadd.f32 %v3376_v28, %v500_v55  ;;  %v373_v36 = vld [vmem:[%s2935_s23 + $0x328] sm:$0xff] }
  0x87   : > { %v888_v44 = vmul.f32 0.2, %v632_v37  ;;  %vm760_vm6 = vcmp.ge.f32.partialorder %v632_v37, 0.0  ;;  %v636_v10 = vadd.f32 %v3376_v28, %v501_v56  ;;  %v503_v43 = vmul.f32 %v3356_v9, %v368_v59 }
  0x88   : > { %2667 = vmatmul.mubr.f32.gmra.mrb[48].mxu0 %v3332_v0  ;;  %v631_v0 = vadd.f32 %v3376_v28, %v496_v13  ;;  %v1013_v54 = vsel %vm757_vm0, %v629_v6, %v885_v41  ;;  %v984_v12 = vsel %vm728_vm3, %v3445_v16, %v856_v23  ;;  %v603_v3 = vadd.f32 %v3376_v28, %v3473_v38  ;;  %v371_v13 = vld [vmem:[%s2935_s23 + $0x318] sm:$0xff] }
  0x89   : > { %2669 = vmatprep.mubr.f32.mxu0 %v3362_v25  ;;  %v855_v25 = vmul.f32 0.2, %v3442_v8  ;;  %2721 = vmatmul.mubr.f32.gmra.mrb[20].mxu1 %v1011_v40  ;;  %v470_v39 = vmul.f32 %v3356_v9, %v335_v61  ;;  %v858_v19 = vmul.f32 0.2, %v602_v52  ;;  %v604_v20 = vadd.f32 %v3376_v28, %v469_v60 }
  0x8a   : > { %2723 = vmatprep.mubr.f32.mxu1 %v1012_v17  ;;  %v887_v18 = vmul.f32 0.2, %v631_v0  ;;  %vm759_vm5 = vcmp.ge.f32.partialorder %v631_v0, 0.0  ;;  %v1017_v16 = vsel %vm761_vm7, %v633_v48, %v889_v62  ;;  %v891_v24 = vmul.f32 0.2, %v635_v4 }
  0x8b   : > { %v983_v58 = vsel %vm727_vm1, %v3442_v8, %v855_v25  ;;  %v370_v8 = vld [vmem:[%s2935_s23 + $0x310] sm:$0xff]  ;;  %v637_v6 = vadd.f32 %v3376_v28, %v502_v2  ;;  %v504_v14 = vmul.f32 %v3356_v9, %v369_v11  ;;  %vm763_vm10 = vcmp.ge.f32.partialorder %v635_v4, 0.0 }
  0x8c   : > { %2670 = vmatmul.mubr.f32.gmra.mrb[50].mxu0 %v3367_v26  ;;  %v634_v26 = vadd.f32 %v3376_v28, %v499_v22  ;;  %v1015_v63 = vsel %vm759_vm5, %v631_v0, %v887_v18  ;;  %v892_v27 = vmul.f32 0.2, %v636_v10  ;;  %v638_v46 = vadd.f32 %v3376_v28, %v503_v43 }
  0x8d   : > { %2672 = vmatprep.mubr.f32.mxu0 %v3414_v29  ;;  %v857_v29 = vmul.f32 0.2, %v3467_v33  ;;  %2724 = vmatmul.mubr.f32.gmra.mrb[22].mxu1 %v1013_v54  ;;  %v505_v30 = vmul.f32 %v3356_v9, %v370_v8  ;;  %vm731_vm11 = vcmp.ge.f32.partialorder %v603_v3, 0.0  ;;  %v859_v15 = vmul.f32 0.2, %v603_v3 }
  0x8e   : > { %2726 = vmatprep.mubr.f32.mxu1 %v1014_v51  ;;  %v890_v1 = vmul.f32 0.2, %v634_v26  ;;  %vm762_vm8 = vcmp.ge.f32.partialorder %v634_v26, 0.0  ;;  %vm764_vm12 = vcmp.ge.f32.partialorder %v636_v10, 0.0  ;;  %vm732_vm13 = vcmp.ge.f32.partialorder %v604_v20, 0.0  ;;  %v375_v51 = vld [vmem:[%s2935_s23 + $0x338] sm:$0xff] }
  0x8f   : > { %v985_v35 = vsel %vm729_vm4, %v3467_v33, %v857_v29  ;;  %v860_v33 = vmul.f32 0.2, %v604_v20  ;;  %v506_v34 = vmul.f32 %v3356_v9, %v371_v13  ;;  %v1019_v38 = vsel %vm763_vm10, %v635_v4, %v891_v24  ;;  %v382_v13 = vld [vmem:[%s2935_s23 + $0x370] sm:$0xff] }
  0x90   : > { %2673 = vmatmul.mubr.f32.gmra.mrb[52].mxu0 %v3419_v42  ;;  %v1016_v42 = vsel %vm760_vm6, %v632_v37, %v888_v44  ;;  %v1018_v21 = vsel %vm762_vm8, %v634_v26, %v890_v1  ;;  %v893_v31 = vmul.f32 0.2, %v637_v6  ;;  %v639_v40 = vadd.f32 %v3376_v28, %v504_v14  ;;  %v376_v44 = vld [vmem:[%s2935_s23 + $0x340] sm:$0xff]  ;;  %v381_v14 = vld [vmem:[%s2935_s23 + $0x368] sm:$0xff] }
  0x91   : > { %2675 = vmatprep.mubr.f32.mxu0 %v980_v5  ;;  %2727 = vmatmul.mubr.f32.gmra.mrb[24].mxu1 %v1015_v63  ;;  %v605_v5 = vadd.f32 %v3376_v28, %v470_v39  ;;  %v507_v41 = vmul.f32 %v3356_v9, %v372_v32  ;;  %v1020_v0 = vsel %vm764_vm12, %v636_v10, %v892_v27  ;;  %vm765_vm14 = vcmp.ge.f32.partialorder %v637_v6, 0.0  ;;  %v378_v63 = vld [vmem:[%s2935_s23 + $0x350] sm:$0xff] }
  0x92   : > { %2729 = vmatprep.mubr.f32.mxu1 %v1016_v42  ;;  %v894_v22 = vmul.f32 0.2, %v638_v46  ;;  %v640_v17 = vadd.f32 %v3376_v28, %v505_v30  ;;  %v987_v37 = vsel %vm731_vm11, %v603_v3, %v859_v15  ;;  %vm766_vm15 = vcmp.ge.f32.partialorder %v638_v46, 0.0  ;;  %v380_v3 = vld [vmem:[%s2935_s23 + $0x360] sm:$0xff]  ;;  %v383_v15 = vld [vmem:[%s2935_s23 + $0x378] sm:$0xff] }
  0x93   : > { %v988_v50 = vsel %vm732_vm13, %v604_v20, %v860_v33  ;;  %vm733_vm0 = vcmp.ge.f32.partialorder %v605_v5, 0.0  ;;  %v861_v47 = vmul.f32 0.2, %v605_v5  ;;  %v641_v25 = vadd.f32 %v3376_v28, %v506_v34 }
  0x94   : > { %2676 = vmatmul.mubr.f32.gmra.mrb[54].mxu0 %v3464_v49  ;;  %v986_v49 = vsel %vm730_vm9, %v602_v52, %v858_v19  ;;  %v1021_v23 = vsel %vm765_vm14, %v637_v6, %v893_v31  ;;  %v895_v48 = vmul.f32 0.2, %v639_v40  ;;  %v642_v53 = vadd.f32 %v3376_v28, %v507_v41  ;;  %v377_v52 = vld [vmem:[%s2935_s23 + $0x348] sm:$0xff] }
  0x95   : > { %2678 = vmatprep.mubr.f32.mxu0 %v982_v7  ;;  %2730 = vmatmul.mubr.f32.gmra.mrb[26].mxu1 %v1017_v16  ;;  %v508_v54 = vmul.f32 %v3356_v9, %v373_v36  ;;  %v1022_v18 = vsel %vm766_vm15, %v638_v46, %v894_v22  ;;  %vm767_vm1 = vcmp.ge.f32.partialorder %v639_v40, 0.0  ;;  %v896_v26 = vmul.f32 0.2, %v640_v17 }
  0x96   : > { %2732 = vmatprep.mubr.f32.mxu1 %v1018_v21  ;;  %v509_v55 = vmul.f32 %v3356_v9, %v374_v45  ;;  %vm768_vm2 = vcmp.ge.f32.partialorder %v640_v17, 0.0  ;;  %v989_v56 = vsel %vm733_vm0, %v605_v5, %v861_v47  ;;  %vm769_vm3 = vcmp.ge.f32.partialorder %v641_v25, 0.0  ;;  %v385_v45 = vld [vmem:[%s2935_s23 + $0x388] sm:$0xff] }
  0x97   : > { %v897_v57 = vmul.f32 0.2, %v641_v25  ;;  %v1023_v7 = vsel %vm767_vm1, %v639_v40, %v895_v48  ;;  %v643_v29 = vadd.f32 %v3376_v28, %v508_v54  ;;  %v510_v59 = vmul.f32 %v3356_v9, %v375_v51  ;;  %v388_v51 = vld [vmem:[%s2935_s23 + $0x3a0] sm:$0xff] }
  0x98   : > { %2679 = vmatmul.mubr.f32.gmra.mrb[56].mxu0 %v983_v58  ;;  %v898_v58 = vmul.f32 0.2, %v642_v53  ;;  %v1024_v60 = vsel %vm768_vm2, %v640_v17, %v896_v26  ;;  %vm770_vm4 = vcmp.ge.f32.partialorder %v642_v53, 0.0  ;;  %v644_v61 = vadd.f32 %v3376_v28, %v509_v55  ;;  %v387_v55 = vld [vmem:[%s2935_s23 + $0x398] sm:$0xff] }
  0x99   : > { %2681 = vmatprep.mubr.f32.mxu0 %v984_v12  ;;  %2733 = vmatmul.mubr.f32.gmra.mrb[28].mxu1 %v1019_v38  ;;  %v511_v62 = vmul.f32 %v3356_v9, %v376_v44  ;;  %v512_v1 = vmul.f32 %v3356_v9, %v377_v52  ;;  %v1025_v4 = vsel %vm769_vm3, %v641_v25, %v897_v57  ;;  %v899_v42 = vmul.f32 0.2, %v643_v29  ;;  %v384_v38 = vld [vmem:[%s2935_s23 + $0x380] sm:$0xff] }
  0x9a   : > { %2735 = vmatprep.mubr.f32.mxu1 %v1020_v0  ;;  %v1026_v2 = vsel %vm770_vm4, %v642_v53, %v898_v58  ;;  %v645_v10 = vadd.f32 %v3376_v28, %v510_v59  ;;  %vm771_vm5 = vcmp.ge.f32.partialorder %v643_v29, 0.0  ;;  %v900_v43 = vmul.f32 0.2, %v644_v61 }
  0x9b   : > { %v646_v11 = vadd.f32 %v3376_v28, %v511_v62  ;;  %v513_v12 = vmul.f32 %v3356_v9, %v378_v63  ;;  %vm772_vm6 = vcmp.ge.f32.partialorder %v644_v61, 0.0  ;;  %v647_v39 = vadd.f32 %v3376_v28, %v512_v1 }
  0x9c   : > { %2682 = vmatmul.mubr.f32.gmra.mrb[58].mxu0 %v985_v35  ;;  %v379_v35 = vld [vmem:[%s2935_s23 + $0x358] sm:$0xff]  ;;  %v1027_v8 = vsel %vm771_vm5, %v643_v29, %v899_v42  ;;  %vm773_vm7 = vcmp.ge.f32.partialorder %v645_v10, 0.0  ;;  %v901_v19 = vmul.f32 0.2, %v645_v10  ;;  %v1028_v16 = vsel %vm772_vm6, %v644_v61, %v900_v43  ;;  %v390_v61 = vld [vmem:[%s2935_s23 + $0x3b0] sm:$0xff] }
  0x9d   : > { %2684 = vmatprep.mubr.f32.mxu0 %v986_v49  ;;  %2736 = vmatmul.mubr.f32.gmra.mrb[30].mxu1 %v1021_v23  ;;  %v514_v20 = vmul.f32 %v3356_v9, %v379_v35  ;;  %v902_v21 = vmul.f32 0.2, %v646_v11  ;;  %v648_v24 = vadd.f32 %v3376_v28, %v513_v12  ;;  %v515_v6 = vmul.f32 %v3356_v9, %v380_v3  ;;  %v392_v12 = vld [vmem:[%s2935_s23 + $0x3c0] sm:$0xff] }
  0x9e   : > { %2738 = vmatprep.mubr.f32.mxu1 %v1022_v18  ;;  %vm774_vm8 = vcmp.ge.f32.partialorder %v646_v11, 0.0  ;;  %vm775_vm9 = vcmp.ge.f32.partialorder %v647_v39, 0.0  ;;  %v1029_v27 = vsel %vm773_vm7, %v645_v10, %v901_v19  ;;  %v903_v46 = vmul.f32 0.2, %v647_v39 }
  0x9f   : > { %v649_v30 = vadd.f32 %v3376_v28, %v514_v20  ;;  %v516_v32 = vmul.f32 %v3356_v9, %v381_v14  ;;  %v1030_v5 = vsel %vm774_vm8, %v646_v11, %v902_v21  ;;  %v904_v49 = vmul.f32 0.2, %v648_v24 }
  0xa0   : > { %2685 = vmatmul.mubr.f32.gmra.mrb[60].mxu0 %v987_v37  ;;  %v650_v33 = vadd.f32 %v3376_v28, %v515_v6  ;;  %v517_v34 = vmul.f32 %v3356_v9, %v382_v13  ;;  %vm776_vm10 = vcmp.ge.f32.partialorder %v648_v24, 0.0  ;;  %v518_v31 = vmul.f32 %v3356_v9, %v383_v15  ;;  %v394_v6 = vld [vmem:[%s2935_s23 + $0x3d0] sm:$0xff] }
  0xa1   : > { %2687 = vmatprep.mubr.f32.mxu0 %v988_v50  ;;  %2739 = vmatmul.mubr.f32.gmra.mrb[32].mxu1 %v1023_v7  ;;  %v1031_v40 = vsel %vm775_vm9, %v647_v39, %v903_v46  ;;  %vm777_vm11 = vcmp.ge.f32.partialorder %v649_v30, 0.0  ;;  %v905_v41 = vmul.f32 0.2, %v649_v30  ;;  %v651_v0 = vadd.f32 %v3376_v28, %v516_v32  ;;  %v386_v50 = vld [vmem:[%s2935_s23 + $0x390] sm:$0xff] }
  0xa2   : > { %2741 = vmatprep.mubr.f32.mxu1 %v1024_v60  ;;  %v1032_v22 = vsel %vm776_vm10, %v648_v24, %v904_v49  ;;  %v906_v17 = vmul.f32 0.2, %v650_v33  ;;  %v652_v36 = vadd.f32 %v3376_v28, %v517_v34  ;;  %v519_v37 = vmul.f32 %v3356_v9, %v384_v38  ;;  %v389_v60 = vld [vmem:[%s2935_s23 + $0x3a8] sm:$0xff]  ;;  %v395_v49 = vld [vmem:[%s2935_s23 + $0x3d8] sm:$0xff] }
  0xa3   : > { %vm778_vm12 = vcmp.ge.f32.partialorder %v650_v33, 0.0  ;;  %v653_v47 = vadd.f32 %v3376_v28, %v518_v31  ;;  %v1033_v25 = vsel %vm777_vm11, %v649_v30, %v905_v41  ;;  %vm779_vm13 = vcmp.ge.f32.partialorder %v651_v0, 0.0  ;;  %v393_v24 = vld [vmem:[%s2935_s23 + $0x3c8] sm:$0xff] }
  0xa4   : > { %2688 = vmatmul.mubr.f32.gmra.mrb[62].mxu0 %v989_v56  ;;  %v907_v23 = vmul.f32 0.2, %v651_v0  ;;  %v520_v48 = vmul.f32 %v3356_v9, %v385_v45  ;;  %v1034_v53 = vsel %vm778_vm12, %v650_v33, %v906_v17  ;;  %v908_v54 = vmul.f32 0.2, %v652_v36  ;;  %v396_v33 = vld [vmem:[%s2935_s23 + $0x3e0] sm:$0xff] }
  0xa5   : > { %2742 = vmatmul.mubr.f32.gmra.mrb[34].mxu1 %v1025_v4  ;;  %v654_v18 = vadd.f32 %v3376_v28, %v519_v37  ;;  %v521_v26 = vmul.f32 %v3356_v9, %v386_v50  ;;  %vm780_vm14 = vcmp.ge.f32.partialorder %v652_v36, 0.0  ;;  %v909_v44 = vmul.f32 0.2, %v653_v47  ;;  %v398_v37 = vld [vmem:[%s2935_s23 + $0x3f0] sm:$0xff] }
  0xa6   : > { %2744 = vmatprep.mubr.f32.mxu1 %v1026_v2  ;;  %v1035_v56 = vsel %vm779_vm13, %v651_v0, %v907_v23  ;;  %vm781_vm15 = vcmp.ge.f32.partialorder %v653_v47, 0.0  ;;  %v655_v57 = vadd.f32 %v3376_v28, %v520_v48  ;;  %v522_v7 = vmul.f32 %v3356_v9, %v387_v55  ;;  %v391_v2 = vld [vmem:[%s2935_s23 + $0x3b8] sm:$0xff] }
  0xa7   : > { %v1036_v58 = vsel %vm780_vm14, %v652_v36, %v908_v54  ;;  %v910_v29 = vmul.f32 0.2, %v654_v18  ;;  %v656_v59 = vadd.f32 %v3376_v28, %v521_v26  ;;  %v523_v52 = vmul.f32 %v3356_v9, %v388_v51  ;;  %v397_v36 = vld [vmem:[%s2935_s23 + $0x3e8] sm:$0xff] }
  0xa8   : > { %vm782_vm0 = vcmp.ge.f32.partialorder %v654_v18, 0.0  ;;  %v1037_v62 = vsel %vm781_vm15, %v653_v47, %v909_v44  ;;  %vm783_vm1 = vcmp.ge.f32.partialorder %v655_v57, 0.0  ;;  %v911_v63 = vmul.f32 0.2, %v655_v57 }
  0xa9   : > { %2745 = vmatmul.mubr.f32.gmra.mrb[36].mxu1 %v1027_v8  ;;  %v657_v1 = vadd.f32 %v3376_v28, %v522_v7  ;;  %v524_v4 = vmul.f32 %v3356_v9, %v389_v60  ;;  %v1038_v42 = vsel %vm782_vm0, %v654_v18, %v910_v29  ;;  %v912_v10 = vmul.f32 0.2, %v656_v59  ;;  %v399_v18 = vld [vmem:[%s2935_s23 + $0x3f8] sm:$0xff] }
  0xaa   : > { %2747 = vmatprep.mubr.f32.mxu1 %v1028_v16  ;;  %v658_v43 = vadd.f32 %v3376_v28, %v523_v52  ;;  %v525_v11 = vmul.f32 %v3356_v9, %v390_v61  ;;  %vm784_vm2 = vcmp.ge.f32.partialorder %v656_v59, 0.0  ;;  %v526_v35 = vmul.f32 %v3356_v9, %v391_v2 }
  0xab   : > { %v1039_v3 = vsel %vm783_vm1, %v655_v57, %v911_v63  ;;  %vm785_vm3 = vcmp.ge.f32.partialorder %v657_v1, 0.0  ;;  %v913_v39 = vmul.f32 0.2, %v657_v1  ;;  %v659_v8 = vadd.f32 %v3376_v28, %v524_v4 }
  0xac   : > { %v1040_v19 = vsel %vm784_vm2, %v656_v59, %v912_v10  ;;  %v914_v20 = vmul.f32 0.2, %v658_v43  ;;  %v660_v16 = vadd.f32 %v3376_v28, %v525_v11  ;;  %v527_v21 = vmul.f32 %v3356_v9, %v392_v12 }
  0xad   : > { %2748 = vmatmul.mubr.f32.gmra.mrb[38].mxu1 %v1029_v27  ;;  %vm786_vm4 = vcmp.ge.f32.partialorder %v658_v43, 0.0  ;;  %v661_v14 = vadd.f32 %v3376_v28, %v526_v35  ;;  %v1041_v13 = vsel %vm785_vm3, %v657_v1, %v913_v39  ;;  %vm787_vm5 = vcmp.ge.f32.partialorder %v659_v8, 0.0 }
  0xae   : > { %2750 = vmatprep.mubr.f32.mxu1 %v1030_v5  ;;  %v915_v27 = vmul.f32 0.2, %v659_v8  ;;  %v528_v46 = vmul.f32 %v3356_v9, %v393_v24  ;;  %v1042_v30 = vsel %vm786_vm4, %v658_v43, %v914_v20  ;;  %v916_v32 = vmul.f32 0.2, %v660_v16 }
  0xaf   : > { %v662_v15 = vadd.f32 %v3376_v28, %v527_v21  ;;  %v529_v5 = vmul.f32 %v3356_v9, %v394_v6  ;;  %vm788_vm6 = vcmp.ge.f32.partialorder %v660_v16, 0.0  ;;  %v917_v34 = vmul.f32 0.2, %v661_v14 }
  0xb0   : > { %v1043_v38 = vsel %vm787_vm5, %v659_v8, %v915_v27  ;;  %vm789_vm7 = vcmp.ge.f32.partialorder %v661_v14, 0.0  ;;  %v663_v31 = vadd.f32 %v3376_v28, %v528_v46  ;;  %v1044_v41 = vsel %vm788_vm6, %v660_v16, %v916_v32 }
  0xb1   : > { %2751 = vmatmul.mubr.f32.gmra.mrb[40].mxu1 %v1031_v40  ;;  %v530_v40 = vmul.f32 %v3356_v9, %v395_v49  ;;  %v918_v0 = vmul.f32 0.2, %v662_v15  ;;  %v531_v17 = vmul.f32 %v3356_v9, %v396_v33  ;;  %vm790_vm8 = vcmp.ge.f32.partialorder %v662_v15, 0.0 }
  0xb2   : > { %2753 = vmatprep.mubr.f32.mxu1 %v1032_v22  ;;  %v664_v22 = vadd.f32 %v3376_v28, %v529_v5  ;;  %v1045_v45 = vsel %vm789_vm7, %v661_v14, %v917_v34  ;;  %vm791_vm9 = vcmp.ge.f32.partialorder %v663_v31, 0.0  ;;  %v919_v50 = vmul.f32 0.2, %v663_v31 }
  0xb3   : > { %v665_v47 = vadd.f32 %v3376_v28, %v530_v40  ;;  %v1046_v23 = vsel %vm790_vm8, %v662_v15, %v918_v0  ;;  %v533_v54 = vmul.f32 %v3356_v9, %v398_v37  ;;  %v534_v44 = vmul.f32 %v3356_v9, %v399_v18 }
  0xb4   : > { %v920_v48 = vmul.f32 0.2, %v664_v22  ;;  %vm792_vm10 = vcmp.ge.f32.partialorder %v664_v22, 0.0  ;;  %v1047_v26 = vsel %vm791_vm9, %v663_v31, %v919_v50 }
  0xb5   : > { %2754 = vmatmul.mubr.f32.gmra.mrb[42].mxu1 %v1033_v25  ;;  %v532_v25 = vmul.f32 %v3356_v9, %v397_v36  ;;  %v921_v55 = vmul.f32 0.2, %v665_v47  ;;  %vm793_vm11 = vcmp.ge.f32.partialorder %v665_v47, 0.0  ;;  %v668_v7 = vadd.f32 %v3376_v28, %v533_v54 }
  0xb6   : > { %2756 = vmatprep.mubr.f32.mxu1 %v1034_v53  ;;  %v666_v53 = vadd.f32 %v3376_v28, %v531_v17  ;;  %v669_v59 = vadd.f32 %v3376_v28, %v534_v44 }
  0xb7   : > { %v667_v51 = vadd.f32 %v3376_v28, %v532_v25  ;;  %v924_v60 = vmul.f32 0.2, %v668_v7  ;;  %vm796_vm14 = vcmp.ge.f32.partialorder %v668_v7, 0.0 }
  0xb8   : > { %v922_v57 = vmul.f32 0.2, %v666_v53  ;;  %vm794_vm12 = vcmp.ge.f32.partialorder %v666_v53, 0.0  ;;  %v925_v61 = vmul.f32 0.2, %v669_v59  ;;  %vm797_vm15 = vcmp.ge.f32.partialorder %v669_v59, 0.0 }
  0xb9   : > { %2757 = vmatmul.mubr.f32.gmra.mrb[44].mxu1 %v1035_v56  ;;  %v1048_v56 = vsel %vm792_vm10, %v664_v22, %v920_v48  ;;  %v923_v29 = vmul.f32 0.2, %v667_v51  ;;  %vm795_vm13 = vcmp.ge.f32.partialorder %v667_v51, 0.0 }
  0xba   : > { %2759 = vmatprep.mubr.f32.mxu1 %v1036_v58  ;;  %v1049_v58 = vsel %vm793_vm11, %v665_v47, %v921_v55  ;;  %v1050_v52 = vsel %vm794_vm12, %v666_v53, %v922_v57  ;;  %v1053_v63 = vsel %vm797_vm15, %v669_v59, %v925_v61 }
  0xbb   : > { %v1051_v9 = vsel %vm795_vm13, %v667_v51, %v923_v29 }
  0xbd   : > { %2760 = vmatmul.mubr.f32.gmra.mrb[46].mxu1 %v1037_v62  ;;  %v1052_v62 = vsel %vm796_vm14, %v668_v7, %v924_v60 }
  0xbe   : > { %2762 = vmatprep.mubr.f32.mxu1 %v1038_v42 }
  0xc1   : > { %2763 = vmatmul.mubr.f32.gmra.mrb[48].mxu1 %v1039_v3 }
  0xc2   : > { %2765 = vmatprep.mubr.f32.mxu1 %v1040_v19 }
  0xc5   : > { %2766 = vmatmul.mubr.f32.gmra.mrb[50].mxu1 %v1041_v13 }
  0xc6   : > { %2768 = vmatprep.mubr.f32.mxu1 %v1042_v30 }
  0xc9   : > { %2769 = vmatmul.mubr.f32.gmra.mrb[52].mxu1 %v1043_v38 }
  0xca   : > { %2771 = vmatprep.mubr.f32.mxu1 %v1044_v41 }
  0xcd   : > { %2772 = vmatmul.mubr.f32.gmra.mrb[54].mxu1 %v1045_v45 }
  0xce   : > { %2774 = vmatprep.mubr.f32.mxu1 %v1046_v23 }
  0xd1   : > { %2775 = vmatmul.mubr.f32.gmra.mrb[56].mxu1 %v1047_v26 }
  0xd2   : > { %2777 = vmatprep.mubr.f32.mxu1 %v1048_v56 }
  0xd5   : > { %2778 = vmatmul.mubr.f32.gmra.mrb[58].mxu1 %v1049_v58 }
  0xd6   : > { %2780 = vmatprep.mubr.f32.mxu1 %v1050_v52 }
  0xd9   : > { %2781 = vmatmul.mubr.f32.gmra.mrb[60].mxu1 %v1051_v9 }
  0xda   : > { %2783 = vmatprep.mubr.f32.mxu1 %v1052_v62 }
  0xdd   : > { %2784 = vmatmul.mubr.f32.gmra.mrb[62].mxu1 %v1053_v63 }
  0xfb   : > { %v2596_v28 = vpop.f32.mrb[0].mxu0 }
  0xfc   : > { %1776 = vst [vmem:[%s3636_s28 + $0x8] sm:$0xff] %v2596_v28  ;;  %v2038_v1 = vmul.f32 %v2596_v28, %v2596_v28  ;;  %v1136_v4 = vpop.f32.mrb[1].mxu0 }
  0xfd   : > { %1775 = vst [vmem:[%s3636_s28] sm:$0xff] %v1136_v4  ;;  %v1903_v2 = vadd.f32 %v2596_v28, %v1136_v4  ;;  %v2037_v42 = vmul.f32 %v1136_v4, %v1136_v4 }
  0xff   : > { %v2165_v10 = vadd.f32 %v2038_v1, %v2037_v42  ;;  %v2599_v43 = vpop.f32.mrb[2].mxu0 }
 0x100   : > { %1778 = vst [vmem:[%s3636_s28 + $0x18] sm:$0xff] %v2599_v43  ;;  %v1146_v11 = vpop.f32.mrb[3].mxu0  ;;  %v2040_v3 = vmul.f32 %v2599_v43, %v2599_v43 }
 0x101   : > { %1777 = vst [vmem:[%s3636_s28 + $0x10] sm:$0xff] %v1146_v11  ;;  %v1904_v12 = vadd.f32 %v1903_v2, %v1146_v11  ;;  %v2039_v35 = vmul.f32 %v1146_v11, %v1146_v11 }
 0x103   : > { %v1905_v39 = vadd.f32 %v2599_v43, %v1904_v12  ;;  %v2166_v8 = vadd.f32 %v2165_v10, %v2039_v35  ;;  %v2602_v19 = vpop.f32.mrb[4].mxu0 }
 0x104   : > { %1780 = vst [vmem:[%s3636_s28 + $0x28] sm:$0xff] %v2602_v19  ;;  %v1156_v20 = vpop.f32.mrb[5].mxu0  ;;  %v2042_v6 = vmul.f32 %v2602_v19, %v2602_v19 }
 0x105   : > { %v2167_v16 = vadd.f32 %v2166_v8, %v2040_v3  ;;  %1779 = vst [vmem:[%s3636_s28 + $0x20] sm:$0xff] %v1156_v20  ;;  %v1906_v21 = vadd.f32 %v1905_v39, %v1156_v20  ;;  %v2041_v24 = vmul.f32 %v1156_v20, %v1156_v20 }
 0x107   : > { %v2168_v14 = vadd.f32 %v2167_v16, %v2041_v24  ;;  %v2605_v13 = vpop.f32.mrb[6].mxu0  ;;  %v1907_v27 = vadd.f32 %v2602_v19, %v1906_v21 }
 0x108   : > { %1782 = vst [vmem:[%s3636_s28 + $0x38] sm:$0xff] %v2605_v13  ;;  %v1166_v46 = vpop.f32.mrb[7].mxu0  ;;  %v2044_v5 = vmul.f32 %v2605_v13, %v2605_v13 }
 0x109   : > { %1781 = vst [vmem:[%s3636_s28 + $0x30] sm:$0xff] %v1166_v46  ;;  %v1908_v30 = vadd.f32 %v1907_v27, %v1166_v46  ;;  %v2043_v32 = vmul.f32 %v1166_v46, %v1166_v46  ;;  %v2169_v15 = vadd.f32 %v2168_v14, %v2042_v6 }
 0x10b   : > { %v2170_v49 = vadd.f32 %v2169_v15, %v2043_v32  ;;  %v2608_v33 = vpop.f32.mrb[8].mxu0  ;;  %v1909_v34 = vadd.f32 %v2605_v13, %v1908_v30 }
 0x10c   : > { %1784 = vst [vmem:[%s3636_s28 + $0x48] sm:$0xff] %v2608_v33  ;;  %v1176_v38 = vpop.f32.mrb[9].mxu0  ;;  %v2046_v0 = vmul.f32 %v2608_v33, %v2608_v33 }
 0x10d   : > { %1783 = vst [vmem:[%s3636_s28 + $0x40] sm:$0xff] %v1176_v38  ;;  %v1910_v31 = vadd.f32 %v1909_v34, %v1176_v38  ;;  %v2045_v40 = vmul.f32 %v1176_v38, %v1176_v38  ;;  %v2171_v41 = vadd.f32 %v2170_v49, %v2044_v5 }
 0x10f   : > { %v2172_v22 = vadd.f32 %v2171_v41, %v2045_v40  ;;  %v2611_v17 = vpop.f32.mrb[10].mxu0  ;;  %v1911_v36 = vadd.f32 %v2608_v33, %v1910_v31 }
 0x110   : > { %1786 = vst [vmem:[%s3636_s28 + $0x58] sm:$0xff] %v2611_v17  ;;  %v1186_v37 = vpop.f32.mrb[11].mxu0  ;;  %v2048_v25 = vmul.f32 %v2611_v17, %v2611_v17 }
 0x111   : > { %1785 = vst [vmem:[%s3636_s28 + $0x50] sm:$0xff] %v1186_v37  ;;  %v1912_v45 = vadd.f32 %v1911_v36, %v1186_v37  ;;  %v2047_v50 = vmul.f32 %v1186_v37, %v1186_v37  ;;  %v2173_v47 = vadd.f32 %v2172_v22, %v2046_v0 }
 0x113   : > { %v2174_v23 = vadd.f32 %v2173_v47, %v2047_v50  ;;  %v2614_v48 = vpop.f32.mrb[12].mxu0  ;;  %v1913_v53 = vadd.f32 %v2611_v17, %v1912_v45 }
 0x114   : > { %1788 = vst [vmem:[%s3636_s28 + $0x68] sm:$0xff] %v2614_v48  ;;  %v1196_v54 = vpop.f32.mrb[13].mxu0  ;;  %v2050_v51 = vmul.f32 %v2614_v48, %v2614_v48 }
 0x115   : > { %1787 = vst [vmem:[%s3636_s28 + $0x60] sm:$0xff] %v1196_v54  ;;  %v1914_v18 = vadd.f32 %v1913_v53, %v1196_v54  ;;  %v2049_v26 = vmul.f32 %v1196_v54, %v1196_v54  ;;  %v2175_v55 = vadd.f32 %v2174_v23, %v2048_v25 }
 0x117   : > { %v2176_v44 = vadd.f32 %v2175_v55, %v2049_v26  ;;  %v2617_v56 = vpop.f32.mrb[14].mxu0  ;;  %v1915_v57 = vadd.f32 %v2614_v48, %v1914_v18 }
 0x118   : > { %1790 = vst [vmem:[%s3636_s28 + $0x78] sm:$0xff] %v2617_v56  ;;  %v1206_v7 = vpop.f32.mrb[15].mxu0  ;;  %v2052_v52 = vmul.f32 %v2617_v56, %v2617_v56 }
 0x119   : > { %1789 = vst [vmem:[%s3636_s28 + $0x70] sm:$0xff] %v1206_v7  ;;  %v1916_v58 = vadd.f32 %v1915_v57, %v1206_v7  ;;  %v2051_v29 = vmul.f32 %v1206_v7, %v1206_v7  ;;  %v2177_v59 = vadd.f32 %v2176_v44, %v2050_v51 }
 0x11b   : > { %v2178_v60 = vadd.f32 %v2177_v59, %v2051_v29  ;;  %v2620_v9 = vpop.f32.mrb[16].mxu0  ;;  %v1917_v61 = vadd.f32 %v2617_v56, %v1916_v58 }
 0x11c   : > { %1792 = vst [vmem:[%s3636_s28 + $0x88] sm:$0xff] %v2620_v9  ;;  %v1216_v62 = vpop.f32.mrb[17].mxu0  ;;  %v2054_v4 = vmul.f32 %v2620_v9, %v2620_v9 }
 0x11d   : > { %1791 = vst [vmem:[%s3636_s28 + $0x80] sm:$0xff] %v1216_v62  ;;  %v1918_v63 = vadd.f32 %v1917_v61, %v1216_v62  ;;  %v2053_v28 = vmul.f32 %v1216_v62, %v1216_v62  ;;  %v2179_v1 = vadd.f32 %v2178_v60, %v2052_v52 }
 0x11f   : > { %v2180_v2 = vadd.f32 %v2179_v1, %v2053_v28  ;;  %v2623_v42 = vpop.f32.mrb[18].mxu0  ;;  %v1919_v10 = vadd.f32 %v2620_v9, %v1918_v63 }
 0x120   : > { %1794 = vst [vmem:[%s3636_s28 + $0x98] sm:$0xff] %v2623_v42  ;;  %v1226_v43 = vpop.f32.mrb[19].mxu0  ;;  %v2056_v3 = vmul.f32 %v2623_v42, %v2623_v42 }
 0x121   : > { %1793 = vst [vmem:[%s3636_s28 + $0x90] sm:$0xff] %v1226_v43  ;;  %v1920_v11 = vadd.f32 %v1919_v10, %v1226_v43  ;;  %v2055_v12 = vmul.f32 %v1226_v43, %v1226_v43  ;;  %v2181_v35 = vadd.f32 %v2180_v2, %v2054_v4 }
 0x123   : > { %v2182_v39 = vadd.f32 %v2181_v35, %v2055_v12  ;;  %v2626_v8 = vpop.f32.mrb[20].mxu0  ;;  %v1921_v19 = vadd.f32 %v2623_v42, %v1920_v11 }
 0x124   : > { %1796 = vst [vmem:[%s3636_s28 + $0xa8] sm:$0xff] %v2626_v8  ;;  %v1236_v20 = vpop.f32.mrb[21].mxu0  ;;  %v2058_v6 = vmul.f32 %v2626_v8, %v2626_v8 }
 0x125   : > { %1795 = vst [vmem:[%s3636_s28 + $0xa0] sm:$0xff] %v1236_v20  ;;  %v1922_v16 = vadd.f32 %v1921_v19, %v1236_v20  ;;  %v2057_v21 = vmul.f32 %v1236_v20, %v1236_v20  ;;  %v2183_v24 = vadd.f32 %v2182_v39, %v2056_v3 }
 0x127   : > { %v2184_v14 = vadd.f32 %v2183_v24, %v2057_v21  ;;  %v2629_v13 = vpop.f32.mrb[22].mxu0  ;;  %v1923_v27 = vadd.f32 %v2626_v8, %v1922_v16 }
 0x128   : > { %1798 = vst [vmem:[%s3636_s28 + $0xb8] sm:$0xff] %v2629_v13  ;;  %v1246_v46 = vpop.f32.mrb[23].mxu0  ;;  %v2060_v5 = vmul.f32 %v2629_v13, %v2629_v13 }
 0x129   : > { %1797 = vst [vmem:[%s3636_s28 + $0xb0] sm:$0xff] %v1246_v46  ;;  %v1924_v30 = vadd.f32 %v1923_v27, %v1246_v46  ;;  %v2059_v32 = vmul.f32 %v1246_v46, %v1246_v46  ;;  %v2185_v15 = vadd.f32 %v2184_v14, %v2058_v6 }
 0x12b   : > { %v2186_v49 = vadd.f32 %v2185_v15, %v2059_v32  ;;  %v2632_v33 = vpop.f32.mrb[24].mxu0  ;;  %v1925_v34 = vadd.f32 %v2629_v13, %v1924_v30 }
 0x12c   : > { %1800 = vst [vmem:[%s3636_s28 + $0xc8] sm:$0xff] %v2632_v33  ;;  %v1256_v38 = vpop.f32.mrb[25].mxu0  ;;  %v2062_v0 = vmul.f32 %v2632_v33, %v2632_v33 }
 0x12d   : > { %1799 = vst [vmem:[%s3636_s28 + $0xc0] sm:$0xff] %v1256_v38  ;;  %v1926_v31 = vadd.f32 %v1925_v34, %v1256_v38  ;;  %v2061_v40 = vmul.f32 %v1256_v38, %v1256_v38  ;;  %v2187_v41 = vadd.f32 %v2186_v49, %v2060_v5 }
 0x12e   : > { %v3668_v7 = vpop.f32.mrb[0].mxu1 }
 0x12f   : > { %v2188_v22 = vadd.f32 %v2187_v41, %v2061_v40  ;;  %v2635_v17 = vpop.f32.mrb[26].mxu0  ;;  %v1927_v36 = vadd.f32 %v2632_v33, %v1926_v31  ;;  %1840 = vst [vmem:[%s3636_s28 + $0x208] sm:$0xff] %v3668_v7  ;;  %v3673_v29 = vpop.f32.mrb[1].mxu1 }
 0x130   : > { %1802 = vst [vmem:[%s3636_s28 + $0xd8] sm:$0xff] %v2635_v17  ;;  %v1266_v37 = vpop.f32.mrb[27].mxu0  ;;  %v2064_v25 = vmul.f32 %v2635_v17, %v2635_v17  ;;  %1839 = vst [vmem:[%s3636_s28 + $0x200] sm:$0xff] %v3673_v29 }
 0x131   : > { %1801 = vst [vmem:[%s3636_s28 + $0xd0] sm:$0xff] %v1266_v37  ;;  %v1928_v45 = vadd.f32 %v1927_v36, %v1266_v37  ;;  %v2063_v50 = vmul.f32 %v1266_v37, %v1266_v37  ;;  %v2189_v47 = vadd.f32 %v2188_v22, %v2062_v0 }
 0x133   : > { %v2190_v23 = vadd.f32 %v2189_v47, %v2063_v50  ;;  %v2638_v48 = vpop.f32.mrb[28].mxu0  ;;  %v1929_v53 = vadd.f32 %v2635_v17, %v1928_v45 }
 0x134   : > { %1804 = vst [vmem:[%s3636_s28 + $0xe8] sm:$0xff] %v2638_v48  ;;  %v1276_v54 = vpop.f32.mrb[29].mxu0  ;;  %v2066_v51 = vmul.f32 %v2638_v48, %v2638_v48 }
 0x135   : > { %1803 = vst [vmem:[%s3636_s28 + $0xe0] sm:$0xff] %v1276_v54  ;;  %v1930_v18 = vadd.f32 %v1929_v53, %v1276_v54  ;;  %v2065_v26 = vmul.f32 %v1276_v54, %v1276_v54  ;;  %v2191_v55 = vadd.f32 %v2190_v23, %v2064_v25  ;;  %v3678_v28 = vpop.f32.mrb[2].mxu1 }
 0x136   : > { %1842 = vst [vmem:[%s3636_s28 + $0x218] sm:$0xff] %v3678_v28  ;;  %v3683_v4 = vpop.f32.mrb[3].mxu1 }
 0x137   : > { %v2192_v44 = vadd.f32 %v2191_v55, %v2065_v26  ;;  %v2641_v56 = vpop.f32.mrb[30].mxu0  ;;  %v1931_v57 = vadd.f32 %v2638_v48, %v1930_v18  ;;  %1841 = vst [vmem:[%s3636_s28 + $0x210] sm:$0xff] %v3683_v4 }
 0x138   : > { %1806 = vst [vmem:[%s3636_s28 + $0xf8] sm:$0xff] %v2641_v56  ;;  %v1286_v58 = vpop.f32.mrb[31].mxu0  ;;  %v2068_v9 = vmul.f32 %v2641_v56, %v2641_v56 }
 0x139   : > { %1805 = vst [vmem:[%s3636_s28 + $0xf0] sm:$0xff] %v1286_v58  ;;  %v1932_v59 = vadd.f32 %v1931_v57, %v1286_v58  ;;  %v2067_v52 = vmul.f32 %v1286_v58, %v1286_v58  ;;  %v2193_v60 = vadd.f32 %v2192_v44, %v2066_v51  ;;  %v3688_v3 = vpop.f32.mrb[4].mxu1 }
 0x13a   : > { %1844 = vst [vmem:[%s3636_s28 + $0x228] sm:$0xff] %v3688_v3  ;;  %v3693_v8 = vpop.f32.mrb[5].mxu1 }
 0x13b   : > { %v2194_v61 = vadd.f32 %v2193_v60, %v2067_v52  ;;  %v2644_v62 = vpop.f32.mrb[32].mxu0  ;;  %v1933_v63 = vadd.f32 %v2641_v56, %v1932_v59  ;;  %1843 = vst [vmem:[%s3636_s28 + $0x220] sm:$0xff] %v3693_v8 }
 0x13c   : > { %1808 = vst [vmem:[%s3636_s28 + $0x108] sm:$0xff] %v2644_v62  ;;  %v1296_v1 = vpop.f32.mrb[33].mxu0  ;;  %v2070_v43 = vmul.f32 %v2644_v62, %v2644_v62 }
 0x13d   : > { %1807 = vst [vmem:[%s3636_s28 + $0x100] sm:$0xff] %v1296_v1  ;;  %v1934_v2 = vadd.f32 %v1933_v63, %v1296_v1  ;;  %v2069_v42 = vmul.f32 %v1296_v1, %v1296_v1  ;;  %v2195_v10 = vadd.f32 %v2194_v61, %v2068_v9 }
 0x13e   : > { %v3698_v13 = vpop.f32.mrb[6].mxu1 }
 0x13f   : > { %v2196_v11 = vadd.f32 %v2195_v10, %v2069_v42  ;;  %v2647_v12 = vpop.f32.mrb[34].mxu0  ;;  %v1935_v35 = vadd.f32 %v2644_v62, %v1934_v2  ;;  %1846 = vst [vmem:[%s3636_s28 + $0x238] sm:$0xff] %v3698_v13  ;;  %v3703_v46 = vpop.f32.mrb[7].mxu1 }
 0x140   : > { %1810 = vst [vmem:[%s3636_s28 + $0x118] sm:$0xff] %v2647_v12  ;;  %v1306_v39 = vpop.f32.mrb[35].mxu0  ;;  %v2072_v21 = vmul.f32 %v2647_v12, %v2647_v12  ;;  %1845 = vst [vmem:[%s3636_s28 + $0x230] sm:$0xff] %v3703_v46 }
 0x141   : > { %1809 = vst [vmem:[%s3636_s28 + $0x110] sm:$0xff] %v1306_v39  ;;  %v1936_v19 = vadd.f32 %v1935_v35, %v1306_v39  ;;  %v2071_v20 = vmul.f32 %v1306_v39, %v1306_v39  ;;  %v2197_v16 = vadd.f32 %v2196_v11, %v2070_v43 }
 0x142   : > { %v3708_v38 = vpop.f32.mrb[8].mxu1 }
 0x143   : > { %v2198_v24 = vadd.f32 %v2197_v16, %v2071_v20  ;;  %v2650_v6 = vpop.f32.mrb[36].mxu0  ;;  %v1937_v14 = vadd.f32 %v2647_v12, %v1936_v19  ;;  %1848 = vst [vmem:[%s3636_s28 + $0x248] sm:$0xff] %v3708_v38  ;;  %v3713_v40 = vpop.f32.mrb[9].mxu1 }
 0x144   : > { %1812 = vst [vmem:[%s3636_s28 + $0x128] sm:$0xff] %v2650_v6  ;;  %v1316_v27 = vpop.f32.mrb[37].mxu0  ;;  %v2074_v5 = vmul.f32 %v2650_v6, %v2650_v6  ;;  %1847 = vst [vmem:[%s3636_s28 + $0x240] sm:$0xff] %v3713_v40 }
 0x145   : > { %1811 = vst [vmem:[%s3636_s28 + $0x120] sm:$0xff] %v1316_v27  ;;  %v1938_v30 = vadd.f32 %v1937_v14, %v1316_v27  ;;  %v2073_v32 = vmul.f32 %v1316_v27, %v1316_v27  ;;  %v2199_v15 = vadd.f32 %v2198_v24, %v2072_v21 }
 0x146   : > { %v3718_v50 = vpop.f32.mrb[10].mxu1 }
 0x147   : > { %v2200_v49 = vadd.f32 %v2199_v15, %v2073_v32  ;;  %v2653_v33 = vpop.f32.mrb[38].mxu0  ;;  %v1939_v34 = vadd.f32 %v2650_v6, %v1938_v30  ;;  %1850 = vst [vmem:[%s3636_s28 + $0x258] sm:$0xff] %v3718_v50  ;;  %v3723_v25 = vpop.f32.mrb[11].mxu1 }
 0x148   : > { %1814 = vst [vmem:[%s3636_s28 + $0x138] sm:$0xff] %v2653_v33  ;;  %v1326_v31 = vpop.f32.mrb[39].mxu0  ;;  %v2076_v17 = vmul.f32 %v2653_v33, %v2653_v33  ;;  %1849 = vst [vmem:[%s3636_s28 + $0x250] sm:$0xff] %v3723_v25 }
 0x149   : > { %1813 = vst [vmem:[%s3636_s28 + $0x130] sm:$0xff] %v1326_v31  ;;  %v1940_v41 = vadd.f32 %v1939_v34, %v1326_v31  ;;  %v2075_v0 = vmul.f32 %v1326_v31, %v1326_v31  ;;  %v2201_v22 = vadd.f32 %v2200_v49, %v2074_v5 }
 0x14b   : > { %v2202_v36 = vadd.f32 %v2201_v22, %v2075_v0  ;;  %v2656_v37 = vpop.f32.mrb[40].mxu0  ;;  %v1941_v45 = vadd.f32 %v2653_v33, %v1940_v41 }
 0x14c   : > { %1816 = vst [vmem:[%s3636_s28 + $0x148] sm:$0xff] %v2656_v37  ;;  %v1336_v47 = vpop.f32.mrb[41].mxu0  ;;  %v2078_v54 = vmul.f32 %v2656_v37, %v2656_v37  ;;  %v3728_v51 = vpop.f32.mrb[12].mxu1 }
 0x14d   : > { %1815 = vst [vmem:[%s3636_s28 + $0x140] sm:$0xff] %v1336_v47  ;;  %v1942_v23 = vadd.f32 %v1941_v45, %v1336_v47  ;;  %v2077_v48 = vmul.f32 %v1336_v47, %v1336_v47  ;;  %v2203_v53 = vadd.f32 %v2202_v36, %v2076_v17  ;;  %1852 = vst [vmem:[%s3636_s28 + $0x268] sm:$0xff] %v3728_v51  ;;  %v3733_v56 = vpop.f32.mrb[13].mxu1 }
 0x14e   : > { %1851 = vst [vmem:[%s3636_s28 + $0x260] sm:$0xff] %v3733_v56 }
 0x14f   : > { %v2204_v18 = vadd.f32 %v2203_v53, %v2077_v48  ;;  %v2659_v26 = vpop.f32.mrb[42].mxu0  ;;  %v1943_v55 = vadd.f32 %v2656_v37, %v1942_v23 }
 0x150   : > { %1818 = vst [vmem:[%s3636_s28 + $0x158] sm:$0xff] %v2659_v26  ;;  %v1346_v44 = vpop.f32.mrb[43].mxu0  ;;  %v2080_v52 = vmul.f32 %v2659_v26, %v2659_v26  ;;  %v3738_v62 = vpop.f32.mrb[14].mxu1 }
 0x151   : > { %1817 = vst [vmem:[%s3636_s28 + $0x150] sm:$0xff] %v1346_v44  ;;  %v1944_v57 = vadd.f32 %v1943_v55, %v1346_v44  ;;  %v2079_v58 = vmul.f32 %v1346_v44, %v1346_v44  ;;  %v2205_v59 = vadd.f32 %v2204_v18, %v2078_v54  ;;  %1854 = vst [vmem:[%s3636_s28 + $0x278] sm:$0xff] %v3738_v62  ;;  %v3743_v1 = vpop.f32.mrb[15].mxu1 }
 0x152   : > { %1853 = vst [vmem:[%s3636_s28 + $0x270] sm:$0xff] %v3743_v1 }
 0x153   : > { %v2206_v60 = vadd.f32 %v2205_v59, %v2079_v58  ;;  %v2662_v9 = vpop.f32.mrb[44].mxu0  ;;  %v1945_v61 = vadd.f32 %v2659_v26, %v1944_v57 }
 0x154   : > { %1820 = vst [vmem:[%s3636_s28 + $0x168] sm:$0xff] %v2662_v9  ;;  %v1356_v63 = vpop.f32.mrb[45].mxu0  ;;  %v2082_v43 = vmul.f32 %v2662_v9, %v2662_v9  ;;  %v3748_v39 = vpop.f32.mrb[16].mxu1 }
 0x155   : > { %1819 = vst [vmem:[%s3636_s28 + $0x160] sm:$0xff] %v1356_v63  ;;  %v1946_v2 = vadd.f32 %v1945_v61, %v1356_v63  ;;  %v2081_v42 = vmul.f32 %v1356_v63, %v1356_v63  ;;  %v2207_v10 = vadd.f32 %v2206_v60, %v2080_v52  ;;  %1856 = vst [vmem:[%s3636_s28 + $0x288] sm:$0xff] %v3748_v39  ;;  %v3753_v20 = vpop.f32.mrb[17].mxu1 }
 0x156   : > { %1855 = vst [vmem:[%s3636_s28 + $0x280] sm:$0xff] %v3753_v20 }
 0x157   : > { %v2208_v11 = vadd.f32 %v2207_v10, %v2081_v42  ;;  %v2665_v12 = vpop.f32.mrb[46].mxu0  ;;  %v1947_v35 = vadd.f32 %v2662_v9, %v1946_v2 }
 0x158   : > { %1822 = vst [vmem:[%s3636_s28 + $0x178] sm:$0xff] %v2665_v12  ;;  %v1366_v19 = vpop.f32.mrb[47].mxu0  ;;  %v2084_v6 = vmul.f32 %v2665_v12, %v2665_v12  ;;  %v3758_v32 = vpop.f32.mrb[18].mxu1 }
 0x159   : > { %1821 = vst [vmem:[%s3636_s28 + $0x170] sm:$0xff] %v1366_v19  ;;  %v1948_v16 = vadd.f32 %v1947_v35, %v1366_v19  ;;  %v2083_v21 = vmul.f32 %v1366_v19, %v1366_v19  ;;  %v2209_v24 = vadd.f32 %v2208_v11, %v2082_v43  ;;  %1858 = vst [vmem:[%s3636_s28 + $0x298] sm:$0xff] %v3758_v32  ;;  %v3763_v5 = vpop.f32.mrb[19].mxu1 }
 0x15a   : > { %1857 = vst [vmem:[%s3636_s28 + $0x290] sm:$0xff] %v3763_v5 }
 0x15b   : > { %v2210_v14 = vadd.f32 %v2209_v24, %v2083_v21  ;;  %v2668_v27 = vpop.f32.mrb[48].mxu0  ;;  %v1949_v30 = vadd.f32 %v2665_v12, %v1948_v16 }
 0x15c   : > { %1824 = vst [vmem:[%s3636_s28 + $0x188] sm:$0xff] %v2668_v27  ;;  %v1376_v15 = vpop.f32.mrb[49].mxu0  ;;  %v2086_v31 = vmul.f32 %v2668_v27, %v2668_v27  ;;  %v3768_v17 = vpop.f32.mrb[20].mxu1 }
 0x15d   : > { %1823 = vst [vmem:[%s3636_s28 + $0x180] sm:$0xff] %v1376_v15  ;;  %v1950_v49 = vadd.f32 %v1949_v30, %v1376_v15  ;;  %v2085_v33 = vmul.f32 %v1376_v15, %v1376_v15  ;;  %v2211_v34 = vadd.f32 %v2210_v14, %v2084_v6  ;;  %1860 = vst [vmem:[%s3636_s28 + $0x2a8] sm:$0xff] %v3768_v17  ;;  %v3773_v37 = vpop.f32.mrb[21].mxu1 }
 0x15e   : > { %1859 = vst [vmem:[%s3636_s28 + $0x2a0] sm:$0xff] %v3773_v37 }
 0x15f   : > { %v2212_v41 = vadd.f32 %v2211_v34, %v2085_v33  ;;  %v2671_v0 = vpop.f32.mrb[50].mxu0  ;;  %v1951_v22 = vadd.f32 %v2668_v27, %v1950_v49 }
 0x160   : > { %1826 = vst [vmem:[%s3636_s28 + $0x198] sm:$0xff] %v2671_v0  ;;  %v1386_v36 = vpop.f32.mrb[51].mxu0  ;;  %v2088_v48 = vmul.f32 %v2671_v0, %v2671_v0  ;;  %v3778_v26 = vpop.f32.mrb[22].mxu1 }
 0x161   : > { %1825 = vst [vmem:[%s3636_s28 + $0x190] sm:$0xff] %v1386_v36  ;;  %v1952_v45 = vadd.f32 %v1951_v22, %v1386_v36  ;;  %v2087_v47 = vmul.f32 %v1386_v36, %v1386_v36  ;;  %v2213_v23 = vadd.f32 %v2212_v41, %v2086_v31  ;;  %1862 = vst [vmem:[%s3636_s28 + $0x2b8] sm:$0xff] %v3778_v26  ;;  %v3783_v44 = vpop.f32.mrb[23].mxu1 }
 0x162   : > { %1861 = vst [vmem:[%s3636_s28 + $0x2b0] sm:$0xff] %v3783_v44 }
 0x163   : > { %v2214_v53 = vadd.f32 %v2213_v23, %v2087_v47  ;;  %v2674_v54 = vpop.f32.mrb[52].mxu0  ;;  %v1953_v18 = vadd.f32 %v2671_v0, %v1952_v45 }
 0x164   : > { %1828 = vst [vmem:[%s3636_s28 + $0x1a8] sm:$0xff] %v2674_v54  ;;  %v1396_v55 = vpop.f32.mrb[53].mxu0  ;;  %v2090_v52 = vmul.f32 %v2674_v54, %v2674_v54  ;;  %v3788_v63 = vpop.f32.mrb[24].mxu1 }
 0x165   : > { %1827 = vst [vmem:[%s3636_s28 + $0x1a0] sm:$0xff] %v1396_v55  ;;  %v1954_v57 = vadd.f32 %v1953_v18, %v1396_v55  ;;  %v2089_v58 = vmul.f32 %v1396_v55, %v1396_v55  ;;  %v2215_v59 = vadd.f32 %v2214_v53, %v2088_v48  ;;  %1864 = vst [vmem:[%s3636_s28 + $0x2c8] sm:$0xff] %v3788_v63  ;;  %v3793_v42 = vpop.f32.mrb[25].mxu1 }
 0x166   : > { %1863 = vst [vmem:[%s3636_s28 + $0x2c0] sm:$0xff] %v3793_v42 }
 0x167   : > { %v2216_v60 = vadd.f32 %v2215_v59, %v2089_v58  ;;  %v2677_v9 = vpop.f32.mrb[54].mxu0  ;;  %v1955_v61 = vadd.f32 %v2674_v54, %v1954_v57 }
 0x168   : > { %1830 = vst [vmem:[%s3636_s28 + $0x1b8] sm:$0xff] %v2677_v9  ;;  %v1406_v2 = vpop.f32.mrb[55].mxu0  ;;  %v2092_v12 = vmul.f32 %v2677_v9, %v2677_v9  ;;  %v3798_v21 = vpop.f32.mrb[26].mxu1 }
 0x169   : > { %1829 = vst [vmem:[%s3636_s28 + $0x1b0] sm:$0xff] %v1406_v2  ;;  %v1956_v10 = vadd.f32 %v1955_v61, %v1406_v2  ;;  %v2091_v43 = vmul.f32 %v1406_v2, %v1406_v2  ;;  %v2217_v11 = vadd.f32 %v2216_v60, %v2090_v52  ;;  %1866 = vst [vmem:[%s3636_s28 + $0x2d8] sm:$0xff] %v3798_v21  ;;  %v3803_v6 = vpop.f32.mrb[27].mxu1 }
 0x16a   : > { %1865 = vst [vmem:[%s3636_s28 + $0x2d0] sm:$0xff] %v3803_v6 }
 0x16b   : > { %v2218_v35 = vadd.f32 %v2217_v11, %v2091_v43  ;;  %v2680_v19 = vpop.f32.mrb[56].mxu0  ;;  %v1957_v16 = vadd.f32 %v2677_v9, %v1956_v10 }
 0x16c   : > { %1832 = vst [vmem:[%s3636_s28 + $0x1c8] sm:$0xff] %v2680_v19  ;;  %v1416_v24 = vpop.f32.mrb[57].mxu0  ;;  %v2094_v15 = vmul.f32 %v2680_v19, %v2680_v19  ;;  %v3808_v31 = vpop.f32.mrb[28].mxu1 }
 0x16d   : > { %1831 = vst [vmem:[%s3636_s28 + $0x1c0] sm:$0xff] %v1416_v24  ;;  %v1958_v14 = vadd.f32 %v1957_v16, %v1416_v24  ;;  %v2093_v27 = vmul.f32 %v1416_v24, %v1416_v24  ;;  %v2219_v30 = vadd.f32 %v2218_v35, %v2092_v12  ;;  %1868 = vst [vmem:[%s3636_s28 + $0x2e8] sm:$0xff] %v3808_v31  ;;  %v3813_v0 = vpop.f32.mrb[29].mxu1 }
 0x16e   : > { %1867 = vst [vmem:[%s3636_s28 + $0x2e0] sm:$0xff] %v3813_v0 }
 0x16f   : > { %v2220_v49 = vadd.f32 %v2219_v30, %v2093_v27  ;;  %v2683_v33 = vpop.f32.mrb[58].mxu0  ;;  %v1959_v34 = vadd.f32 %v2680_v19, %v1958_v14  ;;  %v2101_v14 = vmul.f32 %v3673_v29, %v3673_v29 }
 0x170   : > { %1834 = vst [vmem:[%s3636_s28 + $0x1d8] sm:$0xff] %v2683_v33  ;;  %v1426_v41 = vpop.f32.mrb[59].mxu0  ;;  %v2096_v47 = vmul.f32 %v2683_v33, %v2683_v33  ;;  %v3818_v54 = vpop.f32.mrb[30].mxu1 }
 0x171   : > { %1833 = vst [vmem:[%s3636_s28 + $0x1d0] sm:$0xff] %v1426_v41  ;;  %v1960_v22 = vadd.f32 %v1959_v34, %v1426_v41  ;;  %v2095_v36 = vmul.f32 %v1426_v41, %v1426_v41  ;;  %v2221_v45 = vadd.f32 %v2220_v49, %v2094_v15  ;;  %1870 = vst [vmem:[%s3636_s28 + $0x2f8] sm:$0xff] %v3818_v54  ;;  %v3823_v55 = vpop.f32.mrb[31].mxu1 }
 0x172   : > { %1869 = vst [vmem:[%s3636_s28 + $0x2f0] sm:$0xff] %v3823_v55 }
 0x173   : > { %v2222_v23 = vadd.f32 %v2221_v45, %v2095_v36  ;;  %v2686_v48 = vpop.f32.mrb[60].mxu0  ;;  %v1961_v53 = vadd.f32 %v2683_v33, %v1960_v22  ;;  %v2102_v33 = vmul.f32 %v3668_v7, %v3668_v7  ;;  %v2103_v22 = vmul.f32 %v3683_v4, %v3683_v4 }
 0x174   : > { %1836 = vst [vmem:[%s3636_s28 + $0x1e8] sm:$0xff] %v2686_v48  ;;  %v1436_v18 = vpop.f32.mrb[61].mxu0  ;;  %v2098_v52 = vmul.f32 %v2686_v48, %v2686_v48  ;;  %v3828_v2 = vpop.f32.mrb[32].mxu1 }
 0x175   : > { %1835 = vst [vmem:[%s3636_s28 + $0x1e0] sm:$0xff] %v1436_v18  ;;  %v1962_v57 = vadd.f32 %v1961_v53, %v1436_v18  ;;  %v2097_v58 = vmul.f32 %v1436_v18, %v1436_v18  ;;  %v2223_v59 = vadd.f32 %v2222_v23, %v2096_v47  ;;  %1872 = vst [vmem:[%s3636_s28 + $0x308] sm:$0xff] %v3828_v2  ;;  %v3833_v43 = vpop.f32.mrb[33].mxu1 }
 0x176   : > { %1871 = vst [vmem:[%s3636_s28 + $0x300] sm:$0xff] %v3833_v43  ;;  %v2105_v53 = vmul.f32 %v3693_v8, %v3693_v8 }
 0x177   : > { %v2224_v60 = vadd.f32 %v2223_v59, %v2097_v58  ;;  %v2689_v9 = vpop.f32.mrb[62].mxu0  ;;  %v1963_v61 = vadd.f32 %v2686_v48, %v1962_v57  ;;  %v2106_v59 = vmul.f32 %v3688_v3, %v3688_v3 }
 0x178   : > { %1838 = vst [vmem:[%s3636_s28 + $0x1f8] sm:$0xff] %v2689_v9  ;;  %v1446_v10 = vpop.f32.mrb[63].mxu0  ;;  %v2100_v19 = vmul.f32 %v2689_v9, %v2689_v9  ;;  %v3840_v27 = vpop.f32.mrb[34].mxu1 }
 0x179   : > { %1837 = vst [vmem:[%s3636_s28 + $0x1f0] sm:$0xff] %v1446_v10  ;;  %v1964_v11 = vadd.f32 %v1963_v61, %v1446_v10  ;;  %v2099_v12 = vmul.f32 %v1446_v10, %v1446_v10  ;;  %v2225_v35 = vadd.f32 %v2224_v60, %v2098_v52  ;;  %1874 = vst [vmem:[%s3636_s28 + $0x318] sm:$0xff] %v3840_v27  ;;  %v3844_v30 = vpop.f32.mrb[35].mxu1 }
 0x17a   : > { %1873 = vst [vmem:[%s3636_s28 + $0x310] sm:$0xff] %v3844_v30  ;;  %v2107_v60 = vmul.f32 %v3703_v46, %v3703_v46 }
 0x17b   : > { %v1965_v16 = vadd.f32 %v2689_v9, %v1964_v11  ;;  %v2226_v24 = vadd.f32 %v2225_v35, %v2099_v12  ;;  %v2108_v11 = vmul.f32 %v3698_v13, %v3698_v13  ;;  %v2109_v35 = vmul.f32 %v3713_v40, %v3713_v40 }
 0x17c   : > { %v3854_v36 = vpop.f32.mrb[36].mxu1 }
 0x17d   : > { %v2227_v15 = vadd.f32 %v2226_v24, %v2100_v19  ;;  %v1966_v49 = vadd.f32 %v1965_v16, %v3673_v29  ;;  %1876 = vst [vmem:[%s3636_s28 + $0x328] sm:$0xff] %v3854_v36  ;;  %v3858_v45 = vpop.f32.mrb[37].mxu1 }
 0x17e   : > { %1875 = vst [vmem:[%s3636_s28 + $0x320] sm:$0xff] %v3858_v45 }
 0x17f   : > { %v1967_v34 = vadd.f32 %v3668_v7, %v1966_v49  ;;  %v2228_v41 = vadd.f32 %v2227_v15, %v2101_v14  ;;  %v2104_v7 = vmul.f32 %v3678_v28, %v3678_v28  ;;  %v2110_v14 = vmul.f32 %v3708_v38, %v3708_v38 }
 0x180   : > { %v3868_v18 = vpop.f32.mrb[38].mxu1  ;;  %v2111_v49 = vmul.f32 %v3723_v25, %v3723_v25 }
 0x181   : > { %v2229_v29 = vadd.f32 %v2228_v41, %v2102_v33  ;;  %v1968_v47 = vadd.f32 %v1967_v34, %v3683_v4  ;;  %1878 = vst [vmem:[%s3636_s28 + $0x338] sm:$0xff] %v3868_v18  ;;  %v3872_v57 = vpop.f32.mrb[39].mxu1 }
 0x182   : > { %1877 = vst [vmem:[%s3636_s28 + $0x330] sm:$0xff] %v3872_v57 }
 0x183   : > { %v2230_v23 = vadd.f32 %v2229_v29, %v2103_v22  ;;  %v1969_v48 = vadd.f32 %v3678_v28, %v1968_v47  ;;  %v2112_v22 = vmul.f32 %v3718_v50, %v3718_v50  ;;  %v2113_v47 = vmul.f32 %v3733_v56, %v3733_v56 }
 0x184   : > { %v3882_v9 = vpop.f32.mrb[40].mxu1 }
 0x185   : > { %v1970_v4 = vadd.f32 %v1969_v48, %v3693_v8  ;;  %v2231_v58 = vadd.f32 %v2230_v23, %v2104_v7  ;;  %1880 = vst [vmem:[%s3636_s28 + $0x348] sm:$0xff] %v3882_v9  ;;  %v3886_v61 = vpop.f32.mrb[41].mxu1 }
 0x186   : > { %1879 = vst [vmem:[%s3636_s28 + $0x340] sm:$0xff] %v3886_v61 }
 0x187   : > { %v2232_v28 = vadd.f32 %v2231_v58, %v2105_v53  ;;  %v1971_v52 = vadd.f32 %v3688_v3, %v1970_v4  ;;  %v2114_v53 = vmul.f32 %v3728_v51, %v3728_v51  ;;  %v2115_v58 = vmul.f32 %v3743_v1, %v3743_v1 }
 0x188   : > { %v3896_v19 = vpop.f32.mrb[42].mxu1 }
 0x189   : > { %v1972_v8 = vadd.f32 %v1971_v52, %v3703_v46  ;;  %v2233_v10 = vadd.f32 %v2232_v28, %v2106_v59  ;;  %1882 = vst [vmem:[%s3636_s28 + $0x358] sm:$0xff] %v3896_v19  ;;  %v3900_v16 = vpop.f32.mrb[43].mxu1 }
 0x18a   : > { %1881 = vst [vmem:[%s3636_s28 + $0x350] sm:$0xff] %v3900_v16 }
 0x18b   : > { %v2234_v3 = vadd.f32 %v2233_v10, %v2107_v60  ;;  %v1973_v12 = vadd.f32 %v3698_v13, %v1972_v8  ;;  %v2116_v60 = vmul.f32 %v3738_v62, %v3738_v62  ;;  %v2117_v10 = vmul.f32 %v3753_v20, %v3753_v20 }
 0x18c   : > { %v3910_v33 = vpop.f32.mrb[44].mxu1 }
 0x18d   : > { %v1974_v46 = vadd.f32 %v1973_v12, %v3713_v40  ;;  %v2235_v24 = vadd.f32 %v2234_v3, %v2108_v11  ;;  %1884 = vst [vmem:[%s3636_s28 + $0x368] sm:$0xff] %v3910_v33  ;;  %v3914_v34 = vpop.f32.mrb[45].mxu1 }
 0x18e   : > { %1883 = vst [vmem:[%s3636_s28 + $0x360] sm:$0xff] %v3914_v34 }
 0x18f   : > { %v2236_v13 = vadd.f32 %v2235_v24, %v2109_v35  ;;  %v1975_v15 = vadd.f32 %v3708_v38, %v1974_v46  ;;  %v2118_v35 = vmul.f32 %v3748_v39, %v3748_v39  ;;  %v2119_v24 = vmul.f32 %v3763_v5, %v3763_v5 }
 0x190   : > { %v3924_v7 = vpop.f32.mrb[46].mxu1 }
 0x191   : > { %v1976_v40 = vadd.f32 %v1975_v15, %v3723_v25  ;;  %v2237_v41 = vadd.f32 %v2236_v13, %v2110_v14  ;;  %1886 = vst [vmem:[%s3636_s28 + $0x378] sm:$0xff] %v3924_v7  ;;  %v3928_v23 = vpop.f32.mrb[47].mxu1 }
 0x192   : > { %1885 = vst [vmem:[%s3636_s28 + $0x370] sm:$0xff] %v3928_v23 }
 0x193   : > { %v2238_v38 = vadd.f32 %v2237_v41, %v2111_v49  ;;  %v1977_v29 = vadd.f32 %v3718_v50, %v1976_v40  ;;  %v2120_v49 = vmul.f32 %v3758_v32, %v3758_v32  ;;  %v2121_v41 = vmul.f32 %v3773_v37, %v3773_v37 }
 0x194   : > { %v3938_v59 = vpop.f32.mrb[48].mxu1 }
 0x195   : > { %v1978_v25 = vadd.f32 %v1977_v29, %v3733_v56  ;;  %v2239_v48 = vadd.f32 %v2238_v38, %v2112_v22  ;;  %1888 = vst [vmem:[%s3636_s28 + $0x388] sm:$0xff] %v3938_v59  ;;  %v3942_v28 = vpop.f32.mrb[49].mxu1 }
 0x196   : > { %1887 = vst [vmem:[%s3636_s28 + $0x380] sm:$0xff] %v3942_v28 }
 0x197   : > { %v2240_v50 = vadd.f32 %v2239_v48, %v2113_v47  ;;  %v1979_v4 = vadd.f32 %v3728_v51, %v1978_v25  ;;  %v2122_v47 = vmul.f32 %v3768_v17, %v3768_v17  ;;  %v2123_v48 = vmul.f32 %v3783_v44, %v3783_v44 }
 0x198   : > { %v3952_v11 = vpop.f32.mrb[50].mxu1 }
 0x199   : > { %v1980_v56 = vadd.f32 %v1979_v4, %v3743_v1  ;;  %v2241_v52 = vadd.f32 %v2240_v50, %v2114_v53  ;;  %1890 = vst [vmem:[%s3636_s28 + $0x398] sm:$0xff] %v3952_v11  ;;  %v3956_v3 = vpop.f32.mrb[51].mxu1 }
 0x19a   : > { %1889 = vst [vmem:[%s3636_s28 + $0x390] sm:$0xff] %v3956_v3 }
 0x19b   : > { %v2242_v51 = vadd.f32 %v2241_v52, %v2115_v58  ;;  %v1981_v8 = vadd.f32 %v3738_v62, %v1980_v56  ;;  %v2124_v58 = vmul.f32 %v3778_v26, %v3778_v26  ;;  %v2125_v52 = vmul.f32 %v3793_v42, %v3793_v42 }
 0x19c   : > { %v3966_v14 = vpop.f32.mrb[52].mxu1 }
 0x19d   : > { %v1982_v1 = vadd.f32 %v1981_v8, %v3753_v20  ;;  %v2243_v12 = vadd.f32 %v2242_v51, %v2116_v60  ;;  %1892 = vst [vmem:[%s3636_s28 + $0x3a8] sm:$0xff] %v3966_v14  ;;  %v3970_v13 = vpop.f32.mrb[53].mxu1 }
 0x19e   : > { %1891 = vst [vmem:[%s3636_s28 + $0x3a0] sm:$0xff] %v3970_v13 }
 0x19f   : > { %v2244_v62 = vadd.f32 %v2243_v12, %v2117_v10  ;;  %v1983_v46 = vadd.f32 %v3748_v39, %v1982_v1  ;;  %v2126_v10 = vmul.f32 %v3788_v63, %v3788_v63  ;;  %v2127_v12 = vmul.f32 %v3803_v6, %v3803_v6 }
 0x1a0   : > { %v3980_v22 = vpop.f32.mrb[54].mxu1 }
 0x1a1   : > { %v1984_v20 = vadd.f32 %v1983_v46, %v3763_v5  ;;  %v2245_v15 = vadd.f32 %v2244_v62, %v2118_v35  ;;  %1894 = vst [vmem:[%s3636_s28 + $0x3b8] sm:$0xff] %v3980_v22  ;;  %v3984_v38 = vpop.f32.mrb[55].mxu1 }
 0x1a2   : > { %1893 = vst [vmem:[%s3636_s28 + $0x3b0] sm:$0xff] %v3984_v38 }
 0x1a3   : > { %v2246_v39 = vadd.f32 %v2245_v15, %v2119_v24  ;;  %v1985_v40 = vadd.f32 %v3758_v32, %v1984_v20  ;;  %v2128_v24 = vmul.f32 %v3798_v21, %v3798_v21  ;;  %v2129_v15 = vmul.f32 %v3813_v0, %v3813_v0 }
 0x1a4   : > { %v3994_v53 = vpop.f32.mrb[56].mxu1 }
 0x1a5   : > { %v1986_v5 = vadd.f32 %v1985_v40, %v3773_v37  ;;  %v2247_v29 = vadd.f32 %v2246_v39, %v2120_v49  ;;  %1896 = vst [vmem:[%s3636_s28 + $0x3c8] sm:$0xff] %v3994_v53  ;;  %v3998_v50 = vpop.f32.mrb[57].mxu1 }
 0x1a6   : > { %1895 = vst [vmem:[%s3636_s28 + $0x3c0] sm:$0xff] %v3998_v50 }
 0x1a7   : > { %v2248_v32 = vadd.f32 %v2247_v29, %v2121_v41  ;;  %v1987_v25 = vadd.f32 %v3768_v17, %v1986_v5  ;;  %v2130_v41 = vmul.f32 %v3808_v31, %v3808_v31  ;;  %v2131_v29 = vmul.f32 %v3823_v55, %v3823_v55 }
 0x1a8   : > { %v4008_v60 = vpop.f32.mrb[58].mxu1 }
 0x1a9   : > { %v1988_v37 = vadd.f32 %v1987_v25, %v3783_v44  ;;  %v2249_v4 = vadd.f32 %v2248_v32, %v2122_v47  ;;  %1898 = vst [vmem:[%s3636_s28 + $0x3d8] sm:$0xff] %v4008_v60  ;;  %v4012_v51 = vpop.f32.mrb[59].mxu1  ;;  %v2132_v25 = vmul.f32 %v3818_v54, %v3818_v54 }
 0x1aa   : > { %1897 = vst [vmem:[%s3636_s28 + $0x3d0] sm:$0xff] %v4012_v51 }
 0x1ab   : > { %v2250_v17 = vadd.f32 %v2249_v4, %v2123_v48  ;;  %v1989_v56 = vadd.f32 %v3778_v26, %v1988_v37  ;;  %v2133_v37 = vmul.f32 %v3833_v43, %v3833_v43 }
 0x1ac   : > { %v4022_v35 = vpop.f32.mrb[60].mxu1 }
 0x1ad   : > { %v1990_v44 = vadd.f32 %v1989_v56, %v3793_v42  ;;  %v2251_v8 = vadd.f32 %v2250_v17, %v2124_v58  ;;  %1900 = vst [vmem:[%s3636_s28 + $0x3e8] sm:$0xff] %v4022_v35  ;;  %v4026_v62 = vpop.f32.mrb[61].mxu1 }
 0x1ae   : > { %1899 = vst [vmem:[%s3636_s28 + $0x3e0] sm:$0xff] %v4026_v62 }
 0x1af   : > { %v2252_v26 = vadd.f32 %v2251_v8, %v2125_v52  ;;  %v1991_v1 = vadd.f32 %v3788_v63, %v1990_v44 }
 0x1b0   : > { %v4036_v49 = vpop.f32.mrb[62].mxu1 }
 0x1b1   : > { %v1992_v42 = vadd.f32 %v1991_v1, %v3803_v6  ;;  %v2253_v46 = vadd.f32 %v2252_v26, %v2126_v10  ;;  %1902 = vst [vmem:[%s3636_s28 + $0x3f8] sm:$0xff] %v4036_v49  ;;  %v4040_v39 = vpop.f32.mrb[63].mxu1 }
 0x1b2   : > { %1901 = vst [vmem:[%s3636_s28 + $0x3f0] sm:$0xff] %v4040_v39 }
 0x1b3   : > { %v2254_v20 = vadd.f32 %v2253_v46, %v2127_v12  ;;  %v1993_v63 = vadd.f32 %v3798_v21, %v1992_v42 }
 0x1b5   : > { %v1994_v6 = vadd.f32 %v1993_v63, %v3813_v0  ;;  %v2255_v40 = vadd.f32 %v2254_v20, %v2128_v24 }
 0x1b7   : > { %v2256_v5 = vadd.f32 %v2255_v40, %v2129_v15  ;;  %v1995_v21 = vadd.f32 %v3808_v31, %v1994_v6  ;;  %v2134_v31 = vmul.f32 %v3828_v2, %v3828_v2 }
 0x1b9   : > { %v1996_v47 = vadd.f32 %v1995_v21, %v3823_v55  ;;  %v2257_v32 = vadd.f32 %v2256_v5, %v2130_v41  ;;  %v2135_v55 = vmul.f32 %v3844_v30, %v3844_v30 }
 0x1bb   : > { %v2258_v48 = vadd.f32 %v2257_v32, %v2131_v29  ;;  %v1997_v0 = vadd.f32 %v3818_v54, %v1996_v47  ;;  %v2136_v54 = vmul.f32 %v3840_v27, %v3840_v27 }
 0x1bd   : > { %v1998_v4 = vadd.f32 %v1997_v0, %v3833_v43  ;;  %v2259_v58 = vadd.f32 %v2258_v48, %v2132_v25  ;;  %v2137_v43 = vmul.f32 %v3858_v45, %v3858_v45 }
 0x1bf   : > { %v2260_v17 = vadd.f32 %v2259_v58, %v2133_v37  ;;  %v1999_v56 = vadd.f32 %v3828_v2, %v1998_v4  ;;  %v2138_v2 = vmul.f32 %v3854_v36, %v3854_v36 }
 0x1c1   : > { %v2000_v52 = vadd.f32 %v1999_v56, %v3844_v30  ;;  %v2261_v44 = vadd.f32 %v2260_v17, %v2134_v31  ;;  %v2139_v30 = vmul.f32 %v3872_v57, %v3872_v57 }
 0x1c3   : > { %v2262_v8 = vadd.f32 %v2261_v44, %v2135_v55  ;;  %v2001_v10 = vadd.f32 %v3840_v27, %v2000_v52  ;;  %v2140_v27 = vmul.f32 %v3868_v18, %v3868_v18 }
 0x1c5   : > { %v2002_v26 = vadd.f32 %v2001_v10, %v3858_v45  ;;  %v2263_v1 = vadd.f32 %v2262_v8, %v2136_v54  ;;  %v2141_v45 = vmul.f32 %v3886_v61, %v3886_v61 }
 0x1c7   : > { %v2264_v12 = vadd.f32 %v2263_v1, %v2137_v43  ;;  %v2003_v42 = vadd.f32 %v3854_v36, %v2002_v26  ;;  %v2142_v36 = vmul.f32 %v3882_v9, %v3882_v9 }
 0x1c9   : > { %v2004_v46 = vadd.f32 %v2003_v42, %v3872_v57  ;;  %v2265_v24 = vadd.f32 %v2264_v12, %v2138_v2  ;;  %v2143_v57 = vmul.f32 %v3900_v16, %v3900_v16 }
 0x1cb   : > { %v2266_v20 = vadd.f32 %v2265_v24, %v2139_v30  ;;  %v2005_v63 = vadd.f32 %v3868_v18, %v2004_v46  ;;  %v2144_v18 = vmul.f32 %v3896_v19, %v3896_v19 }
 0x1cd   : > { %v2006_v15 = vadd.f32 %v2005_v63, %v3886_v61  ;;  %v2267_v6 = vadd.f32 %v2266_v20, %v2140_v27  ;;  %v2145_v61 = vmul.f32 %v3914_v34, %v3914_v34 }
 0x1cf   : > { %v2268_v40 = vadd.f32 %v2267_v6, %v2141_v45  ;;  %v2007_v41 = vadd.f32 %v3882_v9, %v2006_v15  ;;  %v2146_v9 = vmul.f32 %v3910_v33, %v3910_v33 }
 0x1d1   : > { %v2008_v5 = vadd.f32 %v2007_v41, %v3900_v16  ;;  %v2269_v21 = vadd.f32 %v2268_v40, %v2142_v36  ;;  %v2147_v16 = vmul.f32 %v3928_v23, %v3928_v23  ;;  %v2161_v36 = vmul.f32 %v4026_v62, %v4026_v62 }
 0x1d3   : > { %v2270_v29 = vadd.f32 %v2269_v21, %v2143_v57  ;;  %v2009_v47 = vadd.f32 %v3896_v19, %v2008_v5  ;;  %v2148_v19 = vmul.f32 %v3924_v7, %v3924_v7  ;;  %v2163_v5 = vmul.f32 %v4040_v39, %v4040_v39 }
 0x1d5   : > { %v2010_v32 = vadd.f32 %v2009_v47, %v3914_v34  ;;  %v2271_v25 = vadd.f32 %v2270_v29, %v2144_v18  ;;  %v2149_v34 = vmul.f32 %v3942_v28, %v3942_v28 }
 0x1d7   : > { %v2272_v48 = vadd.f32 %v2271_v25, %v2145_v61  ;;  %v2011_v0 = vadd.f32 %v3910_v33, %v2010_v32  ;;  %v2150_v33 = vmul.f32 %v3938_v59, %v3938_v59 }
 0x1d9   : > { %v2012_v37 = vadd.f32 %v2011_v0, %v3928_v23  ;;  %v2273_v4 = vadd.f32 %v2272_v48, %v2146_v9  ;;  %v2151_v23 = vmul.f32 %v3956_v3, %v3956_v3 }
 0x1db   : > { %v2274_v58 = vadd.f32 %v2273_v4, %v2147_v16  ;;  %v2013_v31 = vadd.f32 %v3924_v7, %v2012_v37  ;;  %v2152_v7 = vmul.f32 %v3952_v11, %v3952_v11 }
 0x1dd   : > { %v2014_v17 = vadd.f32 %v2013_v31, %v3942_v28  ;;  %v2275_v56 = vadd.f32 %v2274_v58, %v2148_v19  ;;  %v2153_v28 = vmul.f32 %v3970_v13, %v3970_v13 }
 0x1df   : > { %v2276_v55 = vadd.f32 %v2275_v56, %v2149_v34  ;;  %v2015_v52 = vadd.f32 %v3938_v59, %v2014_v17  ;;  %v2154_v59 = vmul.f32 %v3966_v14, %v3966_v14 }
 0x1e1   : > { %v2016_v44 = vadd.f32 %v2015_v52, %v3956_v3  ;;  %v2277_v54 = vadd.f32 %v2276_v55, %v2150_v33  ;;  %v2155_v3 = vmul.f32 %v3984_v38, %v3984_v38 }
 0x1e3   : > { %v2278_v8 = vadd.f32 %v2277_v54, %v2151_v23  ;;  %v2017_v10 = vadd.f32 %v3952_v11, %v2016_v44  ;;  %v2156_v11 = vmul.f32 %v3980_v22, %v3980_v22 }
 0x1e5   : > { %v2018_v43 = vadd.f32 %v2017_v10, %v3970_v13  ;;  %v2279_v26 = vadd.f32 %v2278_v8, %v2152_v7  ;;  %v2157_v13 = vmul.f32 %v3998_v50, %v3998_v50 }
 0x1e7   : > { %v2280_v1 = vadd.f32 %v2279_v26, %v2153_v28  ;;  %v2019_v2 = vadd.f32 %v3966_v14, %v2018_v43  ;;  %v2158_v14 = vmul.f32 %v3994_v53, %v3994_v53 }
 0x1e9   : > { %v2020_v12 = vadd.f32 %v2019_v2, %v3984_v38  ;;  %v2281_v42 = vadd.f32 %v2280_v1, %v2154_v59  ;;  %v2159_v38 = vmul.f32 %v4012_v51, %v4012_v51 }
 0x1eb   : > { %v2282_v30 = vadd.f32 %v2281_v42, %v2155_v3  ;;  %v2021_v46 = vadd.f32 %v3980_v22, %v2020_v12  ;;  %v2160_v22 = vmul.f32 %v4008_v60, %v4008_v60 }
 0x1ed   : > { %v2022_v24 = vadd.f32 %v2021_v46, %v3998_v50  ;;  %v2283_v27 = vadd.f32 %v2282_v30, %v2156_v11 }
 0x1ef   : > { %v2284_v20 = vadd.f32 %v2283_v27, %v2157_v13  ;;  %v2023_v63 = vadd.f32 %v3994_v53, %v2022_v24  ;;  %v2162_v53 = vmul.f32 %v4022_v35, %v4022_v35 }
 0x1f1   : > { %v2024_v45 = vadd.f32 %v2023_v63, %v4012_v51  ;;  %v2285_v15 = vadd.f32 %v2284_v20, %v2158_v14 }
 0x1f3   : > { %v2286_v6 = vadd.f32 %v2285_v15, %v2159_v38  ;;  %v2025_v50 = vadd.f32 %v4008_v60, %v2024_v45  ;;  %v2164_v60 = vmul.f32 %v4036_v49, %v4036_v49 }
 0x1f5   : > { %v2026_v40 = vadd.f32 %v2025_v50, %v4026_v62  ;;  %v2287_v41 = vadd.f32 %v2286_v6, %v2160_v22 }
 0x1f7   : > { %v2288_v57 = vadd.f32 %v2287_v41, %v2161_v36  ;;  %v2027_v51 = vadd.f32 %v4022_v35, %v2026_v40 }
 0x1f9   : > { %v2028_v21 = vadd.f32 %v2027_v51, %v4040_v39  ;;  %v2289_v18 = vadd.f32 %v2288_v57, %v2162_v53 }
 0x1fb   : > { %v2029_v29 = vadd.f32 %v4036_v49, %v2028_v21  ;;  %v2290_v62 = vadd.f32 %v2289_v18, %v2163_v5 }
 0x1fd   : > { %v2030_v47 = vrot.slane %v2029_v29, 4  ;;  %v2291_v61 = vadd.f32 %v2290_v62, %v2164_v60 }
 0x1ff   : > { %v2031_v32 = vadd.f32 %v2030_v47, %v2029_v29  ;;  %v2292_v25 = vrot.slane %v2291_v61, 4 }
 0x201   : > { %v2032_v9 = vrot.slane %v2031_v32, 2  ;;  %v2293_v48 = vadd.f32 %v2292_v25, %v2291_v61 }
 0x203   : > { %v2033_v35 = vadd.f32 %v2032_v9, %v2031_v32  ;;  %v2294_v0 = vrot.slane %v2293_v48, 2 }
 0x205   : > { %v2034_v16 = vrot.slane %v2033_v35, 1  ;;  %v2295_v37 = vadd.f32 %v2294_v0, %v2293_v48 }
 0x207   : > { %v2035_v39 = vadd.f32 %v2034_v16, %v2033_v35  ;;  %v2296_v4 = vrot.slane %v2295_v37, 1 }
 0x209   : > { %2036 = vst [vmem:[%s268_s30] sm:$0x1] %v2035_v39  ;;  %v2297_v49 = vadd.f32 %v2296_v4, %v2295_v37 }
 0x20b   : > { %2298 = vst [vmem:[%s271_s9] sm:$0x1] %v2297_v49 }
 0x20c PF: > { %s17_s21 = sadd.s32 1, %s2850_s21  }
 0x20d   : > { %p14_p5 = scmp.ge.s32.totalorder %s17_s21, 6  }
 0x20f   :  { %16 = sbr.rel (!%p14_p5) target bundleno = 1 (0x1), region = 90 }

// kernel: tile.57
= control target key start
LH: loop header
LB: loop body
LE: loop exit
PB: predicated region body
PF: predicated region fallthrough
CT: control target
= control target key end

     0   :  { %s22_s0 = inlined_call_operand.vmem [shape: f32[16], index: 0, kind: input, shape index: {}]   ;;  %s23_s1 = inlined_call_operand.vmem [shape: f32[2,16], index: 1, kind: output, shape index: {}]  }
   0x1   :  { %v4_v0 = vld [vmem:[%s22_s0] ss:$0 sm:$0xff] }
   0x2   :  { %5 = vst [vmem:[%s23_s1] sm:$0x3] %v4_v0 }

// kernel: tile.62
= control target key start
LH: loop header
LB: loop body
LE: loop exit
PB: predicated region body
PF: predicated region fallthrough
CT: control target
= control target key end

     0   :  { %s22_s0 = inlined_call_operand.vmem [shape: f32[16], index: 0, kind: input, shape index: {}]   ;;  %s23_s1 = inlined_call_operand.vmem [shape: f32[8,16], index: 1, kind: output, shape index: {}]  }
   0x1   :  { %v4_v0 = vld [vmem:[%s22_s0] ss:$0 sm:$0xff] }
   0x2   :  { %5 = vst [vmem:[%s23_s1] sm:$0xff] %v4_v0 }

// kernel: tile.63
= control target key start
LH: loop header
LB: loop body
LE: loop exit
PB: predicated region body
PF: predicated region fallthrough
CT: control target
= control target key end

     0   :  { %s67_s10 = smov 112   ;;  %s68_s11 = smov 80   ;;  %vm3_vm0 = vcmask 130048   ;;  %vm9_vm1 = vcmask 1048448   ;;  %vm15_vm2 = vcmask 917248   ;;  %vm21_vm3 = vcmask 786048   ;;  %s111_s0 = inlined_call_operand.vmem [shape: f32[8,16], index: 0, kind: input, shape index: {}]   ;;  %s112_s1 = inlined_call_operand.vmem [shape: f32[1,128], index: 1, kind: output, shape index: {}]  }
   0x1   :  { %v53_v0 = vld [vmem:[%s111_s0 + $0x7] sm:$0x1]   ;;  %v55_v1 = vld [vmem:[%s111_s0 + $0x5] sm:$0x1]   ;;  %v54_v2 = vld [vmem:[%s111_s0 + $0x6] sm:$0x1]  }
   0x2   :  { %7 = vrot.lane.b32.xlu0 %v53_v0, %s67_s10  ;;  %19 = vrot.lane.b32.xlu1 %v55_v1, %s68_s11  ;;  %v56_v3 = vld [vmem:[%s111_s0 + $0x4] sm:$0x1]   ;;  %v2_v4 = vld [vmem:[%s111_s0] sm:$0x1]   ;;  %s69_s18 = smov 96   ;;  %s70_s19 = smov 64  }
   0x3   :  { %4 = vst.msk [vmem:[#allocation0] sm:$0x1] %vm3_vm0, %v2_v4   ;;  %v57_v5 = vld [vmem:[%s111_s0 + $0x3] sm:$0x1]   ;;  %v58_v6 = vld [vmem:[%s111_s0 + $0x2] sm:$0x1]  }
   0x4   :  { %s71_s24 = smov 48   ;;  %s72_s25 = smov 32   ;;  %v59_v7 = vld [vmem:[%s111_s0 + $0x1] sm:$0x1]   ;;  %vm27_vm4 = vcmask 654848   ;;  %vm33_vm5 = vcmask 523648  }
   0x5   :  { %s73_s0 = smov 16   ;;  %vm39_vm6 = vcmask 392448   ;;  %vm45_vm7 = vcmask 261248  }
   0x6   :  { %13 = vrot.lane.b32.xlu0 %v54_v2, %s69_s18  ;;  %25 = vrot.lane.b32.xlu1 %v56_v3, %s70_s19 }
   0xa   :  { %31 = vrot.lane.b32.xlu0 %v57_v5, %s71_s24  ;;  %37 = vrot.lane.b32.xlu1 %v58_v6, %s72_s25 }
   0xe   :  { %43 = vrot.lane.b32.xlu0 %v59_v7, %s73_s0 }
  0x74   :  { %v8_v8 = vpop.permute.xlu0 %7   ;;  %v20_v9 = vpop.permute.xlu1 %19  }
  0x75   :  { %10 = vst.msk [vmem:[#allocation0] sm:$0x1] %vm9_vm1, %v8_v8  }
  0x78   :  { %v14_v10 = vpop.permute.xlu0 %13   ;;  %v26_v11 = vpop.permute.xlu1 %25  }
  0x79   :  { %16 = vst.msk [vmem:[#allocation0] sm:$0x1] %vm15_vm2, %v14_v10  }
  0x7a   :  { %22 = vst.msk [vmem:[#allocation0] sm:$0x1] %vm21_vm3, %v20_v9  }
  0x7b   :  { %28 = vst.msk [vmem:[#allocation0] sm:$0x1] %vm27_vm4, %v26_v11  }
  0x7c   :  { %v32_v12 = vpop.permute.xlu0 %31   ;;  %v38_v13 = vpop.permute.xlu1 %37  }
  0x7d   :  { %34 = vst.msk [vmem:[#allocation0] sm:$0x1] %vm33_vm5, %v32_v12  }
  0x7e   :  { %40 = vst.msk [vmem:[#allocation0] sm:$0x1] %vm39_vm6, %v38_v13  }
  0x80   :  { %v44_v14 = vpop.permute.xlu0 %43  }
  0x81   :  { %46 = vst.msk [vmem:[#allocation0] sm:$0x1] %vm45_vm7, %v44_v14  }
  0x88   :  { %v50_v15 = vld [vmem:[#allocation0] sm:$0x1] }
  0x89   :  { %52 = vst [vmem:[%s112_s1] sm:$0x1] %v50_v15 }

// kernel: tile.72
= control target key start
LH: loop header
LB: loop body
LE: loop exit
PB: predicated region body
PF: predicated region fallthrough
CT: control target
= control target key end

     0   :  { %s22_s0 = inlined_call_operand.vmem [shape: f32[32], index: 0, kind: input, shape index: {}]   ;;  %s23_s1 = inlined_call_operand.vmem [shape: f32[2,32], index: 1, kind: output, shape index: {}]  }
   0x1   :  { %v4_v0 = vld [vmem:[%s22_s0] ss:$0 sm:$0xff] }
   0x2   :  { %5 = vst [vmem:[%s23_s1] sm:$0x3] %v4_v0 }

// kernel: tile.77
= control target key start
LH: loop header
LB: loop body
LE: loop exit
PB: predicated region body
PF: predicated region fallthrough
CT: control target
= control target key end

     0   :  { %s22_s0 = inlined_call_operand.vmem [shape: f32[32], index: 0, kind: input, shape index: {}]   ;;  %s23_s1 = inlined_call_operand.vmem [shape: f32[4,32], index: 1, kind: output, shape index: {}]  }
   0x1   :  { %v4_v0 = vld [vmem:[%s22_s0] ss:$0 sm:$0xff] }
   0x2   :  { %5 = vst [vmem:[%s23_s1] sm:$0xf] %v4_v0 }

// kernel: tile.78
= control target key start
LH: loop header
LB: loop body
LE: loop exit
PB: predicated region body
PF: predicated region fallthrough
CT: control target
= control target key end

     0   :  { %vm7_vm0 = vcmask 261120   ;;  %s37_s8 = smov 32   ;;  %s38_s9 = smov 64   ;;  %vm13_vm1 = vcmask 1048320   ;;  %vm19_vm2 = vcmask 785920   ;;  %vm25_vm3 = vcmask 523520   ;;  %s55_s0 = inlined_call_operand.vmem [shape: f32[4,32], index: 0, kind: input, shape index: {}]   ;;  %s56_s1 = inlined_call_operand.vmem [shape: f32[1,128], index: 1, kind: output, shape index: {}]  }
   0x1   :  { %v4_v0 = vld [vmem:[%s55_s0] sm:$0xf]  ;;  %s36_s0 = smov 96  }
   0x2   :  { %5 = vst [vmem:[#allocation1] sm:$0xf] %v4_v0 }
   0x9   :  { %v10_v1 = vld [vmem:[#allocation1 + $0x3] sm:$0x1]   ;;  %v22_v2 = vld [vmem:[#allocation1 + $0x1] sm:$0x1]   ;;  %v6_v3 = vld [vmem:[#allocation1] sm:$0x1]  }
   0xa   :  { %11 = vrot.lane.b32.xlu0 %v10_v1, %s36_s0  ;;  %23 = vrot.lane.b32.xlu1 %v22_v2, %s37_s8  ;;  %v16_v4 = vld [vmem:[#allocation1 + $0x2] sm:$0x1]   ;;  %8 = vst.msk [vmem:[#allocation0] sm:$0x1] %vm7_vm0, %v6_v3  }
   0xe   :  { %17 = vrot.lane.b32.xlu0 %v16_v4, %s38_s9 }
  0x7c   :  { %v12_v5 = vpop.permute.xlu0 %11   ;;  %v24_v6 = vpop.permute.xlu1 %23  }
  0x7d   :  { %14 = vst.msk [vmem:[#allocation0] sm:$0x1] %vm13_vm1, %v12_v5  }
  0x80   :  { %v18_v7 = vpop.permute.xlu0 %17  }
  0x81   :  { %20 = vst.msk [vmem:[#allocation0] sm:$0x1] %vm19_vm2, %v18_v7  }
  0x82   :  { %26 = vst.msk [vmem:[#allocation0] sm:$0x1] %vm25_vm3, %v24_v6  }
  0x89   :  { %v30_v8 = vld [vmem:[#allocation0] sm:$0x1] }
  0x8a   :  { %32 = vst [vmem:[%s56_s1] sm:$0x1] %v30_v8 }

// kernel: tile.87
= control target key start
LH: loop header
LB: loop body
LE: loop exit
PB: predicated region body
PF: predicated region fallthrough
CT: control target
= control target key end

     0   :  { %s22_s0 = inlined_call_operand.vmem [shape: f32[64], index: 0, kind: input, shape index: {}]   ;;  %s23_s1 = inlined_call_operand.vmem [shape: f32[2,64], index: 1, kind: output, shape index: {}]  }
   0x1   :  { %v4_v0 = vld [vmem:[%s22_s0] ss:$0 sm:$0xff] }
   0x2   :  { %5 = vst [vmem:[%s23_s1] sm:$0x3] %v4_v0 }

// kernel: tile.88
= control target key start
LH: loop header
LB: loop body
LE: loop exit
PB: predicated region body
PF: predicated region fallthrough
CT: control target
= control target key end

     0   :  { %vm7_vm0 = vcmask 523264   ;;  %vm13_vm1 = vcmask 1048064   ;;  %s39_s0 = inlined_call_operand.vmem [shape: f32[2,64], index: 0, kind: input, shape index: {}]   ;;  %s40_s1 = inlined_call_operand.vmem [shape: f32[1,128], index: 1, kind: output, shape index: {}]  }
   0x1   :  { %v4_v0 = vld [vmem:[%s39_s0] sm:$0x3]  ;;  %s22_s0 = smov 64  }
   0x2   :  { %5 = vst [vmem:[#allocation1] sm:$0x3] %v4_v0 }
   0x9   :  { %v10_v1 = vld [vmem:[#allocation1 + $0x1] sm:$0x1]   ;;  %v6_v2 = vld [vmem:[#allocation1] sm:$0x1]  }
   0xa   :  { %11 = vrot.lane.b32.xlu0 %v10_v1, %s22_s0  ;;  %8 = vst.msk [vmem:[#allocation0] sm:$0x1] %vm7_vm0, %v6_v2  }
  0x7c   :  { %v12_v3 = vpop.permute.xlu0 %11  }
  0x7d   :  { %14 = vst.msk [vmem:[#allocation0] sm:$0x1] %vm13_vm1, %v12_v3  }
  0x84   :  { %v18_v4 = vld [vmem:[#allocation0] sm:$0x1] }
  0x85   :  { %20 = vst [vmem:[%s40_s1] sm:$0x1] %v18_v4 }

// kernel: mul.24
= control target key start
LH: loop header
LB: loop body
LE: loop exit
PB: predicated region body
PF: predicated region fallthrough
CT: control target
= control target key end

     0   :  { %vm7_vm0 = vcmask 523264   ;;  %vm13_vm1 = vcmask 1048064   ;;  %s39_s0 = inlined_call_operand.vmem [shape: f32[2,64,1], index: 0, kind: input, shape index: {}]   ;;  %s40_s1 = inlined_call_operand.vmem [shape: f32[128], index: 1, kind: output, shape index: {}]  }
   0x1   :  { %v4_v0 = vld [vmem:[%s39_s0] sm:$0x3]  ;;  %s22_s0 = smov 64  }
   0x2   :  { %5 = vst [vmem:[#allocation1] sm:$0x3] %v4_v0 }
   0x9   :  { %v10_v1 = vld [vmem:[#allocation1 + $0x1] sm:$0x1]   ;;  %v6_v2 = vld [vmem:[#allocation1] sm:$0x1]  }
   0xa   :  { %11 = vrot.lane.b32.xlu0 %v10_v1, %s22_s0  ;;  %8 = vst.msk [vmem:[#allocation0] sm:$0x1] %vm7_vm0, %v6_v2  }
  0x7c   :  { %v12_v3 = vpop.permute.xlu0 %11  }
  0x7d   :  { %14 = vst.msk [vmem:[#allocation0] sm:$0x1] %vm13_vm1, %v12_v3  }
  0x84   :  { %v18_v4 = vld [vmem:[#allocation0] sm:$0x1] }
  0x85   :  { %20 = vst [vmem:[%s40_s1] sm:$0x1] %v18_v4 }

// kernel: discriminator_forward.9
= control target key start
LH: loop header
LB: loop body
LE: loop exit
PB: predicated region body
PF: predicated region fallthrough
CT: control target
= control target key end

     0   :  { %s2144_s20 = smov 0   ;;  %s3394_s0 = inlined_call_operand.vmem [shape: f32[2,1563,128], index: 0, kind: input, shape index: {}]   ;;  %s3395_s1 = inlined_call_operand.vmem [shape: f32[1,128], index: 1, kind: input, shape index: {}]   ;;  %s3396_s2 = inlined_call_operand.vmem [shape: f32[1,128], index: 2, kind: input, shape index: {}]   ;;  %s3397_s3 = inlined_call_operand.vmem [shape: f32[1563,128], index: 3, kind: input, shape index: {}]   ;;  %s3398_s4 = inlined_call_operand.<no memory space> [shape: f32[1,1], index: 4, kind: input, shape index: {}]   ;;  %s3399_s5 = inlined_call_operand.vmem [shape: f32[2,1,128], index: 5, kind: output, shape index: {}]  }
   0x1   :  { %v10_v0 = vstv %s3398_s4 }
   0x2   :  { %11 = vst [vmem:[#allocation2] sm:$0x1] %v10_v0 }
   0x3 LB: > { %s2073_s21 = sadd.s32 4294967295, %s2108_s20   ;;  %p2077_p0 = scmp.ge.s32.totalorder %s2108_s20, 1  ;;  %s2108_s20 = sphi %s2144_s20, %s17_s20  }
   0x4   : > { %p189_p1 = scmp.lt.s32.totalorder %s2108_s20, 3 }
   0x6   : > { %p190_p2 = pnand %p2077_p0, %p189_p1 }
   0x7   : > { %p215_p3 = scmp.lt.s32.totalorder (!%p190_p2), %s2073_s21, 1  ;;  %v2165_v3 = vld [vmem:[%s3395_s1] ss:$0 sm:$0xff] (!%p190_p2)  ;;  %v1414_v33 = vld [vmem:[%s3397_s3 + $0x8] sm:$0xff] (!%p190_p2)  ;;  %v1415_v39 = vld [vmem:[%s3397_s3 + $0x10] sm:$0xff] (!%p190_p2) }
   0x8   : > { %193 = sbr.rel (%p190_p2) target bundleno = 725 (0x2d5), region = 40  ;;  %v2174_v8 = vld [vmem:[%s3396_s2] ss:$0 sm:$0xff] (!%p190_p2)  ;;  %v1416_v47 = vld [vmem:[%s3397_s3 + $0x18] sm:$0xff] (!%p190_p2)  ;;  %v1418_v62 = vld [vmem:[%s3397_s3 + $0x28] sm:$0xff] (!%p190_p2) }
   0x9   : > { %v1413_v32 = vld [vmem:[%s3397_s3] sm:$0xff] (!%p190_p2) }
   0xa   : > { %v1417_v54 = vld [vmem:[%s3397_s3 + $0x20] sm:$0xff] (!%p190_p2) }
   0xf   : > { %s3401_s21 = smov (!%p215_p3, %s2073_s21), 1 }
  0x10   : > { %s2083_s4 = smul.u32 1568, %s3401_s21  ;;  %s222_s18 = scalar_lea.vmem %s3399_s5, %s3401_s21 }
  0x12   : > { %s2158_s24 = scalar_lea.vmem %s3394_s0, %s2083_s4 }
  0x13   : > { %v223_v1 = vld [vmem:[%s2158_s24] sm:$0xff]  ;;  %v224_v2 = vld [vmem:[%s2158_s24 + $0x8] sm:$0xff]  ;;  %v225_v4 = vld [vmem:[%s2158_s24 + $0x10] sm:$0xff] }
  0x14   : > { %v426_v5 = vmul.f32 %v2165_v3, %v223_v1  ;;  %v427_v6 = vmul.f32 %v2165_v3, %v224_v2  ;;  %v226_v7 = vld [vmem:[%s2158_s24 + $0x18] sm:$0xff]  ;;  %v428_v9 = vmul.f32 %v2165_v3, %v225_v4  ;;  %v227_v10 = vld [vmem:[%s2158_s24 + $0x20] sm:$0xff]  ;;  %v228_v14 = vld [vmem:[%s2158_s24 + $0x28] sm:$0xff] }
  0x15   : > { %v429_v11 = vmul.f32 %v2165_v3, %v226_v7  ;;  %v430_v15 = vmul.f32 %v2165_v3, %v227_v10  ;;  %v229_v17 = vld [vmem:[%s2158_s24 + $0x30] sm:$0xff]  ;;  %v230_v18 = vld [vmem:[%s2158_s24 + $0x38] sm:$0xff]  ;;  %v431_v19 = vmul.f32 %v2165_v3, %v228_v14  ;;  %v231_v26 = vld [vmem:[%s2158_s24 + $0x40] sm:$0xff] }
  0x16   : > { %v629_v12 = vadd.f32 %v2174_v8, %v426_v5  ;;  %v630_v13 = vadd.f32 %v2174_v8, %v427_v6  ;;  %v631_v16 = vadd.f32 %v2174_v8, %v428_v9  ;;  %v432_v23 = vmul.f32 %v2165_v3, %v229_v17  ;;  %v232_v34 = vld [vmem:[%s2158_s24 + $0x48] sm:$0xff]  ;;  %v233_v40 = vld [vmem:[%s2158_s24 + $0x50] sm:$0xff]  ;;  %v234_v48 = vld [vmem:[%s2158_s24 + $0x58] sm:$0xff] }
  0x17   : > { %v632_v20 = vadd.f32 %v2174_v8, %v429_v11  ;;  %v633_v24 = vadd.f32 %v2174_v8, %v430_v15  ;;  %v433_v27 = vmul.f32 %v2165_v3, %v230_v18  ;;  %v634_v28 = vadd.f32 %v2174_v8, %v431_v19  ;;  %v235_v55 = vld [vmem:[%s2158_s24 + $0x60] sm:$0xff]  ;;  %v236_v63 = vld [vmem:[%s2158_s24 + $0x68] sm:$0xff]  ;;  %v1419_v7 = vld [vmem:[%s3397_s3 + $0x30] sm:$0xff] }
  0x18   : > { %v1021_v21 = vmul.f32 0.2, %v629_v12  ;;  %v1022_v22 = vmul.f32 0.2, %v630_v13  ;;  %vm825_vm0 = vcmp.ge.f32.partialorder %v629_v12, 0.0  ;;  %vm826_vm1 = vcmp.ge.f32.partialorder %v630_v13, 0.0 }
  0x19   : > { %v1023_v25 = vmul.f32 0.2, %v631_v16  ;;  %vm827_vm2 = vcmp.ge.f32.partialorder %v631_v16, 0.0  ;;  %v1024_v29 = vmul.f32 0.2, %v632_v20  ;;  %vm828_vm3 = vcmp.ge.f32.partialorder %v632_v20, 0.0 }
  0x1a   : > { %v1217_v30 = vsel %vm825_vm0, %v629_v12, %v1021_v21  ;;  %v1218_v31 = vsel %vm826_vm1, %v630_v13, %v1022_v22  ;;  %v434_v35 = vmul.f32 %v2165_v3, %v231_v26  ;;  %v635_v36 = vadd.f32 %v2174_v8, %v432_v23  ;;  %v237_v9 = vld [vmem:[%s2158_s24 + $0x70] sm:$0xff]  ;;  %v238_v17 = vld [vmem:[%s2158_s24 + $0x78] sm:$0xff] }
  0x1b   : > { %v1025_v37 = vmul.f32 0.2, %v633_v24  ;;  %v1219_v38 = vsel %vm827_vm2, %v631_v16, %v1023_v25  ;;  %vm829_vm4 = vcmp.ge.f32.partialorder %v633_v24, 0.0  ;;  %v1609_v41 = vmul.f32 %v1413_v32, %v1217_v30  ;;  %v1420_v16 = vld [vmem:[%s3397_s3 + $0x38] sm:$0xff]  ;;  %v239_v25 = vld [vmem:[%s2158_s24 + $0x80] sm:$0xff]  ;;  %v1422_v32 = vld [vmem:[%s3397_s3 + $0x48] sm:$0xff] }
  0x1c   : > { %v1610_v42 = vmul.f32 %v1414_v33, %v1218_v31  ;;  %v435_v43 = vmul.f32 %v2165_v3, %v232_v34  ;;  %v636_v44 = vadd.f32 %v2174_v8, %v433_v27  ;;  %v1026_v45 = vmul.f32 0.2, %v634_v28  ;;  %v240_v33 = vld [vmem:[%s2158_s24 + $0x88] sm:$0xff] }
  0x1d   : > { %v1220_v46 = vsel %vm828_vm3, %v632_v20, %v1024_v29  ;;  %vm830_vm5 = vcmp.ge.f32.partialorder %v634_v28, 0.0  ;;  %v1611_v49 = vmul.f32 %v1415_v39, %v1219_v38  ;;  %v436_v50 = vmul.f32 %v2165_v3, %v233_v40  ;;  %v1423_v40 = vld [vmem:[%s3397_s3 + $0x50] sm:$0xff] }
  0x1e   : > { %v637_v51 = vadd.f32 %v2174_v8, %v434_v35  ;;  %v1027_v52 = vmul.f32 0.2, %v635_v36  ;;  %v1221_v53 = vsel %vm829_vm4, %v633_v24, %v1025_v37  ;;  %vm831_vm6 = vcmp.ge.f32.partialorder %v635_v36, 0.0  ;;  %v1421_v24 = vld [vmem:[%s3397_s3 + $0x40] sm:$0xff] }
  0x1f   : > { %v1612_v56 = vmul.f32 %v1416_v47, %v1220_v46  ;;  %v1805_v57 = vadd.f32 %v1610_v42, %v1609_v41  ;;  %v437_v58 = vmul.f32 %v2165_v3, %v234_v48  ;;  %v638_v59 = vadd.f32 %v2174_v8, %v435_v43  ;;  %v241_v41 = vld [vmem:[%s2158_s24 + $0x90] sm:$0xff]  ;;  %v1424_v48 = vld [vmem:[%s3397_s3 + $0x58] sm:$0xff] }
  0x20   : > { %v1028_v60 = vmul.f32 0.2, %v636_v44  ;;  %v1222_v61 = vsel %vm830_vm5, %v634_v28, %v1026_v45  ;;  %vm832_vm7 = vcmp.ge.f32.partialorder %v636_v44, 0.0  ;;  %v1613_v0 = vmul.f32 %v1417_v54, %v1221_v53 }
  0x21   : > { %v1806_v1 = vadd.f32 %v1805_v57, %v1611_v49  ;;  %v438_v2 = vmul.f32 %v2165_v3, %v235_v55  ;;  %v639_v4 = vadd.f32 %v2174_v8, %v436_v50  ;;  %v1029_v5 = vmul.f32 0.2, %v637_v51  ;;  %v242_v49 = vld [vmem:[%s2158_s24 + $0x98] sm:$0xff]  ;;  %v243_v57 = vld [vmem:[%s2158_s24 + $0xa0] sm:$0xff] }
  0x22   : > { %v1223_v6 = vsel %vm831_vm6, %v635_v36, %v1027_v52  ;;  %vm833_vm8 = vcmp.ge.f32.partialorder %v637_v51, 0.0  ;;  %v1614_v10 = vmul.f32 %v1418_v62, %v1222_v61  ;;  %v439_v12 = vmul.f32 %v2165_v3, %v236_v63 }
  0x23   : > { %v1807_v11 = vadd.f32 %v1806_v1, %v1612_v56  ;;  %v640_v13 = vadd.f32 %v2174_v8, %v437_v58  ;;  %v1030_v14 = vmul.f32 0.2, %v638_v59  ;;  %v1224_v15 = vsel %vm832_vm7, %v636_v44, %v1028_v60  ;;  %v1425_v56 = vld [vmem:[%s3397_s3 + $0x60] sm:$0xff]  ;;  %v244_v1 = vld [vmem:[%s2158_s24 + $0xa8] sm:$0xff] }
  0x24   : > { %vm834_vm9 = vcmp.ge.f32.partialorder %v638_v59, 0.0  ;;  %v1615_v18 = vmul.f32 %v1419_v7, %v1223_v6  ;;  %v440_v20 = vmul.f32 %v2165_v3, %v237_v9  ;;  %v641_v21 = vadd.f32 %v2174_v8, %v438_v2 }
  0x25   : > { %v1808_v19 = vadd.f32 %v1807_v11, %v1613_v0  ;;  %v1031_v22 = vmul.f32 0.2, %v639_v4  ;;  %v1225_v23 = vsel %vm833_vm8, %v637_v51, %v1029_v5  ;;  %vm835_vm10 = vcmp.ge.f32.partialorder %v639_v4, 0.0  ;;  %v1426_v0 = vld [vmem:[%s3397_s3 + $0x68] sm:$0xff]  ;;  %v245_v11 = vld [vmem:[%s2158_s24 + $0xb0] sm:$0xff] }
  0x26   : > { %v1616_v26 = vmul.f32 %v1420_v16, %v1224_v15  ;;  %v441_v28 = vmul.f32 %v2165_v3, %v238_v17  ;;  %v642_v29 = vadd.f32 %v2174_v8, %v439_v12  ;;  %v1032_v30 = vmul.f32 0.2, %v640_v13 }
  0x27   : > { %v1809_v27 = vadd.f32 %v1808_v19, %v1614_v10  ;;  %v1226_v31 = vsel %vm834_vm9, %v638_v59, %v1030_v14  ;;  %vm836_vm11 = vcmp.ge.f32.partialorder %v640_v13, 0.0  ;;  %v1617_v34 = vmul.f32 %v1421_v24, %v1225_v23  ;;  %v1427_v10 = vld [vmem:[%s3397_s3 + $0x70] sm:$0xff]  ;;  %v246_v19 = vld [vmem:[%s2158_s24 + $0xb8] sm:$0xff] }
  0x28   : > { %v442_v36 = vmul.f32 %v2165_v3, %v239_v25  ;;  %v643_v37 = vadd.f32 %v2174_v8, %v440_v20  ;;  %v1033_v38 = vmul.f32 0.2, %v641_v21  ;;  %v1227_v39 = vsel %vm835_vm10, %v639_v4, %v1031_v22 }
  0x29   : > { %v1810_v35 = vadd.f32 %v1809_v27, %v1615_v18  ;;  %vm837_vm12 = vcmp.ge.f32.partialorder %v641_v21, 0.0  ;;  %v1618_v42 = vmul.f32 %v1422_v32, %v1226_v31  ;;  %v443_v44 = vmul.f32 %v2165_v3, %v240_v33  ;;  %v1428_v18 = vld [vmem:[%s3397_s3 + $0x78] sm:$0xff]  ;;  %v247_v27 = vld [vmem:[%s2158_s24 + $0xc0] sm:$0xff] }
  0x2a   : > { %v644_v45 = vadd.f32 %v2174_v8, %v441_v28  ;;  %v1034_v46 = vmul.f32 0.2, %v642_v29  ;;  %v1228_v47 = vsel %vm836_vm11, %v640_v13, %v1032_v30  ;;  %vm838_vm13 = vcmp.ge.f32.partialorder %v642_v29, 0.0 }
  0x2b   : > { %v1811_v43 = vadd.f32 %v1810_v35, %v1616_v26  ;;  %v1619_v50 = vmul.f32 %v1423_v40, %v1227_v39  ;;  %v444_v52 = vmul.f32 %v2165_v3, %v241_v41  ;;  %v645_v53 = vadd.f32 %v2174_v8, %v442_v36  ;;  %v1429_v26 = vld [vmem:[%s3397_s3 + $0x80] sm:$0xff]  ;;  %v248_v35 = vld [vmem:[%s2158_s24 + $0xc8] sm:$0xff] }
  0x2c   : > { %v1035_v54 = vmul.f32 0.2, %v643_v37  ;;  %v1229_v55 = vsel %vm837_vm12, %v641_v21, %v1033_v38  ;;  %vm839_vm14 = vcmp.ge.f32.partialorder %v643_v37, 0.0  ;;  %v1620_v58 = vmul.f32 %v1424_v48, %v1228_v47 }
  0x2d   : > { %v1812_v51 = vadd.f32 %v1811_v43, %v1617_v34  ;;  %v445_v60 = vmul.f32 %v2165_v3, %v242_v49  ;;  %v646_v61 = vadd.f32 %v2174_v8, %v443_v44  ;;  %v1036_v62 = vmul.f32 0.2, %v644_v45  ;;  %v1430_v34 = vld [vmem:[%s3397_s3 + $0x88] sm:$0xff]  ;;  %v249_v43 = vld [vmem:[%s2158_s24 + $0xd0] sm:$0xff] }
  0x2e   : > { %v1230_v63 = vsel %vm838_vm13, %v642_v29, %v1034_v46  ;;  %vm840_vm15 = vcmp.ge.f32.partialorder %v644_v45, 0.0  ;;  %v1621_v2 = vmul.f32 %v1425_v56, %v1229_v55  ;;  %v446_v5 = vmul.f32 %v2165_v3, %v243_v57 }
  0x2f   : > { %v1813_v59 = vadd.f32 %v1812_v51, %v1618_v42  ;;  %v647_v6 = vadd.f32 %v2174_v8, %v444_v52  ;;  %v1037_v7 = vmul.f32 0.2, %v645_v53  ;;  %v1231_v9 = vsel %vm839_vm14, %v643_v37, %v1035_v54  ;;  %v1431_v42 = vld [vmem:[%s3397_s3 + $0x90] sm:$0xff]  ;;  %v250_v51 = vld [vmem:[%s2158_s24 + $0xd8] sm:$0xff] }
  0x30   : > { %vm841_vm0 = vcmp.ge.f32.partialorder %v645_v53, 0.0  ;;  %v1622_v12 = vmul.f32 %v1426_v0, %v1230_v63  ;;  %v447_v14 = vmul.f32 %v2165_v3, %v244_v1  ;;  %v648_v15 = vadd.f32 %v2174_v8, %v445_v60 }
  0x31   : > { %v1814_v4 = vadd.f32 %v1813_v59, %v1619_v50  ;;  %v1038_v16 = vmul.f32 0.2, %v646_v61  ;;  %v1232_v17 = vsel %vm840_vm15, %v644_v45, %v1036_v62  ;;  %vm842_vm1 = vcmp.ge.f32.partialorder %v646_v61, 0.0  ;;  %v1432_v50 = vld [vmem:[%s3397_s3 + $0x98] sm:$0xff]  ;;  %v251_v59 = vld [vmem:[%s2158_s24 + $0xe0] sm:$0xff] }
  0x32   : > { %v1623_v20 = vmul.f32 %v1427_v10, %v1231_v9  ;;  %v448_v22 = vmul.f32 %v2165_v3, %v245_v11  ;;  %v649_v23 = vadd.f32 %v2174_v8, %v446_v5  ;;  %v1039_v24 = vmul.f32 0.2, %v647_v6 }
  0x33   : > { %v1815_v13 = vadd.f32 %v1814_v4, %v1620_v58  ;;  %v1233_v25 = vsel %vm841_vm0, %v645_v53, %v1037_v7  ;;  %vm843_vm2 = vcmp.ge.f32.partialorder %v647_v6, 0.0  ;;  %v1624_v28 = vmul.f32 %v1428_v18, %v1232_v17  ;;  %v1433_v58 = vld [vmem:[%s3397_s3 + $0xa0] sm:$0xff]  ;;  %v252_v4 = vld [vmem:[%s2158_s24 + $0xe8] sm:$0xff] }
  0x34   : > { %v449_v30 = vmul.f32 %v2165_v3, %v246_v19  ;;  %v650_v31 = vadd.f32 %v2174_v8, %v447_v14  ;;  %v1040_v32 = vmul.f32 0.2, %v648_v15  ;;  %v1234_v33 = vsel %vm842_vm1, %v646_v61, %v1038_v16 }
  0x35   : > { %v1816_v21 = vadd.f32 %v1815_v13, %v1621_v2  ;;  %vm844_vm3 = vcmp.ge.f32.partialorder %v648_v15, 0.0  ;;  %v1625_v36 = vmul.f32 %v1429_v26, %v1233_v25  ;;  %v450_v38 = vmul.f32 %v2165_v3, %v247_v27  ;;  %v1434_v2 = vld [vmem:[%s3397_s3 + $0xa8] sm:$0xff]  ;;  %v253_v13 = vld [vmem:[%s2158_s24 + $0xf0] sm:$0xff] }
  0x36   : > { %v651_v39 = vadd.f32 %v2174_v8, %v448_v22  ;;  %v1041_v40 = vmul.f32 0.2, %v649_v23  ;;  %v1235_v41 = vsel %vm843_vm2, %v647_v6, %v1039_v24  ;;  %vm845_vm4 = vcmp.ge.f32.partialorder %v649_v23, 0.0 }
  0x37   : > { %v1817_v29 = vadd.f32 %v1816_v21, %v1622_v12  ;;  %v1626_v44 = vmul.f32 %v1430_v34, %v1234_v33  ;;  %v451_v46 = vmul.f32 %v2165_v3, %v248_v35  ;;  %v652_v47 = vadd.f32 %v2174_v8, %v449_v30  ;;  %v1435_v12 = vld [vmem:[%s3397_s3 + $0xb0] sm:$0xff]  ;;  %v254_v21 = vld [vmem:[%s2158_s24 + $0xf8] sm:$0xff] }
  0x38   : > { %v1042_v48 = vmul.f32 0.2, %v650_v31  ;;  %v1236_v49 = vsel %vm844_vm3, %v648_v15, %v1040_v32  ;;  %vm846_vm5 = vcmp.ge.f32.partialorder %v650_v31, 0.0  ;;  %v1627_v52 = vmul.f32 %v1431_v42, %v1235_v41 }
  0x39   : > { %v1818_v37 = vadd.f32 %v1817_v29, %v1623_v20  ;;  %v452_v54 = vmul.f32 %v2165_v3, %v249_v43  ;;  %v653_v55 = vadd.f32 %v2174_v8, %v450_v38  ;;  %v1043_v56 = vmul.f32 0.2, %v651_v39  ;;  %v1436_v20 = vld [vmem:[%s3397_s3 + $0xb8] sm:$0xff]  ;;  %v255_v29 = vld [vmem:[%s2158_s24 + $0x100] sm:$0xff] }
  0x3a   : > { %v1237_v57 = vsel %vm845_vm4, %v649_v23, %v1041_v40  ;;  %vm847_vm6 = vcmp.ge.f32.partialorder %v651_v39, 0.0  ;;  %v1628_v60 = vmul.f32 %v1432_v50, %v1236_v49  ;;  %v453_v62 = vmul.f32 %v2165_v3, %v250_v51 }
  0x3b   : > { %v1819_v45 = vadd.f32 %v1818_v37, %v1624_v28  ;;  %v654_v63 = vadd.f32 %v2174_v8, %v451_v46  ;;  %v1044_v0 = vmul.f32 0.2, %v652_v47  ;;  %v1238_v1 = vsel %vm846_vm5, %v650_v31, %v1042_v48  ;;  %v1437_v28 = vld [vmem:[%s3397_s3 + $0xc0] sm:$0xff]  ;;  %v256_v37 = vld [vmem:[%s2158_s24 + $0x108] sm:$0xff] }
  0x3c   : > { %vm848_vm7 = vcmp.ge.f32.partialorder %v652_v47, 0.0  ;;  %v1629_v5 = vmul.f32 %v1433_v58, %v1237_v57  ;;  %v454_v7 = vmul.f32 %v2165_v3, %v251_v59  ;;  %v655_v9 = vadd.f32 %v2174_v8, %v452_v54 }
  0x3d   : > { %v1820_v53 = vadd.f32 %v1819_v45, %v1625_v36  ;;  %v1045_v10 = vmul.f32 0.2, %v653_v55  ;;  %v1239_v11 = vsel %vm847_vm6, %v651_v39, %v1043_v56  ;;  %vm849_vm8 = vcmp.ge.f32.partialorder %v653_v55, 0.0  ;;  %v1438_v36 = vld [vmem:[%s3397_s3 + $0xc8] sm:$0xff]  ;;  %v257_v45 = vld [vmem:[%s2158_s24 + $0x110] sm:$0xff] }
  0x3e   : > { %v1630_v14 = vmul.f32 %v1434_v2, %v1238_v1  ;;  %v455_v16 = vmul.f32 %v2165_v3, %v252_v4  ;;  %v656_v17 = vadd.f32 %v2174_v8, %v453_v62  ;;  %v1046_v18 = vmul.f32 0.2, %v654_v63 }
  0x3f   : > { %v1821_v61 = vadd.f32 %v1820_v53, %v1626_v44  ;;  %v1240_v19 = vsel %vm848_vm7, %v652_v47, %v1044_v0  ;;  %vm850_vm9 = vcmp.ge.f32.partialorder %v654_v63, 0.0  ;;  %v1631_v22 = vmul.f32 %v1435_v12, %v1239_v11  ;;  %v1439_v44 = vld [vmem:[%s3397_s3 + $0xd0] sm:$0xff]  ;;  %v258_v53 = vld [vmem:[%s2158_s24 + $0x118] sm:$0xff] }
  0x40   : > { %v456_v24 = vmul.f32 %v2165_v3, %v253_v13  ;;  %v657_v25 = vadd.f32 %v2174_v8, %v454_v7  ;;  %v1047_v26 = vmul.f32 0.2, %v655_v9  ;;  %v1241_v27 = vsel %vm849_vm8, %v653_v55, %v1045_v10 }
  0x41   : > { %v1822_v6 = vadd.f32 %v1821_v61, %v1627_v52  ;;  %vm851_vm10 = vcmp.ge.f32.partialorder %v655_v9, 0.0  ;;  %v1632_v30 = vmul.f32 %v1436_v20, %v1240_v19  ;;  %v457_v32 = vmul.f32 %v2165_v3, %v254_v21  ;;  %v1440_v52 = vld [vmem:[%s3397_s3 + $0xd8] sm:$0xff]  ;;  %v259_v61 = vld [vmem:[%s2158_s24 + $0x120] sm:$0xff] }
  0x42   : > { %v658_v33 = vadd.f32 %v2174_v8, %v455_v16  ;;  %v1048_v34 = vmul.f32 0.2, %v656_v17  ;;  %v1242_v35 = vsel %vm850_vm9, %v654_v63, %v1046_v18  ;;  %vm852_vm11 = vcmp.ge.f32.partialorder %v656_v17, 0.0 }
  0x43   : > { %v1823_v15 = vadd.f32 %v1822_v6, %v1628_v60  ;;  %v1633_v38 = vmul.f32 %v1437_v28, %v1241_v27  ;;  %v458_v40 = vmul.f32 %v2165_v3, %v255_v29  ;;  %v659_v41 = vadd.f32 %v2174_v8, %v456_v24  ;;  %v1441_v60 = vld [vmem:[%s3397_s3 + $0xe0] sm:$0xff]  ;;  %v260_v6 = vld [vmem:[%s2158_s24 + $0x128] sm:$0xff] }
  0x44   : > { %v1049_v42 = vmul.f32 0.2, %v657_v25  ;;  %v1243_v43 = vsel %vm851_vm10, %v655_v9, %v1047_v26  ;;  %vm853_vm12 = vcmp.ge.f32.partialorder %v657_v25, 0.0  ;;  %v1634_v46 = vmul.f32 %v1438_v36, %v1242_v35 }
  0x45   : > { %v1824_v23 = vadd.f32 %v1823_v15, %v1629_v5  ;;  %v459_v48 = vmul.f32 %v2165_v3, %v256_v37  ;;  %v660_v49 = vadd.f32 %v2174_v8, %v457_v32  ;;  %v1050_v50 = vmul.f32 0.2, %v658_v33  ;;  %v1442_v5 = vld [vmem:[%s3397_s3 + $0xe8] sm:$0xff]  ;;  %v261_v15 = vld [vmem:[%s2158_s24 + $0x130] sm:$0xff] }
  0x46   : > { %v1244_v51 = vsel %vm852_vm11, %v656_v17, %v1048_v34  ;;  %vm854_vm13 = vcmp.ge.f32.partialorder %v658_v33, 0.0  ;;  %v1635_v54 = vmul.f32 %v1439_v44, %v1243_v43  ;;  %v460_v56 = vmul.f32 %v2165_v3, %v257_v45 }
  0x47   : > { %v1825_v31 = vadd.f32 %v1824_v23, %v1630_v14  ;;  %v661_v57 = vadd.f32 %v2174_v8, %v458_v40  ;;  %v1051_v58 = vmul.f32 0.2, %v659_v41  ;;  %v1245_v59 = vsel %vm853_vm12, %v657_v25, %v1049_v42  ;;  %v1443_v14 = vld [vmem:[%s3397_s3 + $0xf0] sm:$0xff]  ;;  %v262_v23 = vld [vmem:[%s2158_s24 + $0x138] sm:$0xff] }
  0x48   : > { %vm855_vm14 = vcmp.ge.f32.partialorder %v659_v41, 0.0  ;;  %v1636_v62 = vmul.f32 %v1440_v52, %v1244_v51  ;;  %v461_v0 = vmul.f32 %v2165_v3, %v258_v53  ;;  %v662_v1 = vadd.f32 %v2174_v8, %v459_v48 }
  0x49   : > { %v1826_v39 = vadd.f32 %v1825_v31, %v1631_v22  ;;  %v1052_v2 = vmul.f32 0.2, %v660_v49  ;;  %v1246_v4 = vsel %vm854_vm13, %v658_v33, %v1050_v50  ;;  %vm856_vm15 = vcmp.ge.f32.partialorder %v660_v49, 0.0  ;;  %v1444_v22 = vld [vmem:[%s3397_s3 + $0xf8] sm:$0xff]  ;;  %v263_v31 = vld [vmem:[%s2158_s24 + $0x140] sm:$0xff] }
  0x4a   : > { %v1637_v7 = vmul.f32 %v1441_v60, %v1245_v59  ;;  %v462_v10 = vmul.f32 %v2165_v3, %v259_v61  ;;  %v663_v11 = vadd.f32 %v2174_v8, %v460_v56  ;;  %v1053_v12 = vmul.f32 0.2, %v661_v57 }
  0x4b   : > { %v1827_v47 = vadd.f32 %v1826_v39, %v1632_v30  ;;  %v1247_v13 = vsel %vm855_vm14, %v659_v41, %v1051_v58  ;;  %vm857_vm0 = vcmp.ge.f32.partialorder %v661_v57, 0.0  ;;  %v1638_v16 = vmul.f32 %v1442_v5, %v1246_v4  ;;  %v1445_v30 = vld [vmem:[%s3397_s3 + $0x100] sm:$0xff]  ;;  %v264_v39 = vld [vmem:[%s2158_s24 + $0x148] sm:$0xff] }
  0x4c   : > { %v463_v18 = vmul.f32 %v2165_v3, %v260_v6  ;;  %v664_v19 = vadd.f32 %v2174_v8, %v461_v0  ;;  %v1054_v20 = vmul.f32 0.2, %v662_v1  ;;  %v1248_v21 = vsel %vm856_vm15, %v660_v49, %v1052_v2 }
  0x4d   : > { %v1828_v55 = vadd.f32 %v1827_v47, %v1633_v38  ;;  %vm858_vm1 = vcmp.ge.f32.partialorder %v662_v1, 0.0  ;;  %v1639_v24 = vmul.f32 %v1443_v14, %v1247_v13  ;;  %v464_v26 = vmul.f32 %v2165_v3, %v261_v15  ;;  %v1446_v38 = vld [vmem:[%s3397_s3 + $0x108] sm:$0xff]  ;;  %v265_v47 = vld [vmem:[%s2158_s24 + $0x150] sm:$0xff] }
  0x4e   : > { %v665_v27 = vadd.f32 %v2174_v8, %v462_v10  ;;  %v1055_v28 = vmul.f32 0.2, %v663_v11  ;;  %v1249_v29 = vsel %vm857_vm0, %v661_v57, %v1053_v12  ;;  %vm859_vm2 = vcmp.ge.f32.partialorder %v663_v11, 0.0 }
  0x4f   : > { %v1829_v63 = vadd.f32 %v1828_v55, %v1634_v46  ;;  %v1640_v32 = vmul.f32 %v1444_v22, %v1248_v21  ;;  %v465_v34 = vmul.f32 %v2165_v3, %v262_v23  ;;  %v666_v35 = vadd.f32 %v2174_v8, %v463_v18  ;;  %v1447_v46 = vld [vmem:[%s3397_s3 + $0x110] sm:$0xff]  ;;  %v266_v55 = vld [vmem:[%s2158_s24 + $0x158] sm:$0xff] }
  0x50   : > { %v1056_v36 = vmul.f32 0.2, %v664_v19  ;;  %v1250_v37 = vsel %vm858_vm1, %v662_v1, %v1054_v20  ;;  %vm860_vm3 = vcmp.ge.f32.partialorder %v664_v19, 0.0  ;;  %v1641_v40 = vmul.f32 %v1445_v30, %v1249_v29 }
  0x51   : > { %v1830_v9 = vadd.f32 %v1829_v63, %v1635_v54  ;;  %v466_v42 = vmul.f32 %v2165_v3, %v263_v31  ;;  %v667_v43 = vadd.f32 %v2174_v8, %v464_v26  ;;  %v1057_v44 = vmul.f32 0.2, %v665_v27  ;;  %v1448_v54 = vld [vmem:[%s3397_s3 + $0x118] sm:$0xff]  ;;  %v267_v63 = vld [vmem:[%s2158_s24 + $0x160] sm:$0xff] }
  0x52   : > { %v1251_v45 = vsel %vm859_vm2, %v663_v11, %v1055_v28  ;;  %vm861_vm4 = vcmp.ge.f32.partialorder %v665_v27, 0.0  ;;  %v1642_v48 = vmul.f32 %v1446_v38, %v1250_v37  ;;  %v467_v50 = vmul.f32 %v2165_v3, %v264_v39 }
  0x53   : > { %v1831_v17 = vadd.f32 %v1830_v9, %v1636_v62  ;;  %v668_v51 = vadd.f32 %v2174_v8, %v465_v34  ;;  %v1058_v52 = vmul.f32 0.2, %v666_v35  ;;  %v1252_v53 = vsel %vm860_vm3, %v664_v19, %v1056_v36  ;;  %v1449_v62 = vld [vmem:[%s3397_s3 + $0x120] sm:$0xff]  ;;  %v268_v9 = vld [vmem:[%s2158_s24 + $0x168] sm:$0xff] }
  0x54   : > { %vm862_vm5 = vcmp.ge.f32.partialorder %v666_v35, 0.0  ;;  %v1643_v56 = vmul.f32 %v1447_v46, %v1251_v45  ;;  %v468_v58 = vmul.f32 %v2165_v3, %v265_v47  ;;  %v669_v59 = vadd.f32 %v2174_v8, %v466_v42 }
  0x55   : > { %v1832_v25 = vadd.f32 %v1831_v17, %v1637_v7  ;;  %v1059_v60 = vmul.f32 0.2, %v667_v43  ;;  %v1253_v61 = vsel %vm861_vm4, %v665_v27, %v1057_v44  ;;  %vm863_vm6 = vcmp.ge.f32.partialorder %v667_v43, 0.0  ;;  %v1450_v7 = vld [vmem:[%s3397_s3 + $0x128] sm:$0xff]  ;;  %v269_v17 = vld [vmem:[%s2158_s24 + $0x170] sm:$0xff] }
  0x56   : > { %v1644_v0 = vmul.f32 %v1448_v54, %v1252_v53  ;;  %v469_v2 = vmul.f32 %v2165_v3, %v266_v55  ;;  %v670_v4 = vadd.f32 %v2174_v8, %v467_v50  ;;  %v1060_v5 = vmul.f32 0.2, %v668_v51 }
  0x57   : > { %v1833_v33 = vadd.f32 %v1832_v25, %v1638_v16  ;;  %v1254_v6 = vsel %vm862_vm5, %v666_v35, %v1058_v52  ;;  %vm864_vm7 = vcmp.ge.f32.partialorder %v668_v51, 0.0  ;;  %v1645_v10 = vmul.f32 %v1449_v62, %v1253_v61  ;;  %v1451_v16 = vld [vmem:[%s3397_s3 + $0x130] sm:$0xff]  ;;  %v270_v25 = vld [vmem:[%s2158_s24 + $0x178] sm:$0xff] }
  0x58   : > { %v470_v12 = vmul.f32 %v2165_v3, %v267_v63  ;;  %v671_v13 = vadd.f32 %v2174_v8, %v468_v58  ;;  %v1061_v14 = vmul.f32 0.2, %v669_v59  ;;  %v1255_v15 = vsel %vm863_vm6, %v667_v43, %v1059_v60 }
  0x59   : > { %v1834_v41 = vadd.f32 %v1833_v33, %v1639_v24  ;;  %vm865_vm8 = vcmp.ge.f32.partialorder %v669_v59, 0.0  ;;  %v1646_v18 = vmul.f32 %v1450_v7, %v1254_v6  ;;  %v471_v20 = vmul.f32 %v2165_v3, %v268_v9  ;;  %v1452_v24 = vld [vmem:[%s3397_s3 + $0x138] sm:$0xff]  ;;  %v271_v33 = vld [vmem:[%s2158_s24 + $0x180] sm:$0xff] }
  0x5a   : > { %v672_v21 = vadd.f32 %v2174_v8, %v469_v2  ;;  %v1062_v22 = vmul.f32 0.2, %v670_v4  ;;  %v1256_v23 = vsel %vm864_vm7, %v668_v51, %v1060_v5  ;;  %vm866_vm9 = vcmp.ge.f32.partialorder %v670_v4, 0.0 }
  0x5b   : > { %v1835_v49 = vadd.f32 %v1834_v41, %v1640_v32  ;;  %v1647_v26 = vmul.f32 %v1451_v16, %v1255_v15  ;;  %v472_v28 = vmul.f32 %v2165_v3, %v269_v17  ;;  %v673_v29 = vadd.f32 %v2174_v8, %v470_v12  ;;  %v1453_v32 = vld [vmem:[%s3397_s3 + $0x140] sm:$0xff]  ;;  %v272_v41 = vld [vmem:[%s2158_s24 + $0x188] sm:$0xff] }
  0x5c   : > { %v1063_v30 = vmul.f32 0.2, %v671_v13  ;;  %v1257_v31 = vsel %vm865_vm8, %v669_v59, %v1061_v14  ;;  %vm867_vm10 = vcmp.ge.f32.partialorder %v671_v13, 0.0  ;;  %v1648_v34 = vmul.f32 %v1452_v24, %v1256_v23 }
  0x5d   : > { %v1836_v57 = vadd.f32 %v1835_v49, %v1641_v40  ;;  %v473_v36 = vmul.f32 %v2165_v3, %v270_v25  ;;  %v674_v37 = vadd.f32 %v2174_v8, %v471_v20  ;;  %v1064_v38 = vmul.f32 0.2, %v672_v21  ;;  %v1454_v40 = vld [vmem:[%s3397_s3 + $0x148] sm:$0xff]  ;;  %v273_v49 = vld [vmem:[%s2158_s24 + $0x190] sm:$0xff] }
  0x5e   : > { %v1258_v39 = vsel %vm866_vm9, %v670_v4, %v1062_v22  ;;  %vm868_vm11 = vcmp.ge.f32.partialorder %v672_v21, 0.0  ;;  %v1649_v42 = vmul.f32 %v1453_v32, %v1257_v31  ;;  %v474_v44 = vmul.f32 %v2165_v3, %v271_v33 }
  0x5f   : > { %v1837_v1 = vadd.f32 %v1836_v57, %v1642_v48  ;;  %v675_v45 = vadd.f32 %v2174_v8, %v472_v28  ;;  %v1065_v46 = vmul.f32 0.2, %v673_v29  ;;  %v1259_v47 = vsel %vm867_vm10, %v671_v13, %v1063_v30  ;;  %v1455_v48 = vld [vmem:[%s3397_s3 + $0x150] sm:$0xff]  ;;  %v274_v57 = vld [vmem:[%s2158_s24 + $0x198] sm:$0xff] }
  0x60   : > { %vm869_vm12 = vcmp.ge.f32.partialorder %v673_v29, 0.0  ;;  %v1650_v50 = vmul.f32 %v1454_v40, %v1258_v39  ;;  %v475_v52 = vmul.f32 %v2165_v3, %v272_v41  ;;  %v676_v53 = vadd.f32 %v2174_v8, %v473_v36 }
  0x61   : > { %v1838_v11 = vadd.f32 %v1837_v1, %v1643_v56  ;;  %v1066_v54 = vmul.f32 0.2, %v674_v37  ;;  %v1260_v55 = vsel %vm868_vm11, %v672_v21, %v1064_v38  ;;  %v1456_v56 = vld [vmem:[%s3397_s3 + $0x158] sm:$0xff]  ;;  %vm870_vm13 = vcmp.ge.f32.partialorder %v674_v37, 0.0  ;;  %v275_v1 = vld [vmem:[%s2158_s24 + $0x1a0] sm:$0xff] }
  0x62   : > { %v1651_v58 = vmul.f32 %v1455_v48, %v1259_v47  ;;  %v476_v60 = vmul.f32 %v2165_v3, %v273_v49  ;;  %v677_v61 = vadd.f32 %v2174_v8, %v474_v44  ;;  %v1067_v62 = vmul.f32 0.2, %v675_v45 }
  0x63   : > { %v1839_v19 = vadd.f32 %v1838_v11, %v1644_v0  ;;  %v1261_v63 = vsel %vm869_vm12, %v673_v29, %v1065_v46  ;;  %v1457_v0 = vld [vmem:[%s3397_s3 + $0x160] sm:$0xff]  ;;  %vm871_vm14 = vcmp.ge.f32.partialorder %v675_v45, 0.0  ;;  %v1652_v2 = vmul.f32 %v1456_v56, %v1260_v55  ;;  %v276_v11 = vld [vmem:[%s2158_s24 + $0x1a8] sm:$0xff] }
  0x64   : > { %v477_v5 = vmul.f32 %v2165_v3, %v274_v57  ;;  %v678_v6 = vadd.f32 %v2174_v8, %v475_v52  ;;  %v1068_v7 = vmul.f32 0.2, %v676_v53  ;;  %v1262_v9 = vsel %vm870_vm13, %v674_v37, %v1066_v54 }
  0x65   : > { %v1840_v27 = vadd.f32 %v1839_v19, %v1645_v10  ;;  %v1458_v10 = vld [vmem:[%s3397_s3 + $0x168] sm:$0xff]  ;;  %vm872_vm15 = vcmp.ge.f32.partialorder %v676_v53, 0.0  ;;  %v1653_v12 = vmul.f32 %v1457_v0, %v1261_v63  ;;  %v478_v14 = vmul.f32 %v2165_v3, %v275_v1  ;;  %v277_v19 = vld [vmem:[%s2158_s24 + $0x1b0] sm:$0xff] }
  0x66   : > { %v679_v15 = vadd.f32 %v2174_v8, %v476_v60  ;;  %v1069_v16 = vmul.f32 0.2, %v677_v61  ;;  %v1263_v17 = vsel %vm871_vm14, %v675_v45, %v1067_v62  ;;  %vm873_vm0 = vcmp.ge.f32.partialorder %v677_v61, 0.0 }
  0x67   : > { %v1841_v35 = vadd.f32 %v1840_v27, %v1646_v18  ;;  %v1459_v18 = vld [vmem:[%s3397_s3 + $0x170] sm:$0xff]  ;;  %v1654_v20 = vmul.f32 %v1458_v10, %v1262_v9  ;;  %v479_v22 = vmul.f32 %v2165_v3, %v276_v11  ;;  %v680_v23 = vadd.f32 %v2174_v8, %v477_v5  ;;  %v278_v27 = vld [vmem:[%s2158_s24 + $0x1b8] sm:$0xff] }
  0x68   : > { %v1070_v24 = vmul.f32 0.2, %v678_v6  ;;  %v1264_v25 = vsel %vm872_vm15, %v676_v53, %v1068_v7  ;;  %vm874_vm1 = vcmp.ge.f32.partialorder %v678_v6, 0.0  ;;  %v1655_v28 = vmul.f32 %v1459_v18, %v1263_v17 }
  0x69   : > { %v1842_v43 = vadd.f32 %v1841_v35, %v1647_v26  ;;  %v1460_v26 = vld [vmem:[%s3397_s3 + $0x178] sm:$0xff]  ;;  %v480_v30 = vmul.f32 %v2165_v3, %v277_v19  ;;  %v681_v31 = vadd.f32 %v2174_v8, %v478_v14  ;;  %v1071_v32 = vmul.f32 0.2, %v679_v15  ;;  %v279_v35 = vld [vmem:[%s2158_s24 + $0x1c0] sm:$0xff] }
  0x6a   : > { %v1265_v33 = vsel %vm873_vm0, %v677_v61, %v1069_v16  ;;  %vm875_vm2 = vcmp.ge.f32.partialorder %v679_v15, 0.0  ;;  %v1656_v36 = vmul.f32 %v1460_v26, %v1264_v25  ;;  %v481_v38 = vmul.f32 %v2165_v3, %v278_v27 }
  0x6b   : > { %v1843_v51 = vadd.f32 %v1842_v43, %v1648_v34  ;;  %v1461_v34 = vld [vmem:[%s3397_s3 + $0x180] sm:$0xff]  ;;  %v682_v39 = vadd.f32 %v2174_v8, %v479_v22  ;;  %v1072_v40 = vmul.f32 0.2, %v680_v23  ;;  %v1266_v41 = vsel %vm874_vm1, %v678_v6, %v1070_v24  ;;  %v280_v43 = vld [vmem:[%s2158_s24 + $0x1c8] sm:$0xff] }
  0x6c   : > { %vm876_vm3 = vcmp.ge.f32.partialorder %v680_v23, 0.0  ;;  %v1657_v44 = vmul.f32 %v1461_v34, %v1265_v33  ;;  %v482_v46 = vmul.f32 %v2165_v3, %v279_v35  ;;  %v683_v47 = vadd.f32 %v2174_v8, %v480_v30  ;;  %v2521_v24 = vld [vmem:[%s3395_s1] ss:$0 sm:$0xff] }
  0x6d   : > { %v1844_v59 = vadd.f32 %v1843_v51, %v1649_v42  ;;  %v1462_v42 = vld [vmem:[%s3397_s3 + $0x188] sm:$0xff]  ;;  %v1073_v48 = vmul.f32 0.2, %v681_v31  ;;  %v1267_v49 = vsel %vm875_vm2, %v679_v15, %v1071_v32  ;;  %v281_v51 = vld [vmem:[%s2158_s24 + $0x1d0] sm:$0xff]  ;;  %vm877_vm4 = vcmp.ge.f32.partialorder %v681_v31, 0.0 }
  0x6e   : > { %v1658_v52 = vmul.f32 %v1462_v42, %v1266_v41  ;;  %v483_v54 = vmul.f32 %v2165_v3, %v280_v43  ;;  %v684_v55 = vadd.f32 %v2174_v8, %v481_v38  ;;  %v1074_v56 = vmul.f32 0.2, %v682_v39  ;;  %v2534_v33 = vld [vmem:[%s3396_s2] ss:$0 sm:$0xff] }
  0x6f   : > { %v1845_v4 = vadd.f32 %v1844_v59, %v1650_v50  ;;  %v1463_v50 = vld [vmem:[%s3397_s3 + $0x190] sm:$0xff]  ;;  %v1268_v57 = vsel %vm876_vm3, %v680_v23, %v1072_v40  ;;  %v282_v59 = vld [vmem:[%s2158_s24 + $0x1d8] sm:$0xff]  ;;  %vm878_vm5 = vcmp.ge.f32.partialorder %v682_v39, 0.0  ;;  %v484_v62 = vmul.f32 %v2165_v3, %v281_v51 }
  0x70   : > { %v1659_v60 = vmul.f32 %v1463_v50, %v1267_v49  ;;  %v685_v63 = vadd.f32 %v2174_v8, %v482_v46  ;;  %v1075_v0 = vmul.f32 0.2, %v683_v47  ;;  %v1269_v1 = vsel %vm877_vm4, %v681_v31, %v1073_v48 }
  0x71   : > { %v1846_v13 = vadd.f32 %v1845_v4, %v1651_v58  ;;  %v1464_v58 = vld [vmem:[%s3397_s3 + $0x198] sm:$0xff]  ;;  %v283_v4 = vld [vmem:[%s2158_s24 + $0x1e0] sm:$0xff]  ;;  %vm879_vm6 = vcmp.ge.f32.partialorder %v683_v47, 0.0  ;;  %v485_v7 = vmul.f32 %v2165_v3, %v282_v59  ;;  %v686_v9 = vadd.f32 %v2174_v8, %v483_v54 }
  0x72   : > { %v1660_v5 = vmul.f32 %v1464_v58, %v1268_v57  ;;  %v1076_v10 = vmul.f32 0.2, %v684_v55  ;;  %v1270_v11 = vsel %vm878_vm5, %v682_v39, %v1074_v56  ;;  %vm880_vm7 = vcmp.ge.f32.partialorder %v684_v55, 0.0 }
  0x73   : > { %v1847_v21 = vadd.f32 %v1846_v13, %v1652_v2  ;;  %v1465_v2 = vld [vmem:[%s3397_s3 + $0x1a0] sm:$0xff]  ;;  %v284_v13 = vld [vmem:[%s2158_s24 + $0x1e8] sm:$0xff]  ;;  %v486_v16 = vmul.f32 %v2165_v3, %v283_v4  ;;  %v687_v17 = vadd.f32 %v2174_v8, %v484_v62  ;;  %v1077_v18 = vmul.f32 0.2, %v685_v63 }
  0x74   : > { %v1661_v14 = vmul.f32 %v1465_v2, %v1269_v1  ;;  %v1271_v19 = vsel %vm879_vm6, %v683_v47, %v1075_v0  ;;  %vm881_vm8 = vcmp.ge.f32.partialorder %v685_v63, 0.0  ;;  %v487_v3 = vmul.f32 %v2521_v24, %v284_v13 }
  0x75   : > { %v1848_v29 = vadd.f32 %v1847_v21, %v1653_v12  ;;  %v1466_v12 = vld [vmem:[%s3397_s3 + $0x1a8] sm:$0xff]  ;;  %v285_v21 = vld [vmem:[%s2158_s24 + $0x1f0] sm:$0xff]  ;;  %v688_v25 = vadd.f32 %v2174_v8, %v485_v7  ;;  %v1078_v26 = vmul.f32 0.2, %v686_v9  ;;  %v1272_v27 = vsel %vm880_vm7, %v684_v55, %v1076_v10 }
  0x76   : > { %v1662_v22 = vmul.f32 %v1466_v12, %v1270_v11  ;;  %vm882_vm9 = vcmp.ge.f32.partialorder %v686_v9, 0.0  ;;  %v488_v32 = vmul.f32 %v2521_v24, %v285_v21  ;;  %v689_v8 = vadd.f32 %v2534_v33, %v486_v16 }
  0x77   : > { %v1849_v37 = vadd.f32 %v1848_v29, %v1654_v20  ;;  %v1467_v20 = vld [vmem:[%s3397_s3 + $0x1b0] sm:$0xff]  ;;  %v286_v29 = vld [vmem:[%s2158_s24 + $0x1f8] sm:$0xff]  ;;  %v1079_v34 = vmul.f32 0.2, %v687_v17  ;;  %v1273_v35 = vsel %vm881_vm8, %v685_v63, %v1077_v18  ;;  %vm883_vm10 = vcmp.ge.f32.partialorder %v687_v17, 0.0 }
  0x78   : > { %v1663_v30 = vmul.f32 %v1467_v20, %v1271_v19  ;;  %v489_v40 = vmul.f32 %v2521_v24, %v286_v29  ;;  %v690_v41 = vadd.f32 %v2534_v33, %v487_v3  ;;  %v1080_v42 = vmul.f32 0.2, %v688_v25 }
  0x79   : > { %v1850_v45 = vadd.f32 %v1849_v37, %v1655_v28  ;;  %v1468_v28 = vld [vmem:[%s3397_s3 + $0x1b8] sm:$0xff]  ;;  %v287_v37 = vld [vmem:[%s2158_s24 + $0x200] sm:$0xff]  ;;  %v1274_v43 = vsel %vm882_vm9, %v686_v9, %v1078_v26  ;;  %vm884_vm11 = vcmp.ge.f32.partialorder %v688_v25, 0.0  ;;  %v691_v49 = vadd.f32 %v2534_v33, %v488_v32 }
  0x7a   : > { %v1664_v38 = vmul.f32 %v1468_v28, %v1272_v27  ;;  %v490_v48 = vmul.f32 %v2521_v24, %v287_v37  ;;  %v1081_v50 = vmul.f32 0.2, %v689_v8  ;;  %v1275_v51 = vsel %vm883_vm10, %v687_v17, %v1079_v34 }
  0x7b   : > { %v1851_v53 = vadd.f32 %v1850_v45, %v1656_v36  ;;  %v1469_v36 = vld [vmem:[%s3397_s3 + $0x1c0] sm:$0xff]  ;;  %v288_v45 = vld [vmem:[%s2158_s24 + $0x208] sm:$0xff]  ;;  %vm885_vm12 = vcmp.ge.f32.partialorder %v689_v8, 0.0  ;;  %v692_v57 = vadd.f32 %v2534_v33, %v489_v40  ;;  %v1082_v58 = vmul.f32 0.2, %v690_v41 }
  0x7c   : > { %v1665_v46 = vmul.f32 %v1469_v36, %v1273_v35  ;;  %v491_v56 = vmul.f32 %v2521_v24, %v288_v45  ;;  %v1276_v59 = vsel %vm884_vm11, %v688_v25, %v1080_v42  ;;  %vm886_vm13 = vcmp.ge.f32.partialorder %v690_v41, 0.0 }
  0x7d   : > { %v1852_v61 = vadd.f32 %v1851_v53, %v1657_v44  ;;  %v1470_v44 = vld [vmem:[%s3397_s3 + $0x1c8] sm:$0xff]  ;;  %v289_v53 = vld [vmem:[%s2158_s24 + $0x210] sm:$0xff]  ;;  %v693_v1 = vadd.f32 %v2534_v33, %v490_v48  ;;  %v1083_v2 = vmul.f32 0.2, %v691_v49  ;;  %v1277_v4 = vsel %vm885_vm12, %v689_v8, %v1081_v50 }
  0x7e   : > { %v1666_v54 = vmul.f32 %v1470_v44, %v1274_v43  ;;  %v492_v0 = vmul.f32 %v2521_v24, %v289_v53  ;;  %vm887_vm14 = vcmp.ge.f32.partialorder %v691_v49, 0.0  ;;  %v694_v11 = vadd.f32 %v2534_v33, %v491_v56 }
  0x7f   : > { %v1853_v6 = vadd.f32 %v1852_v61, %v1658_v52  ;;  %v1471_v52 = vld [vmem:[%s3397_s3 + $0x1d0] sm:$0xff]  ;;  %v290_v61 = vld [vmem:[%s2158_s24 + $0x218] sm:$0xff]  ;;  %v1084_v12 = vmul.f32 0.2, %v692_v57  ;;  %v1278_v13 = vsel %vm886_vm13, %v690_v41, %v1082_v58  ;;  %vm888_vm15 = vcmp.ge.f32.partialorder %v692_v57, 0.0 }
  0x80   : > { %v1667_v62 = vmul.f32 %v1471_v52, %v1275_v51  ;;  %v493_v10 = vmul.f32 %v2521_v24, %v290_v61  ;;  %v695_v19 = vadd.f32 %v2534_v33, %v492_v0  ;;  %v1085_v20 = vmul.f32 0.2, %v693_v1 }
  0x81   : > { %v1854_v15 = vadd.f32 %v1853_v6, %v1659_v60  ;;  %v1472_v60 = vld [vmem:[%s3397_s3 + $0x1d8] sm:$0xff]  ;;  %v291_v6 = vld [vmem:[%s2158_s24 + $0x220] sm:$0xff]  ;;  %v1279_v21 = vsel %vm887_vm14, %v691_v49, %v1083_v2  ;;  %vm889_vm0 = vcmp.ge.f32.partialorder %v693_v1, 0.0  ;;  %v1086_v28 = vmul.f32 0.2, %v694_v11 }
  0x82   : > { %v1668_v7 = vmul.f32 %v1472_v60, %v1276_v59  ;;  %v494_v18 = vmul.f32 %v2521_v24, %v291_v6  ;;  %v696_v27 = vadd.f32 %v2534_v33, %v493_v10  ;;  %v1280_v29 = vsel %vm888_vm15, %v692_v57, %v1084_v12 }
  0x83   : > { %v1855_v23 = vadd.f32 %v1854_v15, %v1660_v5  ;;  %v1473_v5 = vld [vmem:[%s3397_s3 + $0x1e0] sm:$0xff]  ;;  %v292_v15 = vld [vmem:[%s2158_s24 + $0x228] sm:$0xff]  ;;  %vm890_vm1 = vcmp.ge.f32.partialorder %v694_v11, 0.0  ;;  %v1087_v36 = vmul.f32 0.2, %v695_v19  ;;  %v1281_v37 = vsel %vm889_vm0, %v693_v1, %v1085_v20 }
  0x84   : > { %v1669_v16 = vmul.f32 %v1473_v5, %v1277_v4  ;;  %v495_v26 = vmul.f32 %v2521_v24, %v292_v15  ;;  %v697_v35 = vadd.f32 %v2534_v33, %v494_v18  ;;  %vm891_vm2 = vcmp.ge.f32.partialorder %v695_v19, 0.0 }
  0x85   : > { %v1856_v31 = vadd.f32 %v1855_v23, %v1661_v14  ;;  %v1474_v14 = vld [vmem:[%s3397_s3 + $0x1e8] sm:$0xff]  ;;  %v293_v23 = vld [vmem:[%s2158_s24 + $0x230] sm:$0xff]  ;;  %v1088_v44 = vmul.f32 0.2, %v696_v27  ;;  %v1282_v45 = vsel %vm890_vm1, %v694_v11, %v1086_v28  ;;  %vm892_vm3 = vcmp.ge.f32.partialorder %v696_v27, 0.0 }
  0x86   : > { %v1670_v3 = vmul.f32 %v1474_v14, %v1278_v13  ;;  %v496_v34 = vmul.f32 %v2521_v24, %v293_v23  ;;  %v698_v43 = vadd.f32 %v2534_v33, %v495_v26  ;;  %v1089_v52 = vmul.f32 0.2, %v697_v35 }
  0x87   : > { %v1857_v39 = vadd.f32 %v1856_v31, %v1662_v22  ;;  %v1475_v22 = vld [vmem:[%s3397_s3 + $0x1f0] sm:$0xff]  ;;  %v294_v31 = vld [vmem:[%s2158_s24 + $0x238] sm:$0xff]  ;;  %v1283_v53 = vsel %vm891_vm2, %v695_v19, %v1087_v36  ;;  %vm893_vm4 = vcmp.ge.f32.partialorder %v697_v35, 0.0  ;;  %v1284_v61 = vsel %vm892_vm3, %v696_v27, %v1088_v44 }
  0x88   : > { %v1671_v32 = vmul.f32 %v1475_v22, %v1279_v21  ;;  %v497_v42 = vmul.f32 %v2521_v24, %v294_v31  ;;  %v699_v51 = vadd.f32 %v2534_v33, %v496_v34  ;;  %v1090_v60 = vmul.f32 0.2, %v698_v43 }
  0x89   : > { %v1858_v47 = vadd.f32 %v1857_v39, %v1663_v30  ;;  %v1476_v30 = vld [vmem:[%s3397_s3 + $0x1f8] sm:$0xff]  ;;  %v295_v39 = vld [vmem:[%s2158_s24 + $0x240] sm:$0xff]  ;;  %vm894_vm5 = vcmp.ge.f32.partialorder %v698_v43, 0.0  ;;  %v1285_v6 = vsel %vm893_vm4, %v697_v35, %v1089_v52 }
  0x8a   : > { %v1672_v40 = vmul.f32 %v1476_v30, %v1280_v29  ;;  %v498_v50 = vmul.f32 %v2521_v24, %v295_v39  ;;  %v700_v59 = vadd.f32 %v2534_v33, %v497_v42  ;;  %v1091_v5 = vmul.f32 0.2, %v699_v51 }
  0x8b   : > { %v1859_v55 = vadd.f32 %v1858_v47, %v1664_v38  ;;  %v1477_v38 = vld [vmem:[%s3397_s3 + $0x200] sm:$0xff]  ;;  %v296_v47 = vld [vmem:[%s2158_s24 + $0x248] sm:$0xff]  ;;  %vm895_vm6 = vcmp.ge.f32.partialorder %v699_v51, 0.0  ;;  %v1286_v15 = vsel %vm894_vm5, %v698_v43, %v1090_v60 }
  0x8c   : > { %v1673_v48 = vmul.f32 %v1477_v38, %v1281_v37  ;;  %v499_v58 = vmul.f32 %v2521_v24, %v296_v47  ;;  %v701_v4 = vadd.f32 %v2534_v33, %v498_v50  ;;  %v1092_v14 = vmul.f32 0.2, %v700_v59 }
  0x8d   : > { %v1860_v63 = vadd.f32 %v1859_v55, %v1665_v46  ;;  %v1478_v46 = vld [vmem:[%s3397_s3 + $0x208] sm:$0xff]  ;;  %v297_v55 = vld [vmem:[%s2158_s24 + $0x250] sm:$0xff]  ;;  %vm896_vm7 = vcmp.ge.f32.partialorder %v700_v59, 0.0  ;;  %v1287_v23 = vsel %vm895_vm6, %v699_v51, %v1091_v5 }
  0x8e   : > { %v1674_v56 = vmul.f32 %v1478_v46, %v1282_v45  ;;  %v500_v2 = vmul.f32 %v2521_v24, %v297_v55  ;;  %v702_v13 = vadd.f32 %v2534_v33, %v499_v58  ;;  %v1093_v22 = vmul.f32 0.2, %v701_v4 }
  0x8f   : > { %v1861_v9 = vadd.f32 %v1860_v63, %v1666_v54  ;;  %v1479_v54 = vld [vmem:[%s3397_s3 + $0x210] sm:$0xff]  ;;  %v298_v63 = vld [vmem:[%s2158_s24 + $0x258] sm:$0xff]  ;;  %vm897_vm8 = vcmp.ge.f32.partialorder %v701_v4, 0.0  ;;  %v1288_v31 = vsel %vm896_vm7, %v700_v59, %v1092_v14 }
  0x90   : > { %v1675_v0 = vmul.f32 %v1479_v54, %v1283_v53  ;;  %v501_v12 = vmul.f32 %v2521_v24, %v298_v63  ;;  %v703_v21 = vadd.f32 %v2534_v33, %v500_v2  ;;  %v1094_v30 = vmul.f32 0.2, %v702_v13 }
  0x91   : > { %v1862_v17 = vadd.f32 %v1861_v9, %v1667_v62  ;;  %v1480_v62 = vld [vmem:[%s3397_s3 + $0x218] sm:$0xff]  ;;  %v299_v9 = vld [vmem:[%s2158_s24 + $0x260] sm:$0xff]  ;;  %vm898_vm9 = vcmp.ge.f32.partialorder %v702_v13, 0.0  ;;  %v1289_v39 = vsel %vm897_vm8, %v701_v4, %v1093_v22 }
  0x92   : > { %v1676_v10 = vmul.f32 %v1480_v62, %v1284_v61  ;;  %v502_v20 = vmul.f32 %v2521_v24, %v299_v9  ;;  %v704_v29 = vadd.f32 %v2534_v33, %v501_v12  ;;  %v1095_v38 = vmul.f32 0.2, %v703_v21 }
  0x93   : > { %v1863_v25 = vadd.f32 %v1862_v17, %v1668_v7  ;;  %v1481_v7 = vld [vmem:[%s3397_s3 + $0x220] sm:$0xff]  ;;  %v300_v17 = vld [vmem:[%s2158_s24 + $0x268] sm:$0xff]  ;;  %vm899_vm10 = vcmp.ge.f32.partialorder %v703_v21, 0.0  ;;  %v1290_v47 = vsel %vm898_vm9, %v702_v13, %v1094_v30 }
  0x94   : > { %v1677_v18 = vmul.f32 %v1481_v7, %v1285_v6  ;;  %v503_v28 = vmul.f32 %v2521_v24, %v300_v17  ;;  %v705_v37 = vadd.f32 %v2534_v33, %v502_v20  ;;  %v1096_v46 = vmul.f32 0.2, %v704_v29 }
  0x95   : > { %v1864_v8 = vadd.f32 %v1863_v25, %v1669_v16  ;;  %v1482_v16 = vld [vmem:[%s3397_s3 + $0x228] sm:$0xff]  ;;  %v301_v25 = vld [vmem:[%s2158_s24 + $0x270] sm:$0xff]  ;;  %vm900_vm11 = vcmp.ge.f32.partialorder %v704_v29, 0.0  ;;  %v1291_v55 = vsel %vm899_vm10, %v703_v21, %v1095_v38 }
  0x96   : > { %v1678_v26 = vmul.f32 %v1482_v16, %v1286_v15  ;;  %v504_v36 = vmul.f32 %v2521_v24, %v301_v25  ;;  %v706_v45 = vadd.f32 %v2534_v33, %v503_v28  ;;  %v1097_v54 = vmul.f32 0.2, %v705_v37 }
  0x97   : > { %v1865_v41 = vadd.f32 %v1864_v8, %v1670_v3  ;;  %v1483_v3 = vld [vmem:[%s3397_s3 + $0x230] sm:$0xff]  ;;  %v302_v8 = vld [vmem:[%s2158_s24 + $0x278] sm:$0xff]  ;;  %vm901_vm12 = vcmp.ge.f32.partialorder %v705_v37, 0.0  ;;  %v1292_v63 = vsel %vm900_vm11, %v704_v29, %v1096_v46 }
  0x98   : > { %v1679_v34 = vmul.f32 %v1483_v3, %v1287_v23  ;;  %v505_v44 = vmul.f32 %v2521_v24, %v302_v8  ;;  %v707_v53 = vadd.f32 %v2534_v33, %v504_v36  ;;  %v1098_v62 = vmul.f32 0.2, %v706_v45 }
  0x99   : > { %v1866_v49 = vadd.f32 %v1865_v41, %v1671_v32  ;;  %v1484_v32 = vld [vmem:[%s3397_s3 + $0x238] sm:$0xff]  ;;  %v303_v41 = vld [vmem:[%s2158_s24 + $0x280] sm:$0xff]  ;;  %vm902_vm13 = vcmp.ge.f32.partialorder %v706_v45, 0.0  ;;  %v1293_v9 = vsel %vm901_vm12, %v705_v37, %v1097_v54 }
  0x9a   : > { %v1680_v42 = vmul.f32 %v1484_v32, %v1288_v31  ;;  %v506_v52 = vmul.f32 %v2521_v24, %v303_v41  ;;  %v708_v61 = vadd.f32 %v2534_v33, %v505_v44  ;;  %v1099_v7 = vmul.f32 0.2, %v707_v53 }
  0x9b   : > { %v1867_v57 = vadd.f32 %v1866_v49, %v1672_v40  ;;  %v1485_v40 = vld [vmem:[%s3397_s3 + $0x240] sm:$0xff]  ;;  %v304_v49 = vld [vmem:[%s2158_s24 + $0x288] sm:$0xff]  ;;  %vm903_vm14 = vcmp.ge.f32.partialorder %v707_v53, 0.0  ;;  %v1294_v17 = vsel %vm902_vm13, %v706_v45, %v1098_v62 }
  0x9c   : > { %v1681_v50 = vmul.f32 %v1485_v40, %v1289_v39  ;;  %v507_v60 = vmul.f32 %v2521_v24, %v304_v49  ;;  %v709_v6 = vadd.f32 %v2534_v33, %v506_v52  ;;  %v1100_v16 = vmul.f32 0.2, %v708_v61 }
  0x9d   : > { %v1868_v1 = vadd.f32 %v1867_v57, %v1673_v48  ;;  %v1486_v48 = vld [vmem:[%s3397_s3 + $0x248] sm:$0xff]  ;;  %v305_v57 = vld [vmem:[%s2158_s24 + $0x290] sm:$0xff]  ;;  %vm904_vm15 = vcmp.ge.f32.partialorder %v708_v61, 0.0  ;;  %v1295_v25 = vsel %vm903_vm14, %v707_v53, %v1099_v7 }
  0x9e   : > { %v1682_v58 = vmul.f32 %v1486_v48, %v1290_v47  ;;  %v508_v5 = vmul.f32 %v2521_v24, %v305_v57  ;;  %v710_v15 = vadd.f32 %v2534_v33, %v507_v60  ;;  %v1101_v3 = vmul.f32 0.2, %v709_v6 }
  0x9f   : > { %v1869_v11 = vadd.f32 %v1868_v1, %v1674_v56  ;;  %v1487_v56 = vld [vmem:[%s3397_s3 + $0x250] sm:$0xff]  ;;  %v306_v1 = vld [vmem:[%s2158_s24 + $0x298] sm:$0xff]  ;;  %vm905_vm0 = vcmp.ge.f32.partialorder %v709_v6, 0.0  ;;  %v1296_v8 = vsel %vm904_vm15, %v708_v61, %v1100_v16 }
  0xa0   : > { %v1683_v2 = vmul.f32 %v1487_v56, %v1291_v55  ;;  %v509_v14 = vmul.f32 %v2521_v24, %v306_v1  ;;  %v711_v23 = vadd.f32 %v2534_v33, %v508_v5  ;;  %v1102_v32 = vmul.f32 0.2, %v710_v15 }
  0xa1   : > { %v1870_v19 = vadd.f32 %v1869_v11, %v1675_v0  ;;  %v1488_v0 = vld [vmem:[%s3397_s3 + $0x258] sm:$0xff]  ;;  %v307_v11 = vld [vmem:[%s2158_s24 + $0x2a0] sm:$0xff]  ;;  %vm906_vm1 = vcmp.ge.f32.partialorder %v710_v15, 0.0  ;;  %v1297_v41 = vsel %vm905_vm0, %v709_v6, %v1101_v3 }
  0xa2   : > { %v1684_v12 = vmul.f32 %v1488_v0, %v1292_v63  ;;  %v510_v22 = vmul.f32 %v2521_v24, %v307_v11  ;;  %v712_v31 = vadd.f32 %v2534_v33, %v509_v14  ;;  %v1103_v40 = vmul.f32 0.2, %v711_v23 }
  0xa3   : > { %v1871_v27 = vadd.f32 %v1870_v19, %v1676_v10  ;;  %v1489_v10 = vld [vmem:[%s3397_s3 + $0x260] sm:$0xff]  ;;  %v308_v19 = vld [vmem:[%s2158_s24 + $0x2a8] sm:$0xff]  ;;  %vm907_vm2 = vcmp.ge.f32.partialorder %v711_v23, 0.0  ;;  %v1298_v49 = vsel %vm906_vm1, %v710_v15, %v1102_v32 }
  0xa4   : > { %v1685_v20 = vmul.f32 %v1489_v10, %v1293_v9  ;;  %v511_v30 = vmul.f32 %v2521_v24, %v308_v19  ;;  %v713_v39 = vadd.f32 %v2534_v33, %v510_v22  ;;  %v1104_v48 = vmul.f32 0.2, %v712_v31 }
  0xa5   : > { %v1872_v35 = vadd.f32 %v1871_v27, %v1677_v18  ;;  %v1490_v18 = vld [vmem:[%s3397_s3 + $0x268] sm:$0xff]  ;;  %v309_v27 = vld [vmem:[%s2158_s24 + $0x2b0] sm:$0xff]  ;;  %vm908_vm3 = vcmp.ge.f32.partialorder %v712_v31, 0.0  ;;  %v1299_v57 = vsel %vm907_vm2, %v711_v23, %v1103_v40 }
  0xa6   : > { %v1686_v28 = vmul.f32 %v1490_v18, %v1294_v17  ;;  %v512_v38 = vmul.f32 %v2521_v24, %v309_v27  ;;  %v714_v47 = vadd.f32 %v2534_v33, %v511_v30  ;;  %v1105_v56 = vmul.f32 0.2, %v713_v39 }
  0xa7   : > { %v1873_v43 = vadd.f32 %v1872_v35, %v1678_v26  ;;  %v1491_v26 = vld [vmem:[%s3397_s3 + $0x270] sm:$0xff]  ;;  %v310_v35 = vld [vmem:[%s2158_s24 + $0x2b8] sm:$0xff]  ;;  %vm909_vm4 = vcmp.ge.f32.partialorder %v713_v39, 0.0  ;;  %v1300_v1 = vsel %vm908_vm3, %v712_v31, %v1104_v48 }
  0xa8   : > { %v1687_v36 = vmul.f32 %v1491_v26, %v1295_v25  ;;  %v513_v46 = vmul.f32 %v2521_v24, %v310_v35  ;;  %v715_v55 = vadd.f32 %v2534_v33, %v512_v38  ;;  %v1106_v0 = vmul.f32 0.2, %v714_v47 }
  0xa9   : > { %v1874_v51 = vadd.f32 %v1873_v43, %v1679_v34  ;;  %v1492_v34 = vld [vmem:[%s3397_s3 + $0x278] sm:$0xff]  ;;  %v311_v43 = vld [vmem:[%s2158_s24 + $0x2c0] sm:$0xff]  ;;  %vm910_vm5 = vcmp.ge.f32.partialorder %v714_v47, 0.0  ;;  %v1301_v11 = vsel %vm909_vm4, %v713_v39, %v1105_v56 }
  0xaa   : > { %v1688_v44 = vmul.f32 %v1492_v34, %v1296_v8  ;;  %v514_v54 = vmul.f32 %v2521_v24, %v311_v43  ;;  %v716_v63 = vadd.f32 %v2534_v33, %v513_v46  ;;  %v1107_v10 = vmul.f32 0.2, %v715_v55 }
  0xab   : > { %v1875_v59 = vadd.f32 %v1874_v51, %v1680_v42  ;;  %v1493_v42 = vld [vmem:[%s3397_s3 + $0x280] sm:$0xff]  ;;  %v312_v51 = vld [vmem:[%s2158_s24 + $0x2c8] sm:$0xff]  ;;  %vm911_vm6 = vcmp.ge.f32.partialorder %v715_v55, 0.0  ;;  %v1302_v19 = vsel %vm910_vm5, %v714_v47, %v1106_v0 }
  0xac   : > { %v1689_v52 = vmul.f32 %v1493_v42, %v1297_v41  ;;  %v515_v62 = vmul.f32 %v2521_v24, %v312_v51  ;;  %v717_v9 = vadd.f32 %v2534_v33, %v514_v54  ;;  %v1108_v18 = vmul.f32 0.2, %v716_v63 }
  0xad   : > { %v1876_v4 = vadd.f32 %v1875_v59, %v1681_v50  ;;  %v1494_v50 = vld [vmem:[%s3397_s3 + $0x288] sm:$0xff]  ;;  %v313_v59 = vld [vmem:[%s2158_s24 + $0x2d0] sm:$0xff]  ;;  %vm912_vm7 = vcmp.ge.f32.partialorder %v716_v63, 0.0  ;;  %v1303_v27 = vsel %vm911_vm6, %v715_v55, %v1107_v10 }
  0xae   : > { %v1690_v60 = vmul.f32 %v1494_v50, %v1298_v49  ;;  %v516_v7 = vmul.f32 %v2521_v24, %v313_v59  ;;  %v718_v17 = vadd.f32 %v2534_v33, %v515_v62  ;;  %v1109_v26 = vmul.f32 0.2, %v717_v9 }
  0xaf   : > { %v1877_v13 = vadd.f32 %v1876_v4, %v1682_v58  ;;  %v1495_v58 = vld [vmem:[%s3397_s3 + $0x290] sm:$0xff]  ;;  %v314_v4 = vld [vmem:[%s2158_s24 + $0x2d8] sm:$0xff]  ;;  %vm913_vm8 = vcmp.ge.f32.partialorder %v717_v9, 0.0  ;;  %v1304_v35 = vsel %vm912_vm7, %v716_v63, %v1108_v18 }
  0xb0   : > { %v1691_v5 = vmul.f32 %v1495_v58, %v1299_v57  ;;  %v517_v16 = vmul.f32 %v2521_v24, %v314_v4  ;;  %v719_v25 = vadd.f32 %v2534_v33, %v516_v7  ;;  %v1110_v34 = vmul.f32 0.2, %v718_v17 }
  0xb1   : > { %v1878_v21 = vadd.f32 %v1877_v13, %v1683_v2  ;;  %v1496_v2 = vld [vmem:[%s3397_s3 + $0x298] sm:$0xff]  ;;  %v315_v13 = vld [vmem:[%s2158_s24 + $0x2e0] sm:$0xff]  ;;  %vm914_vm9 = vcmp.ge.f32.partialorder %v718_v17, 0.0  ;;  %v1305_v43 = vsel %vm913_vm8, %v717_v9, %v1109_v26 }
  0xb2   : > { %v1692_v14 = vmul.f32 %v1496_v2, %v1300_v1  ;;  %v518_v3 = vmul.f32 %v2521_v24, %v315_v13  ;;  %v720_v8 = vadd.f32 %v2534_v33, %v517_v16  ;;  %v1111_v42 = vmul.f32 0.2, %v719_v25 }
  0xb3   : > { %v1879_v29 = vadd.f32 %v1878_v21, %v1684_v12  ;;  %v1497_v12 = vld [vmem:[%s3397_s3 + $0x2a0] sm:$0xff]  ;;  %v316_v21 = vld [vmem:[%s2158_s24 + $0x2e8] sm:$0xff]  ;;  %vm915_vm10 = vcmp.ge.f32.partialorder %v719_v25, 0.0  ;;  %v1306_v51 = vsel %vm914_vm9, %v718_v17, %v1110_v34 }
  0xb4   : > { %v1693_v22 = vmul.f32 %v1497_v12, %v1301_v11  ;;  %v519_v32 = vmul.f32 %v2521_v24, %v316_v21  ;;  %v721_v41 = vadd.f32 %v2534_v33, %v518_v3  ;;  %v1112_v50 = vmul.f32 0.2, %v720_v8 }
  0xb5   : > { %v1880_v37 = vadd.f32 %v1879_v29, %v1685_v20  ;;  %v1498_v20 = vld [vmem:[%s3397_s3 + $0x2a8] sm:$0xff]  ;;  %v317_v29 = vld [vmem:[%s2158_s24 + $0x2f0] sm:$0xff]  ;;  %vm916_vm11 = vcmp.ge.f32.partialorder %v720_v8, 0.0  ;;  %v1307_v59 = vsel %vm915_vm10, %v719_v25, %v1111_v42 }
  0xb6   : > { %v1694_v30 = vmul.f32 %v1498_v20, %v1302_v19  ;;  %v520_v40 = vmul.f32 %v2521_v24, %v317_v29  ;;  %v722_v49 = vadd.f32 %v2534_v33, %v519_v32  ;;  %v1113_v58 = vmul.f32 0.2, %v721_v41 }
  0xb7   : > { %v1881_v45 = vadd.f32 %v1880_v37, %v1686_v28  ;;  %v1499_v28 = vld [vmem:[%s3397_s3 + $0x2b0] sm:$0xff]  ;;  %v318_v37 = vld [vmem:[%s2158_s24 + $0x2f8] sm:$0xff]  ;;  %vm917_vm12 = vcmp.ge.f32.partialorder %v721_v41, 0.0  ;;  %v1308_v4 = vsel %vm916_vm11, %v720_v8, %v1112_v50 }
  0xb8   : > { %v1695_v38 = vmul.f32 %v1499_v28, %v1303_v27  ;;  %v521_v48 = vmul.f32 %v2521_v24, %v318_v37  ;;  %v723_v57 = vadd.f32 %v2534_v33, %v520_v40  ;;  %v1114_v2 = vmul.f32 0.2, %v722_v49 }
  0xb9   : > { %v1882_v53 = vadd.f32 %v1881_v45, %v1687_v36  ;;  %v1500_v36 = vld [vmem:[%s3397_s3 + $0x2b8] sm:$0xff]  ;;  %v319_v45 = vld [vmem:[%s2158_s24 + $0x300] sm:$0xff]  ;;  %vm918_vm13 = vcmp.ge.f32.partialorder %v722_v49, 0.0  ;;  %v1309_v13 = vsel %vm917_vm12, %v721_v41, %v1113_v58 }
  0xba   : > { %v1696_v46 = vmul.f32 %v1500_v36, %v1304_v35  ;;  %v522_v56 = vmul.f32 %v2521_v24, %v319_v45  ;;  %v724_v1 = vadd.f32 %v2534_v33, %v521_v48  ;;  %v1115_v12 = vmul.f32 0.2, %v723_v57 }
  0xbb   : > { %v1883_v61 = vadd.f32 %v1882_v53, %v1688_v44  ;;  %v1501_v44 = vld [vmem:[%s3397_s3 + $0x2c0] sm:$0xff]  ;;  %v320_v53 = vld [vmem:[%s2158_s24 + $0x308] sm:$0xff]  ;;  %vm919_vm14 = vcmp.ge.f32.partialorder %v723_v57, 0.0  ;;  %v1310_v21 = vsel %vm918_vm13, %v722_v49, %v1114_v2 }
  0xbc   : > { %v1697_v54 = vmul.f32 %v1501_v44, %v1305_v43  ;;  %v523_v0 = vmul.f32 %v2521_v24, %v320_v53  ;;  %v725_v11 = vadd.f32 %v2534_v33, %v522_v56  ;;  %v1116_v20 = vmul.f32 0.2, %v724_v1 }
  0xbd   : > { %v1884_v6 = vadd.f32 %v1883_v61, %v1689_v52  ;;  %v1502_v52 = vld [vmem:[%s3397_s3 + $0x2c8] sm:$0xff]  ;;  %v321_v61 = vld [vmem:[%s2158_s24 + $0x310] sm:$0xff]  ;;  %vm920_vm15 = vcmp.ge.f32.partialorder %v724_v1, 0.0  ;;  %v1311_v29 = vsel %vm919_vm14, %v723_v57, %v1115_v12 }
  0xbe   : > { %v1698_v62 = vmul.f32 %v1502_v52, %v1306_v51  ;;  %v524_v10 = vmul.f32 %v2521_v24, %v321_v61  ;;  %v726_v19 = vadd.f32 %v2534_v33, %v523_v0  ;;  %v1117_v28 = vmul.f32 0.2, %v725_v11 }
  0xbf   : > { %v1885_v15 = vadd.f32 %v1884_v6, %v1690_v60  ;;  %v1503_v60 = vld [vmem:[%s3397_s3 + $0x2d0] sm:$0xff]  ;;  %v322_v6 = vld [vmem:[%s2158_s24 + $0x318] sm:$0xff]  ;;  %vm921_vm0 = vcmp.ge.f32.partialorder %v725_v11, 0.0  ;;  %v1312_v37 = vsel %vm920_vm15, %v724_v1, %v1116_v20 }
  0xc0   : > { %v1699_v7 = vmul.f32 %v1503_v60, %v1307_v59  ;;  %v525_v18 = vmul.f32 %v2521_v24, %v322_v6  ;;  %v727_v27 = vadd.f32 %v2534_v33, %v524_v10  ;;  %v1118_v36 = vmul.f32 0.2, %v726_v19 }
  0xc1   : > { %v1886_v23 = vadd.f32 %v1885_v15, %v1691_v5  ;;  %v1504_v5 = vld [vmem:[%s3397_s3 + $0x2d8] sm:$0xff]  ;;  %v323_v15 = vld [vmem:[%s2158_s24 + $0x320] sm:$0xff]  ;;  %vm922_vm1 = vcmp.ge.f32.partialorder %v726_v19, 0.0  ;;  %v1313_v45 = vsel %vm921_vm0, %v725_v11, %v1117_v28 }
  0xc2   : > { %v1700_v16 = vmul.f32 %v1504_v5, %v1308_v4  ;;  %v526_v26 = vmul.f32 %v2521_v24, %v323_v15  ;;  %v728_v35 = vadd.f32 %v2534_v33, %v525_v18  ;;  %v1119_v44 = vmul.f32 0.2, %v727_v27 }
  0xc3   : > { %v1887_v31 = vadd.f32 %v1886_v23, %v1692_v14  ;;  %v1505_v14 = vld [vmem:[%s3397_s3 + $0x2e0] sm:$0xff]  ;;  %v324_v23 = vld [vmem:[%s2158_s24 + $0x328] sm:$0xff]  ;;  %vm923_vm2 = vcmp.ge.f32.partialorder %v727_v27, 0.0  ;;  %v1314_v53 = vsel %vm922_vm1, %v726_v19, %v1118_v36 }
  0xc4   : > { %v1701_v3 = vmul.f32 %v1505_v14, %v1309_v13  ;;  %v527_v34 = vmul.f32 %v2521_v24, %v324_v23  ;;  %v729_v43 = vadd.f32 %v2534_v33, %v526_v26  ;;  %v1120_v52 = vmul.f32 0.2, %v728_v35 }
  0xc5   : > { %v1888_v39 = vadd.f32 %v1887_v31, %v1693_v22  ;;  %v1506_v22 = vld [vmem:[%s3397_s3 + $0x2e8] sm:$0xff]  ;;  %v325_v31 = vld [vmem:[%s2158_s24 + $0x330] sm:$0xff]  ;;  %vm924_vm3 = vcmp.ge.f32.partialorder %v728_v35, 0.0  ;;  %v1315_v61 = vsel %vm923_vm2, %v727_v27, %v1119_v44 }
  0xc6   : > { %v1702_v32 = vmul.f32 %v1506_v22, %v1310_v21  ;;  %v528_v42 = vmul.f32 %v2521_v24, %v325_v31  ;;  %v730_v51 = vadd.f32 %v2534_v33, %v527_v34  ;;  %v1121_v60 = vmul.f32 0.2, %v729_v43 }
  0xc7   : > { %v1889_v47 = vadd.f32 %v1888_v39, %v1694_v30  ;;  %v1507_v30 = vld [vmem:[%s3397_s3 + $0x2f0] sm:$0xff]  ;;  %v326_v39 = vld [vmem:[%s2158_s24 + $0x338] sm:$0xff]  ;;  %vm925_vm4 = vcmp.ge.f32.partialorder %v729_v43, 0.0  ;;  %v1316_v6 = vsel %vm924_vm3, %v728_v35, %v1120_v52 }
  0xc8   : > { %v1703_v40 = vmul.f32 %v1507_v30, %v1311_v29  ;;  %v529_v50 = vmul.f32 %v2521_v24, %v326_v39  ;;  %v731_v59 = vadd.f32 %v2534_v33, %v528_v42  ;;  %v1122_v5 = vmul.f32 0.2, %v730_v51 }
  0xc9   : > { %v1890_v55 = vadd.f32 %v1889_v47, %v1695_v38  ;;  %v1508_v38 = vld [vmem:[%s3397_s3 + $0x2f8] sm:$0xff]  ;;  %v327_v47 = vld [vmem:[%s2158_s24 + $0x340] sm:$0xff]  ;;  %vm926_vm5 = vcmp.ge.f32.partialorder %v730_v51, 0.0  ;;  %v1317_v15 = vsel %vm925_vm4, %v729_v43, %v1121_v60 }
  0xca   : > { %v1704_v48 = vmul.f32 %v1508_v38, %v1312_v37  ;;  %v530_v58 = vmul.f32 %v2521_v24, %v327_v47  ;;  %v732_v4 = vadd.f32 %v2534_v33, %v529_v50  ;;  %v1123_v14 = vmul.f32 0.2, %v731_v59 }
  0xcb   : > { %v1891_v63 = vadd.f32 %v1890_v55, %v1696_v46  ;;  %v1509_v46 = vld [vmem:[%s3397_s3 + $0x300] sm:$0xff]  ;;  %v328_v55 = vld [vmem:[%s2158_s24 + $0x348] sm:$0xff]  ;;  %vm927_vm6 = vcmp.ge.f32.partialorder %v731_v59, 0.0  ;;  %v1318_v23 = vsel %vm926_vm5, %v730_v51, %v1122_v5 }
  0xcc   : > { %v1705_v56 = vmul.f32 %v1509_v46, %v1313_v45  ;;  %v531_v2 = vmul.f32 %v2521_v24, %v328_v55  ;;  %v733_v13 = vadd.f32 %v2534_v33, %v530_v58  ;;  %v1124_v22 = vmul.f32 0.2, %v732_v4 }
  0xcd   : > { %v1892_v9 = vadd.f32 %v1891_v63, %v1697_v54  ;;  %v1510_v54 = vld [vmem:[%s3397_s3 + $0x308] sm:$0xff]  ;;  %v329_v63 = vld [vmem:[%s2158_s24 + $0x350] sm:$0xff]  ;;  %vm928_vm7 = vcmp.ge.f32.partialorder %v732_v4, 0.0  ;;  %v1319_v31 = vsel %vm927_vm6, %v731_v59, %v1123_v14 }
  0xce   : > { %v1706_v0 = vmul.f32 %v1510_v54, %v1314_v53  ;;  %v532_v12 = vmul.f32 %v2521_v24, %v329_v63  ;;  %v734_v21 = vadd.f32 %v2534_v33, %v531_v2  ;;  %v1125_v30 = vmul.f32 0.2, %v733_v13 }
  0xcf   : > { %v1893_v17 = vadd.f32 %v1892_v9, %v1698_v62  ;;  %v1511_v62 = vld [vmem:[%s3397_s3 + $0x310] sm:$0xff]  ;;  %v330_v9 = vld [vmem:[%s2158_s24 + $0x358] sm:$0xff]  ;;  %vm929_vm8 = vcmp.ge.f32.partialorder %v733_v13, 0.0  ;;  %v1320_v39 = vsel %vm928_vm7, %v732_v4, %v1124_v22 }
  0xd0   : > { %v1707_v10 = vmul.f32 %v1511_v62, %v1315_v61  ;;  %v533_v20 = vmul.f32 %v2521_v24, %v330_v9  ;;  %v735_v29 = vadd.f32 %v2534_v33, %v532_v12  ;;  %v1126_v38 = vmul.f32 0.2, %v734_v21 }
  0xd1   : > { %v1894_v25 = vadd.f32 %v1893_v17, %v1699_v7  ;;  %v1512_v7 = vld [vmem:[%s3397_s3 + $0x318] sm:$0xff]  ;;  %v331_v17 = vld [vmem:[%s2158_s24 + $0x360] sm:$0xff]  ;;  %vm930_vm9 = vcmp.ge.f32.partialorder %v734_v21, 0.0  ;;  %v1321_v47 = vsel %vm929_vm8, %v733_v13, %v1125_v30 }
  0xd2   : > { %v1708_v18 = vmul.f32 %v1512_v7, %v1316_v6  ;;  %v534_v28 = vmul.f32 %v2521_v24, %v331_v17  ;;  %v736_v37 = vadd.f32 %v2534_v33, %v533_v20  ;;  %v1127_v46 = vmul.f32 0.2, %v735_v29 }
  0xd3   : > { %v1895_v8 = vadd.f32 %v1894_v25, %v1700_v16  ;;  %v1513_v16 = vld [vmem:[%s3397_s3 + $0x320] sm:$0xff]  ;;  %v332_v25 = vld [vmem:[%s2158_s24 + $0x368] sm:$0xff]  ;;  %vm931_vm10 = vcmp.ge.f32.partialorder %v735_v29, 0.0  ;;  %v1322_v55 = vsel %vm930_vm9, %v734_v21, %v1126_v38 }
  0xd4   : > { %v1709_v26 = vmul.f32 %v1513_v16, %v1317_v15  ;;  %v535_v36 = vmul.f32 %v2521_v24, %v332_v25  ;;  %v737_v45 = vadd.f32 %v2534_v33, %v534_v28  ;;  %v1128_v54 = vmul.f32 0.2, %v736_v37 }
  0xd5   : > { %v1896_v41 = vadd.f32 %v1895_v8, %v1701_v3  ;;  %v1514_v3 = vld [vmem:[%s3397_s3 + $0x328] sm:$0xff]  ;;  %v333_v8 = vld [vmem:[%s2158_s24 + $0x370] sm:$0xff]  ;;  %vm932_vm11 = vcmp.ge.f32.partialorder %v736_v37, 0.0  ;;  %v1323_v63 = vsel %vm931_vm10, %v735_v29, %v1127_v46  ;;  %v2876_v46 = vld [vmem:[%s3395_s1] ss:$0 sm:$0xff] }
  0xd6   : > { %v1710_v34 = vmul.f32 %v1514_v3, %v1318_v23  ;;  %v536_v44 = vmul.f32 %v2521_v24, %v333_v8  ;;  %v738_v53 = vadd.f32 %v2534_v33, %v535_v36  ;;  %v1129_v62 = vmul.f32 0.2, %v737_v45 }
  0xd7   : > { %v1897_v49 = vadd.f32 %v1896_v41, %v1702_v32  ;;  %v1515_v32 = vld [vmem:[%s3397_s3 + $0x330] sm:$0xff]  ;;  %v334_v41 = vld [vmem:[%s2158_s24 + $0x378] sm:$0xff]  ;;  %vm933_vm12 = vcmp.ge.f32.partialorder %v737_v45, 0.0  ;;  %v1324_v9 = vsel %vm932_vm11, %v736_v37, %v1128_v54 }
  0xd8   : > { %v1711_v42 = vmul.f32 %v1515_v32, %v1319_v31  ;;  %v537_v52 = vmul.f32 %v2521_v24, %v334_v41  ;;  %v739_v61 = vadd.f32 %v2534_v33, %v536_v44  ;;  %v1130_v7 = vmul.f32 0.2, %v738_v53 }
  0xd9   : > { %v1898_v57 = vadd.f32 %v1897_v49, %v1703_v40  ;;  %v1516_v40 = vld [vmem:[%s3397_s3 + $0x338] sm:$0xff]  ;;  %v335_v49 = vld [vmem:[%s2158_s24 + $0x380] sm:$0xff]  ;;  %vm934_vm13 = vcmp.ge.f32.partialorder %v738_v53, 0.0  ;;  %v1325_v17 = vsel %vm933_vm12, %v737_v45, %v1129_v62 }
  0xda   : > { %v1712_v50 = vmul.f32 %v1516_v40, %v1320_v39  ;;  %v538_v60 = vmul.f32 %v2521_v24, %v335_v49  ;;  %v740_v6 = vadd.f32 %v2534_v33, %v537_v52  ;;  %v1131_v16 = vmul.f32 0.2, %v739_v61 }
  0xdb   : > { %v1899_v1 = vadd.f32 %v1898_v57, %v1704_v48  ;;  %v1517_v48 = vld [vmem:[%s3397_s3 + $0x340] sm:$0xff]  ;;  %v336_v57 = vld [vmem:[%s2158_s24 + $0x388] sm:$0xff]  ;;  %vm935_vm14 = vcmp.ge.f32.partialorder %v739_v61, 0.0  ;;  %v1326_v25 = vsel %vm934_vm13, %v738_v53, %v1130_v7 }
  0xdc   : > { %v1713_v58 = vmul.f32 %v1517_v48, %v1321_v47  ;;  %v539_v5 = vmul.f32 %v2521_v24, %v336_v57  ;;  %v741_v15 = vadd.f32 %v2534_v33, %v538_v60  ;;  %v1132_v3 = vmul.f32 0.2, %v740_v6 }
  0xdd   : > { %v1900_v11 = vadd.f32 %v1899_v1, %v1705_v56  ;;  %v1518_v56 = vld [vmem:[%s3397_s3 + $0x348] sm:$0xff]  ;;  %v337_v1 = vld [vmem:[%s2158_s24 + $0x390] sm:$0xff]  ;;  %vm936_vm15 = vcmp.ge.f32.partialorder %v740_v6, 0.0  ;;  %v1327_v8 = vsel %vm935_vm14, %v739_v61, %v1131_v16 }
  0xde   : > { %v1714_v2 = vmul.f32 %v1518_v56, %v1322_v55  ;;  %v540_v14 = vmul.f32 %v2521_v24, %v337_v1  ;;  %v742_v23 = vadd.f32 %v2534_v33, %v539_v5  ;;  %v1133_v32 = vmul.f32 0.2, %v741_v15  ;;  %v2889_v55 = vld [vmem:[%s3396_s2] ss:$0 sm:$0xff] }
  0xdf   : > { %v1901_v19 = vadd.f32 %v1900_v11, %v1706_v0  ;;  %v1519_v0 = vld [vmem:[%s3397_s3 + $0x350] sm:$0xff]  ;;  %v338_v11 = vld [vmem:[%s2158_s24 + $0x398] sm:$0xff]  ;;  %vm937_vm0 = vcmp.ge.f32.partialorder %v741_v15, 0.0  ;;  %v1328_v41 = vsel %vm936_vm15, %v740_v6, %v1132_v3 }
  0xe0   : > { %v1715_v12 = vmul.f32 %v1519_v0, %v1323_v63  ;;  %v541_v22 = vmul.f32 %v2521_v24, %v338_v11  ;;  %v743_v31 = vadd.f32 %v2534_v33, %v540_v14  ;;  %v1134_v40 = vmul.f32 0.2, %v742_v23 }
  0xe1   : > { %v1902_v27 = vadd.f32 %v1901_v19, %v1707_v10  ;;  %v1520_v10 = vld [vmem:[%s3397_s3 + $0x358] sm:$0xff]  ;;  %v339_v19 = vld [vmem:[%s2158_s24 + $0x3a0] sm:$0xff]  ;;  %vm938_vm1 = vcmp.ge.f32.partialorder %v742_v23, 0.0  ;;  %v1329_v49 = vsel %vm937_vm0, %v741_v15, %v1133_v32 }
  0xe2   : > { %v1716_v20 = vmul.f32 %v1520_v10, %v1324_v9  ;;  %v542_v30 = vmul.f32 %v2521_v24, %v339_v19  ;;  %v744_v39 = vadd.f32 %v2534_v33, %v541_v22  ;;  %v1135_v48 = vmul.f32 0.2, %v743_v31 }
  0xe3   : > { %v1903_v35 = vadd.f32 %v1902_v27, %v1708_v18  ;;  %v1521_v18 = vld [vmem:[%s3397_s3 + $0x360] sm:$0xff]  ;;  %v340_v27 = vld [vmem:[%s2158_s24 + $0x3a8] sm:$0xff]  ;;  %vm939_vm2 = vcmp.ge.f32.partialorder %v743_v31, 0.0  ;;  %v1330_v57 = vsel %vm938_vm1, %v742_v23, %v1134_v40 }
  0xe4   : > { %v1717_v28 = vmul.f32 %v1521_v18, %v1325_v17  ;;  %v543_v38 = vmul.f32 %v2521_v24, %v340_v27  ;;  %v745_v47 = vadd.f32 %v2534_v33, %v542_v30  ;;  %v1136_v56 = vmul.f32 0.2, %v744_v39 }
  0xe5   : > { %v1904_v43 = vadd.f32 %v1903_v35, %v1709_v26  ;;  %v1522_v26 = vld [vmem:[%s3397_s3 + $0x368] sm:$0xff]  ;;  %v341_v35 = vld [vmem:[%s2158_s24 + $0x3b0] sm:$0xff]  ;;  %vm940_vm3 = vcmp.ge.f32.partialorder %v744_v39, 0.0  ;;  %v1331_v1 = vsel %vm939_vm2, %v743_v31, %v1135_v48 }
  0xe6   : > { %v1718_v36 = vmul.f32 %v1522_v26, %v1326_v25  ;;  %v544_v24 = vmul.f32 %v2876_v46, %v341_v35  ;;  %v746_v33 = vadd.f32 %v2889_v55, %v543_v38  ;;  %v1137_v0 = vmul.f32 0.2, %v745_v47 }
  0xe7   : > { %v1905_v51 = vadd.f32 %v1904_v43, %v1710_v34  ;;  %v1523_v34 = vld [vmem:[%s3397_s3 + $0x370] sm:$0xff]  ;;  %v342_v43 = vld [vmem:[%s2158_s24 + $0x3b8] sm:$0xff]  ;;  %vm941_vm4 = vcmp.ge.f32.partialorder %v745_v47, 0.0  ;;  %v1332_v11 = vsel %vm940_vm3, %v744_v39, %v1136_v56 }
  0xe8   : > { %v1719_v44 = vmul.f32 %v1523_v34, %v1327_v8  ;;  %v545_v54 = vmul.f32 %v2876_v46, %v342_v43  ;;  %v747_v63 = vadd.f32 %v2889_v55, %v544_v24  ;;  %v1138_v10 = vmul.f32 0.2, %v746_v33 }
  0xe9   : > { %v1906_v59 = vadd.f32 %v1905_v51, %v1711_v42  ;;  %v1524_v42 = vld [vmem:[%s3397_s3 + $0x378] sm:$0xff]  ;;  %v343_v51 = vld [vmem:[%s2158_s24 + $0x3c0] sm:$0xff]  ;;  %vm942_vm5 = vcmp.ge.f32.partialorder %v746_v33, 0.0  ;;  %v1333_v19 = vsel %vm941_vm4, %v745_v47, %v1137_v0 }
  0xea   : > { %v1720_v52 = vmul.f32 %v1524_v42, %v1328_v41  ;;  %v546_v62 = vmul.f32 %v2876_v46, %v343_v51  ;;  %v748_v9 = vadd.f32 %v2889_v55, %v545_v54  ;;  %v1139_v18 = vmul.f32 0.2, %v747_v63 }
  0xeb   : > { %v1907_v4 = vadd.f32 %v1906_v59, %v1712_v50  ;;  %v1525_v50 = vld [vmem:[%s3397_s3 + $0x380] sm:$0xff]  ;;  %v344_v59 = vld [vmem:[%s2158_s24 + $0x3c8] sm:$0xff]  ;;  %vm943_vm6 = vcmp.ge.f32.partialorder %v747_v63, 0.0  ;;  %v1334_v27 = vsel %vm942_vm5, %v746_v33, %v1138_v10 }
  0xec   : > { %v1721_v60 = vmul.f32 %v1525_v50, %v1329_v49  ;;  %v547_v7 = vmul.f32 %v2876_v46, %v344_v59  ;;  %v749_v17 = vadd.f32 %v2889_v55, %v546_v62  ;;  %v1140_v26 = vmul.f32 0.2, %v748_v9 }
  0xed   : > { %v1908_v13 = vadd.f32 %v1907_v4, %v1713_v58  ;;  %v1526_v58 = vld [vmem:[%s3397_s3 + $0x388] sm:$0xff]  ;;  %v345_v4 = vld [vmem:[%s2158_s24 + $0x3d0] sm:$0xff]  ;;  %vm944_vm7 = vcmp.ge.f32.partialorder %v748_v9, 0.0  ;;  %v1335_v35 = vsel %vm943_vm6, %v747_v63, %v1139_v18 }
  0xee   : > { %v1722_v5 = vmul.f32 %v1526_v58, %v1330_v57  ;;  %v548_v16 = vmul.f32 %v2876_v46, %v345_v4  ;;  %v750_v25 = vadd.f32 %v2889_v55, %v547_v7  ;;  %v1141_v34 = vmul.f32 0.2, %v749_v17 }
  0xef   : > { %v1909_v21 = vadd.f32 %v1908_v13, %v1714_v2  ;;  %v1527_v2 = vld [vmem:[%s3397_s3 + $0x390] sm:$0xff]  ;;  %v346_v13 = vld [vmem:[%s2158_s24 + $0x3d8] sm:$0xff]  ;;  %vm945_vm8 = vcmp.ge.f32.partialorder %v749_v17, 0.0  ;;  %v1336_v43 = vsel %vm944_vm7, %v748_v9, %v1140_v26 }
  0xf0   : > { %v1723_v14 = vmul.f32 %v1527_v2, %v1331_v1  ;;  %v549_v3 = vmul.f32 %v2876_v46, %v346_v13  ;;  %v751_v8 = vadd.f32 %v2889_v55, %v548_v16  ;;  %v1142_v42 = vmul.f32 0.2, %v750_v25 }
  0xf1   : > { %v1910_v29 = vadd.f32 %v1909_v21, %v1715_v12  ;;  %v1528_v12 = vld [vmem:[%s3397_s3 + $0x398] sm:$0xff]  ;;  %v347_v21 = vld [vmem:[%s2158_s24 + $0x3e0] sm:$0xff]  ;;  %vm946_vm9 = vcmp.ge.f32.partialorder %v750_v25, 0.0  ;;  %v1337_v51 = vsel %vm945_vm8, %v749_v17, %v1141_v34 }
  0xf2   : > { %v1724_v22 = vmul.f32 %v1528_v12, %v1332_v11  ;;  %v550_v32 = vmul.f32 %v2876_v46, %v347_v21  ;;  %v752_v41 = vadd.f32 %v2889_v55, %v549_v3  ;;  %v1143_v50 = vmul.f32 0.2, %v751_v8 }
  0xf3   : > { %v1911_v37 = vadd.f32 %v1910_v29, %v1716_v20  ;;  %v1529_v20 = vld [vmem:[%s3397_s3 + $0x3a0] sm:$0xff]  ;;  %v348_v29 = vld [vmem:[%s2158_s24 + $0x3e8] sm:$0xff]  ;;  %vm947_vm10 = vcmp.ge.f32.partialorder %v751_v8, 0.0  ;;  %v1338_v59 = vsel %vm946_vm9, %v750_v25, %v1142_v42 }
  0xf4   : > { %v1725_v30 = vmul.f32 %v1529_v20, %v1333_v19  ;;  %v551_v40 = vmul.f32 %v2876_v46, %v348_v29  ;;  %v753_v49 = vadd.f32 %v2889_v55, %v550_v32  ;;  %v1144_v58 = vmul.f32 0.2, %v752_v41 }
  0xf5   : > { %v1912_v45 = vadd.f32 %v1911_v37, %v1717_v28  ;;  %v1530_v28 = vld [vmem:[%s3397_s3 + $0x3a8] sm:$0xff]  ;;  %v349_v37 = vld [vmem:[%s2158_s24 + $0x3f0] sm:$0xff]  ;;  %vm948_vm11 = vcmp.ge.f32.partialorder %v752_v41, 0.0  ;;  %v1339_v4 = vsel %vm947_vm10, %v751_v8, %v1143_v50 }
  0xf6   : > { %v1726_v38 = vmul.f32 %v1530_v28, %v1334_v27  ;;  %v552_v48 = vmul.f32 %v2876_v46, %v349_v37  ;;  %v754_v57 = vadd.f32 %v2889_v55, %v551_v40  ;;  %v1145_v2 = vmul.f32 0.2, %v753_v49 }
  0xf7   : > { %v1913_v53 = vadd.f32 %v1912_v45, %v1718_v36  ;;  %v1531_v36 = vld [vmem:[%s3397_s3 + $0x3b0] sm:$0xff]  ;;  %v350_v45 = vld [vmem:[%s2158_s24 + $0x3f8] sm:$0xff]  ;;  %vm949_vm12 = vcmp.ge.f32.partialorder %v753_v49, 0.0  ;;  %v1340_v13 = vsel %vm948_vm11, %v752_v41, %v1144_v58 }
  0xf8   : > { %v1727_v24 = vmul.f32 %v1531_v36, %v1335_v35  ;;  %v553_v56 = vmul.f32 %v2876_v46, %v350_v45  ;;  %v755_v1 = vadd.f32 %v2889_v55, %v552_v48  ;;  %v1146_v12 = vmul.f32 0.2, %v754_v57 }
  0xf9   : > { %v1914_v61 = vadd.f32 %v1913_v53, %v1719_v44  ;;  %v1532_v44 = vld [vmem:[%s3397_s3 + $0x3b8] sm:$0xff]  ;;  %v351_v53 = vld [vmem:[%s2158_s24 + $0x400] sm:$0xff]  ;;  %vm950_vm13 = vcmp.ge.f32.partialorder %v754_v57, 0.0  ;;  %v1341_v21 = vsel %vm949_vm12, %v753_v49, %v1145_v2 }
  0xfa   : > { %v1728_v54 = vmul.f32 %v1532_v44, %v1336_v43  ;;  %v554_v0 = vmul.f32 %v2876_v46, %v351_v53  ;;  %v756_v11 = vadd.f32 %v2889_v55, %v553_v56  ;;  %v1147_v20 = vmul.f32 0.2, %v755_v1 }
  0xfb   : > { %v1915_v6 = vadd.f32 %v1914_v61, %v1720_v52  ;;  %v1533_v52 = vld [vmem:[%s3397_s3 + $0x3c0] sm:$0xff]  ;;  %v352_v61 = vld [vmem:[%s2158_s24 + $0x408] sm:$0xff]  ;;  %vm951_vm14 = vcmp.ge.f32.partialorder %v755_v1, 0.0  ;;  %v1342_v29 = vsel %vm950_vm13, %v754_v57, %v1146_v12 }
  0xfc   : > { %v1729_v62 = vmul.f32 %v1533_v52, %v1337_v51  ;;  %v555_v10 = vmul.f32 %v2876_v46, %v352_v61  ;;  %v757_v19 = vadd.f32 %v2889_v55, %v554_v0  ;;  %v1148_v28 = vmul.f32 0.2, %v756_v11 }
  0xfd   : > { %v1916_v15 = vadd.f32 %v1915_v6, %v1721_v60  ;;  %v1534_v60 = vld [vmem:[%s3397_s3 + $0x3c8] sm:$0xff]  ;;  %v353_v6 = vld [vmem:[%s2158_s24 + $0x410] sm:$0xff]  ;;  %vm952_vm15 = vcmp.ge.f32.partialorder %v756_v11, 0.0  ;;  %v1343_v37 = vsel %vm951_vm14, %v755_v1, %v1147_v20 }
  0xfe   : > { %v1730_v7 = vmul.f32 %v1534_v60, %v1338_v59  ;;  %v556_v18 = vmul.f32 %v2876_v46, %v353_v6  ;;  %v758_v27 = vadd.f32 %v2889_v55, %v555_v10  ;;  %v1149_v36 = vmul.f32 0.2, %v757_v19 }
  0xff   : > { %v1917_v23 = vadd.f32 %v1916_v15, %v1722_v5  ;;  %v1535_v5 = vld [vmem:[%s3397_s3 + $0x3d0] sm:$0xff]  ;;  %v354_v15 = vld [vmem:[%s2158_s24 + $0x418] sm:$0xff]  ;;  %vm953_vm0 = vcmp.ge.f32.partialorder %v757_v19, 0.0  ;;  %v1344_v45 = vsel %vm952_vm15, %v756_v11, %v1148_v28 }
 0x100   : > { %v1731_v16 = vmul.f32 %v1535_v5, %v1339_v4  ;;  %v557_v26 = vmul.f32 %v2876_v46, %v354_v15  ;;  %v759_v35 = vadd.f32 %v2889_v55, %v556_v18  ;;  %v1150_v44 = vmul.f32 0.2, %v758_v27 }
 0x101   : > { %v1918_v31 = vadd.f32 %v1917_v23, %v1723_v14  ;;  %v1536_v14 = vld [vmem:[%s3397_s3 + $0x3d8] sm:$0xff]  ;;  %v355_v23 = vld [vmem:[%s2158_s24 + $0x420] sm:$0xff]  ;;  %vm954_vm1 = vcmp.ge.f32.partialorder %v758_v27, 0.0  ;;  %v1345_v53 = vsel %vm953_vm0, %v757_v19, %v1149_v36 }
 0x102   : > { %v1732_v3 = vmul.f32 %v1536_v14, %v1340_v13  ;;  %v558_v34 = vmul.f32 %v2876_v46, %v355_v23  ;;  %v760_v43 = vadd.f32 %v2889_v55, %v557_v26  ;;  %v1151_v52 = vmul.f32 0.2, %v759_v35 }
 0x103   : > { %v1919_v39 = vadd.f32 %v1918_v31, %v1724_v22  ;;  %v1537_v22 = vld [vmem:[%s3397_s3 + $0x3e0] sm:$0xff]  ;;  %v356_v31 = vld [vmem:[%s2158_s24 + $0x428] sm:$0xff]  ;;  %vm955_vm2 = vcmp.ge.f32.partialorder %v759_v35, 0.0  ;;  %v1346_v61 = vsel %vm954_vm1, %v758_v27, %v1150_v44 }
 0x104   : > { %v1733_v32 = vmul.f32 %v1537_v22, %v1341_v21  ;;  %v559_v42 = vmul.f32 %v2876_v46, %v356_v31  ;;  %v761_v51 = vadd.f32 %v2889_v55, %v558_v34  ;;  %v1152_v60 = vmul.f32 0.2, %v760_v43 }
 0x105   : > { %v1920_v47 = vadd.f32 %v1919_v39, %v1725_v30  ;;  %v1538_v30 = vld [vmem:[%s3397_s3 + $0x3e8] sm:$0xff]  ;;  %v357_v39 = vld [vmem:[%s2158_s24 + $0x430] sm:$0xff]  ;;  %vm956_vm3 = vcmp.ge.f32.partialorder %v760_v43, 0.0  ;;  %v1347_v6 = vsel %vm955_vm2, %v759_v35, %v1151_v52 }
 0x106   : > { %v1734_v40 = vmul.f32 %v1538_v30, %v1342_v29  ;;  %v560_v50 = vmul.f32 %v2876_v46, %v357_v39  ;;  %v762_v59 = vadd.f32 %v2889_v55, %v559_v42  ;;  %v1153_v5 = vmul.f32 0.2, %v761_v51 }
 0x107   : > { %v1921_v33 = vadd.f32 %v1920_v47, %v1726_v38  ;;  %v1539_v38 = vld [vmem:[%s3397_s3 + $0x3f0] sm:$0xff]  ;;  %v358_v47 = vld [vmem:[%s2158_s24 + $0x438] sm:$0xff]  ;;  %vm957_vm4 = vcmp.ge.f32.partialorder %v761_v51, 0.0  ;;  %v1348_v15 = vsel %vm956_vm3, %v760_v43, %v1152_v60 }
 0x108   : > { %v1735_v48 = vmul.f32 %v1539_v38, %v1343_v37  ;;  %v561_v58 = vmul.f32 %v2876_v46, %v358_v47  ;;  %v763_v4 = vadd.f32 %v2889_v55, %v560_v50  ;;  %v1154_v14 = vmul.f32 0.2, %v762_v59 }
 0x109   : > { %v1922_v63 = vadd.f32 %v1921_v33, %v1727_v24  ;;  %v1540_v24 = vld [vmem:[%s3397_s3 + $0x3f8] sm:$0xff]  ;;  %v359_v33 = vld [vmem:[%s2158_s24 + $0x440] sm:$0xff]  ;;  %vm958_vm5 = vcmp.ge.f32.partialorder %v762_v59, 0.0  ;;  %v1349_v23 = vsel %vm957_vm4, %v761_v51, %v1153_v5 }
 0x10a   : > { %v1736_v56 = vmul.f32 %v1540_v24, %v1344_v45  ;;  %v562_v2 = vmul.f32 %v2876_v46, %v359_v33  ;;  %v764_v13 = vadd.f32 %v2889_v55, %v561_v58  ;;  %v1155_v22 = vmul.f32 0.2, %v763_v4 }
 0x10b   : > { %v1923_v9 = vadd.f32 %v1922_v63, %v1728_v54  ;;  %v1541_v54 = vld [vmem:[%s3397_s3 + $0x400] sm:$0xff]  ;;  %v360_v63 = vld [vmem:[%s2158_s24 + $0x448] sm:$0xff]  ;;  %vm959_vm6 = vcmp.ge.f32.partialorder %v763_v4, 0.0  ;;  %v1350_v31 = vsel %vm958_vm5, %v762_v59, %v1154_v14 }
 0x10c   : > { %v1737_v0 = vmul.f32 %v1541_v54, %v1345_v53  ;;  %v563_v12 = vmul.f32 %v2876_v46, %v360_v63  ;;  %v765_v21 = vadd.f32 %v2889_v55, %v562_v2  ;;  %v1156_v30 = vmul.f32 0.2, %v764_v13 }
 0x10d   : > { %v1924_v17 = vadd.f32 %v1923_v9, %v1729_v62  ;;  %v1542_v62 = vld [vmem:[%s3397_s3 + $0x408] sm:$0xff]  ;;  %v361_v9 = vld [vmem:[%s2158_s24 + $0x450] sm:$0xff]  ;;  %vm960_vm7 = vcmp.ge.f32.partialorder %v764_v13, 0.0  ;;  %v1351_v39 = vsel %vm959_vm6, %v763_v4, %v1155_v22 }
 0x10e   : > { %v1738_v10 = vmul.f32 %v1542_v62, %v1346_v61  ;;  %v564_v20 = vmul.f32 %v2876_v46, %v361_v9  ;;  %v766_v29 = vadd.f32 %v2889_v55, %v563_v12  ;;  %v1157_v38 = vmul.f32 0.2, %v765_v21 }
 0x10f   : > { %v1925_v25 = vadd.f32 %v1924_v17, %v1730_v7  ;;  %v1543_v7 = vld [vmem:[%s3397_s3 + $0x410] sm:$0xff]  ;;  %v362_v17 = vld [vmem:[%s2158_s24 + $0x458] sm:$0xff]  ;;  %vm961_vm8 = vcmp.ge.f32.partialorder %v765_v21, 0.0  ;;  %v1352_v47 = vsel %vm960_vm7, %v764_v13, %v1156_v30 }
 0x110   : > { %v1739_v18 = vmul.f32 %v1543_v7, %v1347_v6  ;;  %v565_v28 = vmul.f32 %v2876_v46, %v362_v17  ;;  %v767_v37 = vadd.f32 %v2889_v55, %v564_v20  ;;  %v1158_v24 = vmul.f32 0.2, %v766_v29 }
 0x111   : > { %v1926_v8 = vadd.f32 %v1925_v25, %v1731_v16  ;;  %v1544_v16 = vld [vmem:[%s3397_s3 + $0x418] sm:$0xff]  ;;  %v363_v25 = vld [vmem:[%s2158_s24 + $0x460] sm:$0xff]  ;;  %vm962_vm9 = vcmp.ge.f32.partialorder %v766_v29, 0.0  ;;  %v1353_v33 = vsel %vm961_vm8, %v765_v21, %v1157_v38 }
 0x112   : > { %v1740_v26 = vmul.f32 %v1544_v16, %v1348_v15  ;;  %v566_v36 = vmul.f32 %v2876_v46, %v363_v25  ;;  %v768_v45 = vadd.f32 %v2889_v55, %v565_v28  ;;  %v1159_v54 = vmul.f32 0.2, %v767_v37 }
 0x113   : > { %v1927_v41 = vadd.f32 %v1926_v8, %v1732_v3  ;;  %v1545_v3 = vld [vmem:[%s3397_s3 + $0x420] sm:$0xff]  ;;  %v364_v8 = vld [vmem:[%s2158_s24 + $0x468] sm:$0xff]  ;;  %vm963_vm10 = vcmp.ge.f32.partialorder %v767_v37, 0.0  ;;  %v1354_v63 = vsel %vm962_vm9, %v766_v29, %v1158_v24 }
 0x114   : > { %v1741_v34 = vmul.f32 %v1545_v3, %v1349_v23  ;;  %v567_v44 = vmul.f32 %v2876_v46, %v364_v8  ;;  %v769_v53 = vadd.f32 %v2889_v55, %v566_v36  ;;  %v1160_v62 = vmul.f32 0.2, %v768_v45 }
 0x115   : > { %v1928_v49 = vadd.f32 %v1927_v41, %v1733_v32  ;;  %v1546_v32 = vld [vmem:[%s3397_s3 + $0x428] sm:$0xff]  ;;  %v365_v41 = vld [vmem:[%s2158_s24 + $0x470] sm:$0xff]  ;;  %vm964_vm11 = vcmp.ge.f32.partialorder %v768_v45, 0.0  ;;  %v1355_v9 = vsel %vm963_vm10, %v767_v37, %v1159_v54 }
 0x116   : > { %v1742_v42 = vmul.f32 %v1546_v32, %v1350_v31  ;;  %v568_v52 = vmul.f32 %v2876_v46, %v365_v41  ;;  %v770_v61 = vadd.f32 %v2889_v55, %v567_v44  ;;  %v1161_v7 = vmul.f32 0.2, %v769_v53 }
 0x117   : > { %v1929_v57 = vadd.f32 %v1928_v49, %v1734_v40  ;;  %v1547_v40 = vld [vmem:[%s3397_s3 + $0x430] sm:$0xff]  ;;  %v366_v49 = vld [vmem:[%s2158_s24 + $0x478] sm:$0xff]  ;;  %vm965_vm12 = vcmp.ge.f32.partialorder %v769_v53, 0.0  ;;  %v1356_v17 = vsel %vm964_vm11, %v768_v45, %v1160_v62 }
 0x118   : > { %v1743_v50 = vmul.f32 %v1547_v40, %v1351_v39  ;;  %v569_v60 = vmul.f32 %v2876_v46, %v366_v49  ;;  %v771_v6 = vadd.f32 %v2889_v55, %v568_v52  ;;  %v1162_v16 = vmul.f32 0.2, %v770_v61 }
 0x119   : > { %v1930_v1 = vadd.f32 %v1929_v57, %v1735_v48  ;;  %v1548_v48 = vld [vmem:[%s3397_s3 + $0x438] sm:$0xff]  ;;  %v367_v57 = vld [vmem:[%s2158_s24 + $0x480] sm:$0xff]  ;;  %vm966_vm13 = vcmp.ge.f32.partialorder %v770_v61, 0.0  ;;  %v1357_v25 = vsel %vm965_vm12, %v769_v53, %v1161_v7 }
 0x11a   : > { %v1744_v58 = vmul.f32 %v1548_v48, %v1352_v47  ;;  %v570_v5 = vmul.f32 %v2876_v46, %v367_v57  ;;  %v772_v15 = vadd.f32 %v2889_v55, %v569_v60  ;;  %v1163_v3 = vmul.f32 0.2, %v771_v6 }
 0x11b   : > { %v1931_v11 = vadd.f32 %v1930_v1, %v1736_v56  ;;  %v1549_v56 = vld [vmem:[%s3397_s3 + $0x440] sm:$0xff]  ;;  %v368_v1 = vld [vmem:[%s2158_s24 + $0x488] sm:$0xff]  ;;  %vm967_vm14 = vcmp.ge.f32.partialorder %v771_v6, 0.0  ;;  %v1358_v8 = vsel %vm966_vm13, %v770_v61, %v1162_v16 }
 0x11c   : > { %v1745_v2 = vmul.f32 %v1549_v56, %v1353_v33  ;;  %v571_v14 = vmul.f32 %v2876_v46, %v368_v1  ;;  %v773_v23 = vadd.f32 %v2889_v55, %v570_v5  ;;  %v1164_v32 = vmul.f32 0.2, %v772_v15 }
 0x11d   : > { %v1932_v19 = vadd.f32 %v1931_v11, %v1737_v0  ;;  %v1550_v0 = vld [vmem:[%s3397_s3 + $0x448] sm:$0xff]  ;;  %v369_v11 = vld [vmem:[%s2158_s24 + $0x490] sm:$0xff]  ;;  %vm968_vm15 = vcmp.ge.f32.partialorder %v772_v15, 0.0  ;;  %v1359_v41 = vsel %vm967_vm14, %v771_v6, %v1163_v3 }
 0x11e   : > { %v1746_v12 = vmul.f32 %v1550_v0, %v1354_v63  ;;  %v572_v22 = vmul.f32 %v2876_v46, %v369_v11  ;;  %v774_v31 = vadd.f32 %v2889_v55, %v571_v14  ;;  %v1165_v40 = vmul.f32 0.2, %v773_v23 }
 0x11f   : > { %v1933_v27 = vadd.f32 %v1932_v19, %v1738_v10  ;;  %v1551_v10 = vld [vmem:[%s3397_s3 + $0x450] sm:$0xff]  ;;  %v370_v19 = vld [vmem:[%s2158_s24 + $0x498] sm:$0xff]  ;;  %vm969_vm0 = vcmp.ge.f32.partialorder %v773_v23, 0.0  ;;  %v1360_v49 = vsel %vm968_vm15, %v772_v15, %v1164_v32 }
 0x120   : > { %v1747_v20 = vmul.f32 %v1551_v10, %v1355_v9  ;;  %v573_v30 = vmul.f32 %v2876_v46, %v370_v19  ;;  %v775_v39 = vadd.f32 %v2889_v55, %v572_v22  ;;  %v1166_v48 = vmul.f32 0.2, %v774_v31 }
 0x121   : > { %v1934_v35 = vadd.f32 %v1933_v27, %v1739_v18  ;;  %v1552_v18 = vld [vmem:[%s3397_s3 + $0x458] sm:$0xff]  ;;  %v371_v27 = vld [vmem:[%s2158_s24 + $0x4a0] sm:$0xff]  ;;  %vm970_vm1 = vcmp.ge.f32.partialorder %v774_v31, 0.0  ;;  %v1361_v57 = vsel %vm969_vm0, %v773_v23, %v1165_v40 }
 0x122   : > { %v1748_v28 = vmul.f32 %v1552_v18, %v1356_v17  ;;  %v574_v38 = vmul.f32 %v2876_v46, %v371_v27  ;;  %v776_v47 = vadd.f32 %v2889_v55, %v573_v30  ;;  %v1167_v56 = vmul.f32 0.2, %v775_v39 }
 0x123   : > { %v1935_v43 = vadd.f32 %v1934_v35, %v1740_v26  ;;  %v1553_v26 = vld [vmem:[%s3397_s3 + $0x460] sm:$0xff]  ;;  %v372_v35 = vld [vmem:[%s2158_s24 + $0x4a8] sm:$0xff]  ;;  %vm971_vm2 = vcmp.ge.f32.partialorder %v775_v39, 0.0  ;;  %v1362_v1 = vsel %vm970_vm1, %v774_v31, %v1166_v48 }
 0x124   : > { %v1749_v36 = vmul.f32 %v1553_v26, %v1357_v25  ;;  %v575_v24 = vmul.f32 %v2876_v46, %v372_v35  ;;  %v777_v33 = vadd.f32 %v2889_v55, %v574_v38  ;;  %v1168_v0 = vmul.f32 0.2, %v776_v47 }
 0x125   : > { %v1936_v51 = vadd.f32 %v1935_v43, %v1741_v34  ;;  %v1554_v34 = vld [vmem:[%s3397_s3 + $0x468] sm:$0xff]  ;;  %v373_v43 = vld [vmem:[%s2158_s24 + $0x4b0] sm:$0xff]  ;;  %vm972_vm3 = vcmp.ge.f32.partialorder %v776_v47, 0.0  ;;  %v1363_v11 = vsel %vm971_vm2, %v775_v39, %v1167_v56 }
 0x126   : > { %v1750_v44 = vmul.f32 %v1554_v34, %v1358_v8  ;;  %v576_v54 = vmul.f32 %v2876_v46, %v373_v43  ;;  %v778_v63 = vadd.f32 %v2889_v55, %v575_v24  ;;  %v1169_v10 = vmul.f32 0.2, %v777_v33 }
 0x127   : > { %v1937_v59 = vadd.f32 %v1936_v51, %v1742_v42  ;;  %v1555_v42 = vld [vmem:[%s3397_s3 + $0x470] sm:$0xff]  ;;  %v374_v51 = vld [vmem:[%s2158_s24 + $0x4b8] sm:$0xff]  ;;  %vm973_vm4 = vcmp.ge.f32.partialorder %v777_v33, 0.0  ;;  %v1364_v19 = vsel %vm972_vm3, %v776_v47, %v1168_v0 }
 0x128   : > { %v1751_v52 = vmul.f32 %v1555_v42, %v1359_v41  ;;  %v577_v62 = vmul.f32 %v2876_v46, %v374_v51  ;;  %v779_v9 = vadd.f32 %v2889_v55, %v576_v54  ;;  %v1170_v18 = vmul.f32 0.2, %v778_v63 }
 0x129   : > { %v1938_v4 = vadd.f32 %v1937_v59, %v1743_v50  ;;  %v1556_v50 = vld [vmem:[%s3397_s3 + $0x478] sm:$0xff]  ;;  %v375_v59 = vld [vmem:[%s2158_s24 + $0x4c0] sm:$0xff]  ;;  %vm974_vm5 = vcmp.ge.f32.partialorder %v778_v63, 0.0  ;;  %v1365_v27 = vsel %vm973_vm4, %v777_v33, %v1169_v10 }
 0x12a   : > { %v1752_v60 = vmul.f32 %v1556_v50, %v1360_v49  ;;  %v578_v7 = vmul.f32 %v2876_v46, %v375_v59  ;;  %v780_v17 = vadd.f32 %v2889_v55, %v577_v62  ;;  %v1171_v26 = vmul.f32 0.2, %v779_v9 }
 0x12b   : > { %v1939_v13 = vadd.f32 %v1938_v4, %v1744_v58  ;;  %v1557_v58 = vld [vmem:[%s3397_s3 + $0x480] sm:$0xff]  ;;  %v376_v4 = vld [vmem:[%s2158_s24 + $0x4c8] sm:$0xff]  ;;  %vm975_vm6 = vcmp.ge.f32.partialorder %v779_v9, 0.0  ;;  %v1366_v35 = vsel %vm974_vm5, %v778_v63, %v1170_v18 }
 0x12c   : > { %v1753_v5 = vmul.f32 %v1557_v58, %v1361_v57  ;;  %v579_v16 = vmul.f32 %v2876_v46, %v376_v4  ;;  %v781_v25 = vadd.f32 %v2889_v55, %v578_v7  ;;  %v1172_v34 = vmul.f32 0.2, %v780_v17 }
 0x12d   : > { %v1940_v21 = vadd.f32 %v1939_v13, %v1745_v2  ;;  %v1558_v2 = vld [vmem:[%s3397_s3 + $0x488] sm:$0xff]  ;;  %v377_v13 = vld [vmem:[%s2158_s24 + $0x4d0] sm:$0xff]  ;;  %vm976_vm7 = vcmp.ge.f32.partialorder %v780_v17, 0.0  ;;  %v1367_v43 = vsel %vm975_vm6, %v779_v9, %v1171_v26 }
 0x12e   : > { %v1754_v14 = vmul.f32 %v1558_v2, %v1362_v1  ;;  %v580_v3 = vmul.f32 %v2876_v46, %v377_v13  ;;  %v782_v8 = vadd.f32 %v2889_v55, %v579_v16  ;;  %v1173_v42 = vmul.f32 0.2, %v781_v25 }
 0x12f   : > { %v1941_v29 = vadd.f32 %v1940_v21, %v1746_v12  ;;  %v1559_v12 = vld [vmem:[%s3397_s3 + $0x490] sm:$0xff]  ;;  %v378_v21 = vld [vmem:[%s2158_s24 + $0x4d8] sm:$0xff]  ;;  %vm977_vm8 = vcmp.ge.f32.partialorder %v781_v25, 0.0  ;;  %v1368_v51 = vsel %vm976_vm7, %v780_v17, %v1172_v34 }
 0x130   : > { %v1755_v22 = vmul.f32 %v1559_v12, %v1363_v11  ;;  %v581_v32 = vmul.f32 %v2876_v46, %v378_v21  ;;  %v783_v41 = vadd.f32 %v2889_v55, %v580_v3  ;;  %v1174_v50 = vmul.f32 0.2, %v782_v8 }
 0x131   : > { %v1942_v37 = vadd.f32 %v1941_v29, %v1747_v20  ;;  %v1560_v20 = vld [vmem:[%s3397_s3 + $0x498] sm:$0xff]  ;;  %v379_v29 = vld [vmem:[%s2158_s24 + $0x4e0] sm:$0xff]  ;;  %vm978_vm9 = vcmp.ge.f32.partialorder %v782_v8, 0.0  ;;  %v1369_v59 = vsel %vm977_vm8, %v781_v25, %v1173_v42 }
 0x132   : > { %v1756_v30 = vmul.f32 %v1560_v20, %v1364_v19  ;;  %v582_v40 = vmul.f32 %v2876_v46, %v379_v29  ;;  %v784_v49 = vadd.f32 %v2889_v55, %v581_v32  ;;  %v1175_v58 = vmul.f32 0.2, %v783_v41 }
 0x133   : > { %v1943_v45 = vadd.f32 %v1942_v37, %v1748_v28  ;;  %v1561_v28 = vld [vmem:[%s3397_s3 + $0x4a0] sm:$0xff]  ;;  %v380_v37 = vld [vmem:[%s2158_s24 + $0x4e8] sm:$0xff]  ;;  %vm979_vm10 = vcmp.ge.f32.partialorder %v783_v41, 0.0  ;;  %v1370_v4 = vsel %vm978_vm9, %v782_v8, %v1174_v50 }
 0x134   : > { %v1757_v38 = vmul.f32 %v1561_v28, %v1365_v27  ;;  %v583_v48 = vmul.f32 %v2876_v46, %v380_v37  ;;  %v785_v57 = vadd.f32 %v2889_v55, %v582_v40  ;;  %v1176_v2 = vmul.f32 0.2, %v784_v49 }
 0x135   : > { %v1944_v53 = vadd.f32 %v1943_v45, %v1749_v36  ;;  %v1562_v36 = vld [vmem:[%s3397_s3 + $0x4a8] sm:$0xff]  ;;  %v381_v45 = vld [vmem:[%s2158_s24 + $0x4f0] sm:$0xff]  ;;  %vm980_vm11 = vcmp.ge.f32.partialorder %v784_v49, 0.0  ;;  %v1371_v13 = vsel %vm979_vm10, %v783_v41, %v1175_v58 }
 0x136   : > { %v1758_v24 = vmul.f32 %v1562_v36, %v1366_v35  ;;  %v584_v56 = vmul.f32 %v2876_v46, %v381_v45  ;;  %v786_v1 = vadd.f32 %v2889_v55, %v583_v48  ;;  %v1177_v12 = vmul.f32 0.2, %v785_v57 }
 0x137   : > { %v1945_v61 = vadd.f32 %v1944_v53, %v1750_v44  ;;  %v1563_v44 = vld [vmem:[%s3397_s3 + $0x4b0] sm:$0xff]  ;;  %v382_v53 = vld [vmem:[%s2158_s24 + $0x4f8] sm:$0xff]  ;;  %vm981_vm12 = vcmp.ge.f32.partialorder %v785_v57, 0.0  ;;  %v1372_v21 = vsel %vm980_vm11, %v784_v49, %v1176_v2 }
 0x138   : > { %v1759_v54 = vmul.f32 %v1563_v44, %v1367_v43  ;;  %v585_v0 = vmul.f32 %v2876_v46, %v382_v53  ;;  %v787_v11 = vadd.f32 %v2889_v55, %v584_v56  ;;  %v1178_v20 = vmul.f32 0.2, %v786_v1 }
 0x139   : > { %v1946_v6 = vadd.f32 %v1945_v61, %v1751_v52  ;;  %v1564_v52 = vld [vmem:[%s3397_s3 + $0x4b8] sm:$0xff]  ;;  %v383_v61 = vld [vmem:[%s2158_s24 + $0x500] sm:$0xff]  ;;  %vm982_vm13 = vcmp.ge.f32.partialorder %v786_v1, 0.0  ;;  %v1373_v29 = vsel %vm981_vm12, %v785_v57, %v1177_v12 }
 0x13a   : > { %v1760_v62 = vmul.f32 %v1564_v52, %v1368_v51  ;;  %v586_v10 = vmul.f32 %v2876_v46, %v383_v61  ;;  %v788_v19 = vadd.f32 %v2889_v55, %v585_v0  ;;  %v1179_v28 = vmul.f32 0.2, %v787_v11 }
 0x13b   : > { %v1947_v15 = vadd.f32 %v1946_v6, %v1752_v60  ;;  %v1565_v60 = vld [vmem:[%s3397_s3 + $0x4c0] sm:$0xff]  ;;  %v384_v6 = vld [vmem:[%s2158_s24 + $0x508] sm:$0xff]  ;;  %vm983_vm14 = vcmp.ge.f32.partialorder %v787_v11, 0.0  ;;  %v1374_v37 = vsel %vm982_vm13, %v786_v1, %v1178_v20 }
 0x13c   : > { %v1761_v7 = vmul.f32 %v1565_v60, %v1369_v59  ;;  %v587_v18 = vmul.f32 %v2876_v46, %v384_v6  ;;  %v789_v27 = vadd.f32 %v2889_v55, %v586_v10  ;;  %v1180_v36 = vmul.f32 0.2, %v788_v19 }
 0x13d   : > { %v1948_v23 = vadd.f32 %v1947_v15, %v1753_v5  ;;  %v1566_v5 = vld [vmem:[%s3397_s3 + $0x4c8] sm:$0xff]  ;;  %v385_v15 = vld [vmem:[%s2158_s24 + $0x510] sm:$0xff]  ;;  %vm984_vm15 = vcmp.ge.f32.partialorder %v788_v19, 0.0  ;;  %v1375_v45 = vsel %vm983_vm14, %v787_v11, %v1179_v28 }
 0x13e   : > { %v1762_v16 = vmul.f32 %v1566_v5, %v1370_v4  ;;  %v588_v26 = vmul.f32 %v2876_v46, %v385_v15  ;;  %v790_v35 = vadd.f32 %v2889_v55, %v587_v18  ;;  %v1181_v44 = vmul.f32 0.2, %v789_v27 }
 0x13f   : > { %v1949_v31 = vadd.f32 %v1948_v23, %v1754_v14  ;;  %v1567_v14 = vld [vmem:[%s3397_s3 + $0x4d0] sm:$0xff]  ;;  %v386_v23 = vld [vmem:[%s2158_s24 + $0x518] sm:$0xff]  ;;  %vm985_vm0 = vcmp.ge.f32.partialorder %v789_v27, 0.0  ;;  %v1376_v53 = vsel %vm984_vm15, %v788_v19, %v1180_v36 }
 0x140   : > { %v1763_v3 = vmul.f32 %v1567_v14, %v1371_v13  ;;  %v589_v34 = vmul.f32 %v2876_v46, %v386_v23  ;;  %v791_v43 = vadd.f32 %v2889_v55, %v588_v26  ;;  %v1182_v52 = vmul.f32 0.2, %v790_v35 }
 0x141   : > { %v1950_v39 = vadd.f32 %v1949_v31, %v1755_v22  ;;  %v1568_v22 = vld [vmem:[%s3397_s3 + $0x4d8] sm:$0xff]  ;;  %v387_v31 = vld [vmem:[%s2158_s24 + $0x520] sm:$0xff]  ;;  %vm986_vm1 = vcmp.ge.f32.partialorder %v790_v35, 0.0  ;;  %v1377_v61 = vsel %vm985_vm0, %v789_v27, %v1181_v44 }
 0x142   : > { %v1764_v32 = vmul.f32 %v1568_v22, %v1372_v21  ;;  %v590_v42 = vmul.f32 %v2876_v46, %v387_v31  ;;  %v792_v51 = vadd.f32 %v2889_v55, %v589_v34  ;;  %v1183_v60 = vmul.f32 0.2, %v791_v43 }
 0x143   : > { %v1951_v47 = vadd.f32 %v1950_v39, %v1756_v30  ;;  %v1569_v30 = vld [vmem:[%s3397_s3 + $0x4e0] sm:$0xff]  ;;  %v388_v39 = vld [vmem:[%s2158_s24 + $0x528] sm:$0xff]  ;;  %vm987_vm2 = vcmp.ge.f32.partialorder %v791_v43, 0.0  ;;  %v1378_v6 = vsel %vm986_vm1, %v790_v35, %v1182_v52 }
 0x144   : > { %v1765_v40 = vmul.f32 %v1569_v30, %v1373_v29  ;;  %v591_v50 = vmul.f32 %v2876_v46, %v388_v39  ;;  %v793_v59 = vadd.f32 %v2889_v55, %v590_v42  ;;  %v1184_v5 = vmul.f32 0.2, %v792_v51 }
 0x145   : > { %v1952_v33 = vadd.f32 %v1951_v47, %v1757_v38  ;;  %v1570_v38 = vld [vmem:[%s3397_s3 + $0x4e8] sm:$0xff]  ;;  %v389_v47 = vld [vmem:[%s2158_s24 + $0x530] sm:$0xff]  ;;  %vm988_vm3 = vcmp.ge.f32.partialorder %v792_v51, 0.0  ;;  %v1379_v15 = vsel %vm987_vm2, %v791_v43, %v1183_v60 }
 0x146   : > { %v1766_v48 = vmul.f32 %v1570_v38, %v1374_v37  ;;  %v592_v58 = vmul.f32 %v2876_v46, %v389_v47  ;;  %v794_v4 = vadd.f32 %v2889_v55, %v591_v50  ;;  %v1185_v14 = vmul.f32 0.2, %v793_v59 }
 0x147   : > { %v1953_v63 = vadd.f32 %v1952_v33, %v1758_v24  ;;  %v1571_v24 = vld [vmem:[%s3397_s3 + $0x4f0] sm:$0xff]  ;;  %v390_v33 = vld [vmem:[%s2158_s24 + $0x538] sm:$0xff]  ;;  %vm989_vm4 = vcmp.ge.f32.partialorder %v793_v59, 0.0  ;;  %v1380_v23 = vsel %vm988_vm3, %v792_v51, %v1184_v5  ;;  %v3231_v5 = vld [vmem:[%s3395_s1] ss:$0 sm:$0xff] }
 0x148   : > { %v1767_v56 = vmul.f32 %v1571_v24, %v1375_v45  ;;  %v593_v2 = vmul.f32 %v2876_v46, %v390_v33  ;;  %v795_v13 = vadd.f32 %v2889_v55, %v592_v58  ;;  %v1186_v22 = vmul.f32 0.2, %v794_v4 }
 0x149   : > { %v1954_v9 = vadd.f32 %v1953_v63, %v1759_v54  ;;  %v1572_v54 = vld [vmem:[%s3397_s3 + $0x4f8] sm:$0xff]  ;;  %v391_v63 = vld [vmem:[%s2158_s24 + $0x540] sm:$0xff]  ;;  %vm990_vm5 = vcmp.ge.f32.partialorder %v794_v4, 0.0  ;;  %v1381_v31 = vsel %vm989_vm4, %v793_v59, %v1185_v14 }
 0x14a   : > { %v1768_v0 = vmul.f32 %v1572_v54, %v1376_v53  ;;  %v594_v12 = vmul.f32 %v2876_v46, %v391_v63  ;;  %v796_v21 = vadd.f32 %v2889_v55, %v593_v2  ;;  %v1187_v30 = vmul.f32 0.2, %v795_v13 }
 0x14b   : > { %v1955_v17 = vadd.f32 %v1954_v9, %v1760_v62  ;;  %v1573_v62 = vld [vmem:[%s3397_s3 + $0x500] sm:$0xff]  ;;  %v392_v9 = vld [vmem:[%s2158_s24 + $0x548] sm:$0xff]  ;;  %vm991_vm6 = vcmp.ge.f32.partialorder %v795_v13, 0.0  ;;  %v1382_v39 = vsel %vm990_vm5, %v794_v4, %v1186_v22 }
 0x14c   : > { %v1769_v10 = vmul.f32 %v1573_v62, %v1377_v61  ;;  %v595_v20 = vmul.f32 %v2876_v46, %v392_v9  ;;  %v797_v29 = vadd.f32 %v2889_v55, %v594_v12  ;;  %v1188_v38 = vmul.f32 0.2, %v796_v21 }
 0x14d   : > { %v1956_v25 = vadd.f32 %v1955_v17, %v1761_v7  ;;  %v1574_v7 = vld [vmem:[%s3397_s3 + $0x508] sm:$0xff]  ;;  %v393_v17 = vld [vmem:[%s2158_s24 + $0x550] sm:$0xff]  ;;  %vm992_vm7 = vcmp.ge.f32.partialorder %v796_v21, 0.0  ;;  %v1383_v47 = vsel %vm991_vm6, %v795_v13, %v1187_v30 }
 0x14e   : > { %v1770_v18 = vmul.f32 %v1574_v7, %v1378_v6  ;;  %v596_v28 = vmul.f32 %v2876_v46, %v393_v17  ;;  %v798_v37 = vadd.f32 %v2889_v55, %v595_v20  ;;  %v1189_v24 = vmul.f32 0.2, %v797_v29 }
 0x14f   : > { %v1957_v8 = vadd.f32 %v1956_v25, %v1762_v16  ;;  %v1575_v16 = vld [vmem:[%s3397_s3 + $0x510] sm:$0xff]  ;;  %v394_v25 = vld [vmem:[%s2158_s24 + $0x558] sm:$0xff]  ;;  %vm993_vm8 = vcmp.ge.f32.partialorder %v797_v29, 0.0  ;;  %v1384_v33 = vsel %vm992_vm7, %v796_v21, %v1188_v38 }
 0x150   : > { %v1771_v26 = vmul.f32 %v1575_v16, %v1379_v15  ;;  %v597_v36 = vmul.f32 %v2876_v46, %v394_v25  ;;  %v799_v45 = vadd.f32 %v2889_v55, %v596_v28  ;;  %v1190_v54 = vmul.f32 0.2, %v798_v37  ;;  %v3244_v15 = vld [vmem:[%s3396_s2] ss:$0 sm:$0xff] }
 0x151   : > { %v1958_v41 = vadd.f32 %v1957_v8, %v1763_v3  ;;  %v1576_v3 = vld [vmem:[%s3397_s3 + $0x518] sm:$0xff]  ;;  %v395_v8 = vld [vmem:[%s2158_s24 + $0x560] sm:$0xff]  ;;  %vm994_vm9 = vcmp.ge.f32.partialorder %v798_v37, 0.0  ;;  %v1385_v63 = vsel %vm993_vm8, %v797_v29, %v1189_v24 }
 0x152   : > { %v1772_v34 = vmul.f32 %v1576_v3, %v1380_v23  ;;  %v598_v44 = vmul.f32 %v2876_v46, %v395_v8  ;;  %v800_v53 = vadd.f32 %v2889_v55, %v597_v36  ;;  %v1191_v62 = vmul.f32 0.2, %v799_v45 }
 0x153   : > { %v1959_v49 = vadd.f32 %v1958_v41, %v1764_v32  ;;  %v1577_v32 = vld [vmem:[%s3397_s3 + $0x520] sm:$0xff]  ;;  %v396_v41 = vld [vmem:[%s2158_s24 + $0x568] sm:$0xff]  ;;  %vm995_vm10 = vcmp.ge.f32.partialorder %v799_v45, 0.0  ;;  %v1386_v9 = vsel %vm994_vm9, %v798_v37, %v1190_v54 }
 0x154   : > { %v1773_v42 = vmul.f32 %v1577_v32, %v1381_v31  ;;  %v599_v52 = vmul.f32 %v2876_v46, %v396_v41  ;;  %v801_v61 = vadd.f32 %v2889_v55, %v598_v44  ;;  %v1192_v7 = vmul.f32 0.2, %v800_v53 }
 0x155   : > { %v1960_v57 = vadd.f32 %v1959_v49, %v1765_v40  ;;  %v1578_v40 = vld [vmem:[%s3397_s3 + $0x528] sm:$0xff]  ;;  %v397_v49 = vld [vmem:[%s2158_s24 + $0x570] sm:$0xff]  ;;  %vm996_vm11 = vcmp.ge.f32.partialorder %v800_v53, 0.0  ;;  %v1387_v17 = vsel %vm995_vm10, %v799_v45, %v1191_v62 }
 0x156   : > { %v1774_v50 = vmul.f32 %v1578_v40, %v1382_v39  ;;  %v600_v60 = vmul.f32 %v2876_v46, %v397_v49  ;;  %v802_v6 = vadd.f32 %v2889_v55, %v599_v52  ;;  %v1193_v16 = vmul.f32 0.2, %v801_v61 }
 0x157   : > { %v1961_v1 = vadd.f32 %v1960_v57, %v1766_v48  ;;  %v1579_v48 = vld [vmem:[%s3397_s3 + $0x530] sm:$0xff]  ;;  %v398_v57 = vld [vmem:[%s2158_s24 + $0x578] sm:$0xff]  ;;  %vm997_vm12 = vcmp.ge.f32.partialorder %v801_v61, 0.0  ;;  %v1388_v25 = vsel %vm996_vm11, %v800_v53, %v1192_v7 }
 0x158   : > { %v1775_v58 = vmul.f32 %v1579_v48, %v1383_v47  ;;  %v601_v46 = vmul.f32 %v3231_v5, %v398_v57  ;;  %v803_v55 = vadd.f32 %v3244_v15, %v600_v60  ;;  %v1194_v3 = vmul.f32 0.2, %v802_v6 }
 0x159   : > { %v1962_v11 = vadd.f32 %v1961_v1, %v1767_v56  ;;  %v1580_v56 = vld [vmem:[%s3397_s3 + $0x538] sm:$0xff]  ;;  %v399_v1 = vld [vmem:[%s2158_s24 + $0x580] sm:$0xff]  ;;  %vm998_vm13 = vcmp.ge.f32.partialorder %v802_v6, 0.0  ;;  %v1389_v8 = vsel %vm997_vm12, %v801_v61, %v1193_v16 }
 0x15a   : > { %v1776_v2 = vmul.f32 %v1580_v56, %v1384_v33  ;;  %v602_v14 = vmul.f32 %v3231_v5, %v399_v1  ;;  %v804_v23 = vadd.f32 %v3244_v15, %v601_v46  ;;  %v1195_v32 = vmul.f32 0.2, %v803_v55 }
 0x15b   : > { %v1963_v19 = vadd.f32 %v1962_v11, %v1768_v0  ;;  %v1581_v0 = vld [vmem:[%s3397_s3 + $0x540] sm:$0xff]  ;;  %v400_v11 = vld [vmem:[%s2158_s24 + $0x588] sm:$0xff]  ;;  %vm999_vm14 = vcmp.ge.f32.partialorder %v803_v55, 0.0  ;;  %v1390_v41 = vsel %vm998_vm13, %v802_v6, %v1194_v3 }
 0x15c   : > { %v1777_v12 = vmul.f32 %v1581_v0, %v1385_v63  ;;  %v603_v22 = vmul.f32 %v3231_v5, %v400_v11  ;;  %v805_v31 = vadd.f32 %v3244_v15, %v602_v14  ;;  %v1196_v40 = vmul.f32 0.2, %v804_v23 }
 0x15d   : > { %v1964_v27 = vadd.f32 %v1963_v19, %v1769_v10  ;;  %v1582_v10 = vld [vmem:[%s3397_s3 + $0x548] sm:$0xff]  ;;  %v401_v19 = vld [vmem:[%s2158_s24 + $0x590] sm:$0xff]  ;;  %vm1000_vm15 = vcmp.ge.f32.partialorder %v804_v23, 0.0  ;;  %v1391_v49 = vsel %vm999_vm14, %v803_v55, %v1195_v32 }
 0x15e   : > { %v1778_v20 = vmul.f32 %v1582_v10, %v1386_v9  ;;  %v604_v30 = vmul.f32 %v3231_v5, %v401_v19  ;;  %v806_v39 = vadd.f32 %v3244_v15, %v603_v22  ;;  %v1197_v48 = vmul.f32 0.2, %v805_v31 }
 0x15f   : > { %v1965_v35 = vadd.f32 %v1964_v27, %v1770_v18  ;;  %v1583_v18 = vld [vmem:[%s3397_s3 + $0x550] sm:$0xff]  ;;  %v402_v27 = vld [vmem:[%s2158_s24 + $0x598] sm:$0xff]  ;;  %vm1001_vm0 = vcmp.ge.f32.partialorder %v805_v31, 0.0  ;;  %v1392_v57 = vsel %vm1000_vm15, %v804_v23, %v1196_v40 }
 0x160   : > { %v1779_v28 = vmul.f32 %v1583_v18, %v1387_v17  ;;  %v605_v38 = vmul.f32 %v3231_v5, %v402_v27  ;;  %v807_v47 = vadd.f32 %v3244_v15, %v604_v30  ;;  %v1198_v56 = vmul.f32 0.2, %v806_v39 }
 0x161   : > { %v1966_v43 = vadd.f32 %v1965_v35, %v1771_v26  ;;  %v1584_v26 = vld [vmem:[%s3397_s3 + $0x558] sm:$0xff]  ;;  %v403_v35 = vld [vmem:[%s2158_s24 + $0x5a0] sm:$0xff]  ;;  %vm1002_vm1 = vcmp.ge.f32.partialorder %v806_v39, 0.0  ;;  %v1393_v1 = vsel %vm1001_vm0, %v805_v31, %v1197_v48 }
 0x162   : > { %v1780_v36 = vmul.f32 %v1584_v26, %v1388_v25  ;;  %v606_v24 = vmul.f32 %v3231_v5, %v403_v35  ;;  %v808_v33 = vadd.f32 %v3244_v15, %v605_v38  ;;  %v1199_v0 = vmul.f32 0.2, %v807_v47 }
 0x163   : > { %v1967_v51 = vadd.f32 %v1966_v43, %v1772_v34  ;;  %v1585_v34 = vld [vmem:[%s3397_s3 + $0x560] sm:$0xff]  ;;  %v404_v43 = vld [vmem:[%s2158_s24 + $0x5a8] sm:$0xff]  ;;  %vm1003_vm2 = vcmp.ge.f32.partialorder %v807_v47, 0.0  ;;  %v1394_v11 = vsel %vm1002_vm1, %v806_v39, %v1198_v56 }
 0x164   : > { %v1781_v44 = vmul.f32 %v1585_v34, %v1389_v8  ;;  %v607_v54 = vmul.f32 %v3231_v5, %v404_v43  ;;  %v809_v63 = vadd.f32 %v3244_v15, %v606_v24  ;;  %v1200_v10 = vmul.f32 0.2, %v808_v33 }
 0x165   : > { %v1968_v59 = vadd.f32 %v1967_v51, %v1773_v42  ;;  %v1586_v42 = vld [vmem:[%s3397_s3 + $0x568] sm:$0xff]  ;;  %v405_v51 = vld [vmem:[%s2158_s24 + $0x5b0] sm:$0xff]  ;;  %vm1004_vm3 = vcmp.ge.f32.partialorder %v808_v33, 0.0  ;;  %v1395_v19 = vsel %vm1003_vm2, %v807_v47, %v1199_v0 }
 0x166   : > { %v1782_v52 = vmul.f32 %v1586_v42, %v1390_v41  ;;  %v608_v62 = vmul.f32 %v3231_v5, %v405_v51  ;;  %v810_v9 = vadd.f32 %v3244_v15, %v607_v54  ;;  %v1201_v18 = vmul.f32 0.2, %v809_v63 }
 0x167   : > { %v1969_v4 = vadd.f32 %v1968_v59, %v1774_v50  ;;  %v1587_v50 = vld [vmem:[%s3397_s3 + $0x570] sm:$0xff]  ;;  %v406_v59 = vld [vmem:[%s2158_s24 + $0x5b8] sm:$0xff]  ;;  %vm1005_vm4 = vcmp.ge.f32.partialorder %v809_v63, 0.0  ;;  %v1396_v27 = vsel %vm1004_vm3, %v808_v33, %v1200_v10 }
 0x168   : > { %v1783_v60 = vmul.f32 %v1587_v50, %v1391_v49  ;;  %v609_v7 = vmul.f32 %v3231_v5, %v406_v59  ;;  %v811_v17 = vadd.f32 %v3244_v15, %v608_v62  ;;  %v1202_v26 = vmul.f32 0.2, %v810_v9 }
 0x169   : > { %v1970_v13 = vadd.f32 %v1969_v4, %v1775_v58  ;;  %v1588_v58 = vld [vmem:[%s3397_s3 + $0x578] sm:$0xff]  ;;  %v407_v4 = vld [vmem:[%s2158_s24 + $0x5c0] sm:$0xff]  ;;  %vm1006_vm5 = vcmp.ge.f32.partialorder %v810_v9, 0.0  ;;  %v1397_v35 = vsel %vm1005_vm4, %v809_v63, %v1201_v18  ;;  %vm1999_vm4 = vcmask 1042432  }
 0x16a   : > { %v1784_v46 = vmul.f32 %v1588_v58, %v1392_v57  ;;  %v610_v16 = vmul.f32 %v3231_v5, %v407_v4  ;;  %v812_v25 = vadd.f32 %v3244_v15, %v609_v7  ;;  %v1203_v34 = vmul.f32 0.2, %v811_v17  ;;  %v418_v18 = vld [vmem:[%s2158_s24 + $0x618] sm:$0x7] }
 0x16b   : > { %v1971_v21 = vadd.f32 %v1970_v13, %v1776_v2  ;;  %v1589_v2 = vld [vmem:[%s3397_s3 + $0x580] sm:$0xff]  ;;  %v408_v13 = vld [vmem:[%s2158_s24 + $0x5c8] sm:$0xff]  ;;  %vm1007_vm6 = vcmp.ge.f32.partialorder %v811_v17, 0.0  ;;  %v1398_v43 = vsel %vm1006_vm5, %v810_v9, %v1202_v26 }
 0x16c   : > { %v1785_v14 = vmul.f32 %v1589_v2, %v1393_v1  ;;  %v611_v3 = vmul.f32 %v3231_v5, %v408_v13  ;;  %v813_v8 = vadd.f32 %v3244_v15, %v610_v16  ;;  %v1204_v42 = vmul.f32 0.2, %v812_v25 }
 0x16d   : > { %v1972_v29 = vadd.f32 %v1971_v21, %v1777_v12  ;;  %v1590_v12 = vld [vmem:[%s3397_s3 + $0x588] sm:$0xff]  ;;  %v409_v21 = vld [vmem:[%s2158_s24 + $0x5d0] sm:$0xff]  ;;  %vm1008_vm7 = vcmp.ge.f32.partialorder %v812_v25, 0.0  ;;  %v1399_v51 = vsel %vm1007_vm6, %v811_v17, %v1203_v34 }
 0x16e   : > { %v1786_v22 = vmul.f32 %v1590_v12, %v1394_v11  ;;  %v612_v32 = vmul.f32 %v3231_v5, %v409_v21  ;;  %v814_v41 = vadd.f32 %v3244_v15, %v611_v3  ;;  %v1205_v50 = vmul.f32 0.2, %v813_v8  ;;  %v417_v3 = vld [vmem:[%s2158_s24 + $0x610] sm:$0xff] }
 0x16f   : > { %v1973_v37 = vadd.f32 %v1972_v29, %v1778_v20  ;;  %v1591_v20 = vld [vmem:[%s3397_s3 + $0x590] sm:$0xff]  ;;  %v410_v29 = vld [vmem:[%s2158_s24 + $0x5d8] sm:$0xff]  ;;  %vm1009_vm8 = vcmp.ge.f32.partialorder %v813_v8, 0.0  ;;  %v1400_v59 = vsel %vm1008_vm7, %v812_v25, %v1204_v42 }
 0x170   : > { %v1787_v30 = vmul.f32 %v1591_v20, %v1395_v19  ;;  %v613_v40 = vmul.f32 %v3231_v5, %v410_v29  ;;  %v815_v49 = vadd.f32 %v3244_v15, %v612_v32  ;;  %v1206_v58 = vmul.f32 0.2, %v814_v41 }
 0x171   : > { %v1974_v45 = vadd.f32 %v1973_v37, %v1779_v28  ;;  %v1592_v28 = vld [vmem:[%s3397_s3 + $0x598] sm:$0xff]  ;;  %v411_v37 = vld [vmem:[%s2158_s24 + $0x5e0] sm:$0xff]  ;;  %vm1010_vm9 = vcmp.ge.f32.partialorder %v814_v41, 0.0  ;;  %v1401_v4 = vsel %vm1009_vm8, %v813_v8, %v1205_v50  ;;  %v621_v32 = vmul.f32 %v3231_v5, %v418_v18 }
 0x172   : > { %v1788_v38 = vmul.f32 %v1592_v28, %v1396_v27  ;;  %v614_v48 = vmul.f32 %v3231_v5, %v411_v37  ;;  %v816_v57 = vadd.f32 %v3244_v15, %v613_v40  ;;  %v1207_v2 = vmul.f32 0.2, %v815_v49 }
 0x173   : > { %v1975_v53 = vadd.f32 %v1974_v45, %v1780_v36  ;;  %v1593_v36 = vld [vmem:[%s3397_s3 + $0x5a0] sm:$0xff]  ;;  %v412_v45 = vld [vmem:[%s2158_s24 + $0x5e8] sm:$0xff]  ;;  %vm1011_vm10 = vcmp.ge.f32.partialorder %v815_v49, 0.0  ;;  %v1402_v13 = vsel %vm1010_vm9, %v814_v41, %v1206_v58 }
 0x174   : > { %v1789_v24 = vmul.f32 %v1593_v36, %v1397_v35  ;;  %v615_v56 = vmul.f32 %v3231_v5, %v412_v45  ;;  %v817_v1 = vadd.f32 %v3244_v15, %v614_v48  ;;  %v1208_v12 = vmul.f32 0.2, %v816_v57  ;;  %v1602_v45 = vld [vmem:[%s3397_s3 + $0x5e8] sm:$0xff] }
 0x175   : > { %v1976_v61 = vadd.f32 %v1975_v53, %v1781_v44  ;;  %v1594_v44 = vld [vmem:[%s3397_s3 + $0x5a8] sm:$0xff]  ;;  %v413_v53 = vld [vmem:[%s2158_s24 + $0x5f0] sm:$0xff]  ;;  %vm1012_vm11 = vcmp.ge.f32.partialorder %v816_v57, 0.0  ;;  %v620_v35 = vmul.f32 %v3231_v5, %v417_v3 }
 0x176   : > { %v1790_v54 = vmul.f32 %v1594_v44, %v1398_v43  ;;  %v616_v0 = vmul.f32 %v3231_v5, %v413_v53  ;;  %v818_v11 = vadd.f32 %v3244_v15, %v615_v56  ;;  %v1209_v21 = vmul.f32 0.2, %v817_v1  ;;  %v1604_v56 = vld [vmem:[%s3397_s3 + $0x5f8] sm:$0xff] }
 0x177   : > { %v1977_v6 = vadd.f32 %v1976_v61, %v1782_v52  ;;  %v1595_v52 = vld [vmem:[%s3397_s3 + $0x5b0] sm:$0xff]  ;;  %v414_v61 = vld [vmem:[%s2158_s24 + $0x5f8] sm:$0xff]  ;;  %vm1013_vm12 = vcmp.ge.f32.partialorder %v817_v1, 0.0  ;;  %v823_v48 = vadd.f32 %v3244_v15, %v620_v35 }
 0x178   : > { %v1791_v62 = vmul.f32 %v1595_v52, %v1399_v51  ;;  %v617_v10 = vmul.f32 %v3231_v5, %v414_v61  ;;  %v819_v20 = vadd.f32 %v3244_v15, %v616_v0  ;;  %v1210_v29 = vmul.f32 0.2, %v818_v11  ;;  %v1603_v51 = vld [vmem:[%s3397_s3 + $0x5f0] sm:$0xff]  ;;  %v1605_v61 = vld [vmem:[%s3397_s3 + $0x600] sm:$0xff] }
 0x179   : > { %v1978_v55 = vadd.f32 %v1977_v6, %v1783_v60  ;;  %v1596_v60 = vld [vmem:[%s3397_s3 + $0x5b8] sm:$0xff]  ;;  %v415_v6 = vld [vmem:[%s2158_s24 + $0x600] sm:$0xff]  ;;  %vm1014_vm13 = vcmp.ge.f32.partialorder %v818_v11, 0.0  ;;  %vm1019_vm3 = vcmp.ge.f32.partialorder %v823_v48, 0.0 }
 0x17a   : > { %v1792_v7 = vmul.f32 %v1596_v60, %v1400_v59  ;;  %v618_v19 = vmul.f32 %v3231_v5, %v415_v6  ;;  %v820_v28 = vadd.f32 %v3244_v15, %v617_v10  ;;  %v1211_v37 = vmul.f32 0.2, %v819_v20 }
 0x17b   : > { %v1979_v23 = vadd.f32 %v1978_v55, %v1784_v46  ;;  %v1597_v46 = vld [vmem:[%s3397_s3 + $0x5c0] sm:$0xff]  ;;  %v416_v55 = vld [vmem:[%s2158_s24 + $0x608] sm:$0xff]  ;;  %vm1015_vm14 = vcmp.ge.f32.partialorder %v819_v20, 0.0  ;;  %v1406_v44 = vsel %vm1014_vm13, %v818_v11, %v1210_v29 }
 0x17c   : > { %v1793_v16 = vmul.f32 %v1597_v46, %v1401_v4  ;;  %v619_v27 = vmul.f32 %v3231_v5, %v416_v55  ;;  %v821_v36 = vadd.f32 %v3244_v15, %v618_v19  ;;  %v1212_v43 = vmul.f32 0.2, %v820_v28  ;;  %v1608_v4 = vld [vmem:[%s3397_s3 + $0x618] sm:$0x7] }
 0x17d   : > { %v1980_v31 = vadd.f32 %v1979_v23, %v1785_v14  ;;  %v1598_v14 = vld [vmem:[%s3397_s3 + $0x5c8] sm:$0xff]  ;;  %v1599_v23 = vld [vmem:[%s3397_s3 + $0x5d0] sm:$0xff]  ;;  %v824_v5 = vadd.f32 %v3244_v15, %v621_v32  ;;  %vm1016_vm15 = vcmp.ge.f32.partialorder %v820_v28, 0.0  ;;  %v1407_v50 = vsel %vm1015_vm14, %v819_v20, %v1211_v37 }
 0x17e   : > { %v1794_v25 = vmul.f32 %v1598_v14, %v1402_v13  ;;  %v822_v42 = vadd.f32 %v3244_v15, %v619_v27  ;;  %vm1017_vm0 = vcmp.ge.f32.partialorder %v821_v36, 0.0  ;;  %v1798_v52 = vmul.f32 %v1602_v45, %v1406_v44 }
 0x17f   : > { %v1981_v39 = vadd.f32 %v1980_v31, %v1786_v22  ;;  %v1403_v22 = vsel %vm1011_vm10, %v815_v49, %v1207_v2  ;;  %v1600_v31 = vld [vmem:[%s3397_s3 + $0x5d8] sm:$0xff]  ;;  %v1213_v49 = vmul.f32 0.2, %v821_v36  ;;  %v1799_v58 = vmul.f32 %v1603_v51, %v1407_v50 }
 0x180   : > { %v1795_v8 = vmul.f32 %v1599_v23, %v1403_v22  ;;  %vm1018_vm1 = vcmp.ge.f32.partialorder %v822_v42, 0.0  ;;  %vm1020_vm2 = vcmp.ge.f32.partialorder %v824_v5, 0.0  ;;  %v1215_v15 = vmul.f32 0.2, %v823_v48 }
 0x181   : > { %v1982_v47 = vadd.f32 %v1981_v39, %v1787_v30  ;;  %v1404_v30 = vsel %vm1012_vm11, %v816_v57, %v1208_v12  ;;  %v1601_v39 = vld [vmem:[%s3397_s3 + $0x5e0] sm:$0xff]  ;;  %v1216_v57 = vmul.f32 0.2, %v824_v5  ;;  %v1409_v60 = vsel %vm1017_vm0, %v821_v36, %v1213_v49 }
 0x182   : > { %v1796_v40 = vmul.f32 %v1600_v31, %v1404_v30  ;;  %v1801_v46 = vmul.f32 %v1605_v61, %v1409_v60 }
 0x183   : > { %v1983_v33 = vadd.f32 %v1982_v47, %v1788_v38  ;;  %v1405_v38 = vsel %vm1013_vm12, %v817_v1, %v1209_v21  ;;  %v1606_v1 = vld [vmem:[%s3397_s3 + $0x608] sm:$0xff]  ;;  %v1412_v2 = vsel %vm1020_vm2, %v824_v5, %v1216_v57 }
 0x184   : > { %v1804_v12 = vmul.f32 %v1608_v4, %v1412_v2 }
 0x185   : > { %v1984_v63 = vadd.f32 %v1983_v33, %v1789_v24  ;;  %v1797_v24 = vmul.f32 %v1601_v39, %v1405_v38  ;;  %v1408_v33 = vsel %vm1016_vm15, %v820_v28, %v1212_v43 }
 0x187   : > { %v1985_v9 = vadd.f32 %v1984_v63, %v1790_v54  ;;  %v1214_v54 = vmul.f32 0.2, %v822_v42 }
 0x189   : > { %v1986_v17 = vadd.f32 %v1985_v9, %v1791_v62  ;;  %v1800_v62 = vmul.f32 %v1604_v56, %v1408_v33  ;;  %v1410_v0 = vsel %vm1018_vm1, %v822_v42, %v1214_v54  ;;  %v1607_v9 = vld [vmem:[%s3397_s3 + $0x610] sm:$0xff] }
 0x18a   : > { %v1802_v10 = vmul.f32 %v1606_v1, %v1410_v0 }
 0x18b   : > { %v1987_v26 = vadd.f32 %v1986_v17, %v1792_v7  ;;  %v1411_v7 = vsel %vm1019_vm3, %v823_v48, %v1215_v15 }
 0x18c   : > { %v1803_v13 = vmul.f32 %v1607_v9, %v1411_v7 }
 0x18d   : > { %v1988_v34 = vadd.f32 %v1987_v26, %v1793_v16  ;;  %v2000_v16 = vsel %vm1999_vm4, %v1804_v12, 0.0  ;;  %v2010_v26 = vld [vmem:[#allocation2] sm:$0x1] }
 0x18f   : > { %v1989_v41 = vadd.f32 %v1988_v34, %v1794_v25  ;;  %v2110_v25 = vmov 0  }
 0x190   : > { %2093 = vset.pattern.permute.xlu0 %v2110_v25 }
 0x191   : > { %v1990_v47 = vadd.f32 %v1989_v41, %v1795_v8  ;;  %v2021_v8 = vlaneseq }
 0x193   : > { %v1991_v53 = vadd.f32 %v1990_v47, %v1796_v40  ;;  %v2022_v34 = vshrl.u32 %v2021_v8, 7 }
 0x195   : > { %v1992_v59 = vadd.f32 %v1991_v53, %v1797_v24  ;;  %v2023_v35 = vsub.s32 0, %v2022_v34 }
 0x197   : > { %v1993_v63 = vadd.f32 %v1992_v59, %v1798_v52 }
 0x199   : > { %v1994_v6 = vadd.f32 %v1993_v63, %v1799_v58 }
 0x19b   : > { %v1995_v11 = vadd.f32 %v1994_v6, %v1800_v62 }
 0x19d   : > { %v1996_v14 = vadd.f32 %v1995_v11, %v1801_v46 }
 0x19f   : > { %v1997_v55 = vadd.f32 %v1996_v14, %v1802_v10 }
 0x1a1   : > { %v1998_v17 = vadd.f32 %v1997_v55, %v1803_v13 }
 0x1a3   : > { %v2001_v18 = vadd.f32 %v2000_v16, %v1998_v17 }
 0x1a5   : > { %v2002_v19 = vrot.slane %v2001_v18, 4 }
 0x1a7   : > { %v2003_v20 = vadd.f32 %v2002_v19, %v2001_v18 }
 0x1a9   : > { %v2004_v21 = vrot.slane %v2003_v20, 2 }
 0x1ab   : > { %v2005_v22 = vadd.f32 %v2004_v21, %v2003_v20 }
 0x1ad   : > { %v2006_v23 = vrot.slane %v2005_v22, 1 }
 0x1af   : > { %v2007_v3 = vadd.f32 %v2006_v23, %v2005_v22 }
 0x1b1   : > { %2008 = vadd.xlane.f32.xlu0 %v2007_v3 }
 0x23e   : > { %v2009_v27 = vpop.xlane.xlu0 %2008 }
 0x23f   : > { %v2011_v28 = vadd.f32 %v2010_v26, %v2009_v27 }
 0x241   : > { %v2012_v29 = vmul.f32 0.5, %v2011_v28 }
 0x243   : > { %2094 = vtanh.f32 %v2012_v29 }
 0x24d   : > { %v2095_v30 = vpop.eup %2094 }
 0x24e   : > { %v2014_v31 = vadd.f32 1.0, %v2095_v30 }
 0x250   : > { %v2015_v32 = vmul.f32 0.5, %v2014_v31 }
 0x252   : > { %2018 = vperm.xlu0 %2093, %v2015_v32  }
 0x2d1   : > { %v2019_v36 = vpop.permute.xlu0 %2018 }
 0x2d2   : > { %v2024_v37 = vrot.slane %v2019_v36, %v2023_v35 }
 0x2d4   : > { %2025 = vst [vmem:[%s222_s18] sm:$0x1] %v2024_v37 }
 0x2d5 PF: > { %s17_s20 = sadd.s32 1, %s2108_s20  }
 0x2d6   : > { %p14_p4 = scmp.ge.s32.totalorder %s17_s20, 4  }
 0x2d8   :  { %16 = sbr.rel (!%p14_p4) target bundleno = 3 (0x3), region = 70 }

</bundles_post_ra>
